<compile_context>
chip_gen: v7x
topology: tpu7x:2x2x1
jax: 0.10.0
libtpu: 0.0.40
codegen_flags: <defaults>
</compile_context>

<pallas_src>
import functools

import jax
import jax.numpy as jnp
from jax import lax
from jax.experimental import pallas as pl
from jax.experimental.pallas import tpu as pltpu


def _sigmoid(x):
    # exp/div only -> guaranteed Mosaic lowering, also used by the reference.
    return 1.0 / (1.0 + jnp.exp(-x))


# ----------------------------------------------------------------------------
# Fused kernel: encoder LSTM -> decoder LSTM -> topk head -> price head
# ----------------------------------------------------------------------------
def _fused_kernel(*refs, L, T, B, A, H, P, inp_scale, outp_scale):
    """Whole LSTMModel.network_forward in a single Pallas launch.

    refs layout (B below is the sublane-padded batch):
      [0]                       seq2d                     (T*B, A)
      [1 : 1+3L]                encoder (w_ih_t, w_hh_t, bias) per layer
      [1+3L : 1+6L]             decoder (w_ih_t, w_hh_t, bias) per layer
      [1+6L : 5+6L]             topk_w_t (L*4H, A), topk_b (1, A),
                                price_w_t (H, A),  price_b (1, A)
      [5+6L], [6+6L]            outputs: pred2d (P*B, A), selection (B, A)
      [7+6L : ]                 scratch: ebuf (T*B, H), dbuf (P*B, H),
                                exp_buf (T*B, 4H), dxp_buf (P*B, 4H),
                                h_scr (B, H), c_scr (B, H)
    """
    f32 = jnp.float32

    seq_ref = refs[0]
    enc_w = [refs[1 + 3 * l: 4 + 3 * l] for l in range(L)]
    dec_w = [refs[1 + 3 * L + 3 * l: 4 + 3 * L + 3 * l] for l in range(L)]
    topk_w_ref, topk_b_ref, price_w_ref, price_b_ref = refs[1 + 6 * L: 5 + 6 * L]
    pred_ref, sel_ref = refs[5 + 6 * L], refs[6 + 6 * L]
    ebuf, dbuf, exp_buf, dxp_buf, h_scr, c_scr = refs[7 + 6 * L:]

    def _row(t):
        r = t * B
        return r if isinstance(t, int) else pl.multiple_of(r, B)

    def _loop(n, body):
        # Short, static trip counts: full unroll (best LLO scheduling).
        if n <= 64:
            for t in range(n):
                body(t)
        else:
            lax.fori_loop(0, n, lambda t, c: (body(t), c)[1], None)

    def run_layer(nsteps, whh_ref, gate_in, out_buf):
        """One LSTM layer. gate_in(t) -> (B, 4H) input-path pre-activations
        (x_t @ W_ih + b, hoisted out of the loop). Writes h_t into out_buf
        rows [t*B, (t+1)*B). Returns (h_T, c_T)."""
        h_scr[...] = jnp.zeros_like(h_scr)
        c_scr[...] = jnp.zeros_like(c_scr)
        whh = whh_ref[...]                                  # (H, 4H), load once

        def step(t):
            gates = gate_in(t) + jnp.dot(h_scr[...], whh,
                                         preferred_element_type=f32)
            i = _sigmoid(gates[:, 0:H])
            f = _sigmoid(gates[:, H:2 * H])
            g = jnp.tanh(gates[:, 2 * H:3 * H])
            o = _sigmoid(gates[:, 3 * H:4 * H])
            c_new = f * c_scr[...] + i * g
            h_new = o * jnp.tanh(c_new)
            h_scr[...] = h_new
            c_scr[...] = c_new
            out_buf[pl.ds(_row(t), B), :] = h_new

        _loop(nsteps, step)
        return h_scr[...], c_scr[...]

    # ------------------------------ encoder ---------------------------------
    enc_h, enc_c = [], []
    for l in range(L):
        wih_ref, whh_ref, b_ref = enc_w[l]
        if l == 0:
            x_in = seq_ref[...]
            if inp_scale != 1.0:
                x_in = x_in * inp_scale                     # fused input scale
        else:
            x_in = ebuf[...]                                # previous layer out
        # hoisted input projection: one matmul for all T timesteps
        exp_buf[...] = (jnp.dot(x_in, wih_ref[...], preferred_element_type=f32)
                        + b_ref[...])
        hT, cT = run_layer(T, whh_ref,
                           lambda t: exp_buf[pl.ds(_row(t), B), :], ebuf)
        enc_h.append(hT)
        enc_c.append(cT)

    # last timestep of last encoder layer == latent_feat
    latent = ebuf[(T - 1) * B: T * B, :]                    # (B, H)

    # ------------------------------ decoder ---------------------------------
    dec_h, dec_c = [], []
    for l in range(L):
        wih_ref, whh_ref, b_ref = dec_w[l]
        if l == 0:
            # layer-0 input is the SAME latent every step: project it once
            xp0 = (jnp.dot(latent, wih_ref[...], preferred_element_type=f32)
                   + b_ref[...])                            # (B, 4H)
            gate_in = lambda t, xp0=xp0: xp0
        else:
            dxp_buf[...] = (jnp.dot(dbuf[...], wih_ref[...],
                                    preferred_element_type=f32) + b_ref[...])
            gate_in = lambda t: dxp_buf[pl.ds(_row(t), B), :]
        hT, cT = run_layer(P, whh_ref, gate_in, dbuf)
        dec_h.append(hT)
        dec_c.append(cT)

    # --------------------- selection head (topk_fc + sigmoid) ---------------
    # cat((enc_h, enc_c, dec_h, dec_c), -1).permute(1,0,2).reshape(B, L*4H) @ W
    # computed as a sum of per-block matmuls (no in-kernel concat/relayout).
    tw = topk_w_ref[...]                                    # (L*4H, A)
    logits = jnp.zeros((B, A), f32) + topk_b_ref[...]
    for l in range(L):
        base = 4 * H * l
        logits = logits + jnp.dot(enc_h[l], tw[base:base + H, :],
                                  preferred_element_type=f32)
        logits = logits + jnp.dot(enc_c[l], tw[base + H:base + 2 * H, :],
                                  preferred_element_type=f32)
        logits = logits + jnp.dot(dec_h[l], tw[base + 2 * H:base + 3 * H, :],
                                  preferred_element_type=f32)
        logits = logits + jnp.dot(dec_c[l], tw[base + 3 * H:base + 4 * H, :],
                                  preferred_element_type=f32)
    sel_ref[...] = _sigmoid(logits)

    # ---------------- price head (price_fc, z - tanh(z), out scale) ---------
    z = (jnp.dot(dbuf[...], price_w_ref[...], preferred_element_type=f32)
         + price_b_ref[...])                                # (P*B, A)
    out = z - jnp.tanh(z)
    if outp_scale != 1.0:
        out = out * outp_scale
    pred_ref[...] = out


@functools.partial(jax.jit, static_argnames=("pred_len", "inp_scale", "outp_scale"))
def _fused_network_forward(seq, enc_params, dec_params, topk_wt, topk_b,
                           price_wt, price_b, *, pred_len, inp_scale, outp_scale):
    """seq: (T, B, A) time-major. Returns (pred_seq (P, B, A), selection (B, A))."""
    T, B, A = seq.shape
    L = len(enc_params)
    H = price_wt.shape[0]
    P = int(pred_len)
    G = 4 * H

    # Pad batch to a sublane multiple so per-timestep row slabs are tile aligned.
    BP = max(8, ((B + 7) // 8) * 8)
    if BP != B:
        seq = jnp.pad(seq, ((0, 0), (0, BP - B), (0, 0)))
    seq2d = seq.reshape(T * BP, A)

    args = [seq2d]
    for (wih, whh, b) in tuple(enc_params) + tuple(dec_params):
        args += [wih, whh, b]
    args += [topk_wt, topk_b, price_wt, price_b]

    kernel = functools.partial(_fused_kernel, L=L, T=T, B=BP, A=A, H=H, P=P,
                               inp_scale=float(inp_scale),
                               outp_scale=float(outp_scale))

    pred2d, sel = pl.pallas_call(
        kernel,
        out_shape=(jax.ShapeDtypeStruct((P * BP, A), jnp.float32),
                   jax.ShapeDtypeStruct((BP, A), jnp.float32)),
        in_specs=[pl.BlockSpec(memory_space=pltpu.MemorySpace.VMEM)
                  for _ in args],
        out_specs=(pl.BlockSpec(memory_space=pltpu.MemorySpace.VMEM),
                   pl.BlockSpec(memory_space=pltpu.MemorySpace.VMEM)),
        scratch_shapes=[
            pltpu.VMEM((T * BP, H), jnp.float32),   # encoder layer activations
            pltpu.VMEM((P * BP, H), jnp.float32),   # decoder layer activations
            pltpu.VMEM((T * BP, G), jnp.float32),   # hoisted enc input proj
            pltpu.VMEM((P * BP, G), jnp.float32),   # hoisted dec input proj
            pltpu.VMEM((BP, H), jnp.float32),       # h state
            pltpu.VMEM((BP, H), jnp.float32),       # c state
        ],
    )(*args)

    pred_seq = pred2d.reshape(P, BP, A)[:, :B, :]
    selection = sel[:B, :]
    return pred_seq, selection


# ----------------------------------------------------------------------------
# Parameter init (PyTorch-style distributions, stored pre-transposed)
# ----------------------------------------------------------------------------
def _uniform(key, shape, scale):
    return jax.random.uniform(key, shape, jnp.float32, minval=-scale, maxval=scale)


def _init_lstm(key, num_layers, input_size, hidden_size):
    """Per layer: (w_ih_t (In, 4H), w_hh_t (H, 4H), bias (1, 4H) = b_ih + b_hh).
    Gate order along the 4H axis: i, f, g, o (PyTorch convention)."""
    params = []
    bound = 1.0 / (hidden_size ** 0.5)
    for li in range(num_layers):
        key, k1, k2, k3, k4 = jax.random.split(key, 5)
        in_sz = input_size if li == 0 else hidden_size
        w_ih_t = _uniform(k1, (in_sz, 4 * hidden_size), bound)
        w_hh_t = _uniform(k2, (hidden_size, 4 * hidden_size), bound)
        bias = (_uniform(k3, (1, 4 * hidden_size), bound)
                + _uniform(k4, (1, 4 * hidden_size), bound))
        params.append((w_ih_t, w_hh_t, bias))
    return params, key


class LSTMModelPallas:
    """Pallas port of LSTMModel (mode='pred')."""

    def __init__(self, num_assets, feature_size, num_layers=3,
                 inp_scale=50, outp_scale=0.1, seed=0):
        self.num_assets = num_assets
        self.feature_size = feature_size
        self.num_layers = num_layers
        self.inp_scale = inp_scale
        self.outp_scale = outp_scale

        key = jax.random.PRNGKey(seed)
        self.enc_params, key = _init_lstm(key, num_layers, num_assets, feature_size)
        self.dec_params, key = _init_lstm(key, num_layers, feature_size, feature_size)

        topk_in = num_layers * feature_size * 4
        key, k1, k2, k3, k4 = jax.random.split(key, 5)
        kt = 1.0 / (topk_in ** 0.5)
        kp = 1.0 / (feature_size ** 0.5)
        self.topk_wt = _uniform(k1, (topk_in, num_assets), kt)    # (L*4H, A)
        self.topk_b = _uniform(k2, (1, num_assets), kt)
        self.price_wt = _uniform(k3, (feature_size, num_assets), kp)  # (H, A)
        self.price_b = _uniform(k4, (1, num_assets), kp)

    def _call(self, seq, pred_len, inp_scale, outp_scale):
        return _fused_network_forward(
            seq, self.enc_params, self.dec_params, self.topk_wt, self.topk_b,
            self.price_wt, self.price_b, pred_len=int(pred_len),
            inp_scale=float(inp_scale), outp_scale=float(outp_scale))

    def network_forward(self, seq, pred_len):
        seq = jnp.asarray(seq, jnp.float32)
        batched = seq.ndim == 3
        if not batched:
            seq = seq[:, None, :]
        pred_seq, sel = self._call(seq, pred_len, 1.0, 1.0)
        if not batched:
            pred_seq, sel = pred_seq[:, 0, :], sel[0]
        return pred_seq, sel

    def forward(self, seq, pred_len, mode="pred"):
        seq = jnp.asarray(seq, jnp.float32)
        batched = seq.ndim == 3
        if not batched:
            seq = seq[:, None, :]
        pred_seq, _sel = self._call(seq, pred_len, self.inp_scale, self.outp_scale)
        if not batched:
            pred_seq = pred_seq[:, 0, :]
        if mode == "pred":
            return pred_seq
        # TODO(synk): 'predict-then-opt' / 'history-opt' / 'predict-and-opt'
        # need Gurobi / CvxpyLayers / gumbel_sinkhorn_topk (external solvers),
        # which have no Pallas equivalent.
        raise ValueError(f"mode={mode} is not supported in the Pallas port.")


# ----------------------------------------------------------------------------
# Pure-JAX reference (no Pallas) for validation
# ----------------------------------------------------------------------------
def _reference_forward(model, seq, pred_len):
    def lstm(x_seq, layers):
        Tn, Bn, _ = x_seq.shape
        y = x_seq
        h_fin, c_fin = [], []
        for (w_ih_t, w_hh_t, b) in layers:
            Hn = w_hh_t.shape[0]
            h = jnp.zeros((Bn, Hn), jnp.float32)
            c = jnp.zeros((Bn, Hn), jnp.float32)
            outs = []
            for t in range(Tn):
                gates = y[t] @ w_ih_t + h @ w_hh_t + b[0]
                i = _sigmoid(gates[:, 0:Hn])
                f = _sigmoid(gates[:, Hn:2 * Hn])
                g = jnp.tanh(gates[:, 2 * Hn:3 * Hn])
                o = _sigmoid(gates[:, 3 * Hn:4 * Hn])
                c = f * c + i * g
                h = o * jnp.tanh(c)
                outs.append(h)
            y = jnp.stack(outs, axis=0)
            h_fin.append(h)
            c_fin.append(c)
        return y, jnp.stack(h_fin), jnp.stack(c_fin)

    x = seq * model.inp_scale
    T, B, A = x.shape
    y_enc, eh, ec = lstm(x, model.enc_params)
    latent = y_enc[-1:]
    dec_in = jnp.tile(latent, (pred_len, 1, 1))
    y_dec, dh, dc = lstm(dec_in, model.dec_params)
    hid = jnp.concatenate([eh, ec, dh, dc], axis=-1)        # (L, B, 4H)
    hid = jnp.transpose(hid, (1, 0, 2)).reshape(B, -1)
    selection = _sigmoid(hid @ model.topk_wt + model.topk_b[0])
    z = y_dec.reshape(pred_len * B, -1) @ model.price_wt + model.price_b[0]
    pred = (z - jnp.tanh(z)).reshape(pred_len, B, A) * model.outp_scale
    return pred, selection


# ----------------------------------------------------------------------------
# Demo
# ----------------------------------------------------------------------------
if __name__ == "__main__":
    num_assets = 8
    feature_size = 32
    num_layers = 3
    seq_len = 8
    batch = 2
    pred_len = 4

    model = LSTMModelPallas(num_assets, feature_size, num_layers,
                            inp_scale=50, outp_scale=0.1, seed=0)

    key = jax.random.PRNGKey(0)
    # small daily returns, time-major (N, B, A)
    seq = 0.01 * jax.random.normal(key, (seq_len, batch, num_assets), jnp.float32)

    pred_seq = model.forward(seq, pred_len, mode="pred")
    pred_seq = jax.block_until_ready(pred_seq)
    assert pred_seq.shape == (pred_len, batch, num_assets)
    assert bool(jnp.all(jnp.isfinite(pred_seq)))

    # validate both heads against the pure-JAX reference
    pred_k, sel_k = model._call(seq, pred_len, model.inp_scale, model.outp_scale)
    pred_ref, sel_ref = _reference_forward(model, seq, pred_len)
    assert bool(jnp.allclose(pred_k, pred_ref, atol=1e-3, rtol=5e-2)), \
        float(jnp.max(jnp.abs(pred_k - pred_ref)))
    assert bool(jnp.allclose(sel_k, sel_ref, atol=1e-2, rtol=5e-2)), \
        float(jnp.max(jnp.abs(sel_k - sel_ref)))

    print("KERNEL_OK")
</pallas_src>

<mosaic_0001>
module attributes {stable_mosaic.version = 11 : i64} {
  func.func @_fused_kernel(%arg0: memref<64x8xf32, #tpu.memory_space<vmem>>, %arg1: memref<8x128xf32, #tpu.memory_space<vmem>>, %arg2: memref<32x128xf32, #tpu.memory_space<vmem>>, %arg3: memref<1x128xf32, #tpu.memory_space<vmem>>, %arg4: memref<32x128xf32, #tpu.memory_space<vmem>>, %arg5: memref<32x128xf32, #tpu.memory_space<vmem>>, %arg6: memref<1x128xf32, #tpu.memory_space<vmem>>, %arg7: memref<32x128xf32, #tpu.memory_space<vmem>>, %arg8: memref<32x128xf32, #tpu.memory_space<vmem>>, %arg9: memref<1x128xf32, #tpu.memory_space<vmem>>, %arg10: memref<32x128xf32, #tpu.memory_space<vmem>>, %arg11: memref<32x128xf32, #tpu.memory_space<vmem>>, %arg12: memref<1x128xf32, #tpu.memory_space<vmem>>, %arg13: memref<32x128xf32, #tpu.memory_space<vmem>>, %arg14: memref<32x128xf32, #tpu.memory_space<vmem>>, %arg15: memref<1x128xf32, #tpu.memory_space<vmem>>, %arg16: memref<32x128xf32, #tpu.memory_space<vmem>>, %arg17: memref<32x128xf32, #tpu.memory_space<vmem>>, %arg18: memref<1x128xf32, #tpu.memory_space<vmem>>, %arg19: memref<384x8xf32, #tpu.memory_space<vmem>>, %arg20: memref<1x8xf32, #tpu.memory_space<vmem>>, %arg21: memref<32x8xf32, #tpu.memory_space<vmem>>, %arg22: memref<1x8xf32, #tpu.memory_space<vmem>>, %arg23: memref<32x8xf32, #tpu.memory_space<vmem>>, %arg24: memref<8x8xf32, #tpu.memory_space<vmem>>, %arg25: memref<64x32xf32, #tpu.memory_space<vmem>>, %arg26: memref<32x32xf32, #tpu.memory_space<vmem>>, %arg27: memref<64x128xf32, #tpu.memory_space<vmem>>, %arg28: memref<32x128xf32, #tpu.memory_space<vmem>>, %arg29: memref<8x32xf32, #tpu.memory_space<vmem>>, %arg30: memref<8x32xf32, #tpu.memory_space<vmem>>) attributes {dimension_semantics = [], scalar_prefetch = 0 : i64, scratch_operands = 6 : i64, tpu.core_type = #tpu.core_type<tc>} {
    %c0 = arith.constant 0 : index
    %c0_0 = arith.constant 0 : index
    %0 = vector.load %arg0[%c0, %c0_0] : memref<64x8xf32, #tpu.memory_space<vmem>>, vector<64x8xf32>
    %cst = arith.constant 5.000000e+01 : f32
    %1 = vector.broadcast %cst : f32 to vector<64x8xf32>
    %2 = arith.mulf %0, %1 : vector<64x8xf32>
    %c0_1 = arith.constant 0 : index
    %c0_2 = arith.constant 0 : index
    %3 = vector.load %arg1[%c0_1, %c0_2] : memref<8x128xf32, #tpu.memory_space<vmem>>, vector<8x128xf32>
    %cst_3 = arith.constant dense<0.000000e+00> : vector<64x128xf32>
    %4 = tpu.matmul %2, %3, %cst_3 {dimension_numbers = #tpu.dot_dimension_numbers<[1], [0], [0], [1], [0, 0, 1, 1], [], []>} : vector<64x8xf32>, vector<8x128xf32>, vector<64x128xf32> -> vector<64x128xf32>
    %c0_4 = arith.constant 0 : index
    %c0_5 = arith.constant 0 : index
    %5 = vector.load %arg3[%c0_4, %c0_5] : memref<1x128xf32, #tpu.memory_space<vmem>>, vector<1x128xf32>
    %6 = vector.broadcast %5 : vector<1x128xf32> to vector<64x128xf32>
    %7 = arith.addf %4, %6 : vector<64x128xf32>
    %c0_6 = arith.constant 0 : index
    %c0_7 = arith.constant 0 : index
    %8 = vector.load %arg27[%c0_6, %c0_7] : memref<64x128xf32, #tpu.memory_space<vmem>>, vector<64x128xf32>
    tpu.vector_store %arg27[%c0_6, %c0_7], %7 {strides = array<i32>} : memref<64x128xf32, #tpu.memory_space<vmem>>, vector<64x128xf32>,
    %cst_8 = arith.constant 0.000000e+00 : f32
    %9 = vector.broadcast %cst_8 : f32 to vector<8x32xf32>
    %c0_9 = arith.constant 0 : index
    %c0_10 = arith.constant 0 : index
    %10 = vector.load %arg29[%c0_9, %c0_10] : memref<8x32xf32, #tpu.memory_space<vmem>>, vector<8x32xf32>
    tpu.vector_store %arg29[%c0_9, %c0_10], %9 {strides = array<i32>} : memref<8x32xf32, #tpu.memory_space<vmem>>, vector<8x32xf32>,
    %cst_11 = arith.constant 0.000000e+00 : f32
    %11 = vector.broadcast %cst_11 : f32 to vector<8x32xf32>
    %c0_12 = arith.constant 0 : index
    %c0_13 = arith.constant 0 : index
    %12 = vector.load %arg30[%c0_12, %c0_13] : memref<8x32xf32, #tpu.memory_space<vmem>>, vector<8x32xf32>
    tpu.vector_store %arg30[%c0_12, %c0_13], %11 {strides = array<i32>} : memref<8x32xf32, #tpu.memory_space<vmem>>, vector<8x32xf32>,
    %c0_14 = arith.constant 0 : index
    %c0_15 = arith.constant 0 : index
    %13 = vector.load %arg2[%c0_14, %c0_15] : memref<32x128xf32, #tpu.memory_space<vmem>>, vector<32x128xf32>
    %c0_16 = arith.constant 0 : index
    %c0_17 = arith.constant 0 : index
    %14 = vector.load %arg27[%c0_16, %c0_17] : memref<64x128xf32, #tpu.memory_space<vmem>>, vector<8x128xf32>
    %c0_18 = arith.constant 0 : index
    %c0_19 = arith.constant 0 : index
    %15 = vector.load %arg29[%c0_18, %c0_19] : memref<8x32xf32, #tpu.memory_space<vmem>>, vector<8x32xf32>
    %cst_20 = arith.constant dense<0.000000e+00> : vector<8x128xf32>
    %16 = tpu.matmul %15, %13, %cst_20 {dimension_numbers = #tpu.dot_dimension_numbers<[1], [0], [0], [1], [0, 0, 1, 1], [], []>} : vector<8x32xf32>, vector<32x128xf32>, vector<8x128xf32> -> vector<8x128xf32>
    %17 = arith.addf %14, %16 : vector<8x128xf32>
    %18 = vector.extract_strided_slice %17 {offsets = [0, 0], sizes = [8, 32], strides = [1, 1]} : vector<8x128xf32> to vector<8x32xf32>
    %cst_21 = arith.constant 0.000000e+00 : f32
    %19 = vector.broadcast %cst_21 : f32 to vector<8x32xf32>
    %20 = arith.subf %19, %18 : vector<8x32xf32>
    %21 = math.exp %20 : vector<8x32xf32>
    %cst_22 = arith.constant 1.000000e+00 : f32
    %22 = vector.broadcast %cst_22 : f32 to vector<8x32xf32>
    %23 = arith.addf %22, %21 : vector<8x32xf32>
    %cst_23 = arith.constant 1.000000e+00 : f32
    %24 = vector.broadcast %cst_23 : f32 to vector<8x32xf32>
    %25 = arith.divf %24, %23 : vector<8x32xf32>
    %26 = vector.extract_strided_slice %17 {offsets = [0, 32], sizes = [8, 32], strides = [1, 1]} : vector<8x128xf32> to vector<8x32xf32>
    %cst_24 = arith.constant 0.000000e+00 : f32
    %27 = vector.broadcast %cst_24 : f32 to vector<8x32xf32>
    %28 = arith.subf %27, %26 : vector<8x32xf32>
    %29 = math.exp %28 : vector<8x32xf32>
    %cst_25 = arith.constant 1.000000e+00 : f32
    %30 = vector.broadcast %cst_25 : f32 to vector<8x32xf32>
    %31 = arith.addf %30, %29 : vector<8x32xf32>
    %cst_26 = arith.constant 1.000000e+00 : f32
    %32 = vector.broadcast %cst_26 : f32 to vector<8x32xf32>
    %33 = arith.divf %32, %31 : vector<8x32xf32>
    %34 = vector.extract_strided_slice %17 {offsets = [0, 64], sizes = [8, 32], strides = [1, 1]} : vector<8x128xf32> to vector<8x32xf32>
    %35 = math.tanh %34 : vector<8x32xf32>
    %36 = vector.extract_strided_slice %17 {offsets = [0, 96], sizes = [8, 32], strides = [1, 1]} : vector<8x128xf32> to vector<8x32xf32>
    %cst_27 = arith.constant 0.000000e+00 : f32
    %37 = vector.broadcast %cst_27 : f32 to vector<8x32xf32>
    %38 = arith.subf %37, %36 : vector<8x32xf32>
    %39 = math.exp %38 : vector<8x32xf32>
    %cst_28 = arith.constant 1.000000e+00 : f32
    %40 = vector.broadcast %cst_28 : f32 to vector<8x32xf32>
    %41 = arith.addf %40, %39 : vector<8x32xf32>
    %cst_29 = arith.constant 1.000000e+00 : f32
    %42 = vector.broadcast %cst_29 : f32 to vector<8x32xf32>
    %43 = arith.divf %42, %41 : vector<8x32xf32>
    %c0_30 = arith.constant 0 : index
    %c0_31 = arith.constant 0 : index
    %44 = vector.load %arg30[%c0_30, %c0_31] : memref<8x32xf32, #tpu.memory_space<vmem>>, vector<8x32xf32>
    %45 = arith.mulf %33, %44 : vector<8x32xf32>
    %46 = arith.mulf %25, %35 : vector<8x32xf32>
    %47 = arith.addf %45, %46 : vector<8x32xf32>
    %48 = math.tanh %47 : vector<8x32xf32>
    %49 = arith.mulf %43, %48 : vector<8x32xf32>
    %c0_32 = arith.constant 0 : index
    %c0_33 = arith.constant 0 : index
    %50 = vector.load %arg29[%c0_32, %c0_33] : memref<8x32xf32, #tpu.memory_space<vmem>>, vector<8x32xf32>
    tpu.vector_store %arg29[%c0_32, %c0_33], %49 {strides = array<i32>} : memref<8x32xf32, #tpu.memory_space<vmem>>, vector<8x32xf32>,
    %c0_34 = arith.constant 0 : index
    %c0_35 = arith.constant 0 : index
    %51 = vector.load %arg30[%c0_34, %c0_35] : memref<8x32xf32, #tpu.memory_space<vmem>>, vector<8x32xf32>
    tpu.vector_store %arg30[%c0_34, %c0_35], %47 {strides = array<i32>} : memref<8x32xf32, #tpu.memory_space<vmem>>, vector<8x32xf32>,
    %c0_36 = arith.constant 0 : index
    %c0_37 = arith.constant 0 : index
    %52 = vector.load %arg25[%c0_36, %c0_37] : memref<64x32xf32, #tpu.memory_space<vmem>>, vector<8x32xf32>
    tpu.vector_store %arg25[%c0_36, %c0_37], %49 {strides = array<i32>} : memref<64x32xf32, #tpu.memory_space<vmem>>, vector<8x32xf32>,
    %c8 = arith.constant 8 : index
    %c0_38 = arith.constant 0 : index
    %53 = vector.load %arg27[%c8, %c0_38] : memref<64x128xf32, #tpu.memory_space<vmem>>, vector<8x128xf32>
    %c0_39 = arith.constant 0 : index
    %c0_40 = arith.constant 0 : index
    %54 = vector.load %arg29[%c0_39, %c0_40] : memref<8x32xf32, #tpu.memory_space<vmem>>, vector<8x32xf32>
    %cst_41 = arith.constant dense<0.000000e+00> : vector<8x128xf32>
    %55 = tpu.matmul %54, %13, %cst_41 {dimension_numbers = #tpu.dot_dimension_numbers<[1], [0], [0], [1], [0, 0, 1, 1], [], []>} : vector<8x32xf32>, vector<32x128xf32>, vector<8x128xf32> -> vector<8x128xf32>
    %56 = arith.addf %53, %55 : vector<8x128xf32>
    %57 = vector.extract_strided_slice %56 {offsets = [0, 0], sizes = [8, 32], strides = [1, 1]} : vector<8x128xf32> to vector<8x32xf32>
    %cst_42 = arith.constant 0.000000e+00 : f32
    %58 = vector.broadcast %cst_42 : f32 to vector<8x32xf32>
    %59 = arith.subf %58, %57 : vector<8x32xf32>
    %60 = math.exp %59 : vector<8x32xf32>
    %cst_43 = arith.constant 1.000000e+00 : f32
    %61 = vector.broadcast %cst_43 : f32 to vector<8x32xf32>
    %62 = arith.addf %61, %60 : vector<8x32xf32>
    %cst_44 = arith.constant 1.000000e+00 : f32
    %63 = vector.broadcast %cst_44 : f32 to vector<8x32xf32>
    %64 = arith.divf %63, %62 : vector<8x32xf32>
    %65 = vector.extract_strided_slice %56 {offsets = [0, 32], sizes = [8, 32], strides = [1, 1]} : vector<8x128xf32> to vector<8x32xf32>
    %cst_45 = arith.constant 0.000000e+00 : f32
    %66 = vector.broadcast %cst_45 : f32 to vector<8x32xf32>
    %67 = arith.subf %66, %65 : vector<8x32xf32>
    %68 = math.exp %67 : vector<8x32xf32>
    %cst_46 = arith.constant 1.000000e+00 : f32
    %69 = vector.broadcast %cst_46 : f32 to vector<8x32xf32>
    %70 = arith.addf %69, %68 : vector<8x32xf32>
    %cst_47 = arith.constant 1.000000e+00 : f32
    %71 = vector.broadcast %cst_47 : f32 to vector<8x32xf32>
    %72 = arith.divf %71, %70 : vector<8x32xf32>
    %73 = vector.extract_strided_slice %56 {offsets = [0, 64], sizes = [8, 32], strides = [1, 1]} : vector<8x128xf32> to vector<8x32xf32>
    %74 = math.tanh %73 : vector<8x32xf32>
    %75 = vector.extract_strided_slice %56 {offsets = [0, 96], sizes = [8, 32], strides = [1, 1]} : vector<8x128xf32> to vector<8x32xf32>
    %cst_48 = arith.constant 0.000000e+00 : f32
    %76 = vector.broadcast %cst_48 : f32 to vector<8x32xf32>
    %77 = arith.subf %76, %75 : vector<8x32xf32>
    %78 = math.exp %77 : vector<8x32xf32>
    %cst_49 = arith.constant 1.000000e+00 : f32
    %79 = vector.broadcast %cst_49 : f32 to vector<8x32xf32>
    %80 = arith.addf %79, %78 : vector<8x32xf32>
    %cst_50 = arith.constant 1.000000e+00 : f32
    %81 = vector.broadcast %cst_50 : f32 to vector<8x32xf32>
    %82 = arith.divf %81, %80 : vector<8x32xf32>
    %c0_51 = arith.constant 0 : index
    %c0_52 = arith.constant 0 : index
    %83 = vector.load %arg30[%c0_51, %c0_52] : memref<8x32xf32, #tpu.memory_space<vmem>>, vector<8x32xf32>
    %84 = arith.mulf %72, %83 : vector<8x32xf32>
    %85 = arith.mulf %64, %74 : vector<8x32xf32>
    %86 = arith.addf %84, %85 : vector<8x32xf32>
    %87 = math.tanh %86 : vector<8x32xf32>
    %88 = arith.mulf %82, %87 : vector<8x32xf32>
    %c0_53 = arith.constant 0 : index
    %c0_54 = arith.constant 0 : index
    %89 = vector.load %arg29[%c0_53, %c0_54] : memref<8x32xf32, #tpu.memory_space<vmem>>, vector<8x32xf32>
    tpu.vector_store %arg29[%c0_53, %c0_54], %88 {strides = array<i32>} : memref<8x32xf32, #tpu.memory_space<vmem>>, vector<8x32xf32>,
    %c0_55 = arith.constant 0 : index
    %c0_56 = arith.constant 0 : index
    %90 = vector.load %arg30[%c0_55, %c0_56] : memref<8x32xf32, #tpu.memory_space<vmem>>, vector<8x32xf32>
    tpu.vector_store %arg30[%c0_55, %c0_56], %86 {strides = array<i32>} : memref<8x32xf32, #tpu.memory_space<vmem>>, vector<8x32xf32>,
    %c8_57 = arith.constant 8 : index
    %c0_58 = arith.constant 0 : index
    %91 = vector.load %arg25[%c8_57, %c0_58] : memref<64x32xf32, #tpu.memory_space<vmem>>, vector<8x32xf32>
    tpu.vector_store %arg25[%c8_57, %c0_58], %88 {strides = array<i32>} : memref<64x32xf32, #tpu.memory_space<vmem>>, vector<8x32xf32>,
    %c16 = arith.constant 16 : index
    %c0_59 = arith.constant 0 : index
    %92 = vector.load %arg27[%c16, %c0_59] : memref<64x128xf32, #tpu.memory_space<vmem>>, vector<8x128xf32>
    %c0_60 = arith.constant 0 : index
    %c0_61 = arith.constant 0 : index
    %93 = vector.load %arg29[%c0_60, %c0_61] : memref<8x32xf32, #tpu.memory_space<vmem>>, vector<8x32xf32>
    %cst_62 = arith.constant dense<0.000000e+00> : vector<8x128xf32>
    %94 = tpu.matmul %93, %13, %cst_62 {dimension_numbers = #tpu.dot_dimension_numbers<[1], [0], [0], [1], [0, 0, 1, 1], [], []>} : vector<8x32xf32>, vector<32x128xf32>, vector<8x128xf32> -> vector<8x128xf32>
    %95 = arith.addf %92, %94 : vector<8x128xf32>
    %96 = vector.extract_strided_slice %95 {offsets = [0, 0], sizes = [8, 32], strides = [1, 1]} : vector<8x128xf32> to vector<8x32xf32>
    %cst_63 = arith.constant 0.000000e+00 : f32
    %97 = vector.broadcast %cst_63 : f32 to vector<8x32xf32>
    %98 = arith.subf %97, %96 : vector<8x32xf32>
    %99 = math.exp %98 : vector<8x32xf32>
    %cst_64 = arith.constant 1.000000e+00 : f32
    %100 = vector.broadcast %cst_64 : f32 to vector<8x32xf32>
    %101 = arith.addf %100, %99 : vector<8x32xf32>
    %cst_65 = arith.constant 1.000000e+00 : f32
    %102 = vector.broadcast %cst_65 : f32 to vector<8x32xf32>
    %103 = arith.divf %102, %101 : vector<8x32xf32>
    %104 = vector.extract_strided_slice %95 {offsets = [0, 32], sizes = [8, 32], strides = [1, 1]} : vector<8x128xf32> to vector<8x32xf32>
    %cst_66 = arith.constant 0.000000e+00 : f32
    %105 = vector.broadcast %cst_66 : f32 to vector<8x32xf32>
    %106 = arith.subf %105, %104 : vector<8x32xf32>
    %107 = math.exp %106 : vector<8x32xf32>
    %cst_67 = arith.constant 1.000000e+00 : f32
    %108 = vector.broadcast %cst_67 : f32 to vector<8x32xf32>
    %109 = arith.addf %108, %107 : vector<8x32xf32>
    %cst_68 = arith.constant 1.000000e+00 : f32
    %110 = vector.broadcast %cst_68 : f32 to vector<8x32xf32>
    %111 = arith.divf %110, %109 : vector<8x32xf32>
    %112 = vector.extract_strided_slice %95 {offsets = [0, 64], sizes = [8, 32], strides = [1, 1]} : vector<8x128xf32> to vector<8x32xf32>
    %113 = math.tanh %112 : vector<8x32xf32>
    %114 = vector.extract_strided_slice %95 {offsets = [0, 96], sizes = [8, 32], strides = [1, 1]} : vector<8x128xf32> to vector<8x32xf32>
    %cst_69 = arith.constant 0.000000e+00 : f32
    %115 = vector.broadcast %cst_69 : f32 to vector<8x32xf32>
    %116 = arith.subf %115, %114 : vector<8x32xf32>
    %117 = math.exp %116 : vector<8x32xf32>
    %cst_70 = arith.constant 1.000000e+00 : f32
    %118 = vector.broadcast %cst_70 : f32 to vector<8x32xf32>
    %119 = arith.addf %118, %117 : vector<8x32xf32>
    %cst_71 = arith.constant 1.000000e+00 : f32
    %120 = vector.broadcast %cst_71 : f32 to vector<8x32xf32>
    %121 = arith.divf %120, %119 : vector<8x32xf32>
    %c0_72 = arith.constant 0 : index
    %c0_73 = arith.constant 0 : index
    %122 = vector.load %arg30[%c0_72, %c0_73] : memref<8x32xf32, #tpu.memory_space<vmem>>, vector<8x32xf32>
    %123 = arith.mulf %111, %122 : vector<8x32xf32>
    %124 = arith.mulf %103, %113 : vector<8x32xf32>
    %125 = arith.addf %123, %124 : vector<8x32xf32>
    %126 = math.tanh %125 : vector<8x32xf32>
    %127 = arith.mulf %121, %126 : vector<8x32xf32>
    %c0_74 = arith.constant 0 : index
    %c0_75 = arith.constant 0 : index
    %128 = vector.load %arg29[%c0_74, %c0_75] : memref<8x32xf32, #tpu.memory_space<vmem>>, vector<8x32xf32>
    tpu.vector_store %arg29[%c0_74, %c0_75], %127 {strides = array<i32>} : memref<8x32xf32, #tpu.memory_space<vmem>>, vector<8x32xf32>,
    %c0_76 = arith.constant 0 : index
    %c0_77 = arith.constant 0 : index
    %129 = vector.load %arg30[%c0_76, %c0_77] : memref<8x32xf32, #tpu.memory_space<vmem>>, vector<8x32xf32>
    tpu.vector_store %arg30[%c0_76, %c0_77], %125 {strides = array<i32>} : memref<8x32xf32, #tpu.memory_space<vmem>>, vector<8x32xf32>,
    %c16_78 = arith.constant 16 : index
    %c0_79 = arith.constant 0 : index
    %130 = vector.load %arg25[%c16_78, %c0_79] : memref<64x32xf32, #tpu.memory_space<vmem>>, vector<8x32xf32>
    tpu.vector_store %arg25[%c16_78, %c0_79], %127 {strides = array<i32>} : memref<64x32xf32, #tpu.memory_space<vmem>>, vector<8x32xf32>,
    %c24 = arith.constant 24 : index
    %c0_80 = arith.constant 0 : index
    %131 = vector.load %arg27[%c24, %c0_80] : memref<64x128xf32, #tpu.memory_space<vmem>>, vector<8x128xf32>
    %c0_81 = arith.constant 0 : index
    %c0_82 = arith.constant 0 : index
    %132 = vector.load %arg29[%c0_81, %c0_82] : memref<8x32xf32, #tpu.memory_space<vmem>>, vector<8x32xf32>
    %cst_83 = arith.constant dense<0.000000e+00> : vector<8x128xf32>
    %133 = tpu.matmul %132, %13, %cst_83 {dimension_numbers = #tpu.dot_dimension_numbers<[1], [0], [0], [1], [0, 0, 1, 1], [], []>} : vector<8x32xf32>, vector<32x128xf32>, vector<8x128xf32> -> vector<8x128xf32>
    %134 = arith.addf %131, %133 : vector<8x128xf32>
    %135 = vector.extract_strided_slice %134 {offsets = [0, 0], sizes = [8, 32], strides = [1, 1]} : vector<8x128xf32> to vector<8x32xf32>
    %cst_84 = arith.constant 0.000000e+00 : f32
    %136 = vector.broadcast %cst_84 : f32 to vector<8x32xf32>
    %137 = arith.subf %136, %135 : vector<8x32xf32>
    %138 = math.exp %137 : vector<8x32xf32>
    %cst_85 = arith.constant 1.000000e+00 : f32
    %139 = vector.broadcast %cst_85 : f32 to vector<8x32xf32>
    %140 = arith.addf %139, %138 : vector<8x32xf32>
    %cst_86 = arith.constant 1.000000e+00 : f32
    %141 = vector.broadcast %cst_86 : f32 to vector<8x32xf32>
    %142 = arith.divf %141, %140 : vector<8x32xf32>
    %143 = vector.extract_strided_slice %134 {offsets = [0, 32], sizes = [8, 32], strides = [1, 1]} : vector<8x128xf32> to vector<8x32xf32>
    %cst_87 = arith.constant 0.000000e+00 : f32
    %144 = vector.broadcast %cst_87 : f32 to vector<8x32xf32>
    %145 = arith.subf %144, %143 : vector<8x32xf32>
    %146 = math.exp %145 : vector<8x32xf32>
    %cst_88 = arith.constant 1.000000e+00 : f32
    %147 = vector.broadcast %cst_88 : f32 to vector<8x32xf32>
    %148 = arith.addf %147, %146 : vector<8x32xf32>
    %cst_89 = arith.constant 1.000000e+00 : f32
    %149 = vector.broadcast %cst_89 : f32 to vector<8x32xf32>
    %150 = arith.divf %149, %148 : vector<8x32xf32>
    %151 = vector.extract_strided_slice %134 {offsets = [0, 64], sizes = [8, 32], strides = [1, 1]} : vector<8x128xf32> to vector<8x32xf32>
    %152 = math.tanh %151 : vector<8x32xf32>
    %153 = vector.extract_strided_slice %134 {offsets = [0, 96], sizes = [8, 32], strides = [1, 1]} : vector<8x128xf32> to vector<8x32xf32>
    %cst_90 = arith.constant 0.000000e+00 : f32
    %154 = vector.broadcast %cst_90 : f32 to vector<8x32xf32>
    %155 = arith.subf %154, %153 : vector<8x32xf32>
    %156 = math.exp %155 : vector<8x32xf32>
    %cst_91 = arith.constant 1.000000e+00 : f32
    %157 = vector.broadcast %cst_91 : f32 to vector<8x32xf32>
    %158 = arith.addf %157, %156 : vector<8x32xf32>
    %cst_92 = arith.constant 1.000000e+00 : f32
    %159 = vector.broadcast %cst_92 : f32 to vector<8x32xf32>
    %160 = arith.divf %159, %158 : vector<8x32xf32>
    %c0_93 = arith.constant 0 : index
    %c0_94 = arith.constant 0 : index
    %161 = vector.load %arg30[%c0_93, %c0_94] : memref<8x32xf32, #tpu.memory_space<vmem>>, vector<8x32xf32>
    %162 = arith.mulf %150, %161 : vector<8x32xf32>
    %163 = arith.mulf %142, %152 : vector<8x32xf32>
    %164 = arith.addf %162, %163 : vector<8x32xf32>
    %165 = math.tanh %164 : vector<8x32xf32>
    %166 = arith.mulf %160, %165 : vector<8x32xf32>
    %c0_95 = arith.constant 0 : index
    %c0_96 = arith.constant 0 : index
    %167 = vector.load %arg29[%c0_95, %c0_96] : memref<8x32xf32, #tpu.memory_space<vmem>>, vector<8x32xf32>
    tpu.vector_store %arg29[%c0_95, %c0_96], %166 {strides = array<i32>} : memref<8x32xf32, #tpu.memory_space<vmem>>, vector<8x32xf32>,
    %c0_97 = arith.constant 0 : index
    %c0_98 = arith.constant 0 : index
    %168 = vector.load %arg30[%c0_97, %c0_98] : memref<8x32xf32, #tpu.memory_space<vmem>>, vector<8x32xf32>
    tpu.vector_store %arg30[%c0_97, %c0_98], %164 {strides = array<i32>} : memref<8x32xf32, #tpu.memory_space<vmem>>, vector<8x32xf32>,
    %c24_99 = arith.constant 24 : index
    %c0_100 = arith.constant 0 : index
    %169 = vector.load %arg25[%c24_99, %c0_100] : memref<64x32xf32, #tpu.memory_space<vmem>>, vector<8x32xf32>
    tpu.vector_store %arg25[%c24_99, %c0_100], %166 {strides = array<i32>} : memref<64x32xf32, #tpu.memory_space<vmem>>, vector<8x32xf32>,
    %c32 = arith.constant 32 : index
    %c0_101 = arith.constant 0 : index
    %170 = vector.load %arg27[%c32, %c0_101] : memref<64x128xf32, #tpu.memory_space<vmem>>, vector<8x128xf32>
    %c0_102 = arith.constant 0 : index
    %c0_103 = arith.constant 0 : index
    %171 = vector.load %arg29[%c0_102, %c0_103] : memref<8x32xf32, #tpu.memory_space<vmem>>, vector<8x32xf32>
    %cst_104 = arith.constant dense<0.000000e+00> : vector<8x128xf32>
    %172 = tpu.matmul %171, %13, %cst_104 {dimension_numbers = #tpu.dot_dimension_numbers<[1], [0], [0], [1], [0, 0, 1, 1], [], []>} : vector<8x32xf32>, vector<32x128xf32>, vector<8x128xf32> -> vector<8x128xf32>
    %173 = arith.addf %170, %172 : vector<8x128xf32>
    %174 = vector.extract_strided_slice %173 {offsets = [0, 0], sizes = [8, 32], strides = [1, 1]} : vector<8x128xf32> to vector<8x32xf32>
    %cst_105 = arith.constant 0.000000e+00 : f32
    %175 = vector.broadcast %cst_105 : f32 to vector<8x32xf32>
    %176 = arith.subf %175, %174 : vector<8x32xf32>
    %177 = math.exp %176 : vector<8x32xf32>
    %cst_106 = arith.constant 1.000000e+00 : f32
    %178 = vector.broadcast %cst_106 : f32 to vector<8x32xf32>
    %179 = arith.addf %178, %177 : vector<8x32xf32>
    %cst_107 = arith.constant 1.000000e+00 : f32
    %180 = vector.broadcast %cst_107 : f32 to vector<8x32xf32>
    %181 = arith.divf %180, %179 : vector<8x32xf32>
    %182 = vector.extract_strided_slice %173 {offsets = [0, 32], sizes = [8, 32], strides = [1, 1]} : vector<8x128xf32> to vector<8x32xf32>
    %cst_108 = arith.constant 0.000000e+00 : f32
    %183 = vector.broadcast %cst_108 : f32 to vector<8x32xf32>
    %184 = arith.subf %183, %182 : vector<8x32xf32>
    %185 = math.exp %184 : vector<8x32xf32>
    %cst_109 = arith.constant 1.000000e+00 : f32
    %186 = vector.broadcast %cst_109 : f32 to vector<8x32xf32>
    %187 = arith.addf %186, %185 : vector<8x32xf32>
    %cst_110 = arith.constant 1.000000e+00 : f32
    %188 = vector.broadcast %cst_110 : f32 to vector<8x32xf32>
    %189 = arith.divf %188, %187 : vector<8x32xf32>
    %190 = vector.extract_strided_slice %173 {offsets = [0, 64], sizes = [8, 32], strides = [1, 1]} : vector<8x128xf32> to vector<8x32xf32>
    %191 = math.tanh %190 : vector<8x32xf32>
    %192 = vector.extract_strided_slice %173 {offsets = [0, 96], sizes = [8, 32], strides = [1, 1]} : vector<8x128xf32> to vector<8x32xf32>
    %cst_111 = arith.constant 0.000000e+00 : f32
    %193 = vector.broadcast %cst_111 : f32 to vector<8x32xf32>
    %194 = arith.subf %193, %192 : vector<8x32xf32>
    %195 = math.exp %194 : vector<8x32xf32>
    %cst_112 = arith.constant 1.000000e+00 : f32
    %196 = vector.broadcast %cst_112 : f32 to vector<8x32xf32>
    %197 = arith.addf %196, %195 : vector<8x32xf32>
    %cst_113 = arith.constant 1.000000e+00 : f32
    %198 = vector.broadcast %cst_113 : f32 to vector<8x32xf32>
    %199 = arith.divf %198, %197 : vector<8x32xf32>
    %c0_114 = arith.constant 0 : index
    %c0_115 = arith.constant 0 : index
    %200 = vector.load %arg30[%c0_114, %c0_115] : memref<8x32xf32, #tpu.memory_space<vmem>>, vector<8x32xf32>
    %201 = arith.mulf %189, %200 : vector<8x32xf32>
    %202 = arith.mulf %181, %191 : vector<8x32xf32>
    %203 = arith.addf %201, %202 : vector<8x32xf32>
    %204 = math.tanh %203 : vector<8x32xf32>
    %205 = arith.mulf %199, %204 : vector<8x32xf32>
    %c0_116 = arith.constant 0 : index
    %c0_117 = arith.constant 0 : index
    %206 = vector.load %arg29[%c0_116, %c0_117] : memref<8x32xf32, #tpu.memory_space<vmem>>, vector<8x32xf32>
    tpu.vector_store %arg29[%c0_116, %c0_117], %205 {strides = array<i32>} : memref<8x32xf32, #tpu.memory_space<vmem>>, vector<8x32xf32>,
    %c0_118 = arith.constant 0 : index
    %c0_119 = arith.constant 0 : index
    %207 = vector.load %arg30[%c0_118, %c0_119] : memref<8x32xf32, #tpu.memory_space<vmem>>, vector<8x32xf32>
    tpu.vector_store %arg30[%c0_118, %c0_119], %203 {strides = array<i32>} : memref<8x32xf32, #tpu.memory_space<vmem>>, vector<8x32xf32>,
    %c32_120 = arith.constant 32 : index
    %c0_121 = arith.constant 0 : index
    %208 = vector.load %arg25[%c32_120, %c0_121] : memref<64x32xf32, #tpu.memory_space<vmem>>, vector<8x32xf32>
    tpu.vector_store %arg25[%c32_120, %c0_121], %205 {strides = array<i32>} : memref<64x32xf32, #tpu.memory_space<vmem>>, vector<8x32xf32>,
    %c40 = arith.constant 40 : index
    %c0_122 = arith.constant 0 : index
    %209 = vector.load %arg27[%c40, %c0_122] : memref<64x128xf32, #tpu.memory_space<vmem>>, vector<8x128xf32>
    %c0_123 = arith.constant 0 : index
    %c0_124 = arith.constant 0 : index
    %210 = vector.load %arg29[%c0_123, %c0_124] : memref<8x32xf32, #tpu.memory_space<vmem>>, vector<8x32xf32>
    %cst_125 = arith.constant dense<0.000000e+00> : vector<8x128xf32>
    %211 = tpu.matmul %210, %13, %cst_125 {dimension_numbers = #tpu.dot_dimension_numbers<[1], [0], [0], [1], [0, 0, 1, 1], [], []>} : vector<8x32xf32>, vector<32x128xf32>, vector<8x128xf32> -> vector<8x128xf32>
    %212 = arith.addf %209, %211 : vector<8x128xf32>
    %213 = vector.extract_strided_slice %212 {offsets = [0, 0], sizes = [8, 32], strides = [1, 1]} : vector<8x128xf32> to vector<8x32xf32>
    %cst_126 = arith.constant 0.000000e+00 : f32
    %214 = vector.broadcast %cst_126 : f32 to vector<8x32xf32>
    %215 = arith.subf %214, %213 : vector<8x32xf32>
    %216 = math.exp %215 : vector<8x32xf32>
    %cst_127 = arith.constant 1.000000e+00 : f32
    %217 = vector.broadcast %cst_127 : f32 to vector<8x32xf32>
    %218 = arith.addf %217, %216 : vector<8x32xf32>
    %cst_128 = arith.constant 1.000000e+00 : f32
    %219 = vector.broadcast %cst_128 : f32 to vector<8x32xf32>
    %220 = arith.divf %219, %218 : vector<8x32xf32>
    %221 = vector.extract_strided_slice %212 {offsets = [0, 32], sizes = [8, 32], strides = [1, 1]} : vector<8x128xf32> to vector<8x32xf32>
    %cst_129 = arith.constant 0.000000e+00 : f32
    %222 = vector.broadcast %cst_129 : f32 to vector<8x32xf32>
    %223 = arith.subf %222, %221 : vector<8x32xf32>
    %224 = math.exp %223 : vector<8x32xf32>
    %cst_130 = arith.constant 1.000000e+00 : f32
    %225 = vector.broadcast %cst_130 : f32 to vector<8x32xf32>
    %226 = arith.addf %225, %224 : vector<8x32xf32>
    %cst_131 = arith.constant 1.000000e+00 : f32
    %227 = vector.broadcast %cst_131 : f32 to vector<8x32xf32>
    %228 = arith.divf %227, %226 : vector<8x32xf32>
    %229 = vector.extract_strided_slice %212 {offsets = [0, 64], sizes = [8, 32], strides = [1, 1]} : vector<8x128xf32> to vector<8x32xf32>
    %230 = math.tanh %229 : vector<8x32xf32>
    %231 = vector.extract_strided_slice %212 {offsets = [0, 96], sizes = [8, 32], strides = [1, 1]} : vector<8x128xf32> to vector<8x32xf32>
    %cst_132 = arith.constant 0.000000e+00 : f32
    %232 = vector.broadcast %cst_132 : f32 to vector<8x32xf32>
    %233 = arith.subf %232, %231 : vector<8x32xf32>
    %234 = math.exp %233 : vector<8x32xf32>
    %cst_133 = arith.constant 1.000000e+00 : f32
    %235 = vector.broadcast %cst_133 : f32 to vector<8x32xf32>
    %236 = arith.addf %235, %234 : vector<8x32xf32>
    %cst_134 = arith.constant 1.000000e+00 : f32
    %237 = vector.broadcast %cst_134 : f32 to vector<8x32xf32>
    %238 = arith.divf %237, %236 : vector<8x32xf32>
    %c0_135 = arith.constant 0 : index
    %c0_136 = arith.constant 0 : index
    %239 = vector.load %arg30[%c0_135, %c0_136] : memref<8x32xf32, #tpu.memory_space<vmem>>, vector<8x32xf32>
    %240 = arith.mulf %228, %239 : vector<8x32xf32>
    %241 = arith.mulf %220, %230 : vector<8x32xf32>
    %242 = arith.addf %240, %241 : vector<8x32xf32>
    %243 = math.tanh %242 : vector<8x32xf32>
    %244 = arith.mulf %238, %243 : vector<8x32xf32>
    %c0_137 = arith.constant 0 : index
    %c0_138 = arith.constant 0 : index
    %245 = vector.load %arg29[%c0_137, %c0_138] : memref<8x32xf32, #tpu.memory_space<vmem>>, vector<8x32xf32>
    tpu.vector_store %arg29[%c0_137, %c0_138], %244 {strides = array<i32>} : memref<8x32xf32, #tpu.memory_space<vmem>>, vector<8x32xf32>,
    %c0_139 = arith.constant 0 : index
    %c0_140 = arith.constant 0 : index
    %246 = vector.load %arg30[%c0_139, %c0_140] : memref<8x32xf32, #tpu.memory_space<vmem>>, vector<8x32xf32>
    tpu.vector_store %arg30[%c0_139, %c0_140], %242 {strides = array<i32>} : memref<8x32xf32, #tpu.memory_space<vmem>>, vector<8x32xf32>,
    %c40_141 = arith.constant 40 : index
    %c0_142 = arith.constant 0 : index
    %247 = vector.load %arg25[%c40_141, %c0_142] : memref<64x32xf32, #tpu.memory_space<vmem>>, vector<8x32xf32>
    tpu.vector_store %arg25[%c40_141, %c0_142], %244 {strides = array<i32>} : memref<64x32xf32, #tpu.memory_space<vmem>>, vector<8x32xf32>,
    %c48 = arith.constant 48 : index
    %c0_143 = arith.constant 0 : index
    %248 = vector.load %arg27[%c48, %c0_143] : memref<64x128xf32, #tpu.memory_space<vmem>>, vector<8x128xf32>
    %c0_144 = arith.constant 0 : index
    %c0_145 = arith.constant 0 : index
    %249 = vector.load %arg29[%c0_144, %c0_145] : memref<8x32xf32, #tpu.memory_space<vmem>>, vector<8x32xf32>
    %cst_146 = arith.constant dense<0.000000e+00> : vector<8x128xf32>
    %250 = tpu.matmul %249, %13, %cst_146 {dimension_numbers = #tpu.dot_dimension_numbers<[1], [0], [0], [1], [0, 0, 1, 1], [], []>} : vector<8x32xf32>, vector<32x128xf32>, vector<8x128xf32> -> vector<8x128xf32>
    %251 = arith.addf %248, %250 : vector<8x128xf32>
    %252 = vector.extract_strided_slice %251 {offsets = [0, 0], sizes = [8, 32], strides = [1, 1]} : vector<8x128xf32> to vector<8x32xf32>
    %cst_147 = arith.constant 0.000000e+00 : f32
    %253 = vector.broadcast %cst_147 : f32 to vector<8x32xf32>
    %254 = arith.subf %253, %252 : vector<8x32xf32>
    %255 = math.exp %254 : vector<8x32xf32>
    %cst_148 = arith.constant 1.000000e+00 : f32
    %256 = vector.broadcast %cst_148 : f32 to vector<8x32xf32>
    %257 = arith.addf %256, %255 : vector<8x32xf32>
    %cst_149 = arith.constant 1.000000e+00 : f32
    %258 = vector.broadcast %cst_149 : f32 to vector<8x32xf32>
    %259 = arith.divf %258, %257 : vector<8x32xf32>
    %260 = vector.extract_strided_slice %251 {offsets = [0, 32], sizes = [8, 32], strides = [1, 1]} : vector<8x128xf32> to vector<8x32xf32>
    %cst_150 = arith.constant 0.000000e+00 : f32
    %261 = vector.broadcast %cst_150 : f32 to vector<8x32xf32>
    %262 = arith.subf %261, %260 : vector<8x32xf32>
    %263 = math.exp %262 : vector<8x32xf32>
    %cst_151 = arith.constant 1.000000e+00 : f32
    %264 = vector.broadcast %cst_151 : f32 to vector<8x32xf32>
    %265 = arith.addf %264, %263 : vector<8x32xf32>
    %cst_152 = arith.constant 1.000000e+00 : f32
    %266 = vector.broadcast %cst_152 : f32 to vector<8x32xf32>
    %267 = arith.divf %266, %265 : vector<8x32xf32>
    %268 = vector.extract_strided_slice %251 {offsets = [0, 64], sizes = [8, 32], strides = [1, 1]} : vector<8x128xf32> to vector<8x32xf32>
    %269 = math.tanh %268 : vector<8x32xf32>
    %270 = vector.extract_strided_slice %251 {offsets = [0, 96], sizes = [8, 32], strides = [1, 1]} : vector<8x128xf32> to vector<8x32xf32>
    %cst_153 = arith.constant 0.000000e+00 : f32
    %271 = vector.broadcast %cst_153 : f32 to vector<8x32xf32>
    %272 = arith.subf %271, %270 : vector<8x32xf32>
    %273 = math.exp %272 : vector<8x32xf32>
    %cst_154 = arith.constant 1.000000e+00 : f32
    %274 = vector.broadcast %cst_154 : f32 to vector<8x32xf32>
    %275 = arith.addf %274, %273 : vector<8x32xf32>
    %cst_155 = arith.constant 1.000000e+00 : f32
    %276 = vector.broadcast %cst_155 : f32 to vector<8x32xf32>
    %277 = arith.divf %276, %275 : vector<8x32xf32>
    %c0_156 = arith.constant 0 : index
    %c0_157 = arith.constant 0 : index
    %278 = vector.load %arg30[%c0_156, %c0_157] : memref<8x32xf32, #tpu.memory_space<vmem>>, vector<8x32xf32>
    %279 = arith.mulf %267, %278 : vector<8x32xf32>
    %280 = arith.mulf %259, %269 : vector<8x32xf32>
    %281 = arith.addf %279, %280 : vector<8x32xf32>
    %282 = math.tanh %281 : vector<8x32xf32>
    %283 = arith.mulf %277, %282 : vector<8x32xf32>
    %c0_158 = arith.constant 0 : index
    %c0_159 = arith.constant 0 : index
    %284 = vector.load %arg29[%c0_158, %c0_159] : memref<8x32xf32, #tpu.memory_space<vmem>>, vector<8x32xf32>
    tpu.vector_store %arg29[%c0_158, %c0_159], %283 {strides = array<i32>} : memref<8x32xf32, #tpu.memory_space<vmem>>, vector<8x32xf32>,
    %c0_160 = arith.constant 0 : index
    %c0_161 = arith.constant 0 : index
    %285 = vector.load %arg30[%c0_160, %c0_161] : memref<8x32xf32, #tpu.memory_space<vmem>>, vector<8x32xf32>
    tpu.vector_store %arg30[%c0_160, %c0_161], %281 {strides = array<i32>} : memref<8x32xf32, #tpu.memory_space<vmem>>, vector<8x32xf32>,
    %c48_162 = arith.constant 48 : index
    %c0_163 = arith.constant 0 : index
    %286 = vector.load %arg25[%c48_162, %c0_163] : memref<64x32xf32, #tpu.memory_space<vmem>>, vector<8x32xf32>
    tpu.vector_store %arg25[%c48_162, %c0_163], %283 {strides = array<i32>} : memref<64x32xf32, #tpu.memory_space<vmem>>, vector<8x32xf32>,
    %c56 = arith.constant 56 : index
    %c0_164 = arith.constant 0 : index
    %287 = vector.load %arg27[%c56, %c0_164] : memref<64x128xf32, #tpu.memory_space<vmem>>, vector<8x128xf32>
    %c0_165 = arith.constant 0 : index
    %c0_166 = arith.constant 0 : index
    %288 = vector.load %arg29[%c0_165, %c0_166] : memref<8x32xf32, #tpu.memory_space<vmem>>, vector<8x32xf32>
    %cst_167 = arith.constant dense<0.000000e+00> : vector<8x128xf32>
    %289 = tpu.matmul %288, %13, %cst_167 {dimension_numbers = #tpu.dot_dimension_numbers<[1], [0], [0], [1], [0, 0, 1, 1], [], []>} : vector<8x32xf32>, vector<32x128xf32>, vector<8x128xf32> -> vector<8x128xf32>
    %290 = arith.addf %287, %289 : vector<8x128xf32>
    %291 = vector.extract_strided_slice %290 {offsets = [0, 0], sizes = [8, 32], strides = [1, 1]} : vector<8x128xf32> to vector<8x32xf32>
    %cst_168 = arith.constant 0.000000e+00 : f32
    %292 = vector.broadcast %cst_168 : f32 to vector<8x32xf32>
    %293 = arith.subf %292, %291 : vector<8x32xf32>
    %294 = math.exp %293 : vector<8x32xf32>
    %cst_169 = arith.constant 1.000000e+00 : f32
    %295 = vector.broadcast %cst_169 : f32 to vector<8x32xf32>
    %296 = arith.addf %295, %294 : vector<8x32xf32>
    %cst_170 = arith.constant 1.000000e+00 : f32
    %297 = vector.broadcast %cst_170 : f32 to vector<8x32xf32>
    %298 = arith.divf %297, %296 : vector<8x32xf32>
    %299 = vector.extract_strided_slice %290 {offsets = [0, 32], sizes = [8, 32], strides = [1, 1]} : vector<8x128xf32> to vector<8x32xf32>
    %cst_171 = arith.constant 0.000000e+00 : f32
    %300 = vector.broadcast %cst_171 : f32 to vector<8x32xf32>
    %301 = arith.subf %300, %299 : vector<8x32xf32>
    %302 = math.exp %301 : vector<8x32xf32>
    %cst_172 = arith.constant 1.000000e+00 : f32
    %303 = vector.broadcast %cst_172 : f32 to vector<8x32xf32>
    %304 = arith.addf %303, %302 : vector<8x32xf32>
    %cst_173 = arith.constant 1.000000e+00 : f32
    %305 = vector.broadcast %cst_173 : f32 to vector<8x32xf32>
    %306 = arith.divf %305, %304 : vector<8x32xf32>
    %307 = vector.extract_strided_slice %290 {offsets = [0, 64], sizes = [8, 32], strides = [1, 1]} : vector<8x128xf32> to vector<8x32xf32>
    %308 = math.tanh %307 : vector<8x32xf32>
    %309 = vector.extract_strided_slice %290 {offsets = [0, 96], sizes = [8, 32], strides = [1, 1]} : vector<8x128xf32> to vector<8x32xf32>
    %cst_174 = arith.constant 0.000000e+00 : f32
    %310 = vector.broadcast %cst_174 : f32 to vector<8x32xf32>
    %311 = arith.subf %310, %309 : vector<8x32xf32>
    %312 = math.exp %311 : vector<8x32xf32>
    %cst_175 = arith.constant 1.000000e+00 : f32
    %313 = vector.broadcast %cst_175 : f32 to vector<8x32xf32>
    %314 = arith.addf %313, %312 : vector<8x32xf32>
    %cst_176 = arith.constant 1.000000e+00 : f32
    %315 = vector.broadcast %cst_176 : f32 to vector<8x32xf32>
    %316 = arith.divf %315, %314 : vector<8x32xf32>
    %c0_177 = arith.constant 0 : index
    %c0_178 = arith.constant 0 : index
    %317 = vector.load %arg30[%c0_177, %c0_178] : memref<8x32xf32, #tpu.memory_space<vmem>>, vector<8x32xf32>
    %318 = arith.mulf %306, %317 : vector<8x32xf32>
    %319 = arith.mulf %298, %308 : vector<8x32xf32>
    %320 = arith.addf %318, %319 : vector<8x32xf32>
    %321 = math.tanh %320 : vector<8x32xf32>
    %322 = arith.mulf %316, %321 : vector<8x32xf32>
    %c0_179 = arith.constant 0 : index
    %c0_180 = arith.constant 0 : index
    %323 = vector.load %arg29[%c0_179, %c0_180] : memref<8x32xf32, #tpu.memory_space<vmem>>, vector<8x32xf32>
    tpu.vector_store %arg29[%c0_179, %c0_180], %322 {strides = array<i32>} : memref<8x32xf32, #tpu.memory_space<vmem>>, vector<8x32xf32>,
    %c0_181 = arith.constant 0 : index
    %c0_182 = arith.constant 0 : index
    %324 = vector.load %arg30[%c0_181, %c0_182] : memref<8x32xf32, #tpu.memory_space<vmem>>, vector<8x32xf32>
    tpu.vector_store %arg30[%c0_181, %c0_182], %320 {strides = array<i32>} : memref<8x32xf32, #tpu.memory_space<vmem>>, vector<8x32xf32>,
    %c56_183 = arith.constant 56 : index
    %c0_184 = arith.constant 0 : index
    %325 = vector.load %arg25[%c56_183, %c0_184] : memref<64x32xf32, #tpu.memory_space<vmem>>, vector<8x32xf32>
    tpu.vector_store %arg25[%c56_183, %c0_184], %322 {strides = array<i32>} : memref<64x32xf32, #tpu.memory_space<vmem>>, vector<8x32xf32>,
    %c0_185 = arith.constant 0 : index
    %c0_186 = arith.constant 0 : index
    %326 = vector.load %arg29[%c0_185, %c0_186] : memref<8x32xf32, #tpu.memory_space<vmem>>, vector<8x32xf32>
    %c0_187 = arith.constant 0 : index
    %c0_188 = arith.constant 0 : index
    %327 = vector.load %arg30[%c0_187, %c0_188] : memref<8x32xf32, #tpu.memory_space<vmem>>, vector<8x32xf32>
    %c0_189 = arith.constant 0 : index
    %c0_190 = arith.constant 0 : index
    %328 = vector.load %arg25[%c0_189, %c0_190] : memref<64x32xf32, #tpu.memory_space<vmem>>, vector<64x32xf32>
    %c0_191 = arith.constant 0 : index
    %c0_192 = arith.constant 0 : index
    %329 = vector.load %arg4[%c0_191, %c0_192] : memref<32x128xf32, #tpu.memory_space<vmem>>, vector<32x128xf32>
    %cst_193 = arith.constant dense<0.000000e+00> : vector<64x128xf32>
    %330 = tpu.matmul %328, %329, %cst_193 {dimension_numbers = #tpu.dot_dimension_numbers<[1], [0], [0], [1], [0, 0, 1, 1], [], []>} : vector<64x32xf32>, vector<32x128xf32>, vector<64x128xf32> -> vector<64x128xf32>
    %c0_194 = arith.constant 0 : index
    %c0_195 = arith.constant 0 : index
    %331 = vector.load %arg6[%c0_194, %c0_195] : memref<1x128xf32, #tpu.memory_space<vmem>>, vector<1x128xf32>
    %332 = vector.broadcast %331 : vector<1x128xf32> to vector<64x128xf32>
    %333 = arith.addf %330, %332 : vector<64x128xf32>
    %c0_196 = arith.constant 0 : index
    %c0_197 = arith.constant 0 : index
    %334 = vector.load %arg27[%c0_196, %c0_197] : memref<64x128xf32, #tpu.memory_space<vmem>>, vector<64x128xf32>
    tpu.vector_store %arg27[%c0_196, %c0_197], %333 {strides = array<i32>} : memref<64x128xf32, #tpu.memory_space<vmem>>, vector<64x128xf32>,
    %cst_198 = arith.constant 0.000000e+00 : f32
    %335 = vector.broadcast %cst_198 : f32 to vector<8x32xf32>
    %c0_199 = arith.constant 0 : index
    %c0_200 = arith.constant 0 : index
    %336 = vector.load %arg29[%c0_199, %c0_200] : memref<8x32xf32, #tpu.memory_space<vmem>>, vector<8x32xf32>
    tpu.vector_store %arg29[%c0_199, %c0_200], %335 {strides = array<i32>} : memref<8x32xf32, #tpu.memory_space<vmem>>, vector<8x32xf32>,
    %cst_201 = arith.constant 0.000000e+00 : f32
    %337 = vector.broadcast %cst_201 : f32 to vector<8x32xf32>
    %c0_202 = arith.constant 0 : index
    %c0_203 = arith.constant 0 : index
    %338 = vector.load %arg30[%c0_202, %c0_203] : memref<8x32xf32, #tpu.memory_space<vmem>>, vector<8x32xf32>
    tpu.vector_store %arg30[%c0_202, %c0_203], %337 {strides = array<i32>} : memref<8x32xf32, #tpu.memory_space<vmem>>, vector<8x32xf32>,
    %c0_204 = arith.constant 0 : index
    %c0_205 = arith.constant 0 : index
    %339 = vector.load %arg5[%c0_204, %c0_205] : memref<32x128xf32, #tpu.memory_space<vmem>>, vector<32x128xf32>
    %c0_206 = arith.constant 0 : index
    %c0_207 = arith.constant 0 : index
    %340 = vector.load %arg27[%c0_206, %c0_207] : memref<64x128xf32, #tpu.memory_space<vmem>>, vector<8x128xf32>
    %c0_208 = arith.constant 0 : index
    %c0_209 = arith.constant 0 : index
    %341 = vector.load %arg29[%c0_208, %c0_209] : memref<8x32xf32, #tpu.memory_space<vmem>>, vector<8x32xf32>
    %cst_210 = arith.constant dense<0.000000e+00> : vector<8x128xf32>
    %342 = tpu.matmul %341, %339, %cst_210 {dimension_numbers = #tpu.dot_dimension_numbers<[1], [0], [0], [1], [0, 0, 1, 1], [], []>} : vector<8x32xf32>, vector<32x128xf32>, vector<8x128xf32> -> vector<8x128xf32>
    %343 = arith.addf %340, %342 : vector<8x128xf32>
    %344 = vector.extract_strided_slice %343 {offsets = [0, 0], sizes = [8, 32], strides = [1, 1]} : vector<8x128xf32> to vector<8x32xf32>
    %cst_211 = arith.constant 0.000000e+00 : f32
    %345 = vector.broadcast %cst_211 : f32 to vector<8x32xf32>
    %346 = arith.subf %345, %344 : vector<8x32xf32>
    %347 = math.exp %346 : vector<8x32xf32>
    %cst_212 = arith.constant 1.000000e+00 : f32
    %348 = vector.broadcast %cst_212 : f32 to vector<8x32xf32>
    %349 = arith.addf %348, %347 : vector<8x32xf32>
    %cst_213 = arith.constant 1.000000e+00 : f32
    %350 = vector.broadcast %cst_213 : f32 to vector<8x32xf32>
    %351 = arith.divf %350, %349 : vector<8x32xf32>
    %352 = vector.extract_strided_slice %343 {offsets = [0, 32], sizes = [8, 32], strides = [1, 1]} : vector<8x128xf32> to vector<8x32xf32>
    %cst_214 = arith.constant 0.000000e+00 : f32
    %353 = vector.broadcast %cst_214 : f32 to vector<8x32xf32>
    %354 = arith.subf %353, %352 : vector<8x32xf32>
    %355 = math.exp %354 : vector<8x32xf32>
    %cst_215 = arith.constant 1.000000e+00 : f32
    %356 = vector.broadcast %cst_215 : f32 to vector<8x32xf32>
    %357 = arith.addf %356, %355 : vector<8x32xf32>
    %cst_216 = arith.constant 1.000000e+00 : f32
    %358 = vector.broadcast %cst_216 : f32 to vector<8x32xf32>
    %359 = arith.divf %358, %357 : vector<8x32xf32>
    %360 = vector.extract_strided_slice %343 {offsets = [0, 64], sizes = [8, 32], strides = [1, 1]} : vector<8x128xf32> to vector<8x32xf32>
    %361 = math.tanh %360 : vector<8x32xf32>
    %362 = vector.extract_strided_slice %343 {offsets = [0, 96], sizes = [8, 32], strides = [1, 1]} : vector<8x128xf32> to vector<8x32xf32>
    %cst_217 = arith.constant 0.000000e+00 : f32
    %363 = vector.broadcast %cst_217 : f32 to vector<8x32xf32>
    %364 = arith.subf %363, %362 : vector<8x32xf32>
    %365 = math.exp %364 : vector<8x32xf32>
    %cst_218 = arith.constant 1.000000e+00 : f32
    %366 = vector.broadcast %cst_218 : f32 to vector<8x32xf32>
    %367 = arith.addf %366, %365 : vector<8x32xf32>
    %cst_219 = arith.constant 1.000000e+00 : f32
    %368 = vector.broadcast %cst_219 : f32 to vector<8x32xf32>
    %369 = arith.divf %368, %367 : vector<8x32xf32>
    %c0_220 = arith.constant 0 : index
    %c0_221 = arith.constant 0 : index
    %370 = vector.load %arg30[%c0_220, %c0_221] : memref<8x32xf32, #tpu.memory_space<vmem>>, vector<8x32xf32>
    %371 = arith.mulf %359, %370 : vector<8x32xf32>
    %372 = arith.mulf %351, %361 : vector<8x32xf32>
    %373 = arith.addf %371, %372 : vector<8x32xf32>
    %374 = math.tanh %373 : vector<8x32xf32>
    %375 = arith.mulf %369, %374 : vector<8x32xf32>
    %c0_222 = arith.constant 0 : index
    %c0_223 = arith.constant 0 : index
    %376 = vector.load %arg29[%c0_222, %c0_223] : memref<8x32xf32, #tpu.memory_space<vmem>>, vector<8x32xf32>
    tpu.vector_store %arg29[%c0_222, %c0_223], %375 {strides = array<i32>} : memref<8x32xf32, #tpu.memory_space<vmem>>, vector<8x32xf32>,
    %c0_224 = arith.constant 0 : index
    %c0_225 = arith.constant 0 : index
    %377 = vector.load %arg30[%c0_224, %c0_225] : memref<8x32xf32, #tpu.memory_space<vmem>>, vector<8x32xf32>
    tpu.vector_store %arg30[%c0_224, %c0_225], %373 {strides = array<i32>} : memref<8x32xf32, #tpu.memory_space<vmem>>, vector<8x32xf32>,
    %c0_226 = arith.constant 0 : index
    %c0_227 = arith.constant 0 : index
    %378 = vector.load %arg25[%c0_226, %c0_227] : memref<64x32xf32, #tpu.memory_space<vmem>>, vector<8x32xf32>
    tpu.vector_store %arg25[%c0_226, %c0_227], %375 {strides = array<i32>} : memref<64x32xf32, #tpu.memory_space<vmem>>, vector<8x32xf32>,
    %c8_228 = arith.constant 8 : index
    %c0_229 = arith.constant 0 : index
    %379 = vector.load %arg27[%c8_228, %c0_229] : memref<64x128xf32, #tpu.memory_space<vmem>>, vector<8x128xf32>
    %c0_230 = arith.constant 0 : index
    %c0_231 = arith.constant 0 : index
    %380 = vector.load %arg29[%c0_230, %c0_231] : memref<8x32xf32, #tpu.memory_space<vmem>>, vector<8x32xf32>
    %cst_232 = arith.constant dense<0.000000e+00> : vector<8x128xf32>
    %381 = tpu.matmul %380, %339, %cst_232 {dimension_numbers = #tpu.dot_dimension_numbers<[1], [0], [0], [1], [0, 0, 1, 1], [], []>} : vector<8x32xf32>, vector<32x128xf32>, vector<8x128xf32> -> vector<8x128xf32>
    %382 = arith.addf %379, %381 : vector<8x128xf32>
    %383 = vector.extract_strided_slice %382 {offsets = [0, 0], sizes = [8, 32], strides = [1, 1]} : vector<8x128xf32> to vector<8x32xf32>
    %cst_233 = arith.constant 0.000000e+00 : f32
    %384 = vector.broadcast %cst_233 : f32 to vector<8x32xf32>
    %385 = arith.subf %384, %383 : vector<8x32xf32>
    %386 = math.exp %385 : vector<8x32xf32>
    %cst_234 = arith.constant 1.000000e+00 : f32
    %387 = vector.broadcast %cst_234 : f32 to vector<8x32xf32>
    %388 = arith.addf %387, %386 : vector<8x32xf32>
    %cst_235 = arith.constant 1.000000e+00 : f32
    %389 = vector.broadcast %cst_235 : f32 to vector<8x32xf32>
    %390 = arith.divf %389, %388 : vector<8x32xf32>
    %391 = vector.extract_strided_slice %382 {offsets = [0, 32], sizes = [8, 32], strides = [1, 1]} : vector<8x128xf32> to vector<8x32xf32>
    %cst_236 = arith.constant 0.000000e+00 : f32
    %392 = vector.broadcast %cst_236 : f32 to vector<8x32xf32>
    %393 = arith.subf %392, %391 : vector<8x32xf32>
    %394 = math.exp %393 : vector<8x32xf32>
    %cst_237 = arith.constant 1.000000e+00 : f32
    %395 = vector.broadcast %cst_237 : f32 to vector<8x32xf32>
    %396 = arith.addf %395, %394 : vector<8x32xf32>
    %cst_238 = arith.constant 1.000000e+00 : f32
    %397 = vector.broadcast %cst_238 : f32 to vector<8x32xf32>
    %398 = arith.divf %397, %396 : vector<8x32xf32>
    %399 = vector.extract_strided_slice %382 {offsets = [0, 64], sizes = [8, 32], strides = [1, 1]} : vector<8x128xf32> to vector<8x32xf32>
    %400 = math.tanh %399 : vector<8x32xf32>
    %401 = vector.extract_strided_slice %382 {offsets = [0, 96], sizes = [8, 32], strides = [1, 1]} : vector<8x128xf32> to vector<8x32xf32>
    %cst_239 = arith.constant 0.000000e+00 : f32
    %402 = vector.broadcast %cst_239 : f32 to vector<8x32xf32>
    %403 = arith.subf %402, %401 : vector<8x32xf32>
    %404 = math.exp %403 : vector<8x32xf32>
    %cst_240 = arith.constant 1.000000e+00 : f32
    %405 = vector.broadcast %cst_240 : f32 to vector<8x32xf32>
    %406 = arith.addf %405, %404 : vector<8x32xf32>
    %cst_241 = arith.constant 1.000000e+00 : f32
    %407 = vector.broadcast %cst_241 : f32 to vector<8x32xf32>
    %408 = arith.divf %407, %406 : vector<8x32xf32>
    %c0_242 = arith.constant 0 : index
    %c0_243 = arith.constant 0 : index
    %409 = vector.load %arg30[%c0_242, %c0_243] : memref<8x32xf32, #tpu.memory_space<vmem>>, vector<8x32xf32>
    %410 = arith.mulf %398, %409 : vector<8x32xf32>
    %411 = arith.mulf %390, %400 : vector<8x32xf32>
    %412 = arith.addf %410, %411 : vector<8x32xf32>
    %413 = math.tanh %412 : vector<8x32xf32>
    %414 = arith.mulf %408, %413 : vector<8x32xf32>
    %c0_244 = arith.constant 0 : index
    %c0_245 = arith.constant 0 : index
    %415 = vector.load %arg29[%c0_244, %c0_245] : memref<8x32xf32, #tpu.memory_space<vmem>>, vector<8x32xf32>
    tpu.vector_store %arg29[%c0_244, %c0_245], %414 {strides = array<i32>} : memref<8x32xf32, #tpu.memory_space<vmem>>, vector<8x32xf32>,
    %c0_246 = arith.constant 0 : index
    %c0_247 = arith.constant 0 : index
    %416 = vector.load %arg30[%c0_246, %c0_247] : memref<8x32xf32, #tpu.memory_space<vmem>>, vector<8x32xf32>
    tpu.vector_store %arg30[%c0_246, %c0_247], %412 {strides = array<i32>} : memref<8x32xf32, #tpu.memory_space<vmem>>, vector<8x32xf32>,
    %c8_248 = arith.constant 8 : index
    %c0_249 = arith.constant 0 : index
    %417 = vector.load %arg25[%c8_248, %c0_249] : memref<64x32xf32, #tpu.memory_space<vmem>>, vector<8x32xf32>
    tpu.vector_store %arg25[%c8_248, %c0_249], %414 {strides = array<i32>} : memref<64x32xf32, #tpu.memory_space<vmem>>, vector<8x32xf32>,
    %c16_250 = arith.constant 16 : index
    %c0_251 = arith.constant 0 : index
    %418 = vector.load %arg27[%c16_250, %c0_251] : memref<64x128xf32, #tpu.memory_space<vmem>>, vector<8x128xf32>
    %c0_252 = arith.constant 0 : index
    %c0_253 = arith.constant 0 : index
    %419 = vector.load %arg29[%c0_252, %c0_253] : memref<8x32xf32, #tpu.memory_space<vmem>>, vector<8x32xf32>
    %cst_254 = arith.constant dense<0.000000e+00> : vector<8x128xf32>
    %420 = tpu.matmul %419, %339, %cst_254 {dimension_numbers = #tpu.dot_dimension_numbers<[1], [0], [0], [1], [0, 0, 1, 1], [], []>} : vector<8x32xf32>, vector<32x128xf32>, vector<8x128xf32> -> vector<8x128xf32>
    %421 = arith.addf %418, %420 : vector<8x128xf32>
    %422 = vector.extract_strided_slice %421 {offsets = [0, 0], sizes = [8, 32], strides = [1, 1]} : vector<8x128xf32> to vector<8x32xf32>
    %cst_255 = arith.constant 0.000000e+00 : f32
    %423 = vector.broadcast %cst_255 : f32 to vector<8x32xf32>
    %424 = arith.subf %423, %422 : vector<8x32xf32>
    %425 = math.exp %424 : vector<8x32xf32>
    %cst_256 = arith.constant 1.000000e+00 : f32
    %426 = vector.broadcast %cst_256 : f32 to vector<8x32xf32>
    %427 = arith.addf %426, %425 : vector<8x32xf32>
    %cst_257 = arith.constant 1.000000e+00 : f32
    %428 = vector.broadcast %cst_257 : f32 to vector<8x32xf32>
    %429 = arith.divf %428, %427 : vector<8x32xf32>
    %430 = vector.extract_strided_slice %421 {offsets = [0, 32], sizes = [8, 32], strides = [1, 1]} : vector<8x128xf32> to vector<8x32xf32>
    %cst_258 = arith.constant 0.000000e+00 : f32
    %431 = vector.broadcast %cst_258 : f32 to vector<8x32xf32>
    %432 = arith.subf %431, %430 : vector<8x32xf32>
    %433 = math.exp %432 : vector<8x32xf32>
    %cst_259 = arith.constant 1.000000e+00 : f32
    %434 = vector.broadcast %cst_259 : f32 to vector<8x32xf32>
    %435 = arith.addf %434, %433 : vector<8x32xf32>
    %cst_260 = arith.constant 1.000000e+00 : f32
    %436 = vector.broadcast %cst_260 : f32 to vector<8x32xf32>
    %437 = arith.divf %436, %435 : vector<8x32xf32>
    %438 = vector.extract_strided_slice %421 {offsets = [0, 64], sizes = [8, 32], strides = [1, 1]} : vector<8x128xf32> to vector<8x32xf32>
    %439 = math.tanh %438 : vector<8x32xf32>
    %440 = vector.extract_strided_slice %421 {offsets = [0, 96], sizes = [8, 32], strides = [1, 1]} : vector<8x128xf32> to vector<8x32xf32>
    %cst_261 = arith.constant 0.000000e+00 : f32
    %441 = vector.broadcast %cst_261 : f32 to vector<8x32xf32>
    %442 = arith.subf %441, %440 : vector<8x32xf32>
    %443 = math.exp %442 : vector<8x32xf32>
    %cst_262 = arith.constant 1.000000e+00 : f32
    %444 = vector.broadcast %cst_262 : f32 to vector<8x32xf32>
    %445 = arith.addf %444, %443 : vector<8x32xf32>
    %cst_263 = arith.constant 1.000000e+00 : f32
    %446 = vector.broadcast %cst_263 : f32 to vector<8x32xf32>
    %447 = arith.divf %446, %445 : vector<8x32xf32>
    %c0_264 = arith.constant 0 : index
    %c0_265 = arith.constant 0 : index
    %448 = vector.load %arg30[%c0_264, %c0_265] : memref<8x32xf32, #tpu.memory_space<vmem>>, vector<8x32xf32>
    %449 = arith.mulf %437, %448 : vector<8x32xf32>
    %450 = arith.mulf %429, %439 : vector<8x32xf32>
    %451 = arith.addf %449, %450 : vector<8x32xf32>
    %452 = math.tanh %451 : vector<8x32xf32>
    %453 = arith.mulf %447, %452 : vector<8x32xf32>
    %c0_266 = arith.constant 0 : index
    %c0_267 = arith.constant 0 : index
    %454 = vector.load %arg29[%c0_266, %c0_267] : memref<8x32xf32, #tpu.memory_space<vmem>>, vector<8x32xf32>
    tpu.vector_store %arg29[%c0_266, %c0_267], %453 {strides = array<i32>} : memref<8x32xf32, #tpu.memory_space<vmem>>, vector<8x32xf32>,
    %c0_268 = arith.constant 0 : index
    %c0_269 = arith.constant 0 : index
    %455 = vector.load %arg30[%c0_268, %c0_269] : memref<8x32xf32, #tpu.memory_space<vmem>>, vector<8x32xf32>
    tpu.vector_store %arg30[%c0_268, %c0_269], %451 {strides = array<i32>} : memref<8x32xf32, #tpu.memory_space<vmem>>, vector<8x32xf32>,
    %c16_270 = arith.constant 16 : index
    %c0_271 = arith.constant 0 : index
    %456 = vector.load %arg25[%c16_270, %c0_271] : memref<64x32xf32, #tpu.memory_space<vmem>>, vector<8x32xf32>
    tpu.vector_store %arg25[%c16_270, %c0_271], %453 {strides = array<i32>} : memref<64x32xf32, #tpu.memory_space<vmem>>, vector<8x32xf32>,
    %c24_272 = arith.constant 24 : index
    %c0_273 = arith.constant 0 : index
    %457 = vector.load %arg27[%c24_272, %c0_273] : memref<64x128xf32, #tpu.memory_space<vmem>>, vector<8x128xf32>
    %c0_274 = arith.constant 0 : index
    %c0_275 = arith.constant 0 : index
    %458 = vector.load %arg29[%c0_274, %c0_275] : memref<8x32xf32, #tpu.memory_space<vmem>>, vector<8x32xf32>
    %cst_276 = arith.constant dense<0.000000e+00> : vector<8x128xf32>
    %459 = tpu.matmul %458, %339, %cst_276 {dimension_numbers = #tpu.dot_dimension_numbers<[1], [0], [0], [1], [0, 0, 1, 1], [], []>} : vector<8x32xf32>, vector<32x128xf32>, vector<8x128xf32> -> vector<8x128xf32>
    %460 = arith.addf %457, %459 : vector<8x128xf32>
    %461 = vector.extract_strided_slice %460 {offsets = [0, 0], sizes = [8, 32], strides = [1, 1]} : vector<8x128xf32> to vector<8x32xf32>
    %cst_277 = arith.constant 0.000000e+00 : f32
    %462 = vector.broadcast %cst_277 : f32 to vector<8x32xf32>
    %463 = arith.subf %462, %461 : vector<8x32xf32>
    %464 = math.exp %463 : vector<8x32xf32>
    %cst_278 = arith.constant 1.000000e+00 : f32
    %465 = vector.broadcast %cst_278 : f32 to vector<8x32xf32>
    %466 = arith.addf %465, %464 : vector<8x32xf32>
    %cst_279 = arith.constant 1.000000e+00 : f32
    %467 = vector.broadcast %cst_279 : f32 to vector<8x32xf32>
    %468 = arith.divf %467, %466 : vector<8x32xf32>
    %469 = vector.extract_strided_slice %460 {offsets = [0, 32], sizes = [8, 32], strides = [1, 1]} : vector<8x128xf32> to vector<8x32xf32>
    %cst_280 = arith.constant 0.000000e+00 : f32
    %470 = vector.broadcast %cst_280 : f32 to vector<8x32xf32>
    %471 = arith.subf %470, %469 : vector<8x32xf32>
    %472 = math.exp %471 : vector<8x32xf32>
    %cst_281 = arith.constant 1.000000e+00 : f32
    %473 = vector.broadcast %cst_281 : f32 to vector<8x32xf32>
    %474 = arith.addf %473, %472 : vector<8x32xf32>
    %cst_282 = arith.constant 1.000000e+00 : f32
    %475 = vector.broadcast %cst_282 : f32 to vector<8x32xf32>
    %476 = arith.divf %475, %474 : vector<8x32xf32>
    %477 = vector.extract_strided_slice %460 {offsets = [0, 64], sizes = [8, 32], strides = [1, 1]} : vector<8x128xf32> to vector<8x32xf32>
    %478 = math.tanh %477 : vector<8x32xf32>
    %479 = vector.extract_strided_slice %460 {offsets = [0, 96], sizes = [8, 32], strides = [1, 1]} : vector<8x128xf32> to vector<8x32xf32>
    %cst_283 = arith.constant 0.000000e+00 : f32
    %480 = vector.broadcast %cst_283 : f32 to vector<8x32xf32>
    %481 = arith.subf %480, %479 : vector<8x32xf32>
    %482 = math.exp %481 : vector<8x32xf32>
    %cst_284 = arith.constant 1.000000e+00 : f32
    %483 = vector.broadcast %cst_284 : f32 to vector<8x32xf32>
    %484 = arith.addf %483, %482 : vector<8x32xf32>
    %cst_285 = arith.constant 1.000000e+00 : f32
    %485 = vector.broadcast %cst_285 : f32 to vector<8x32xf32>
    %486 = arith.divf %485, %484 : vector<8x32xf32>
    %c0_286 = arith.constant 0 : index
    %c0_287 = arith.constant 0 : index
    %487 = vector.load %arg30[%c0_286, %c0_287] : memref<8x32xf32, #tpu.memory_space<vmem>>, vector<8x32xf32>
    %488 = arith.mulf %476, %487 : vector<8x32xf32>
    %489 = arith.mulf %468, %478 : vector<8x32xf32>
    %490 = arith.addf %488, %489 : vector<8x32xf32>
    %491 = math.tanh %490 : vector<8x32xf32>
    %492 = arith.mulf %486, %491 : vector<8x32xf32>
    %c0_288 = arith.constant 0 : index
    %c0_289 = arith.constant 0 : index
    %493 = vector.load %arg29[%c0_288, %c0_289] : memref<8x32xf32, #tpu.memory_space<vmem>>, vector<8x32xf32>
    tpu.vector_store %arg29[%c0_288, %c0_289], %492 {strides = array<i32>} : memref<8x32xf32, #tpu.memory_space<vmem>>, vector<8x32xf32>,
    %c0_290 = arith.constant 0 : index
    %c0_291 = arith.constant 0 : index
    %494 = vector.load %arg30[%c0_290, %c0_291] : memref<8x32xf32, #tpu.memory_space<vmem>>, vector<8x32xf32>
    tpu.vector_store %arg30[%c0_290, %c0_291], %490 {strides = array<i32>} : memref<8x32xf32, #tpu.memory_space<vmem>>, vector<8x32xf32>,
    %c24_292 = arith.constant 24 : index
    %c0_293 = arith.constant 0 : index
    %495 = vector.load %arg25[%c24_292, %c0_293] : memref<64x32xf32, #tpu.memory_space<vmem>>, vector<8x32xf32>
    tpu.vector_store %arg25[%c24_292, %c0_293], %492 {strides = array<i32>} : memref<64x32xf32, #tpu.memory_space<vmem>>, vector<8x32xf32>,
    %c32_294 = arith.constant 32 : index
    %c0_295 = arith.constant 0 : index
    %496 = vector.load %arg27[%c32_294, %c0_295] : memref<64x128xf32, #tpu.memory_space<vmem>>, vector<8x128xf32>
    %c0_296 = arith.constant 0 : index
    %c0_297 = arith.constant 0 : index
    %497 = vector.load %arg29[%c0_296, %c0_297] : memref<8x32xf32, #tpu.memory_space<vmem>>, vector<8x32xf32>
    %cst_298 = arith.constant dense<0.000000e+00> : vector<8x128xf32>
    %498 = tpu.matmul %497, %339, %cst_298 {dimension_numbers = #tpu.dot_dimension_numbers<[1], [0], [0], [1], [0, 0, 1, 1], [], []>} : vector<8x32xf32>, vector<32x128xf32>, vector<8x128xf32> -> vector<8x128xf32>
    %499 = arith.addf %496, %498 : vector<8x128xf32>
    %500 = vector.extract_strided_slice %499 {offsets = [0, 0], sizes = [8, 32], strides = [1, 1]} : vector<8x128xf32> to vector<8x32xf32>
    %cst_299 = arith.constant 0.000000e+00 : f32
    %501 = vector.broadcast %cst_299 : f32 to vector<8x32xf32>
    %502 = arith.subf %501, %500 : vector<8x32xf32>
    %503 = math.exp %502 : vector<8x32xf32>
    %cst_300 = arith.constant 1.000000e+00 : f32
    %504 = vector.broadcast %cst_300 : f32 to vector<8x32xf32>
    %505 = arith.addf %504, %503 : vector<8x32xf32>
    %cst_301 = arith.constant 1.000000e+00 : f32
    %506 = vector.broadcast %cst_301 : f32 to vector<8x32xf32>
    %507 = arith.divf %506, %505 : vector<8x32xf32>
    %508 = vector.extract_strided_slice %499 {offsets = [0, 32], sizes = [8, 32], strides = [1, 1]} : vector<8x128xf32> to vector<8x32xf32>
    %cst_302 = arith.constant 0.000000e+00 : f32
    %509 = vector.broadcast %cst_302 : f32 to vector<8x32xf32>
    %510 = arith.subf %509, %508 : vector<8x32xf32>
    %511 = math.exp %510 : vector<8x32xf32>
    %cst_303 = arith.constant 1.000000e+00 : f32
    %512 = vector.broadcast %cst_303 : f32 to vector<8x32xf32>
    %513 = arith.addf %512, %511 : vector<8x32xf32>
    %cst_304 = arith.constant 1.000000e+00 : f32
    %514 = vector.broadcast %cst_304 : f32 to vector<8x32xf32>
    %515 = arith.divf %514, %513 : vector<8x32xf32>
    %516 = vector.extract_strided_slice %499 {offsets = [0, 64], sizes = [8, 32], strides = [1, 1]} : vector<8x128xf32> to vector<8x32xf32>
    %517 = math.tanh %516 : vector<8x32xf32>
    %518 = vector.extract_strided_slice %499 {offsets = [0, 96], sizes = [8, 32], strides = [1, 1]} : vector<8x128xf32> to vector<8x32xf32>
    %cst_305 = arith.constant 0.000000e+00 : f32
    %519 = vector.broadcast %cst_305 : f32 to vector<8x32xf32>
    %520 = arith.subf %519, %518 : vector<8x32xf32>
    %521 = math.exp %520 : vector<8x32xf32>
    %cst_306 = arith.constant 1.000000e+00 : f32
    %522 = vector.broadcast %cst_306 : f32 to vector<8x32xf32>
    %523 = arith.addf %522, %521 : vector<8x32xf32>
    %cst_307 = arith.constant 1.000000e+00 : f32
    %524 = vector.broadcast %cst_307 : f32 to vector<8x32xf32>
    %525 = arith.divf %524, %523 : vector<8x32xf32>
    %c0_308 = arith.constant 0 : index
    %c0_309 = arith.constant 0 : index
    %526 = vector.load %arg30[%c0_308, %c0_309] : memref<8x32xf32, #tpu.memory_space<vmem>>, vector<8x32xf32>
    %527 = arith.mulf %515, %526 : vector<8x32xf32>
    %528 = arith.mulf %507, %517 : vector<8x32xf32>
    %529 = arith.addf %527, %528 : vector<8x32xf32>
    %530 = math.tanh %529 : vector<8x32xf32>
    %531 = arith.mulf %525, %530 : vector<8x32xf32>
    %c0_310 = arith.constant 0 : index
    %c0_311 = arith.constant 0 : index
    %532 = vector.load %arg29[%c0_310, %c0_311] : memref<8x32xf32, #tpu.memory_space<vmem>>, vector<8x32xf32>
    tpu.vector_store %arg29[%c0_310, %c0_311], %531 {strides = array<i32>} : memref<8x32xf32, #tpu.memory_space<vmem>>, vector<8x32xf32>,
    %c0_312 = arith.constant 0 : index
    %c0_313 = arith.constant 0 : index
    %533 = vector.load %arg30[%c0_312, %c0_313] : memref<8x32xf32, #tpu.memory_space<vmem>>, vector<8x32xf32>
    tpu.vector_store %arg30[%c0_312, %c0_313], %529 {strides = array<i32>} : memref<8x32xf32, #tpu.memory_space<vmem>>, vector<8x32xf32>,
    %c32_314 = arith.constant 32 : index
    %c0_315 = arith.constant 0 : index
    %534 = vector.load %arg25[%c32_314, %c0_315] : memref<64x32xf32, #tpu.memory_space<vmem>>, vector<8x32xf32>
    tpu.vector_store %arg25[%c32_314, %c0_315], %531 {strides = array<i32>} : memref<64x32xf32, #tpu.memory_space<vmem>>, vector<8x32xf32>,
    %c40_316 = arith.constant 40 : index
    %c0_317 = arith.constant 0 : index
    %535 = vector.load %arg27[%c40_316, %c0_317] : memref<64x128xf32, #tpu.memory_space<vmem>>, vector<8x128xf32>
    %c0_318 = arith.constant 0 : index
    %c0_319 = arith.constant 0 : index
    %536 = vector.load %arg29[%c0_318, %c0_319] : memref<8x32xf32, #tpu.memory_space<vmem>>, vector<8x32xf32>
    %cst_320 = arith.constant dense<0.000000e+00> : vector<8x128xf32>
    %537 = tpu.matmul %536, %339, %cst_320 {dimension_numbers = #tpu.dot_dimension_numbers<[1], [0], [0], [1], [0, 0, 1, 1], [], []>} : vector<8x32xf32>, vector<32x128xf32>, vector<8x128xf32> -> vector<8x128xf32>
    %538 = arith.addf %535, %537 : vector<8x128xf32>
    %539 = vector.extract_strided_slice %538 {offsets = [0, 0], sizes = [8, 32], strides = [1, 1]} : vector<8x128xf32> to vector<8x32xf32>
    %cst_321 = arith.constant 0.000000e+00 : f32
    %540 = vector.broadcast %cst_321 : f32 to vector<8x32xf32>
    %541 = arith.subf %540, %539 : vector<8x32xf32>
    %542 = math.exp %541 : vector<8x32xf32>
    %cst_322 = arith.constant 1.000000e+00 : f32
    %543 = vector.broadcast %cst_322 : f32 to vector<8x32xf32>
    %544 = arith.addf %543, %542 : vector<8x32xf32>
    %cst_323 = arith.constant 1.000000e+00 : f32
    %545 = vector.broadcast %cst_323 : f32 to vector<8x32xf32>
    %546 = arith.divf %545, %544 : vector<8x32xf32>
    %547 = vector.extract_strided_slice %538 {offsets = [0, 32], sizes = [8, 32], strides = [1, 1]} : vector<8x128xf32> to vector<8x32xf32>
    %cst_324 = arith.constant 0.000000e+00 : f32
    %548 = vector.broadcast %cst_324 : f32 to vector<8x32xf32>
    %549 = arith.subf %548, %547 : vector<8x32xf32>
    %550 = math.exp %549 : vector<8x32xf32>
    %cst_325 = arith.constant 1.000000e+00 : f32
    %551 = vector.broadcast %cst_325 : f32 to vector<8x32xf32>
    %552 = arith.addf %551, %550 : vector<8x32xf32>
    %cst_326 = arith.constant 1.000000e+00 : f32
    %553 = vector.broadcast %cst_326 : f32 to vector<8x32xf32>
    %554 = arith.divf %553, %552 : vector<8x32xf32>
    %555 = vector.extract_strided_slice %538 {offsets = [0, 64], sizes = [8, 32], strides = [1, 1]} : vector<8x128xf32> to vector<8x32xf32>
    %556 = math.tanh %555 : vector<8x32xf32>
    %557 = vector.extract_strided_slice %538 {offsets = [0, 96], sizes = [8, 32], strides = [1, 1]} : vector<8x128xf32> to vector<8x32xf32>
    %cst_327 = arith.constant 0.000000e+00 : f32
    %558 = vector.broadcast %cst_327 : f32 to vector<8x32xf32>
    %559 = arith.subf %558, %557 : vector<8x32xf32>
    %560 = math.exp %559 : vector<8x32xf32>
    %cst_328 = arith.constant 1.000000e+00 : f32
    %561 = vector.broadcast %cst_328 : f32 to vector<8x32xf32>
    %562 = arith.addf %561, %560 : vector<8x32xf32>
    %cst_329 = arith.constant 1.000000e+00 : f32
    %563 = vector.broadcast %cst_329 : f32 to vector<8x32xf32>
    %564 = arith.divf %563, %562 : vector<8x32xf32>
    %c0_330 = arith.constant 0 : index
    %c0_331 = arith.constant 0 : index
    %565 = vector.load %arg30[%c0_330, %c0_331] : memref<8x32xf32, #tpu.memory_space<vmem>>, vector<8x32xf32>
    %566 = arith.mulf %554, %565 : vector<8x32xf32>
    %567 = arith.mulf %546, %556 : vector<8x32xf32>
    %568 = arith.addf %566, %567 : vector<8x32xf32>
    %569 = math.tanh %568 : vector<8x32xf32>
    %570 = arith.mulf %564, %569 : vector<8x32xf32>
    %c0_332 = arith.constant 0 : index
    %c0_333 = arith.constant 0 : index
    %571 = vector.load %arg29[%c0_332, %c0_333] : memref<8x32xf32, #tpu.memory_space<vmem>>, vector<8x32xf32>
    tpu.vector_store %arg29[%c0_332, %c0_333], %570 {strides = array<i32>} : memref<8x32xf32, #tpu.memory_space<vmem>>, vector<8x32xf32>,
    %c0_334 = arith.constant 0 : index
    %c0_335 = arith.constant 0 : index
    %572 = vector.load %arg30[%c0_334, %c0_335] : memref<8x32xf32, #tpu.memory_space<vmem>>, vector<8x32xf32>
    tpu.vector_store %arg30[%c0_334, %c0_335], %568 {strides = array<i32>} : memref<8x32xf32, #tpu.memory_space<vmem>>, vector<8x32xf32>,
    %c40_336 = arith.constant 40 : index
    %c0_337 = arith.constant 0 : index
    %573 = vector.load %arg25[%c40_336, %c0_337] : memref<64x32xf32, #tpu.memory_space<vmem>>, vector<8x32xf32>
    tpu.vector_store %arg25[%c40_336, %c0_337], %570 {strides = array<i32>} : memref<64x32xf32, #tpu.memory_space<vmem>>, vector<8x32xf32>,
    %c48_338 = arith.constant 48 : index
    %c0_339 = arith.constant 0 : index
    %574 = vector.load %arg27[%c48_338, %c0_339] : memref<64x128xf32, #tpu.memory_space<vmem>>, vector<8x128xf32>
    %c0_340 = arith.constant 0 : index
    %c0_341 = arith.constant 0 : index
    %575 = vector.load %arg29[%c0_340, %c0_341] : memref<8x32xf32, #tpu.memory_space<vmem>>, vector<8x32xf32>
    %cst_342 = arith.constant dense<0.000000e+00> : vector<8x128xf32>
    %576 = tpu.matmul %575, %339, %cst_342 {dimension_numbers = #tpu.dot_dimension_numbers<[1], [0], [0], [1], [0, 0, 1, 1], [], []>} : vector<8x32xf32>, vector<32x128xf32>, vector<8x128xf32> -> vector<8x128xf32>
    %577 = arith.addf %574, %576 : vector<8x128xf32>
    %578 = vector.extract_strided_slice %577 {offsets = [0, 0], sizes = [8, 32], strides = [1, 1]} : vector<8x128xf32> to vector<8x32xf32>
    %cst_343 = arith.constant 0.000000e+00 : f32
    %579 = vector.broadcast %cst_343 : f32 to vector<8x32xf32>
    %580 = arith.subf %579, %578 : vector<8x32xf32>
    %581 = math.exp %580 : vector<8x32xf32>
    %cst_344 = arith.constant 1.000000e+00 : f32
    %582 = vector.broadcast %cst_344 : f32 to vector<8x32xf32>
    %583 = arith.addf %582, %581 : vector<8x32xf32>
    %cst_345 = arith.constant 1.000000e+00 : f32
    %584 = vector.broadcast %cst_345 : f32 to vector<8x32xf32>
    %585 = arith.divf %584, %583 : vector<8x32xf32>
    %586 = vector.extract_strided_slice %577 {offsets = [0, 32], sizes = [8, 32], strides = [1, 1]} : vector<8x128xf32> to vector<8x32xf32>
    %cst_346 = arith.constant 0.000000e+00 : f32
    %587 = vector.broadcast %cst_346 : f32 to vector<8x32xf32>
    %588 = arith.subf %587, %586 : vector<8x32xf32>
    %589 = math.exp %588 : vector<8x32xf32>
    %cst_347 = arith.constant 1.000000e+00 : f32
    %590 = vector.broadcast %cst_347 : f32 to vector<8x32xf32>
    %591 = arith.addf %590, %589 : vector<8x32xf32>
    %cst_348 = arith.constant 1.000000e+00 : f32
    %592 = vector.broadcast %cst_348 : f32 to vector<8x32xf32>
    %593 = arith.divf %592, %591 : vector<8x32xf32>
    %594 = vector.extract_strided_slice %577 {offsets = [0, 64], sizes = [8, 32], strides = [1, 1]} : vector<8x128xf32> to vector<8x32xf32>
    %595 = math.tanh %594 : vector<8x32xf32>
    %596 = vector.extract_strided_slice %577 {offsets = [0, 96], sizes = [8, 32], strides = [1, 1]} : vector<8x128xf32> to vector<8x32xf32>
    %cst_349 = arith.constant 0.000000e+00 : f32
    %597 = vector.broadcast %cst_349 : f32 to vector<8x32xf32>
    %598 = arith.subf %597, %596 : vector<8x32xf32>
    %599 = math.exp %598 : vector<8x32xf32>
    %cst_350 = arith.constant 1.000000e+00 : f32
    %600 = vector.broadcast %cst_350 : f32 to vector<8x32xf32>
    %601 = arith.addf %600, %599 : vector<8x32xf32>
    %cst_351 = arith.constant 1.000000e+00 : f32
    %602 = vector.broadcast %cst_351 : f32 to vector<8x32xf32>
    %603 = arith.divf %602, %601 : vector<8x32xf32>
    %c0_352 = arith.constant 0 : index
    %c0_353 = arith.constant 0 : index
    %604 = vector.load %arg30[%c0_352, %c0_353] : memref<8x32xf32, #tpu.memory_space<vmem>>, vector<8x32xf32>
    %605 = arith.mulf %593, %604 : vector<8x32xf32>
    %606 = arith.mulf %585, %595 : vector<8x32xf32>
    %607 = arith.addf %605, %606 : vector<8x32xf32>
    %608 = math.tanh %607 : vector<8x32xf32>
    %609 = arith.mulf %603, %608 : vector<8x32xf32>
    %c0_354 = arith.constant 0 : index
    %c0_355 = arith.constant 0 : index
    %610 = vector.load %arg29[%c0_354, %c0_355] : memref<8x32xf32, #tpu.memory_space<vmem>>, vector<8x32xf32>
    tpu.vector_store %arg29[%c0_354, %c0_355], %609 {strides = array<i32>} : memref<8x32xf32, #tpu.memory_space<vmem>>, vector<8x32xf32>,
    %c0_356 = arith.constant 0 : index
    %c0_357 = arith.constant 0 : index
    %611 = vector.load %arg30[%c0_356, %c0_357] : memref<8x32xf32, #tpu.memory_space<vmem>>, vector<8x32xf32>
    tpu.vector_store %arg30[%c0_356, %c0_357], %607 {strides = array<i32>} : memref<8x32xf32, #tpu.memory_space<vmem>>, vector<8x32xf32>,
    %c48_358 = arith.constant 48 : index
    %c0_359 = arith.constant 0 : index
    %612 = vector.load %arg25[%c48_358, %c0_359] : memref<64x32xf32, #tpu.memory_space<vmem>>, vector<8x32xf32>
    tpu.vector_store %arg25[%c48_358, %c0_359], %609 {strides = array<i32>} : memref<64x32xf32, #tpu.memory_space<vmem>>, vector<8x32xf32>,
    %c56_360 = arith.constant 56 : index
    %c0_361 = arith.constant 0 : index
    %613 = vector.load %arg27[%c56_360, %c0_361] : memref<64x128xf32, #tpu.memory_space<vmem>>, vector<8x128xf32>
    %c0_362 = arith.constant 0 : index
    %c0_363 = arith.constant 0 : index
    %614 = vector.load %arg29[%c0_362, %c0_363] : memref<8x32xf32, #tpu.memory_space<vmem>>, vector<8x32xf32>
    %cst_364 = arith.constant dense<0.000000e+00> : vector<8x128xf32>
    %615 = tpu.matmul %614, %339, %cst_364 {dimension_numbers = #tpu.dot_dimension_numbers<[1], [0], [0], [1], [0, 0, 1, 1], [], []>} : vector<8x32xf32>, vector<32x128xf32>, vector<8x128xf32> -> vector<8x128xf32>
    %616 = arith.addf %613, %615 : vector<8x128xf32>
    %617 = vector.extract_strided_slice %616 {offsets = [0, 0], sizes = [8, 32], strides = [1, 1]} : vector<8x128xf32> to vector<8x32xf32>
    %cst_365 = arith.constant 0.000000e+00 : f32
    %618 = vector.broadcast %cst_365 : f32 to vector<8x32xf32>
    %619 = arith.subf %618, %617 : vector<8x32xf32>
    %620 = math.exp %619 : vector<8x32xf32>
    %cst_366 = arith.constant 1.000000e+00 : f32
    %621 = vector.broadcast %cst_366 : f32 to vector<8x32xf32>
    %622 = arith.addf %621, %620 : vector<8x32xf32>
    %cst_367 = arith.constant 1.000000e+00 : f32
    %623 = vector.broadcast %cst_367 : f32 to vector<8x32xf32>
    %624 = arith.divf %623, %622 : vector<8x32xf32>
    %625 = vector.extract_strided_slice %616 {offsets = [0, 32], sizes = [8, 32], strides = [1, 1]} : vector<8x128xf32> to vector<8x32xf32>
    %cst_368 = arith.constant 0.000000e+00 : f32
    %626 = vector.broadcast %cst_368 : f32 to vector<8x32xf32>
    %627 = arith.subf %626, %625 : vector<8x32xf32>
    %628 = math.exp %627 : vector<8x32xf32>
    %cst_369 = arith.constant 1.000000e+00 : f32
    %629 = vector.broadcast %cst_369 : f32 to vector<8x32xf32>
    %630 = arith.addf %629, %628 : vector<8x32xf32>
    %cst_370 = arith.constant 1.000000e+00 : f32
    %631 = vector.broadcast %cst_370 : f32 to vector<8x32xf32>
    %632 = arith.divf %631, %630 : vector<8x32xf32>
    %633 = vector.extract_strided_slice %616 {offsets = [0, 64], sizes = [8, 32], strides = [1, 1]} : vector<8x128xf32> to vector<8x32xf32>
    %634 = math.tanh %633 : vector<8x32xf32>
    %635 = vector.extract_strided_slice %616 {offsets = [0, 96], sizes = [8, 32], strides = [1, 1]} : vector<8x128xf32> to vector<8x32xf32>
    %cst_371 = arith.constant 0.000000e+00 : f32
    %636 = vector.broadcast %cst_371 : f32 to vector<8x32xf32>
    %637 = arith.subf %636, %635 : vector<8x32xf32>
    %638 = math.exp %637 : vector<8x32xf32>
    %cst_372 = arith.constant 1.000000e+00 : f32
    %639 = vector.broadcast %cst_372 : f32 to vector<8x32xf32>
    %640 = arith.addf %639, %638 : vector<8x32xf32>
    %cst_373 = arith.constant 1.000000e+00 : f32
    %641 = vector.broadcast %cst_373 : f32 to vector<8x32xf32>
    %642 = arith.divf %641, %640 : vector<8x32xf32>
    %c0_374 = arith.constant 0 : index
    %c0_375 = arith.constant 0 : index
    %643 = vector.load %arg30[%c0_374, %c0_375] : memref<8x32xf32, #tpu.memory_space<vmem>>, vector<8x32xf32>
    %644 = arith.mulf %632, %643 : vector<8x32xf32>
    %645 = arith.mulf %624, %634 : vector<8x32xf32>
    %646 = arith.addf %644, %645 : vector<8x32xf32>
    %647 = math.tanh %646 : vector<8x32xf32>
    %648 = arith.mulf %642, %647 : vector<8x32xf32>
    %c0_376 = arith.constant 0 : index
    %c0_377 = arith.constant 0 : index
    %649 = vector.load %arg29[%c0_376, %c0_377] : memref<8x32xf32, #tpu.memory_space<vmem>>, vector<8x32xf32>
    tpu.vector_store %arg29[%c0_376, %c0_377], %648 {strides = array<i32>} : memref<8x32xf32, #tpu.memory_space<vmem>>, vector<8x32xf32>,
    %c0_378 = arith.constant 0 : index
    %c0_379 = arith.constant 0 : index
    %650 = vector.load %arg30[%c0_378, %c0_379] : memref<8x32xf32, #tpu.memory_space<vmem>>, vector<8x32xf32>
    tpu.vector_store %arg30[%c0_378, %c0_379], %646 {strides = array<i32>} : memref<8x32xf32, #tpu.memory_space<vmem>>, vector<8x32xf32>,
    %c56_380 = arith.constant 56 : index
    %c0_381 = arith.constant 0 : index
    %651 = vector.load %arg25[%c56_380, %c0_381] : memref<64x32xf32, #tpu.memory_space<vmem>>, vector<8x32xf32>
    tpu.vector_store %arg25[%c56_380, %c0_381], %648 {strides = array<i32>} : memref<64x32xf32, #tpu.memory_space<vmem>>, vector<8x32xf32>,
    %c0_382 = arith.constant 0 : index
    %c0_383 = arith.constant 0 : index
    %652 = vector.load %arg29[%c0_382, %c0_383] : memref<8x32xf32, #tpu.memory_space<vmem>>, vector<8x32xf32>
    %c0_384 = arith.constant 0 : index
    %c0_385 = arith.constant 0 : index
    %653 = vector.load %arg30[%c0_384, %c0_385] : memref<8x32xf32, #tpu.memory_space<vmem>>, vector<8x32xf32>
    %c0_386 = arith.constant 0 : index
    %c0_387 = arith.constant 0 : index
    %654 = vector.load %arg25[%c0_386, %c0_387] : memref<64x32xf32, #tpu.memory_space<vmem>>, vector<64x32xf32>
    %c0_388 = arith.constant 0 : index
    %c0_389 = arith.constant 0 : index
    %655 = vector.load %arg7[%c0_388, %c0_389] : memref<32x128xf32, #tpu.memory_space<vmem>>, vector<32x128xf32>
    %cst_390 = arith.constant dense<0.000000e+00> : vector<64x128xf32>
    %656 = tpu.matmul %654, %655, %cst_390 {dimension_numbers = #tpu.dot_dimension_numbers<[1], [0], [0], [1], [0, 0, 1, 1], [], []>} : vector<64x32xf32>, vector<32x128xf32>, vector<64x128xf32> -> vector<64x128xf32>
    %c0_391 = arith.constant 0 : index
    %c0_392 = arith.constant 0 : index
    %657 = vector.load %arg9[%c0_391, %c0_392] : memref<1x128xf32, #tpu.memory_space<vmem>>, vector<1x128xf32>
    %658 = vector.broadcast %657 : vector<1x128xf32> to vector<64x128xf32>
    %659 = arith.addf %656, %658 : vector<64x128xf32>
    %c0_393 = arith.constant 0 : index
    %c0_394 = arith.constant 0 : index
    %660 = vector.load %arg27[%c0_393, %c0_394] : memref<64x128xf32, #tpu.memory_space<vmem>>, vector<64x128xf32>
    tpu.vector_store %arg27[%c0_393, %c0_394], %659 {strides = array<i32>} : memref<64x128xf32, #tpu.memory_space<vmem>>, vector<64x128xf32>,
    %cst_395 = arith.constant 0.000000e+00 : f32
    %661 = vector.broadcast %cst_395 : f32 to vector<8x32xf32>
    %c0_396 = arith.constant 0 : index
    %c0_397 = arith.constant 0 : index
    %662 = vector.load %arg29[%c0_396, %c0_397] : memref<8x32xf32, #tpu.memory_space<vmem>>, vector<8x32xf32>
    tpu.vector_store %arg29[%c0_396, %c0_397], %661 {strides = array<i32>} : memref<8x32xf32, #tpu.memory_space<vmem>>, vector<8x32xf32>,
    %cst_398 = arith.constant 0.000000e+00 : f32
    %663 = vector.broadcast %cst_398 : f32 to vector<8x32xf32>
    %c0_399 = arith.constant 0 : index
    %c0_400 = arith.constant 0 : index
    %664 = vector.load %arg30[%c0_399, %c0_400] : memref<8x32xf32, #tpu.memory_space<vmem>>, vector<8x32xf32>
    tpu.vector_store %arg30[%c0_399, %c0_400], %663 {strides = array<i32>} : memref<8x32xf32, #tpu.memory_space<vmem>>, vector<8x32xf32>,
    %c0_401 = arith.constant 0 : index
    %c0_402 = arith.constant 0 : index
    %665 = vector.load %arg8[%c0_401, %c0_402] : memref<32x128xf32, #tpu.memory_space<vmem>>, vector<32x128xf32>
    %c0_403 = arith.constant 0 : index
    %c0_404 = arith.constant 0 : index
    %666 = vector.load %arg27[%c0_403, %c0_404] : memref<64x128xf32, #tpu.memory_space<vmem>>, vector<8x128xf32>
    %c0_405 = arith.constant 0 : index
    %c0_406 = arith.constant 0 : index
    %667 = vector.load %arg29[%c0_405, %c0_406] : memref<8x32xf32, #tpu.memory_space<vmem>>, vector<8x32xf32>
    %cst_407 = arith.constant dense<0.000000e+00> : vector<8x128xf32>
    %668 = tpu.matmul %667, %665, %cst_407 {dimension_numbers = #tpu.dot_dimension_numbers<[1], [0], [0], [1], [0, 0, 1, 1], [], []>} : vector<8x32xf32>, vector<32x128xf32>, vector<8x128xf32> -> vector<8x128xf32>
    %669 = arith.addf %666, %668 : vector<8x128xf32>
    %670 = vector.extract_strided_slice %669 {offsets = [0, 0], sizes = [8, 32], strides = [1, 1]} : vector<8x128xf32> to vector<8x32xf32>
    %cst_408 = arith.constant 0.000000e+00 : f32
    %671 = vector.broadcast %cst_408 : f32 to vector<8x32xf32>
    %672 = arith.subf %671, %670 : vector<8x32xf32>
    %673 = math.exp %672 : vector<8x32xf32>
    %cst_409 = arith.constant 1.000000e+00 : f32
    %674 = vector.broadcast %cst_409 : f32 to vector<8x32xf32>
    %675 = arith.addf %674, %673 : vector<8x32xf32>
    %cst_410 = arith.constant 1.000000e+00 : f32
    %676 = vector.broadcast %cst_410 : f32 to vector<8x32xf32>
    %677 = arith.divf %676, %675 : vector<8x32xf32>
    %678 = vector.extract_strided_slice %669 {offsets = [0, 32], sizes = [8, 32], strides = [1, 1]} : vector<8x128xf32> to vector<8x32xf32>
    %cst_411 = arith.constant 0.000000e+00 : f32
    %679 = vector.broadcast %cst_411 : f32 to vector<8x32xf32>
    %680 = arith.subf %679, %678 : vector<8x32xf32>
    %681 = math.exp %680 : vector<8x32xf32>
    %cst_412 = arith.constant 1.000000e+00 : f32
    %682 = vector.broadcast %cst_412 : f32 to vector<8x32xf32>
    %683 = arith.addf %682, %681 : vector<8x32xf32>
    %cst_413 = arith.constant 1.000000e+00 : f32
    %684 = vector.broadcast %cst_413 : f32 to vector<8x32xf32>
    %685 = arith.divf %684, %683 : vector<8x32xf32>
    %686 = vector.extract_strided_slice %669 {offsets = [0, 64], sizes = [8, 32], strides = [1, 1]} : vector<8x128xf32> to vector<8x32xf32>
    %687 = math.tanh %686 : vector<8x32xf32>
    %688 = vector.extract_strided_slice %669 {offsets = [0, 96], sizes = [8, 32], strides = [1, 1]} : vector<8x128xf32> to vector<8x32xf32>
    %cst_414 = arith.constant 0.000000e+00 : f32
    %689 = vector.broadcast %cst_414 : f32 to vector<8x32xf32>
    %690 = arith.subf %689, %688 : vector<8x32xf32>
    %691 = math.exp %690 : vector<8x32xf32>
    %cst_415 = arith.constant 1.000000e+00 : f32
    %692 = vector.broadcast %cst_415 : f32 to vector<8x32xf32>
    %693 = arith.addf %692, %691 : vector<8x32xf32>
    %cst_416 = arith.constant 1.000000e+00 : f32
    %694 = vector.broadcast %cst_416 : f32 to vector<8x32xf32>
    %695 = arith.divf %694, %693 : vector<8x32xf32>
    %c0_417 = arith.constant 0 : index
    %c0_418 = arith.constant 0 : index
    %696 = vector.load %arg30[%c0_417, %c0_418] : memref<8x32xf32, #tpu.memory_space<vmem>>, vector<8x32xf32>
    %697 = arith.mulf %685, %696 : vector<8x32xf32>
    %698 = arith.mulf %677, %687 : vector<8x32xf32>
    %699 = arith.addf %697, %698 : vector<8x32xf32>
    %700 = math.tanh %699 : vector<8x32xf32>
    %701 = arith.mulf %695, %700 : vector<8x32xf32>
    %c0_419 = arith.constant 0 : index
    %c0_420 = arith.constant 0 : index
    %702 = vector.load %arg29[%c0_419, %c0_420] : memref<8x32xf32, #tpu.memory_space<vmem>>, vector<8x32xf32>
    tpu.vector_store %arg29[%c0_419, %c0_420], %701 {strides = array<i32>} : memref<8x32xf32, #tpu.memory_space<vmem>>, vector<8x32xf32>,
    %c0_421 = arith.constant 0 : index
    %c0_422 = arith.constant 0 : index
    %703 = vector.load %arg30[%c0_421, %c0_422] : memref<8x32xf32, #tpu.memory_space<vmem>>, vector<8x32xf32>
    tpu.vector_store %arg30[%c0_421, %c0_422], %699 {strides = array<i32>} : memref<8x32xf32, #tpu.memory_space<vmem>>, vector<8x32xf32>,
    %c0_423 = arith.constant 0 : index
    %c0_424 = arith.constant 0 : index
    %704 = vector.load %arg25[%c0_423, %c0_424] : memref<64x32xf32, #tpu.memory_space<vmem>>, vector<8x32xf32>
    tpu.vector_store %arg25[%c0_423, %c0_424], %701 {strides = array<i32>} : memref<64x32xf32, #tpu.memory_space<vmem>>, vector<8x32xf32>,
    %c8_425 = arith.constant 8 : index
    %c0_426 = arith.constant 0 : index
    %705 = vector.load %arg27[%c8_425, %c0_426] : memref<64x128xf32, #tpu.memory_space<vmem>>, vector<8x128xf32>
    %c0_427 = arith.constant 0 : index
    %c0_428 = arith.constant 0 : index
    %706 = vector.load %arg29[%c0_427, %c0_428] : memref<8x32xf32, #tpu.memory_space<vmem>>, vector<8x32xf32>
    %cst_429 = arith.constant dense<0.000000e+00> : vector<8x128xf32>
    %707 = tpu.matmul %706, %665, %cst_429 {dimension_numbers = #tpu.dot_dimension_numbers<[1], [0], [0], [1], [0, 0, 1, 1], [], []>} : vector<8x32xf32>, vector<32x128xf32>, vector<8x128xf32> -> vector<8x128xf32>
    %708 = arith.addf %705, %707 : vector<8x128xf32>
    %709 = vector.extract_strided_slice %708 {offsets = [0, 0], sizes = [8, 32], strides = [1, 1]} : vector<8x128xf32> to vector<8x32xf32>
    %cst_430 = arith.constant 0.000000e+00 : f32
    %710 = vector.broadcast %cst_430 : f32 to vector<8x32xf32>
    %711 = arith.subf %710, %709 : vector<8x32xf32>
    %712 = math.exp %711 : vector<8x32xf32>
    %cst_431 = arith.constant 1.000000e+00 : f32
    %713 = vector.broadcast %cst_431 : f32 to vector<8x32xf32>
    %714 = arith.addf %713, %712 : vector<8x32xf32>
    %cst_432 = arith.constant 1.000000e+00 : f32
    %715 = vector.broadcast %cst_432 : f32 to vector<8x32xf32>
    %716 = arith.divf %715, %714 : vector<8x32xf32>
    %717 = vector.extract_strided_slice %708 {offsets = [0, 32], sizes = [8, 32], strides = [1, 1]} : vector<8x128xf32> to vector<8x32xf32>
    %cst_433 = arith.constant 0.000000e+00 : f32
    %718 = vector.broadcast %cst_433 : f32 to vector<8x32xf32>
    %719 = arith.subf %718, %717 : vector<8x32xf32>
    %720 = math.exp %719 : vector<8x32xf32>
    %cst_434 = arith.constant 1.000000e+00 : f32
    %721 = vector.broadcast %cst_434 : f32 to vector<8x32xf32>
    %722 = arith.addf %721, %720 : vector<8x32xf32>
    %cst_435 = arith.constant 1.000000e+00 : f32
    %723 = vector.broadcast %cst_435 : f32 to vector<8x32xf32>
    %724 = arith.divf %723, %722 : vector<8x32xf32>
    %725 = vector.extract_strided_slice %708 {offsets = [0, 64], sizes = [8, 32], strides = [1, 1]} : vector<8x128xf32> to vector<8x32xf32>
    %726 = math.tanh %725 : vector<8x32xf32>
    %727 = vector.extract_strided_slice %708 {offsets = [0, 96], sizes = [8, 32], strides = [1, 1]} : vector<8x128xf32> to vector<8x32xf32>
    %cst_436 = arith.constant 0.000000e+00 : f32
    %728 = vector.broadcast %cst_436 : f32 to vector<8x32xf32>
    %729 = arith.subf %728, %727 : vector<8x32xf32>
    %730 = math.exp %729 : vector<8x32xf32>
    %cst_437 = arith.constant 1.000000e+00 : f32
    %731 = vector.broadcast %cst_437 : f32 to vector<8x32xf32>
    %732 = arith.addf %731, %730 : vector<8x32xf32>
    %cst_438 = arith.constant 1.000000e+00 : f32
    %733 = vector.broadcast %cst_438 : f32 to vector<8x32xf32>
    %734 = arith.divf %733, %732 : vector<8x32xf32>
    %c0_439 = arith.constant 0 : index
    %c0_440 = arith.constant 0 : index
    %735 = vector.load %arg30[%c0_439, %c0_440] : memref<8x32xf32, #tpu.memory_space<vmem>>, vector<8x32xf32>
    %736 = arith.mulf %724, %735 : vector<8x32xf32>
    %737 = arith.mulf %716, %726 : vector<8x32xf32>
    %738 = arith.addf %736, %737 : vector<8x32xf32>
    %739 = math.tanh %738 : vector<8x32xf32>
    %740 = arith.mulf %734, %739 : vector<8x32xf32>
    %c0_441 = arith.constant 0 : index
    %c0_442 = arith.constant 0 : index
    %741 = vector.load %arg29[%c0_441, %c0_442] : memref<8x32xf32, #tpu.memory_space<vmem>>, vector<8x32xf32>
    tpu.vector_store %arg29[%c0_441, %c0_442], %740 {strides = array<i32>} : memref<8x32xf32, #tpu.memory_space<vmem>>, vector<8x32xf32>,
    %c0_443 = arith.constant 0 : index
    %c0_444 = arith.constant 0 : index
    %742 = vector.load %arg30[%c0_443, %c0_444] : memref<8x32xf32, #tpu.memory_space<vmem>>, vector<8x32xf32>
    tpu.vector_store %arg30[%c0_443, %c0_444], %738 {strides = array<i32>} : memref<8x32xf32, #tpu.memory_space<vmem>>, vector<8x32xf32>,
    %c8_445 = arith.constant 8 : index
    %c0_446 = arith.constant 0 : index
    %743 = vector.load %arg25[%c8_445, %c0_446] : memref<64x32xf32, #tpu.memory_space<vmem>>, vector<8x32xf32>
    tpu.vector_store %arg25[%c8_445, %c0_446], %740 {strides = array<i32>} : memref<64x32xf32, #tpu.memory_space<vmem>>, vector<8x32xf32>,
    %c16_447 = arith.constant 16 : index
    %c0_448 = arith.constant 0 : index
    %744 = vector.load %arg27[%c16_447, %c0_448] : memref<64x128xf32, #tpu.memory_space<vmem>>, vector<8x128xf32>
    %c0_449 = arith.constant 0 : index
    %c0_450 = arith.constant 0 : index
    %745 = vector.load %arg29[%c0_449, %c0_450] : memref<8x32xf32, #tpu.memory_space<vmem>>, vector<8x32xf32>
    %cst_451 = arith.constant dense<0.000000e+00> : vector<8x128xf32>
    %746 = tpu.matmul %745, %665, %cst_451 {dimension_numbers = #tpu.dot_dimension_numbers<[1], [0], [0], [1], [0, 0, 1, 1], [], []>} : vector<8x32xf32>, vector<32x128xf32>, vector<8x128xf32> -> vector<8x128xf32>
    %747 = arith.addf %744, %746 : vector<8x128xf32>
    %748 = vector.extract_strided_slice %747 {offsets = [0, 0], sizes = [8, 32], strides = [1, 1]} : vector<8x128xf32> to vector<8x32xf32>
    %cst_452 = arith.constant 0.000000e+00 : f32
    %749 = vector.broadcast %cst_452 : f32 to vector<8x32xf32>
    %750 = arith.subf %749, %748 : vector<8x32xf32>
    %751 = math.exp %750 : vector<8x32xf32>
    %cst_453 = arith.constant 1.000000e+00 : f32
    %752 = vector.broadcast %cst_453 : f32 to vector<8x32xf32>
    %753 = arith.addf %752, %751 : vector<8x32xf32>
    %cst_454 = arith.constant 1.000000e+00 : f32
    %754 = vector.broadcast %cst_454 : f32 to vector<8x32xf32>
    %755 = arith.divf %754, %753 : vector<8x32xf32>
    %756 = vector.extract_strided_slice %747 {offsets = [0, 32], sizes = [8, 32], strides = [1, 1]} : vector<8x128xf32> to vector<8x32xf32>
    %cst_455 = arith.constant 0.000000e+00 : f32
    %757 = vector.broadcast %cst_455 : f32 to vector<8x32xf32>
    %758 = arith.subf %757, %756 : vector<8x32xf32>
    %759 = math.exp %758 : vector<8x32xf32>
    %cst_456 = arith.constant 1.000000e+00 : f32
    %760 = vector.broadcast %cst_456 : f32 to vector<8x32xf32>
    %761 = arith.addf %760, %759 : vector<8x32xf32>
    %cst_457 = arith.constant 1.000000e+00 : f32
    %762 = vector.broadcast %cst_457 : f32 to vector<8x32xf32>
    %763 = arith.divf %762, %761 : vector<8x32xf32>
    %764 = vector.extract_strided_slice %747 {offsets = [0, 64], sizes = [8, 32], strides = [1, 1]} : vector<8x128xf32> to vector<8x32xf32>
    %765 = math.tanh %764 : vector<8x32xf32>
    %766 = vector.extract_strided_slice %747 {offsets = [0, 96], sizes = [8, 32], strides = [1, 1]} : vector<8x128xf32> to vector<8x32xf32>
    %cst_458 = arith.constant 0.000000e+00 : f32
    %767 = vector.broadcast %cst_458 : f32 to vector<8x32xf32>
    %768 = arith.subf %767, %766 : vector<8x32xf32>
    %769 = math.exp %768 : vector<8x32xf32>
    %cst_459 = arith.constant 1.000000e+00 : f32
    %770 = vector.broadcast %cst_459 : f32 to vector<8x32xf32>
    %771 = arith.addf %770, %769 : vector<8x32xf32>
    %cst_460 = arith.constant 1.000000e+00 : f32
    %772 = vector.broadcast %cst_460 : f32 to vector<8x32xf32>
    %773 = arith.divf %772, %771 : vector<8x32xf32>
    %c0_461 = arith.constant 0 : index
    %c0_462 = arith.constant 0 : index
    %774 = vector.load %arg30[%c0_461, %c0_462] : memref<8x32xf32, #tpu.memory_space<vmem>>, vector<8x32xf32>
    %775 = arith.mulf %763, %774 : vector<8x32xf32>
    %776 = arith.mulf %755, %765 : vector<8x32xf32>
    %777 = arith.addf %775, %776 : vector<8x32xf32>
    %778 = math.tanh %777 : vector<8x32xf32>
    %779 = arith.mulf %773, %778 : vector<8x32xf32>
    %c0_463 = arith.constant 0 : index
    %c0_464 = arith.constant 0 : index
    %780 = vector.load %arg29[%c0_463, %c0_464] : memref<8x32xf32, #tpu.memory_space<vmem>>, vector<8x32xf32>
    tpu.vector_store %arg29[%c0_463, %c0_464], %779 {strides = array<i32>} : memref<8x32xf32, #tpu.memory_space<vmem>>, vector<8x32xf32>,
    %c0_465 = arith.constant 0 : index
    %c0_466 = arith.constant 0 : index
    %781 = vector.load %arg30[%c0_465, %c0_466] : memref<8x32xf32, #tpu.memory_space<vmem>>, vector<8x32xf32>
    tpu.vector_store %arg30[%c0_465, %c0_466], %777 {strides = array<i32>} : memref<8x32xf32, #tpu.memory_space<vmem>>, vector<8x32xf32>,
    %c16_467 = arith.constant 16 : index
    %c0_468 = arith.constant 0 : index
    %782 = vector.load %arg25[%c16_467, %c0_468] : memref<64x32xf32, #tpu.memory_space<vmem>>, vector<8x32xf32>
    tpu.vector_store %arg25[%c16_467, %c0_468], %779 {strides = array<i32>} : memref<64x32xf32, #tpu.memory_space<vmem>>, vector<8x32xf32>,
    %c24_469 = arith.constant 24 : index
    %c0_470 = arith.constant 0 : index
    %783 = vector.load %arg27[%c24_469, %c0_470] : memref<64x128xf32, #tpu.memory_space<vmem>>, vector<8x128xf32>
    %c0_471 = arith.constant 0 : index
    %c0_472 = arith.constant 0 : index
    %784 = vector.load %arg29[%c0_471, %c0_472] : memref<8x32xf32, #tpu.memory_space<vmem>>, vector<8x32xf32>
    %cst_473 = arith.constant dense<0.000000e+00> : vector<8x128xf32>
    %785 = tpu.matmul %784, %665, %cst_473 {dimension_numbers = #tpu.dot_dimension_numbers<[1], [0], [0], [1], [0, 0, 1, 1], [], []>} : vector<8x32xf32>, vector<32x128xf32>, vector<8x128xf32> -> vector<8x128xf32>
    %786 = arith.addf %783, %785 : vector<8x128xf32>
    %787 = vector.extract_strided_slice %786 {offsets = [0, 0], sizes = [8, 32], strides = [1, 1]} : vector<8x128xf32> to vector<8x32xf32>
    %cst_474 = arith.constant 0.000000e+00 : f32
    %788 = vector.broadcast %cst_474 : f32 to vector<8x32xf32>
    %789 = arith.subf %788, %787 : vector<8x32xf32>
    %790 = math.exp %789 : vector<8x32xf32>
    %cst_475 = arith.constant 1.000000e+00 : f32
    %791 = vector.broadcast %cst_475 : f32 to vector<8x32xf32>
    %792 = arith.addf %791, %790 : vector<8x32xf32>
    %cst_476 = arith.constant 1.000000e+00 : f32
    %793 = vector.broadcast %cst_476 : f32 to vector<8x32xf32>
    %794 = arith.divf %793, %792 : vector<8x32xf32>
    %795 = vector.extract_strided_slice %786 {offsets = [0, 32], sizes = [8, 32], strides = [1, 1]} : vector<8x128xf32> to vector<8x32xf32>
    %cst_477 = arith.constant 0.000000e+00 : f32
    %796 = vector.broadcast %cst_477 : f32 to vector<8x32xf32>
    %797 = arith.subf %796, %795 : vector<8x32xf32>
    %798 = math.exp %797 : vector<8x32xf32>
    %cst_478 = arith.constant 1.000000e+00 : f32
    %799 = vector.broadcast %cst_478 : f32 to vector<8x32xf32>
    %800 = arith.addf %799, %798 : vector<8x32xf32>
    %cst_479 = arith.constant 1.000000e+00 : f32
    %801 = vector.broadcast %cst_479 : f32 to vector<8x32xf32>
    %802 = arith.divf %801, %800 : vector<8x32xf32>
    %803 = vector.extract_strided_slice %786 {offsets = [0, 64], sizes = [8, 32], strides = [1, 1]} : vector<8x128xf32> to vector<8x32xf32>
    %804 = math.tanh %803 : vector<8x32xf32>
    %805 = vector.extract_strided_slice %786 {offsets = [0, 96], sizes = [8, 32], strides = [1, 1]} : vector<8x128xf32> to vector<8x32xf32>
    %cst_480 = arith.constant 0.000000e+00 : f32
    %806 = vector.broadcast %cst_480 : f32 to vector<8x32xf32>
    %807 = arith.subf %806, %805 : vector<8x32xf32>
    %808 = math.exp %807 : vector<8x32xf32>
    %cst_481 = arith.constant 1.000000e+00 : f32
    %809 = vector.broadcast %cst_481 : f32 to vector<8x32xf32>
    %810 = arith.addf %809, %808 : vector<8x32xf32>
    %cst_482 = arith.constant 1.000000e+00 : f32
    %811 = vector.broadcast %cst_482 : f32 to vector<8x32xf32>
    %812 = arith.divf %811, %810 : vector<8x32xf32>
    %c0_483 = arith.constant 0 : index
    %c0_484 = arith.constant 0 : index
    %813 = vector.load %arg30[%c0_483, %c0_484] : memref<8x32xf32, #tpu.memory_space<vmem>>, vector<8x32xf32>
    %814 = arith.mulf %802, %813 : vector<8x32xf32>
    %815 = arith.mulf %794, %804 : vector<8x32xf32>
    %816 = arith.addf %814, %815 : vector<8x32xf32>
    %817 = math.tanh %816 : vector<8x32xf32>
    %818 = arith.mulf %812, %817 : vector<8x32xf32>
    %c0_485 = arith.constant 0 : index
    %c0_486 = arith.constant 0 : index
    %819 = vector.load %arg29[%c0_485, %c0_486] : memref<8x32xf32, #tpu.memory_space<vmem>>, vector<8x32xf32>
    tpu.vector_store %arg29[%c0_485, %c0_486], %818 {strides = array<i32>} : memref<8x32xf32, #tpu.memory_space<vmem>>, vector<8x32xf32>,
    %c0_487 = arith.constant 0 : index
    %c0_488 = arith.constant 0 : index
    %820 = vector.load %arg30[%c0_487, %c0_488] : memref<8x32xf32, #tpu.memory_space<vmem>>, vector<8x32xf32>
    tpu.vector_store %arg30[%c0_487, %c0_488], %816 {strides = array<i32>} : memref<8x32xf32, #tpu.memory_space<vmem>>, vector<8x32xf32>,
    %c24_489 = arith.constant 24 : index
    %c0_490 = arith.constant 0 : index
    %821 = vector.load %arg25[%c24_489, %c0_490] : memref<64x32xf32, #tpu.memory_space<vmem>>, vector<8x32xf32>
    tpu.vector_store %arg25[%c24_489, %c0_490], %818 {strides = array<i32>} : memref<64x32xf32, #tpu.memory_space<vmem>>, vector<8x32xf32>,
    %c32_491 = arith.constant 32 : index
    %c0_492 = arith.constant 0 : index
    %822 = vector.load %arg27[%c32_491, %c0_492] : memref<64x128xf32, #tpu.memory_space<vmem>>, vector<8x128xf32>
    %c0_493 = arith.constant 0 : index
    %c0_494 = arith.constant 0 : index
    %823 = vector.load %arg29[%c0_493, %c0_494] : memref<8x32xf32, #tpu.memory_space<vmem>>, vector<8x32xf32>
    %cst_495 = arith.constant dense<0.000000e+00> : vector<8x128xf32>
    %824 = tpu.matmul %823, %665, %cst_495 {dimension_numbers = #tpu.dot_dimension_numbers<[1], [0], [0], [1], [0, 0, 1, 1], [], []>} : vector<8x32xf32>, vector<32x128xf32>, vector<8x128xf32> -> vector<8x128xf32>
    %825 = arith.addf %822, %824 : vector<8x128xf32>
    %826 = vector.extract_strided_slice %825 {offsets = [0, 0], sizes = [8, 32], strides = [1, 1]} : vector<8x128xf32> to vector<8x32xf32>
    %cst_496 = arith.constant 0.000000e+00 : f32
    %827 = vector.broadcast %cst_496 : f32 to vector<8x32xf32>
    %828 = arith.subf %827, %826 : vector<8x32xf32>
    %829 = math.exp %828 : vector<8x32xf32>
    %cst_497 = arith.constant 1.000000e+00 : f32
    %830 = vector.broadcast %cst_497 : f32 to vector<8x32xf32>
    %831 = arith.addf %830, %829 : vector<8x32xf32>
    %cst_498 = arith.constant 1.000000e+00 : f32
    %832 = vector.broadcast %cst_498 : f32 to vector<8x32xf32>
    %833 = arith.divf %832, %831 : vector<8x32xf32>
    %834 = vector.extract_strided_slice %825 {offsets = [0, 32], sizes = [8, 32], strides = [1, 1]} : vector<8x128xf32> to vector<8x32xf32>
    %cst_499 = arith.constant 0.000000e+00 : f32
    %835 = vector.broadcast %cst_499 : f32 to vector<8x32xf32>
    %836 = arith.subf %835, %834 : vector<8x32xf32>
    %837 = math.exp %836 : vector<8x32xf32>
    %cst_500 = arith.constant 1.000000e+00 : f32
    %838 = vector.broadcast %cst_500 : f32 to vector<8x32xf32>
    %839 = arith.addf %838, %837 : vector<8x32xf32>
    %cst_501 = arith.constant 1.000000e+00 : f32
    %840 = vector.broadcast %cst_501 : f32 to vector<8x32xf32>
    %841 = arith.divf %840, %839 : vector<8x32xf32>
    %842 = vector.extract_strided_slice %825 {offsets = [0, 64], sizes = [8, 32], strides = [1, 1]} : vector<8x128xf32> to vector<8x32xf32>
    %843 = math.tanh %842 : vector<8x32xf32>
    %844 = vector.extract_strided_slice %825 {offsets = [0, 96], sizes = [8, 32], strides = [1, 1]} : vector<8x128xf32> to vector<8x32xf32>
    %cst_502 = arith.constant 0.000000e+00 : f32
    %845 = vector.broadcast %cst_502 : f32 to vector<8x32xf32>
    %846 = arith.subf %845, %844 : vector<8x32xf32>
    %847 = math.exp %846 : vector<8x32xf32>
    %cst_503 = arith.constant 1.000000e+00 : f32
    %848 = vector.broadcast %cst_503 : f32 to vector<8x32xf32>
    %849 = arith.addf %848, %847 : vector<8x32xf32>
    %cst_504 = arith.constant 1.000000e+00 : f32
    %850 = vector.broadcast %cst_504 : f32 to vector<8x32xf32>
    %851 = arith.divf %850, %849 : vector<8x32xf32>
    %c0_505 = arith.constant 0 : index
    %c0_506 = arith.constant 0 : index
    %852 = vector.load %arg30[%c0_505, %c0_506] : memref<8x32xf32, #tpu.memory_space<vmem>>, vector<8x32xf32>
    %853 = arith.mulf %841, %852 : vector<8x32xf32>
    %854 = arith.mulf %833, %843 : vector<8x32xf32>
    %855 = arith.addf %853, %854 : vector<8x32xf32>
    %856 = math.tanh %855 : vector<8x32xf32>
    %857 = arith.mulf %851, %856 : vector<8x32xf32>
    %c0_507 = arith.constant 0 : index
    %c0_508 = arith.constant 0 : index
    %858 = vector.load %arg29[%c0_507, %c0_508] : memref<8x32xf32, #tpu.memory_space<vmem>>, vector<8x32xf32>
    tpu.vector_store %arg29[%c0_507, %c0_508], %857 {strides = array<i32>} : memref<8x32xf32, #tpu.memory_space<vmem>>, vector<8x32xf32>,
    %c0_509 = arith.constant 0 : index
    %c0_510 = arith.constant 0 : index
    %859 = vector.load %arg30[%c0_509, %c0_510] : memref<8x32xf32, #tpu.memory_space<vmem>>, vector<8x32xf32>
    tpu.vector_store %arg30[%c0_509, %c0_510], %855 {strides = array<i32>} : memref<8x32xf32, #tpu.memory_space<vmem>>, vector<8x32xf32>,
    %c32_511 = arith.constant 32 : index
    %c0_512 = arith.constant 0 : index
    %860 = vector.load %arg25[%c32_511, %c0_512] : memref<64x32xf32, #tpu.memory_space<vmem>>, vector<8x32xf32>
    tpu.vector_store %arg25[%c32_511, %c0_512], %857 {strides = array<i32>} : memref<64x32xf32, #tpu.memory_space<vmem>>, vector<8x32xf32>,
    %c40_513 = arith.constant 40 : index
    %c0_514 = arith.constant 0 : index
    %861 = vector.load %arg27[%c40_513, %c0_514] : memref<64x128xf32, #tpu.memory_space<vmem>>, vector<8x128xf32>
    %c0_515 = arith.constant 0 : index
    %c0_516 = arith.constant 0 : index
    %862 = vector.load %arg29[%c0_515, %c0_516] : memref<8x32xf32, #tpu.memory_space<vmem>>, vector<8x32xf32>
    %cst_517 = arith.constant dense<0.000000e+00> : vector<8x128xf32>
    %863 = tpu.matmul %862, %665, %cst_517 {dimension_numbers = #tpu.dot_dimension_numbers<[1], [0], [0], [1], [0, 0, 1, 1], [], []>} : vector<8x32xf32>, vector<32x128xf32>, vector<8x128xf32> -> vector<8x128xf32>
    %864 = arith.addf %861, %863 : vector<8x128xf32>
    %865 = vector.extract_strided_slice %864 {offsets = [0, 0], sizes = [8, 32], strides = [1, 1]} : vector<8x128xf32> to vector<8x32xf32>
    %cst_518 = arith.constant 0.000000e+00 : f32
    %866 = vector.broadcast %cst_518 : f32 to vector<8x32xf32>
    %867 = arith.subf %866, %865 : vector<8x32xf32>
    %868 = math.exp %867 : vector<8x32xf32>
    %cst_519 = arith.constant 1.000000e+00 : f32
    %869 = vector.broadcast %cst_519 : f32 to vector<8x32xf32>
    %870 = arith.addf %869, %868 : vector<8x32xf32>
    %cst_520 = arith.constant 1.000000e+00 : f32
    %871 = vector.broadcast %cst_520 : f32 to vector<8x32xf32>
    %872 = arith.divf %871, %870 : vector<8x32xf32>
    %873 = vector.extract_strided_slice %864 {offsets = [0, 32], sizes = [8, 32], strides = [1, 1]} : vector<8x128xf32> to vector<8x32xf32>
    %cst_521 = arith.constant 0.000000e+00 : f32
    %874 = vector.broadcast %cst_521 : f32 to vector<8x32xf32>
    %875 = arith.subf %874, %873 : vector<8x32xf32>
    %876 = math.exp %875 : vector<8x32xf32>
    %cst_522 = arith.constant 1.000000e+00 : f32
    %877 = vector.broadcast %cst_522 : f32 to vector<8x32xf32>
    %878 = arith.addf %877, %876 : vector<8x32xf32>
    %cst_523 = arith.constant 1.000000e+00 : f32
    %879 = vector.broadcast %cst_523 : f32 to vector<8x32xf32>
    %880 = arith.divf %879, %878 : vector<8x32xf32>
    %881 = vector.extract_strided_slice %864 {offsets = [0, 64], sizes = [8, 32], strides = [1, 1]} : vector<8x128xf32> to vector<8x32xf32>
    %882 = math.tanh %881 : vector<8x32xf32>
    %883 = vector.extract_strided_slice %864 {offsets = [0, 96], sizes = [8, 32], strides = [1, 1]} : vector<8x128xf32> to vector<8x32xf32>
    %cst_524 = arith.constant 0.000000e+00 : f32
    %884 = vector.broadcast %cst_524 : f32 to vector<8x32xf32>
    %885 = arith.subf %884, %883 : vector<8x32xf32>
    %886 = math.exp %885 : vector<8x32xf32>
    %cst_525 = arith.constant 1.000000e+00 : f32
    %887 = vector.broadcast %cst_525 : f32 to vector<8x32xf32>
    %888 = arith.addf %887, %886 : vector<8x32xf32>
    %cst_526 = arith.constant 1.000000e+00 : f32
    %889 = vector.broadcast %cst_526 : f32 to vector<8x32xf32>
    %890 = arith.divf %889, %888 : vector<8x32xf32>
    %c0_527 = arith.constant 0 : index
    %c0_528 = arith.constant 0 : index
    %891 = vector.load %arg30[%c0_527, %c0_528] : memref<8x32xf32, #tpu.memory_space<vmem>>, vector<8x32xf32>
    %892 = arith.mulf %880, %891 : vector<8x32xf32>
    %893 = arith.mulf %872, %882 : vector<8x32xf32>
    %894 = arith.addf %892, %893 : vector<8x32xf32>
    %895 = math.tanh %894 : vector<8x32xf32>
    %896 = arith.mulf %890, %895 : vector<8x32xf32>
    %c0_529 = arith.constant 0 : index
    %c0_530 = arith.constant 0 : index
    %897 = vector.load %arg29[%c0_529, %c0_530] : memref<8x32xf32, #tpu.memory_space<vmem>>, vector<8x32xf32>
    tpu.vector_store %arg29[%c0_529, %c0_530], %896 {strides = array<i32>} : memref<8x32xf32, #tpu.memory_space<vmem>>, vector<8x32xf32>,
    %c0_531 = arith.constant 0 : index
    %c0_532 = arith.constant 0 : index
    %898 = vector.load %arg30[%c0_531, %c0_532] : memref<8x32xf32, #tpu.memory_space<vmem>>, vector<8x32xf32>
    tpu.vector_store %arg30[%c0_531, %c0_532], %894 {strides = array<i32>} : memref<8x32xf32, #tpu.memory_space<vmem>>, vector<8x32xf32>,
    %c40_533 = arith.constant 40 : index
    %c0_534 = arith.constant 0 : index
    %899 = vector.load %arg25[%c40_533, %c0_534] : memref<64x32xf32, #tpu.memory_space<vmem>>, vector<8x32xf32>
    tpu.vector_store %arg25[%c40_533, %c0_534], %896 {strides = array<i32>} : memref<64x32xf32, #tpu.memory_space<vmem>>, vector<8x32xf32>,
    %c48_535 = arith.constant 48 : index
    %c0_536 = arith.constant 0 : index
    %900 = vector.load %arg27[%c48_535, %c0_536] : memref<64x128xf32, #tpu.memory_space<vmem>>, vector<8x128xf32>
    %c0_537 = arith.constant 0 : index
    %c0_538 = arith.constant 0 : index
    %901 = vector.load %arg29[%c0_537, %c0_538] : memref<8x32xf32, #tpu.memory_space<vmem>>, vector<8x32xf32>
    %cst_539 = arith.constant dense<0.000000e+00> : vector<8x128xf32>
    %902 = tpu.matmul %901, %665, %cst_539 {dimension_numbers = #tpu.dot_dimension_numbers<[1], [0], [0], [1], [0, 0, 1, 1], [], []>} : vector<8x32xf32>, vector<32x128xf32>, vector<8x128xf32> -> vector<8x128xf32>
    %903 = arith.addf %900, %902 : vector<8x128xf32>
    %904 = vector.extract_strided_slice %903 {offsets = [0, 0], sizes = [8, 32], strides = [1, 1]} : vector<8x128xf32> to vector<8x32xf32>
    %cst_540 = arith.constant 0.000000e+00 : f32
    %905 = vector.broadcast %cst_540 : f32 to vector<8x32xf32>
    %906 = arith.subf %905, %904 : vector<8x32xf32>
    %907 = math.exp %906 : vector<8x32xf32>
    %cst_541 = arith.constant 1.000000e+00 : f32
    %908 = vector.broadcast %cst_541 : f32 to vector<8x32xf32>
    %909 = arith.addf %908, %907 : vector<8x32xf32>
    %cst_542 = arith.constant 1.000000e+00 : f32
    %910 = vector.broadcast %cst_542 : f32 to vector<8x32xf32>
    %911 = arith.divf %910, %909 : vector<8x32xf32>
    %912 = vector.extract_strided_slice %903 {offsets = [0, 32], sizes = [8, 32], strides = [1, 1]} : vector<8x128xf32> to vector<8x32xf32>
    %cst_543 = arith.constant 0.000000e+00 : f32
    %913 = vector.broadcast %cst_543 : f32 to vector<8x32xf32>
    %914 = arith.subf %913, %912 : vector<8x32xf32>
    %915 = math.exp %914 : vector<8x32xf32>
    %cst_544 = arith.constant 1.000000e+00 : f32
    %916 = vector.broadcast %cst_544 : f32 to vector<8x32xf32>
    %917 = arith.addf %916, %915 : vector<8x32xf32>
    %cst_545 = arith.constant 1.000000e+00 : f32
    %918 = vector.broadcast %cst_545 : f32 to vector<8x32xf32>
    %919 = arith.divf %918, %917 : vector<8x32xf32>
    %920 = vector.extract_strided_slice %903 {offsets = [0, 64], sizes = [8, 32], strides = [1, 1]} : vector<8x128xf32> to vector<8x32xf32>
    %921 = math.tanh %920 : vector<8x32xf32>
    %922 = vector.extract_strided_slice %903 {offsets = [0, 96], sizes = [8, 32], strides = [1, 1]} : vector<8x128xf32> to vector<8x32xf32>
    %cst_546 = arith.constant 0.000000e+00 : f32
    %923 = vector.broadcast %cst_546 : f32 to vector<8x32xf32>
    %924 = arith.subf %923, %922 : vector<8x32xf32>
    %925 = math.exp %924 : vector<8x32xf32>
    %cst_547 = arith.constant 1.000000e+00 : f32
    %926 = vector.broadcast %cst_547 : f32 to vector<8x32xf32>
    %927 = arith.addf %926, %925 : vector<8x32xf32>
    %cst_548 = arith.constant 1.000000e+00 : f32
    %928 = vector.broadcast %cst_548 : f32 to vector<8x32xf32>
    %929 = arith.divf %928, %927 : vector<8x32xf32>
    %c0_549 = arith.constant 0 : index
    %c0_550 = arith.constant 0 : index
    %930 = vector.load %arg30[%c0_549, %c0_550] : memref<8x32xf32, #tpu.memory_space<vmem>>, vector<8x32xf32>
    %931 = arith.mulf %919, %930 : vector<8x32xf32>
    %932 = arith.mulf %911, %921 : vector<8x32xf32>
    %933 = arith.addf %931, %932 : vector<8x32xf32>
    %934 = math.tanh %933 : vector<8x32xf32>
    %935 = arith.mulf %929, %934 : vector<8x32xf32>
    %c0_551 = arith.constant 0 : index
    %c0_552 = arith.constant 0 : index
    %936 = vector.load %arg29[%c0_551, %c0_552] : memref<8x32xf32, #tpu.memory_space<vmem>>, vector<8x32xf32>
    tpu.vector_store %arg29[%c0_551, %c0_552], %935 {strides = array<i32>} : memref<8x32xf32, #tpu.memory_space<vmem>>, vector<8x32xf32>,
    %c0_553 = arith.constant 0 : index
    %c0_554 = arith.constant 0 : index
    %937 = vector.load %arg30[%c0_553, %c0_554] : memref<8x32xf32, #tpu.memory_space<vmem>>, vector<8x32xf32>
    tpu.vector_store %arg30[%c0_553, %c0_554], %933 {strides = array<i32>} : memref<8x32xf32, #tpu.memory_space<vmem>>, vector<8x32xf32>,
    %c48_555 = arith.constant 48 : index
    %c0_556 = arith.constant 0 : index
    %938 = vector.load %arg25[%c48_555, %c0_556] : memref<64x32xf32, #tpu.memory_space<vmem>>, vector<8x32xf32>
    tpu.vector_store %arg25[%c48_555, %c0_556], %935 {strides = array<i32>} : memref<64x32xf32, #tpu.memory_space<vmem>>, vector<8x32xf32>,
    %c56_557 = arith.constant 56 : index
    %c0_558 = arith.constant 0 : index
    %939 = vector.load %arg27[%c56_557, %c0_558] : memref<64x128xf32, #tpu.memory_space<vmem>>, vector<8x128xf32>
    %c0_559 = arith.constant 0 : index
    %c0_560 = arith.constant 0 : index
    %940 = vector.load %arg29[%c0_559, %c0_560] : memref<8x32xf32, #tpu.memory_space<vmem>>, vector<8x32xf32>
    %cst_561 = arith.constant dense<0.000000e+00> : vector<8x128xf32>
    %941 = tpu.matmul %940, %665, %cst_561 {dimension_numbers = #tpu.dot_dimension_numbers<[1], [0], [0], [1], [0, 0, 1, 1], [], []>} : vector<8x32xf32>, vector<32x128xf32>, vector<8x128xf32> -> vector<8x128xf32>
    %942 = arith.addf %939, %941 : vector<8x128xf32>
    %943 = vector.extract_strided_slice %942 {offsets = [0, 0], sizes = [8, 32], strides = [1, 1]} : vector<8x128xf32> to vector<8x32xf32>
    %cst_562 = arith.constant 0.000000e+00 : f32
    %944 = vector.broadcast %cst_562 : f32 to vector<8x32xf32>
    %945 = arith.subf %944, %943 : vector<8x32xf32>
    %946 = math.exp %945 : vector<8x32xf32>
    %cst_563 = arith.constant 1.000000e+00 : f32
    %947 = vector.broadcast %cst_563 : f32 to vector<8x32xf32>
    %948 = arith.addf %947, %946 : vector<8x32xf32>
    %cst_564 = arith.constant 1.000000e+00 : f32
    %949 = vector.broadcast %cst_564 : f32 to vector<8x32xf32>
    %950 = arith.divf %949, %948 : vector<8x32xf32>
    %951 = vector.extract_strided_slice %942 {offsets = [0, 32], sizes = [8, 32], strides = [1, 1]} : vector<8x128xf32> to vector<8x32xf32>
    %cst_565 = arith.constant 0.000000e+00 : f32
    %952 = vector.broadcast %cst_565 : f32 to vector<8x32xf32>
    %953 = arith.subf %952, %951 : vector<8x32xf32>
    %954 = math.exp %953 : vector<8x32xf32>
    %cst_566 = arith.constant 1.000000e+00 : f32
    %955 = vector.broadcast %cst_566 : f32 to vector<8x32xf32>
    %956 = arith.addf %955, %954 : vector<8x32xf32>
    %cst_567 = arith.constant 1.000000e+00 : f32
    %957 = vector.broadcast %cst_567 : f32 to vector<8x32xf32>
    %958 = arith.divf %957, %956 : vector<8x32xf32>
    %959 = vector.extract_strided_slice %942 {offsets = [0, 64], sizes = [8, 32], strides = [1, 1]} : vector<8x128xf32> to vector<8x32xf32>
    %960 = math.tanh %959 : vector<8x32xf32>
    %961 = vector.extract_strided_slice %942 {offsets = [0, 96], sizes = [8, 32], strides = [1, 1]} : vector<8x128xf32> to vector<8x32xf32>
    %cst_568 = arith.constant 0.000000e+00 : f32
    %962 = vector.broadcast %cst_568 : f32 to vector<8x32xf32>
    %963 = arith.subf %962, %961 : vector<8x32xf32>
    %964 = math.exp %963 : vector<8x32xf32>
    %cst_569 = arith.constant 1.000000e+00 : f32
    %965 = vector.broadcast %cst_569 : f32 to vector<8x32xf32>
    %966 = arith.addf %965, %964 : vector<8x32xf32>
    %cst_570 = arith.constant 1.000000e+00 : f32
    %967 = vector.broadcast %cst_570 : f32 to vector<8x32xf32>
    %968 = arith.divf %967, %966 : vector<8x32xf32>
    %c0_571 = arith.constant 0 : index
    %c0_572 = arith.constant 0 : index
    %969 = vector.load %arg30[%c0_571, %c0_572] : memref<8x32xf32, #tpu.memory_space<vmem>>, vector<8x32xf32>
    %970 = arith.mulf %958, %969 : vector<8x32xf32>
    %971 = arith.mulf %950, %960 : vector<8x32xf32>
    %972 = arith.addf %970, %971 : vector<8x32xf32>
    %973 = math.tanh %972 : vector<8x32xf32>
    %974 = arith.mulf %968, %973 : vector<8x32xf32>
    %c0_573 = arith.constant 0 : index
    %c0_574 = arith.constant 0 : index
    %975 = vector.load %arg29[%c0_573, %c0_574] : memref<8x32xf32, #tpu.memory_space<vmem>>, vector<8x32xf32>
    tpu.vector_store %arg29[%c0_573, %c0_574], %974 {strides = array<i32>} : memref<8x32xf32, #tpu.memory_space<vmem>>, vector<8x32xf32>,
    %c0_575 = arith.constant 0 : index
    %c0_576 = arith.constant 0 : index
    %976 = vector.load %arg30[%c0_575, %c0_576] : memref<8x32xf32, #tpu.memory_space<vmem>>, vector<8x32xf32>
    tpu.vector_store %arg30[%c0_575, %c0_576], %972 {strides = array<i32>} : memref<8x32xf32, #tpu.memory_space<vmem>>, vector<8x32xf32>,
    %c56_577 = arith.constant 56 : index
    %c0_578 = arith.constant 0 : index
    %977 = vector.load %arg25[%c56_577, %c0_578] : memref<64x32xf32, #tpu.memory_space<vmem>>, vector<8x32xf32>
    tpu.vector_store %arg25[%c56_577, %c0_578], %974 {strides = array<i32>} : memref<64x32xf32, #tpu.memory_space<vmem>>, vector<8x32xf32>,
    %c0_579 = arith.constant 0 : index
    %c0_580 = arith.constant 0 : index
    %978 = vector.load %arg29[%c0_579, %c0_580] : memref<8x32xf32, #tpu.memory_space<vmem>>, vector<8x32xf32>
    %c0_581 = arith.constant 0 : index
    %c0_582 = arith.constant 0 : index
    %979 = vector.load %arg30[%c0_581, %c0_582] : memref<8x32xf32, #tpu.memory_space<vmem>>, vector<8x32xf32>
    %c56_583 = arith.constant 56 : index
    %c0_584 = arith.constant 0 : index
    %980 = vector.load %arg25[%c56_583, %c0_584] : memref<64x32xf32, #tpu.memory_space<vmem>>, vector<8x32xf32>
    %c0_585 = arith.constant 0 : index
    %c0_586 = arith.constant 0 : index
    %981 = vector.load %arg10[%c0_585, %c0_586] : memref<32x128xf32, #tpu.memory_space<vmem>>, vector<32x128xf32>
    %cst_587 = arith.constant dense<0.000000e+00> : vector<8x128xf32>
    %982 = tpu.matmul %980, %981, %cst_587 {dimension_numbers = #tpu.dot_dimension_numbers<[1], [0], [0], [1], [0, 0, 1, 1], [], []>} : vector<8x32xf32>, vector<32x128xf32>, vector<8x128xf32> -> vector<8x128xf32>
    %c0_588 = arith.constant 0 : index
    %c0_589 = arith.constant 0 : index
    %983 = vector.load %arg12[%c0_588, %c0_589] : memref<1x128xf32, #tpu.memory_space<vmem>>, vector<1x128xf32>
    %984 = vector.broadcast %983 : vector<1x128xf32> to vector<8x128xf32>
    %985 = arith.addf %982, %984 : vector<8x128xf32>
    %cst_590 = arith.constant 0.000000e+00 : f32
    %986 = vector.broadcast %cst_590 : f32 to vector<8x32xf32>
    %c0_591 = arith.constant 0 : index
    %c0_592 = arith.constant 0 : index
    %987 = vector.load %arg29[%c0_591, %c0_592] : memref<8x32xf32, #tpu.memory_space<vmem>>, vector<8x32xf32>
    tpu.vector_store %arg29[%c0_591, %c0_592], %986 {strides = array<i32>} : memref<8x32xf32, #tpu.memory_space<vmem>>, vector<8x32xf32>,
    %cst_593 = arith.constant 0.000000e+00 : f32
    %988 = vector.broadcast %cst_593 : f32 to vector<8x32xf32>
    %c0_594 = arith.constant 0 : index
    %c0_595 = arith.constant 0 : index
    %989 = vector.load %arg30[%c0_594, %c0_595] : memref<8x32xf32, #tpu.memory_space<vmem>>, vector<8x32xf32>
    tpu.vector_store %arg30[%c0_594, %c0_595], %988 {strides = array<i32>} : memref<8x32xf32, #tpu.memory_space<vmem>>, vector<8x32xf32>,
    %c0_596 = arith.constant 0 : index
    %c0_597 = arith.constant 0 : index
    %990 = vector.load %arg11[%c0_596, %c0_597] : memref<32x128xf32, #tpu.memory_space<vmem>>, vector<32x128xf32>
    %c0_598 = arith.constant 0 : index
    %c0_599 = arith.constant 0 : index
    %991 = vector.load %arg29[%c0_598, %c0_599] : memref<8x32xf32, #tpu.memory_space<vmem>>, vector<8x32xf32>
    %cst_600 = arith.constant dense<0.000000e+00> : vector<8x128xf32>
    %992 = tpu.matmul %991, %990, %cst_600 {dimension_numbers = #tpu.dot_dimension_numbers<[1], [0], [0], [1], [0, 0, 1, 1], [], []>} : vector<8x32xf32>, vector<32x128xf32>, vector<8x128xf32> -> vector<8x128xf32>
    %993 = arith.addf %985, %992 : vector<8x128xf32>
    %994 = vector.extract_strided_slice %993 {offsets = [0, 0], sizes = [8, 32], strides = [1, 1]} : vector<8x128xf32> to vector<8x32xf32>
    %cst_601 = arith.constant 0.000000e+00 : f32
    %995 = vector.broadcast %cst_601 : f32 to vector<8x32xf32>
    %996 = arith.subf %995, %994 : vector<8x32xf32>
    %997 = math.exp %996 : vector<8x32xf32>
    %cst_602 = arith.constant 1.000000e+00 : f32
    %998 = vector.broadcast %cst_602 : f32 to vector<8x32xf32>
    %999 = arith.addf %998, %997 : vector<8x32xf32>
    %cst_603 = arith.constant 1.000000e+00 : f32
    %1000 = vector.broadcast %cst_603 : f32 to vector<8x32xf32>
    %1001 = arith.divf %1000, %999 : vector<8x32xf32>
    %1002 = vector.extract_strided_slice %993 {offsets = [0, 32], sizes = [8, 32], strides = [1, 1]} : vector<8x128xf32> to vector<8x32xf32>
    %cst_604 = arith.constant 0.000000e+00 : f32
    %1003 = vector.broadcast %cst_604 : f32 to vector<8x32xf32>
    %1004 = arith.subf %1003, %1002 : vector<8x32xf32>
    %1005 = math.exp %1004 : vector<8x32xf32>
    %cst_605 = arith.constant 1.000000e+00 : f32
    %1006 = vector.broadcast %cst_605 : f32 to vector<8x32xf32>
    %1007 = arith.addf %1006, %1005 : vector<8x32xf32>
    %cst_606 = arith.constant 1.000000e+00 : f32
    %1008 = vector.broadcast %cst_606 : f32 to vector<8x32xf32>
    %1009 = arith.divf %1008, %1007 : vector<8x32xf32>
    %1010 = vector.extract_strided_slice %993 {offsets = [0, 64], sizes = [8, 32], strides = [1, 1]} : vector<8x128xf32> to vector<8x32xf32>
    %1011 = math.tanh %1010 : vector<8x32xf32>
    %1012 = vector.extract_strided_slice %993 {offsets = [0, 96], sizes = [8, 32], strides = [1, 1]} : vector<8x128xf32> to vector<8x32xf32>
    %cst_607 = arith.constant 0.000000e+00 : f32
    %1013 = vector.broadcast %cst_607 : f32 to vector<8x32xf32>
    %1014 = arith.subf %1013, %1012 : vector<8x32xf32>
    %1015 = math.exp %1014 : vector<8x32xf32>
    %cst_608 = arith.constant 1.000000e+00 : f32
    %1016 = vector.broadcast %cst_608 : f32 to vector<8x32xf32>
    %1017 = arith.addf %1016, %1015 : vector<8x32xf32>
    %cst_609 = arith.constant 1.000000e+00 : f32
    %1018 = vector.broadcast %cst_609 : f32 to vector<8x32xf32>
    %1019 = arith.divf %1018, %1017 : vector<8x32xf32>
    %c0_610 = arith.constant 0 : index
    %c0_611 = arith.constant 0 : index
    %1020 = vector.load %arg30[%c0_610, %c0_611] : memref<8x32xf32, #tpu.memory_space<vmem>>, vector<8x32xf32>
    %1021 = arith.mulf %1009, %1020 : vector<8x32xf32>
    %1022 = arith.mulf %1001, %1011 : vector<8x32xf32>
    %1023 = arith.addf %1021, %1022 : vector<8x32xf32>
    %1024 = math.tanh %1023 : vector<8x32xf32>
    %1025 = arith.mulf %1019, %1024 : vector<8x32xf32>
    %c0_612 = arith.constant 0 : index
    %c0_613 = arith.constant 0 : index
    %1026 = vector.load %arg29[%c0_612, %c0_613] : memref<8x32xf32, #tpu.memory_space<vmem>>, vector<8x32xf32>
    tpu.vector_store %arg29[%c0_612, %c0_613], %1025 {strides = array<i32>} : memref<8x32xf32, #tpu.memory_space<vmem>>, vector<8x32xf32>,
    %c0_614 = arith.constant 0 : index
    %c0_615 = arith.constant 0 : index
    %1027 = vector.load %arg30[%c0_614, %c0_615] : memref<8x32xf32, #tpu.memory_space<vmem>>, vector<8x32xf32>
    tpu.vector_store %arg30[%c0_614, %c0_615], %1023 {strides = array<i32>} : memref<8x32xf32, #tpu.memory_space<vmem>>, vector<8x32xf32>,
    %c0_616 = arith.constant 0 : index
    %c0_617 = arith.constant 0 : index
    %1028 = vector.load %arg26[%c0_616, %c0_617] : memref<32x32xf32, #tpu.memory_space<vmem>>, vector<8x32xf32>
    tpu.vector_store %arg26[%c0_616, %c0_617], %1025 {strides = array<i32>} : memref<32x32xf32, #tpu.memory_space<vmem>>, vector<8x32xf32>,
    %c0_618 = arith.constant 0 : index
    %c0_619 = arith.constant 0 : index
    %1029 = vector.load %arg29[%c0_618, %c0_619] : memref<8x32xf32, #tpu.memory_space<vmem>>, vector<8x32xf32>
    %cst_620 = arith.constant dense<0.000000e+00> : vector<8x128xf32>
    %1030 = tpu.matmul %1029, %990, %cst_620 {dimension_numbers = #tpu.dot_dimension_numbers<[1], [0], [0], [1], [0, 0, 1, 1], [], []>} : vector<8x32xf32>, vector<32x128xf32>, vector<8x128xf32> -> vector<8x128xf32>
    %1031 = arith.addf %985, %1030 : vector<8x128xf32>
    %1032 = vector.extract_strided_slice %1031 {offsets = [0, 0], sizes = [8, 32], strides = [1, 1]} : vector<8x128xf32> to vector<8x32xf32>
    %cst_621 = arith.constant 0.000000e+00 : f32
    %1033 = vector.broadcast %cst_621 : f32 to vector<8x32xf32>
    %1034 = arith.subf %1033, %1032 : vector<8x32xf32>
    %1035 = math.exp %1034 : vector<8x32xf32>
    %cst_622 = arith.constant 1.000000e+00 : f32
    %1036 = vector.broadcast %cst_622 : f32 to vector<8x32xf32>
    %1037 = arith.addf %1036, %1035 : vector<8x32xf32>
    %cst_623 = arith.constant 1.000000e+00 : f32
    %1038 = vector.broadcast %cst_623 : f32 to vector<8x32xf32>
    %1039 = arith.divf %1038, %1037 : vector<8x32xf32>
    %1040 = vector.extract_strided_slice %1031 {offsets = [0, 32], sizes = [8, 32], strides = [1, 1]} : vector<8x128xf32> to vector<8x32xf32>
    %cst_624 = arith.constant 0.000000e+00 : f32
    %1041 = vector.broadcast %cst_624 : f32 to vector<8x32xf32>
    %1042 = arith.subf %1041, %1040 : vector<8x32xf32>
    %1043 = math.exp %1042 : vector<8x32xf32>
    %cst_625 = arith.constant 1.000000e+00 : f32
    %1044 = vector.broadcast %cst_625 : f32 to vector<8x32xf32>
    %1045 = arith.addf %1044, %1043 : vector<8x32xf32>
    %cst_626 = arith.constant 1.000000e+00 : f32
    %1046 = vector.broadcast %cst_626 : f32 to vector<8x32xf32>
    %1047 = arith.divf %1046, %1045 : vector<8x32xf32>
    %1048 = vector.extract_strided_slice %1031 {offsets = [0, 64], sizes = [8, 32], strides = [1, 1]} : vector<8x128xf32> to vector<8x32xf32>
    %1049 = math.tanh %1048 : vector<8x32xf32>
    %1050 = vector.extract_strided_slice %1031 {offsets = [0, 96], sizes = [8, 32], strides = [1, 1]} : vector<8x128xf32> to vector<8x32xf32>
    %cst_627 = arith.constant 0.000000e+00 : f32
    %1051 = vector.broadcast %cst_627 : f32 to vector<8x32xf32>
    %1052 = arith.subf %1051, %1050 : vector<8x32xf32>
    %1053 = math.exp %1052 : vector<8x32xf32>
    %cst_628 = arith.constant 1.000000e+00 : f32
    %1054 = vector.broadcast %cst_628 : f32 to vector<8x32xf32>
    %1055 = arith.addf %1054, %1053 : vector<8x32xf32>
    %cst_629 = arith.constant 1.000000e+00 : f32
    %1056 = vector.broadcast %cst_629 : f32 to vector<8x32xf32>
    %1057 = arith.divf %1056, %1055 : vector<8x32xf32>
    %c0_630 = arith.constant 0 : index
    %c0_631 = arith.constant 0 : index
    %1058 = vector.load %arg30[%c0_630, %c0_631] : memref<8x32xf32, #tpu.memory_space<vmem>>, vector<8x32xf32>
    %1059 = arith.mulf %1047, %1058 : vector<8x32xf32>
    %1060 = arith.mulf %1039, %1049 : vector<8x32xf32>
    %1061 = arith.addf %1059, %1060 : vector<8x32xf32>
    %1062 = math.tanh %1061 : vector<8x32xf32>
    %1063 = arith.mulf %1057, %1062 : vector<8x32xf32>
    %c0_632 = arith.constant 0 : index
    %c0_633 = arith.constant 0 : index
    %1064 = vector.load %arg29[%c0_632, %c0_633] : memref<8x32xf32, #tpu.memory_space<vmem>>, vector<8x32xf32>
    tpu.vector_store %arg29[%c0_632, %c0_633], %1063 {strides = array<i32>} : memref<8x32xf32, #tpu.memory_space<vmem>>, vector<8x32xf32>,
    %c0_634 = arith.constant 0 : index
    %c0_635 = arith.constant 0 : index
    %1065 = vector.load %arg30[%c0_634, %c0_635] : memref<8x32xf32, #tpu.memory_space<vmem>>, vector<8x32xf32>
    tpu.vector_store %arg30[%c0_634, %c0_635], %1061 {strides = array<i32>} : memref<8x32xf32, #tpu.memory_space<vmem>>, vector<8x32xf32>,
    %c8_636 = arith.constant 8 : index
    %c0_637 = arith.constant 0 : index
    %1066 = vector.load %arg26[%c8_636, %c0_637] : memref<32x32xf32, #tpu.memory_space<vmem>>, vector<8x32xf32>
    tpu.vector_store %arg26[%c8_636, %c0_637], %1063 {strides = array<i32>} : memref<32x32xf32, #tpu.memory_space<vmem>>, vector<8x32xf32>,
    %c0_638 = arith.constant 0 : index
    %c0_639 = arith.constant 0 : index
    %1067 = vector.load %arg29[%c0_638, %c0_639] : memref<8x32xf32, #tpu.memory_space<vmem>>, vector<8x32xf32>
    %cst_640 = arith.constant dense<0.000000e+00> : vector<8x128xf32>
    %1068 = tpu.matmul %1067, %990, %cst_640 {dimension_numbers = #tpu.dot_dimension_numbers<[1], [0], [0], [1], [0, 0, 1, 1], [], []>} : vector<8x32xf32>, vector<32x128xf32>, vector<8x128xf32> -> vector<8x128xf32>
    %1069 = arith.addf %985, %1068 : vector<8x128xf32>
    %1070 = vector.extract_strided_slice %1069 {offsets = [0, 0], sizes = [8, 32], strides = [1, 1]} : vector<8x128xf32> to vector<8x32xf32>
    %cst_641 = arith.constant 0.000000e+00 : f32
    %1071 = vector.broadcast %cst_641 : f32 to vector<8x32xf32>
    %1072 = arith.subf %1071, %1070 : vector<8x32xf32>
    %1073 = math.exp %1072 : vector<8x32xf32>
    %cst_642 = arith.constant 1.000000e+00 : f32
    %1074 = vector.broadcast %cst_642 : f32 to vector<8x32xf32>
    %1075 = arith.addf %1074, %1073 : vector<8x32xf32>
    %cst_643 = arith.constant 1.000000e+00 : f32
    %1076 = vector.broadcast %cst_643 : f32 to vector<8x32xf32>
    %1077 = arith.divf %1076, %1075 : vector<8x32xf32>
    %1078 = vector.extract_strided_slice %1069 {offsets = [0, 32], sizes = [8, 32], strides = [1, 1]} : vector<8x128xf32> to vector<8x32xf32>
    %cst_644 = arith.constant 0.000000e+00 : f32
    %1079 = vector.broadcast %cst_644 : f32 to vector<8x32xf32>
    %1080 = arith.subf %1079, %1078 : vector<8x32xf32>
    %1081 = math.exp %1080 : vector<8x32xf32>
    %cst_645 = arith.constant 1.000000e+00 : f32
    %1082 = vector.broadcast %cst_645 : f32 to vector<8x32xf32>
    %1083 = arith.addf %1082, %1081 : vector<8x32xf32>
    %cst_646 = arith.constant 1.000000e+00 : f32
    %1084 = vector.broadcast %cst_646 : f32 to vector<8x32xf32>
    %1085 = arith.divf %1084, %1083 : vector<8x32xf32>
    %1086 = vector.extract_strided_slice %1069 {offsets = [0, 64], sizes = [8, 32], strides = [1, 1]} : vector<8x128xf32> to vector<8x32xf32>
    %1087 = math.tanh %1086 : vector<8x32xf32>
    %1088 = vector.extract_strided_slice %1069 {offsets = [0, 96], sizes = [8, 32], strides = [1, 1]} : vector<8x128xf32> to vector<8x32xf32>
    %cst_647 = arith.constant 0.000000e+00 : f32
    %1089 = vector.broadcast %cst_647 : f32 to vector<8x32xf32>
    %1090 = arith.subf %1089, %1088 : vector<8x32xf32>
    %1091 = math.exp %1090 : vector<8x32xf32>
    %cst_648 = arith.constant 1.000000e+00 : f32
    %1092 = vector.broadcast %cst_648 : f32 to vector<8x32xf32>
    %1093 = arith.addf %1092, %1091 : vector<8x32xf32>
    %cst_649 = arith.constant 1.000000e+00 : f32
    %1094 = vector.broadcast %cst_649 : f32 to vector<8x32xf32>
    %1095 = arith.divf %1094, %1093 : vector<8x32xf32>
    %c0_650 = arith.constant 0 : index
    %c0_651 = arith.constant 0 : index
    %1096 = vector.load %arg30[%c0_650, %c0_651] : memref<8x32xf32, #tpu.memory_space<vmem>>, vector<8x32xf32>
    %1097 = arith.mulf %1085, %1096 : vector<8x32xf32>
    %1098 = arith.mulf %1077, %1087 : vector<8x32xf32>
    %1099 = arith.addf %1097, %1098 : vector<8x32xf32>
    %1100 = math.tanh %1099 : vector<8x32xf32>
    %1101 = arith.mulf %1095, %1100 : vector<8x32xf32>
    %c0_652 = arith.constant 0 : index
    %c0_653 = arith.constant 0 : index
    %1102 = vector.load %arg29[%c0_652, %c0_653] : memref<8x32xf32, #tpu.memory_space<vmem>>, vector<8x32xf32>
    tpu.vector_store %arg29[%c0_652, %c0_653], %1101 {strides = array<i32>} : memref<8x32xf32, #tpu.memory_space<vmem>>, vector<8x32xf32>,
    %c0_654 = arith.constant 0 : index
    %c0_655 = arith.constant 0 : index
    %1103 = vector.load %arg30[%c0_654, %c0_655] : memref<8x32xf32, #tpu.memory_space<vmem>>, vector<8x32xf32>
    tpu.vector_store %arg30[%c0_654, %c0_655], %1099 {strides = array<i32>} : memref<8x32xf32, #tpu.memory_space<vmem>>, vector<8x32xf32>,
    %c16_656 = arith.constant 16 : index
    %c0_657 = arith.constant 0 : index
    %1104 = vector.load %arg26[%c16_656, %c0_657] : memref<32x32xf32, #tpu.memory_space<vmem>>, vector<8x32xf32>
    tpu.vector_store %arg26[%c16_656, %c0_657], %1101 {strides = array<i32>} : memref<32x32xf32, #tpu.memory_space<vmem>>, vector<8x32xf32>,
    %c0_658 = arith.constant 0 : index
    %c0_659 = arith.constant 0 : index
    %1105 = vector.load %arg29[%c0_658, %c0_659] : memref<8x32xf32, #tpu.memory_space<vmem>>, vector<8x32xf32>
    %cst_660 = arith.constant dense<0.000000e+00> : vector<8x128xf32>
    %1106 = tpu.matmul %1105, %990, %cst_660 {dimension_numbers = #tpu.dot_dimension_numbers<[1], [0], [0], [1], [0, 0, 1, 1], [], []>} : vector<8x32xf32>, vector<32x128xf32>, vector<8x128xf32> -> vector<8x128xf32>
    %1107 = arith.addf %985, %1106 : vector<8x128xf32>
    %1108 = vector.extract_strided_slice %1107 {offsets = [0, 0], sizes = [8, 32], strides = [1, 1]} : vector<8x128xf32> to vector<8x32xf32>
    %cst_661 = arith.constant 0.000000e+00 : f32
    %1109 = vector.broadcast %cst_661 : f32 to vector<8x32xf32>
    %1110 = arith.subf %1109, %1108 : vector<8x32xf32>
    %1111 = math.exp %1110 : vector<8x32xf32>
    %cst_662 = arith.constant 1.000000e+00 : f32
    %1112 = vector.broadcast %cst_662 : f32 to vector<8x32xf32>
    %1113 = arith.addf %1112, %1111 : vector<8x32xf32>
    %cst_663 = arith.constant 1.000000e+00 : f32
    %1114 = vector.broadcast %cst_663 : f32 to vector<8x32xf32>
    %1115 = arith.divf %1114, %1113 : vector<8x32xf32>
    %1116 = vector.extract_strided_slice %1107 {offsets = [0, 32], sizes = [8, 32], strides = [1, 1]} : vector<8x128xf32> to vector<8x32xf32>
    %cst_664 = arith.constant 0.000000e+00 : f32
    %1117 = vector.broadcast %cst_664 : f32 to vector<8x32xf32>
    %1118 = arith.subf %1117, %1116 : vector<8x32xf32>
    %1119 = math.exp %1118 : vector<8x32xf32>
    %cst_665 = arith.constant 1.000000e+00 : f32
    %1120 = vector.broadcast %cst_665 : f32 to vector<8x32xf32>
    %1121 = arith.addf %1120, %1119 : vector<8x32xf32>
    %cst_666 = arith.constant 1.000000e+00 : f32
    %1122 = vector.broadcast %cst_666 : f32 to vector<8x32xf32>
    %1123 = arith.divf %1122, %1121 : vector<8x32xf32>
    %1124 = vector.extract_strided_slice %1107 {offsets = [0, 64], sizes = [8, 32], strides = [1, 1]} : vector<8x128xf32> to vector<8x32xf32>
    %1125 = math.tanh %1124 : vector<8x32xf32>
    %1126 = vector.extract_strided_slice %1107 {offsets = [0, 96], sizes = [8, 32], strides = [1, 1]} : vector<8x128xf32> to vector<8x32xf32>
    %cst_667 = arith.constant 0.000000e+00 : f32
    %1127 = vector.broadcast %cst_667 : f32 to vector<8x32xf32>
    %1128 = arith.subf %1127, %1126 : vector<8x32xf32>
    %1129 = math.exp %1128 : vector<8x32xf32>
    %cst_668 = arith.constant 1.000000e+00 : f32
    %1130 = vector.broadcast %cst_668 : f32 to vector<8x32xf32>
    %1131 = arith.addf %1130, %1129 : vector<8x32xf32>
    %cst_669 = arith.constant 1.000000e+00 : f32
    %1132 = vector.broadcast %cst_669 : f32 to vector<8x32xf32>
    %1133 = arith.divf %1132, %1131 : vector<8x32xf32>
    %c0_670 = arith.constant 0 : index
    %c0_671 = arith.constant 0 : index
    %1134 = vector.load %arg30[%c0_670, %c0_671] : memref<8x32xf32, #tpu.memory_space<vmem>>, vector<8x32xf32>
    %1135 = arith.mulf %1123, %1134 : vector<8x32xf32>
    %1136 = arith.mulf %1115, %1125 : vector<8x32xf32>
    %1137 = arith.addf %1135, %1136 : vector<8x32xf32>
    %1138 = math.tanh %1137 : vector<8x32xf32>
    %1139 = arith.mulf %1133, %1138 : vector<8x32xf32>
    %c0_672 = arith.constant 0 : index
    %c0_673 = arith.constant 0 : index
    %1140 = vector.load %arg29[%c0_672, %c0_673] : memref<8x32xf32, #tpu.memory_space<vmem>>, vector<8x32xf32>
    tpu.vector_store %arg29[%c0_672, %c0_673], %1139 {strides = array<i32>} : memref<8x32xf32, #tpu.memory_space<vmem>>, vector<8x32xf32>,
    %c0_674 = arith.constant 0 : index
    %c0_675 = arith.constant 0 : index
    %1141 = vector.load %arg30[%c0_674, %c0_675] : memref<8x32xf32, #tpu.memory_space<vmem>>, vector<8x32xf32>
    tpu.vector_store %arg30[%c0_674, %c0_675], %1137 {strides = array<i32>} : memref<8x32xf32, #tpu.memory_space<vmem>>, vector<8x32xf32>,
    %c24_676 = arith.constant 24 : index
    %c0_677 = arith.constant 0 : index
    %1142 = vector.load %arg26[%c24_676, %c0_677] : memref<32x32xf32, #tpu.memory_space<vmem>>, vector<8x32xf32>
    tpu.vector_store %arg26[%c24_676, %c0_677], %1139 {strides = array<i32>} : memref<32x32xf32, #tpu.memory_space<vmem>>, vector<8x32xf32>,
    %c0_678 = arith.constant 0 : index
    %c0_679 = arith.constant 0 : index
    %1143 = vector.load %arg29[%c0_678, %c0_679] : memref<8x32xf32, #tpu.memory_space<vmem>>, vector<8x32xf32>
    %c0_680 = arith.constant 0 : index
    %c0_681 = arith.constant 0 : index
    %1144 = vector.load %arg30[%c0_680, %c0_681] : memref<8x32xf32, #tpu.memory_space<vmem>>, vector<8x32xf32>
    %c0_682 = arith.constant 0 : index
    %c0_683 = arith.constant 0 : index
    %1145 = vector.load %arg26[%c0_682, %c0_683] : memref<32x32xf32, #tpu.memory_space<vmem>>, vector<32x32xf32>
    %c0_684 = arith.constant 0 : index
    %c0_685 = arith.constant 0 : index
    %1146 = vector.load %arg13[%c0_684, %c0_685] : memref<32x128xf32, #tpu.memory_space<vmem>>, vector<32x128xf32>
    %cst_686 = arith.constant dense<0.000000e+00> : vector<32x128xf32>
    %1147 = tpu.matmul %1145, %1146, %cst_686 {dimension_numbers = #tpu.dot_dimension_numbers<[1], [0], [0], [1], [0, 0, 1, 1], [], []>} : vector<32x32xf32>, vector<32x128xf32>, vector<32x128xf32> -> vector<32x128xf32>
    %c0_687 = arith.constant 0 : index
    %c0_688 = arith.constant 0 : index
    %1148 = vector.load %arg15[%c0_687, %c0_688] : memref<1x128xf32, #tpu.memory_space<vmem>>, vector<1x128xf32>
    %1149 = vector.broadcast %1148 : vector<1x128xf32> to vector<32x128xf32>
    %1150 = arith.addf %1147, %1149 : vector<32x128xf32>
    %c0_689 = arith.constant 0 : index
    %c0_690 = arith.constant 0 : index
    %1151 = vector.load %arg28[%c0_689, %c0_690] : memref<32x128xf32, #tpu.memory_space<vmem>>, vector<32x128xf32>
    tpu.vector_store %arg28[%c0_689, %c0_690], %1150 {strides = array<i32>} : memref<32x128xf32, #tpu.memory_space<vmem>>, vector<32x128xf32>,
    %cst_691 = arith.constant 0.000000e+00 : f32
    %1152 = vector.broadcast %cst_691 : f32 to vector<8x32xf32>
    %c0_692 = arith.constant 0 : index
    %c0_693 = arith.constant 0 : index
    %1153 = vector.load %arg29[%c0_692, %c0_693] : memref<8x32xf32, #tpu.memory_space<vmem>>, vector<8x32xf32>
    tpu.vector_store %arg29[%c0_692, %c0_693], %1152 {strides = array<i32>} : memref<8x32xf32, #tpu.memory_space<vmem>>, vector<8x32xf32>,
    %cst_694 = arith.constant 0.000000e+00 : f32
    %1154 = vector.broadcast %cst_694 : f32 to vector<8x32xf32>
    %c0_695 = arith.constant 0 : index
    %c0_696 = arith.constant 0 : index
    %1155 = vector.load %arg30[%c0_695, %c0_696] : memref<8x32xf32, #tpu.memory_space<vmem>>, vector<8x32xf32>
    tpu.vector_store %arg30[%c0_695, %c0_696], %1154 {strides = array<i32>} : memref<8x32xf32, #tpu.memory_space<vmem>>, vector<8x32xf32>,
    %c0_697 = arith.constant 0 : index
    %c0_698 = arith.constant 0 : index
    %1156 = vector.load %arg14[%c0_697, %c0_698] : memref<32x128xf32, #tpu.memory_space<vmem>>, vector<32x128xf32>
    %c0_699 = arith.constant 0 : index
    %c0_700 = arith.constant 0 : index
    %1157 = vector.load %arg28[%c0_699, %c0_700] : memref<32x128xf32, #tpu.memory_space<vmem>>, vector<8x128xf32>
    %c0_701 = arith.constant 0 : index
    %c0_702 = arith.constant 0 : index
    %1158 = vector.load %arg29[%c0_701, %c0_702] : memref<8x32xf32, #tpu.memory_space<vmem>>, vector<8x32xf32>
    %cst_703 = arith.constant dense<0.000000e+00> : vector<8x128xf32>
    %1159 = tpu.matmul %1158, %1156, %cst_703 {dimension_numbers = #tpu.dot_dimension_numbers<[1], [0], [0], [1], [0, 0, 1, 1], [], []>} : vector<8x32xf32>, vector<32x128xf32>, vector<8x128xf32> -> vector<8x128xf32>
    %1160 = arith.addf %1157, %1159 : vector<8x128xf32>
    %1161 = vector.extract_strided_slice %1160 {offsets = [0, 0], sizes = [8, 32], strides = [1, 1]} : vector<8x128xf32> to vector<8x32xf32>
    %cst_704 = arith.constant 0.000000e+00 : f32
    %1162 = vector.broadcast %cst_704 : f32 to vector<8x32xf32>
    %1163 = arith.subf %1162, %1161 : vector<8x32xf32>
    %1164 = math.exp %1163 : vector<8x32xf32>
    %cst_705 = arith.constant 1.000000e+00 : f32
    %1165 = vector.broadcast %cst_705 : f32 to vector<8x32xf32>
    %1166 = arith.addf %1165, %1164 : vector<8x32xf32>
    %cst_706 = arith.constant 1.000000e+00 : f32
    %1167 = vector.broadcast %cst_706 : f32 to vector<8x32xf32>
    %1168 = arith.divf %1167, %1166 : vector<8x32xf32>
    %1169 = vector.extract_strided_slice %1160 {offsets = [0, 32], sizes = [8, 32], strides = [1, 1]} : vector<8x128xf32> to vector<8x32xf32>
    %cst_707 = arith.constant 0.000000e+00 : f32
    %1170 = vector.broadcast %cst_707 : f32 to vector<8x32xf32>
    %1171 = arith.subf %1170, %1169 : vector<8x32xf32>
    %1172 = math.exp %1171 : vector<8x32xf32>
    %cst_708 = arith.constant 1.000000e+00 : f32
    %1173 = vector.broadcast %cst_708 : f32 to vector<8x32xf32>
    %1174 = arith.addf %1173, %1172 : vector<8x32xf32>
    %cst_709 = arith.constant 1.000000e+00 : f32
    %1175 = vector.broadcast %cst_709 : f32 to vector<8x32xf32>
    %1176 = arith.divf %1175, %1174 : vector<8x32xf32>
    %1177 = vector.extract_strided_slice %1160 {offsets = [0, 64], sizes = [8, 32], strides = [1, 1]} : vector<8x128xf32> to vector<8x32xf32>
    %1178 = math.tanh %1177 : vector<8x32xf32>
    %1179 = vector.extract_strided_slice %1160 {offsets = [0, 96], sizes = [8, 32], strides = [1, 1]} : vector<8x128xf32> to vector<8x32xf32>
    %cst_710 = arith.constant 0.000000e+00 : f32
    %1180 = vector.broadcast %cst_710 : f32 to vector<8x32xf32>
    %1181 = arith.subf %1180, %1179 : vector<8x32xf32>
    %1182 = math.exp %1181 : vector<8x32xf32>
    %cst_711 = arith.constant 1.000000e+00 : f32
    %1183 = vector.broadcast %cst_711 : f32 to vector<8x32xf32>
    %1184 = arith.addf %1183, %1182 : vector<8x32xf32>
    %cst_712 = arith.constant 1.000000e+00 : f32
    %1185 = vector.broadcast %cst_712 : f32 to vector<8x32xf32>
    %1186 = arith.divf %1185, %1184 : vector<8x32xf32>
    %c0_713 = arith.constant 0 : index
    %c0_714 = arith.constant 0 : index
    %1187 = vector.load %arg30[%c0_713, %c0_714] : memref<8x32xf32, #tpu.memory_space<vmem>>, vector<8x32xf32>
    %1188 = arith.mulf %1176, %1187 : vector<8x32xf32>
    %1189 = arith.mulf %1168, %1178 : vector<8x32xf32>
    %1190 = arith.addf %1188, %1189 : vector<8x32xf32>
    %1191 = math.tanh %1190 : vector<8x32xf32>
    %1192 = arith.mulf %1186, %1191 : vector<8x32xf32>
    %c0_715 = arith.constant 0 : index
    %c0_716 = arith.constant 0 : index
    %1193 = vector.load %arg29[%c0_715, %c0_716] : memref<8x32xf32, #tpu.memory_space<vmem>>, vector<8x32xf32>
    tpu.vector_store %arg29[%c0_715, %c0_716], %1192 {strides = array<i32>} : memref<8x32xf32, #tpu.memory_space<vmem>>, vector<8x32xf32>,
    %c0_717 = arith.constant 0 : index
    %c0_718 = arith.constant 0 : index
    %1194 = vector.load %arg30[%c0_717, %c0_718] : memref<8x32xf32, #tpu.memory_space<vmem>>, vector<8x32xf32>
    tpu.vector_store %arg30[%c0_717, %c0_718], %1190 {strides = array<i32>} : memref<8x32xf32, #tpu.memory_space<vmem>>, vector<8x32xf32>,
    %c0_719 = arith.constant 0 : index
    %c0_720 = arith.constant 0 : index
    %1195 = vector.load %arg26[%c0_719, %c0_720] : memref<32x32xf32, #tpu.memory_space<vmem>>, vector<8x32xf32>
    tpu.vector_store %arg26[%c0_719, %c0_720], %1192 {strides = array<i32>} : memref<32x32xf32, #tpu.memory_space<vmem>>, vector<8x32xf32>,
    %c8_721 = arith.constant 8 : index
    %c0_722 = arith.constant 0 : index
    %1196 = vector.load %arg28[%c8_721, %c0_722] : memref<32x128xf32, #tpu.memory_space<vmem>>, vector<8x128xf32>
    %c0_723 = arith.constant 0 : index
    %c0_724 = arith.constant 0 : index
    %1197 = vector.load %arg29[%c0_723, %c0_724] : memref<8x32xf32, #tpu.memory_space<vmem>>, vector<8x32xf32>
    %cst_725 = arith.constant dense<0.000000e+00> : vector<8x128xf32>
    %1198 = tpu.matmul %1197, %1156, %cst_725 {dimension_numbers = #tpu.dot_dimension_numbers<[1], [0], [0], [1], [0, 0, 1, 1], [], []>} : vector<8x32xf32>, vector<32x128xf32>, vector<8x128xf32> -> vector<8x128xf32>
    %1199 = arith.addf %1196, %1198 : vector<8x128xf32>
    %1200 = vector.extract_strided_slice %1199 {offsets = [0, 0], sizes = [8, 32], strides = [1, 1]} : vector<8x128xf32> to vector<8x32xf32>
    %cst_726 = arith.constant 0.000000e+00 : f32
    %1201 = vector.broadcast %cst_726 : f32 to vector<8x32xf32>
    %1202 = arith.subf %1201, %1200 : vector<8x32xf32>
    %1203 = math.exp %1202 : vector<8x32xf32>
    %cst_727 = arith.constant 1.000000e+00 : f32
    %1204 = vector.broadcast %cst_727 : f32 to vector<8x32xf32>
    %1205 = arith.addf %1204, %1203 : vector<8x32xf32>
    %cst_728 = arith.constant 1.000000e+00 : f32
    %1206 = vector.broadcast %cst_728 : f32 to vector<8x32xf32>
    %1207 = arith.divf %1206, %1205 : vector<8x32xf32>
    %1208 = vector.extract_strided_slice %1199 {offsets = [0, 32], sizes = [8, 32], strides = [1, 1]} : vector<8x128xf32> to vector<8x32xf32>
    %cst_729 = arith.constant 0.000000e+00 : f32
    %1209 = vector.broadcast %cst_729 : f32 to vector<8x32xf32>
    %1210 = arith.subf %1209, %1208 : vector<8x32xf32>
    %1211 = math.exp %1210 : vector<8x32xf32>
    %cst_730 = arith.constant 1.000000e+00 : f32
    %1212 = vector.broadcast %cst_730 : f32 to vector<8x32xf32>
    %1213 = arith.addf %1212, %1211 : vector<8x32xf32>
    %cst_731 = arith.constant 1.000000e+00 : f32
    %1214 = vector.broadcast %cst_731 : f32 to vector<8x32xf32>
    %1215 = arith.divf %1214, %1213 : vector<8x32xf32>
    %1216 = vector.extract_strided_slice %1199 {offsets = [0, 64], sizes = [8, 32], strides = [1, 1]} : vector<8x128xf32> to vector<8x32xf32>
    %1217 = math.tanh %1216 : vector<8x32xf32>
    %1218 = vector.extract_strided_slice %1199 {offsets = [0, 96], sizes = [8, 32], strides = [1, 1]} : vector<8x128xf32> to vector<8x32xf32>
    %cst_732 = arith.constant 0.000000e+00 : f32
    %1219 = vector.broadcast %cst_732 : f32 to vector<8x32xf32>
    %1220 = arith.subf %1219, %1218 : vector<8x32xf32>
    %1221 = math.exp %1220 : vector<8x32xf32>
    %cst_733 = arith.constant 1.000000e+00 : f32
    %1222 = vector.broadcast %cst_733 : f32 to vector<8x32xf32>
    %1223 = arith.addf %1222, %1221 : vector<8x32xf32>
    %cst_734 = arith.constant 1.000000e+00 : f32
    %1224 = vector.broadcast %cst_734 : f32 to vector<8x32xf32>
    %1225 = arith.divf %1224, %1223 : vector<8x32xf32>
    %c0_735 = arith.constant 0 : index
    %c0_736 = arith.constant 0 : index
    %1226 = vector.load %arg30[%c0_735, %c0_736] : memref<8x32xf32, #tpu.memory_space<vmem>>, vector<8x32xf32>
    %1227 = arith.mulf %1215, %1226 : vector<8x32xf32>
    %1228 = arith.mulf %1207, %1217 : vector<8x32xf32>
    %1229 = arith.addf %1227, %1228 : vector<8x32xf32>
    %1230 = math.tanh %1229 : vector<8x32xf32>
    %1231 = arith.mulf %1225, %1230 : vector<8x32xf32>
    %c0_737 = arith.constant 0 : index
    %c0_738 = arith.constant 0 : index
    %1232 = vector.load %arg29[%c0_737, %c0_738] : memref<8x32xf32, #tpu.memory_space<vmem>>, vector<8x32xf32>
    tpu.vector_store %arg29[%c0_737, %c0_738], %1231 {strides = array<i32>} : memref<8x32xf32, #tpu.memory_space<vmem>>, vector<8x32xf32>,
    %c0_739 = arith.constant 0 : index
    %c0_740 = arith.constant 0 : index
    %1233 = vector.load %arg30[%c0_739, %c0_740] : memref<8x32xf32, #tpu.memory_space<vmem>>, vector<8x32xf32>
    tpu.vector_store %arg30[%c0_739, %c0_740], %1229 {strides = array<i32>} : memref<8x32xf32, #tpu.memory_space<vmem>>, vector<8x32xf32>,
    %c8_741 = arith.constant 8 : index
    %c0_742 = arith.constant 0 : index
    %1234 = vector.load %arg26[%c8_741, %c0_742] : memref<32x32xf32, #tpu.memory_space<vmem>>, vector<8x32xf32>
    tpu.vector_store %arg26[%c8_741, %c0_742], %1231 {strides = array<i32>} : memref<32x32xf32, #tpu.memory_space<vmem>>, vector<8x32xf32>,
    %c16_743 = arith.constant 16 : index
    %c0_744 = arith.constant 0 : index
    %1235 = vector.load %arg28[%c16_743, %c0_744] : memref<32x128xf32, #tpu.memory_space<vmem>>, vector<8x128xf32>
    %c0_745 = arith.constant 0 : index
    %c0_746 = arith.constant 0 : index
    %1236 = vector.load %arg29[%c0_745, %c0_746] : memref<8x32xf32, #tpu.memory_space<vmem>>, vector<8x32xf32>
    %cst_747 = arith.constant dense<0.000000e+00> : vector<8x128xf32>
    %1237 = tpu.matmul %1236, %1156, %cst_747 {dimension_numbers = #tpu.dot_dimension_numbers<[1], [0], [0], [1], [0, 0, 1, 1], [], []>} : vector<8x32xf32>, vector<32x128xf32>, vector<8x128xf32> -> vector<8x128xf32>
    %1238 = arith.addf %1235, %1237 : vector<8x128xf32>
    %1239 = vector.extract_strided_slice %1238 {offsets = [0, 0], sizes = [8, 32], strides = [1, 1]} : vector<8x128xf32> to vector<8x32xf32>
    %cst_748 = arith.constant 0.000000e+00 : f32
    %1240 = vector.broadcast %cst_748 : f32 to vector<8x32xf32>
    %1241 = arith.subf %1240, %1239 : vector<8x32xf32>
    %1242 = math.exp %1241 : vector<8x32xf32>
    %cst_749 = arith.constant 1.000000e+00 : f32
    %1243 = vector.broadcast %cst_749 : f32 to vector<8x32xf32>
    %1244 = arith.addf %1243, %1242 : vector<8x32xf32>
    %cst_750 = arith.constant 1.000000e+00 : f32
    %1245 = vector.broadcast %cst_750 : f32 to vector<8x32xf32>
    %1246 = arith.divf %1245, %1244 : vector<8x32xf32>
    %1247 = vector.extract_strided_slice %1238 {offsets = [0, 32], sizes = [8, 32], strides = [1, 1]} : vector<8x128xf32> to vector<8x32xf32>
    %cst_751 = arith.constant 0.000000e+00 : f32
    %1248 = vector.broadcast %cst_751 : f32 to vector<8x32xf32>
    %1249 = arith.subf %1248, %1247 : vector<8x32xf32>
    %1250 = math.exp %1249 : vector<8x32xf32>
    %cst_752 = arith.constant 1.000000e+00 : f32
    %1251 = vector.broadcast %cst_752 : f32 to vector<8x32xf32>
    %1252 = arith.addf %1251, %1250 : vector<8x32xf32>
    %cst_753 = arith.constant 1.000000e+00 : f32
    %1253 = vector.broadcast %cst_753 : f32 to vector<8x32xf32>
    %1254 = arith.divf %1253, %1252 : vector<8x32xf32>
    %1255 = vector.extract_strided_slice %1238 {offsets = [0, 64], sizes = [8, 32], strides = [1, 1]} : vector<8x128xf32> to vector<8x32xf32>
    %1256 = math.tanh %1255 : vector<8x32xf32>
    %1257 = vector.extract_strided_slice %1238 {offsets = [0, 96], sizes = [8, 32], strides = [1, 1]} : vector<8x128xf32> to vector<8x32xf32>
    %cst_754 = arith.constant 0.000000e+00 : f32
    %1258 = vector.broadcast %cst_754 : f32 to vector<8x32xf32>
    %1259 = arith.subf %1258, %1257 : vector<8x32xf32>
    %1260 = math.exp %1259 : vector<8x32xf32>
    %cst_755 = arith.constant 1.000000e+00 : f32
    %1261 = vector.broadcast %cst_755 : f32 to vector<8x32xf32>
    %1262 = arith.addf %1261, %1260 : vector<8x32xf32>
    %cst_756 = arith.constant 1.000000e+00 : f32
    %1263 = vector.broadcast %cst_756 : f32 to vector<8x32xf32>
    %1264 = arith.divf %1263, %1262 : vector<8x32xf32>
    %c0_757 = arith.constant 0 : index
    %c0_758 = arith.constant 0 : index
    %1265 = vector.load %arg30[%c0_757, %c0_758] : memref<8x32xf32, #tpu.memory_space<vmem>>, vector<8x32xf32>
    %1266 = arith.mulf %1254, %1265 : vector<8x32xf32>
    %1267 = arith.mulf %1246, %1256 : vector<8x32xf32>
    %1268 = arith.addf %1266, %1267 : vector<8x32xf32>
    %1269 = math.tanh %1268 : vector<8x32xf32>
    %1270 = arith.mulf %1264, %1269 : vector<8x32xf32>
    %c0_759 = arith.constant 0 : index
    %c0_760 = arith.constant 0 : index
    %1271 = vector.load %arg29[%c0_759, %c0_760] : memref<8x32xf32, #tpu.memory_space<vmem>>, vector<8x32xf32>
    tpu.vector_store %arg29[%c0_759, %c0_760], %1270 {strides = array<i32>} : memref<8x32xf32, #tpu.memory_space<vmem>>, vector<8x32xf32>,
    %c0_761 = arith.constant 0 : index
    %c0_762 = arith.constant 0 : index
    %1272 = vector.load %arg30[%c0_761, %c0_762] : memref<8x32xf32, #tpu.memory_space<vmem>>, vector<8x32xf32>
    tpu.vector_store %arg30[%c0_761, %c0_762], %1268 {strides = array<i32>} : memref<8x32xf32, #tpu.memory_space<vmem>>, vector<8x32xf32>,
    %c16_763 = arith.constant 16 : index
    %c0_764 = arith.constant 0 : index
    %1273 = vector.load %arg26[%c16_763, %c0_764] : memref<32x32xf32, #tpu.memory_space<vmem>>, vector<8x32xf32>
    tpu.vector_store %arg26[%c16_763, %c0_764], %1270 {strides = array<i32>} : memref<32x32xf32, #tpu.memory_space<vmem>>, vector<8x32xf32>,
    %c24_765 = arith.constant 24 : index
    %c0_766 = arith.constant 0 : index
    %1274 = vector.load %arg28[%c24_765, %c0_766] : memref<32x128xf32, #tpu.memory_space<vmem>>, vector<8x128xf32>
    %c0_767 = arith.constant 0 : index
    %c0_768 = arith.constant 0 : index
    %1275 = vector.load %arg29[%c0_767, %c0_768] : memref<8x32xf32, #tpu.memory_space<vmem>>, vector<8x32xf32>
    %cst_769 = arith.constant dense<0.000000e+00> : vector<8x128xf32>
    %1276 = tpu.matmul %1275, %1156, %cst_769 {dimension_numbers = #tpu.dot_dimension_numbers<[1], [0], [0], [1], [0, 0, 1, 1], [], []>} : vector<8x32xf32>, vector<32x128xf32>, vector<8x128xf32> -> vector<8x128xf32>
    %1277 = arith.addf %1274, %1276 : vector<8x128xf32>
    %1278 = vector.extract_strided_slice %1277 {offsets = [0, 0], sizes = [8, 32], strides = [1, 1]} : vector<8x128xf32> to vector<8x32xf32>
    %cst_770 = arith.constant 0.000000e+00 : f32
    %1279 = vector.broadcast %cst_770 : f32 to vector<8x32xf32>
    %1280 = arith.subf %1279, %1278 : vector<8x32xf32>
    %1281 = math.exp %1280 : vector<8x32xf32>
    %cst_771 = arith.constant 1.000000e+00 : f32
    %1282 = vector.broadcast %cst_771 : f32 to vector<8x32xf32>
    %1283 = arith.addf %1282, %1281 : vector<8x32xf32>
    %cst_772 = arith.constant 1.000000e+00 : f32
    %1284 = vector.broadcast %cst_772 : f32 to vector<8x32xf32>
    %1285 = arith.divf %1284, %1283 : vector<8x32xf32>
    %1286 = vector.extract_strided_slice %1277 {offsets = [0, 32], sizes = [8, 32], strides = [1, 1]} : vector<8x128xf32> to vector<8x32xf32>
    %cst_773 = arith.constant 0.000000e+00 : f32
    %1287 = vector.broadcast %cst_773 : f32 to vector<8x32xf32>
    %1288 = arith.subf %1287, %1286 : vector<8x32xf32>
    %1289 = math.exp %1288 : vector<8x32xf32>
    %cst_774 = arith.constant 1.000000e+00 : f32
    %1290 = vector.broadcast %cst_774 : f32 to vector<8x32xf32>
    %1291 = arith.addf %1290, %1289 : vector<8x32xf32>
    %cst_775 = arith.constant 1.000000e+00 : f32
    %1292 = vector.broadcast %cst_775 : f32 to vector<8x32xf32>
    %1293 = arith.divf %1292, %1291 : vector<8x32xf32>
    %1294 = vector.extract_strided_slice %1277 {offsets = [0, 64], sizes = [8, 32], strides = [1, 1]} : vector<8x128xf32> to vector<8x32xf32>
    %1295 = math.tanh %1294 : vector<8x32xf32>
    %1296 = vector.extract_strided_slice %1277 {offsets = [0, 96], sizes = [8, 32], strides = [1, 1]} : vector<8x128xf32> to vector<8x32xf32>
    %cst_776 = arith.constant 0.000000e+00 : f32
    %1297 = vector.broadcast %cst_776 : f32 to vector<8x32xf32>
    %1298 = arith.subf %1297, %1296 : vector<8x32xf32>
    %1299 = math.exp %1298 : vector<8x32xf32>
    %cst_777 = arith.constant 1.000000e+00 : f32
    %1300 = vector.broadcast %cst_777 : f32 to vector<8x32xf32>
    %1301 = arith.addf %1300, %1299 : vector<8x32xf32>
    %cst_778 = arith.constant 1.000000e+00 : f32
    %1302 = vector.broadcast %cst_778 : f32 to vector<8x32xf32>
    %1303 = arith.divf %1302, %1301 : vector<8x32xf32>
    %c0_779 = arith.constant 0 : index
    %c0_780 = arith.constant 0 : index
    %1304 = vector.load %arg30[%c0_779, %c0_780] : memref<8x32xf32, #tpu.memory_space<vmem>>, vector<8x32xf32>
    %1305 = arith.mulf %1293, %1304 : vector<8x32xf32>
    %1306 = arith.mulf %1285, %1295 : vector<8x32xf32>
    %1307 = arith.addf %1305, %1306 : vector<8x32xf32>
    %1308 = math.tanh %1307 : vector<8x32xf32>
    %1309 = arith.mulf %1303, %1308 : vector<8x32xf32>
    %c0_781 = arith.constant 0 : index
    %c0_782 = arith.constant 0 : index
    %1310 = vector.load %arg29[%c0_781, %c0_782] : memref<8x32xf32, #tpu.memory_space<vmem>>, vector<8x32xf32>
    tpu.vector_store %arg29[%c0_781, %c0_782], %1309 {strides = array<i32>} : memref<8x32xf32, #tpu.memory_space<vmem>>, vector<8x32xf32>,
    %c0_783 = arith.constant 0 : index
    %c0_784 = arith.constant 0 : index
    %1311 = vector.load %arg30[%c0_783, %c0_784] : memref<8x32xf32, #tpu.memory_space<vmem>>, vector<8x32xf32>
    tpu.vector_store %arg30[%c0_783, %c0_784], %1307 {strides = array<i32>} : memref<8x32xf32, #tpu.memory_space<vmem>>, vector<8x32xf32>,
    %c24_785 = arith.constant 24 : index
    %c0_786 = arith.constant 0 : index
    %1312 = vector.load %arg26[%c24_785, %c0_786] : memref<32x32xf32, #tpu.memory_space<vmem>>, vector<8x32xf32>
    tpu.vector_store %arg26[%c24_785, %c0_786], %1309 {strides = array<i32>} : memref<32x32xf32, #tpu.memory_space<vmem>>, vector<8x32xf32>,
    %c0_787 = arith.constant 0 : index
    %c0_788 = arith.constant 0 : index
    %1313 = vector.load %arg29[%c0_787, %c0_788] : memref<8x32xf32, #tpu.memory_space<vmem>>, vector<8x32xf32>
    %c0_789 = arith.constant 0 : index
    %c0_790 = arith.constant 0 : index
    %1314 = vector.load %arg30[%c0_789, %c0_790] : memref<8x32xf32, #tpu.memory_space<vmem>>, vector<8x32xf32>
    %c0_791 = arith.constant 0 : index
    %c0_792 = arith.constant 0 : index
    %1315 = vector.load %arg26[%c0_791, %c0_792] : memref<32x32xf32, #tpu.memory_space<vmem>>, vector<32x32xf32>
    %c0_793 = arith.constant 0 : index
    %c0_794 = arith.constant 0 : index
    %1316 = vector.load %arg16[%c0_793, %c0_794] : memref<32x128xf32, #tpu.memory_space<vmem>>, vector<32x128xf32>
    %cst_795 = arith.constant dense<0.000000e+00> : vector<32x128xf32>
    %1317 = tpu.matmul %1315, %1316, %cst_795 {dimension_numbers = #tpu.dot_dimension_numbers<[1], [0], [0], [1], [0, 0, 1, 1], [], []>} : vector<32x32xf32>, vector<32x128xf32>, vector<32x128xf32> -> vector<32x128xf32>
    %c0_796 = arith.constant 0 : index
    %c0_797 = arith.constant 0 : index
    %1318 = vector.load %arg18[%c0_796, %c0_797] : memref<1x128xf32, #tpu.memory_space<vmem>>, vector<1x128xf32>
    %1319 = vector.broadcast %1318 : vector<1x128xf32> to vector<32x128xf32>
    %1320 = arith.addf %1317, %1319 : vector<32x128xf32>
    %c0_798 = arith.constant 0 : index
    %c0_799 = arith.constant 0 : index
    %1321 = vector.load %arg28[%c0_798, %c0_799] : memref<32x128xf32, #tpu.memory_space<vmem>>, vector<32x128xf32>
    tpu.vector_store %arg28[%c0_798, %c0_799], %1320 {strides = array<i32>} : memref<32x128xf32, #tpu.memory_space<vmem>>, vector<32x128xf32>,
    %cst_800 = arith.constant 0.000000e+00 : f32
    %1322 = vector.broadcast %cst_800 : f32 to vector<8x32xf32>
    %c0_801 = arith.constant 0 : index
    %c0_802 = arith.constant 0 : index
    %1323 = vector.load %arg29[%c0_801, %c0_802] : memref<8x32xf32, #tpu.memory_space<vmem>>, vector<8x32xf32>
    tpu.vector_store %arg29[%c0_801, %c0_802], %1322 {strides = array<i32>} : memref<8x32xf32, #tpu.memory_space<vmem>>, vector<8x32xf32>,
    %cst_803 = arith.constant 0.000000e+00 : f32
    %1324 = vector.broadcast %cst_803 : f32 to vector<8x32xf32>
    %c0_804 = arith.constant 0 : index
    %c0_805 = arith.constant 0 : index
    %1325 = vector.load %arg30[%c0_804, %c0_805] : memref<8x32xf32, #tpu.memory_space<vmem>>, vector<8x32xf32>
    tpu.vector_store %arg30[%c0_804, %c0_805], %1324 {strides = array<i32>} : memref<8x32xf32, #tpu.memory_space<vmem>>, vector<8x32xf32>,
    %c0_806 = arith.constant 0 : index
    %c0_807 = arith.constant 0 : index
    %1326 = vector.load %arg17[%c0_806, %c0_807] : memref<32x128xf32, #tpu.memory_space<vmem>>, vector<32x128xf32>
    %c0_808 = arith.constant 0 : index
    %c0_809 = arith.constant 0 : index
    %1327 = vector.load %arg28[%c0_808, %c0_809] : memref<32x128xf32, #tpu.memory_space<vmem>>, vector<8x128xf32>
    %c0_810 = arith.constant 0 : index
    %c0_811 = arith.constant 0 : index
    %1328 = vector.load %arg29[%c0_810, %c0_811] : memref<8x32xf32, #tpu.memory_space<vmem>>, vector<8x32xf32>
    %cst_812 = arith.constant dense<0.000000e+00> : vector<8x128xf32>
    %1329 = tpu.matmul %1328, %1326, %cst_812 {dimension_numbers = #tpu.dot_dimension_numbers<[1], [0], [0], [1], [0, 0, 1, 1], [], []>} : vector<8x32xf32>, vector<32x128xf32>, vector<8x128xf32> -> vector<8x128xf32>
    %1330 = arith.addf %1327, %1329 : vector<8x128xf32>
    %1331 = vector.extract_strided_slice %1330 {offsets = [0, 0], sizes = [8, 32], strides = [1, 1]} : vector<8x128xf32> to vector<8x32xf32>
    %cst_813 = arith.constant 0.000000e+00 : f32
    %1332 = vector.broadcast %cst_813 : f32 to vector<8x32xf32>
    %1333 = arith.subf %1332, %1331 : vector<8x32xf32>
    %1334 = math.exp %1333 : vector<8x32xf32>
    %cst_814 = arith.constant 1.000000e+00 : f32
    %1335 = vector.broadcast %cst_814 : f32 to vector<8x32xf32>
    %1336 = arith.addf %1335, %1334 : vector<8x32xf32>
    %cst_815 = arith.constant 1.000000e+00 : f32
    %1337 = vector.broadcast %cst_815 : f32 to vector<8x32xf32>
    %1338 = arith.divf %1337, %1336 : vector<8x32xf32>
    %1339 = vector.extract_strided_slice %1330 {offsets = [0, 32], sizes = [8, 32], strides = [1, 1]} : vector<8x128xf32> to vector<8x32xf32>
    %cst_816 = arith.constant 0.000000e+00 : f32
    %1340 = vector.broadcast %cst_816 : f32 to vector<8x32xf32>
    %1341 = arith.subf %1340, %1339 : vector<8x32xf32>
    %1342 = math.exp %1341 : vector<8x32xf32>
    %cst_817 = arith.constant 1.000000e+00 : f32
    %1343 = vector.broadcast %cst_817 : f32 to vector<8x32xf32>
    %1344 = arith.addf %1343, %1342 : vector<8x32xf32>
    %cst_818 = arith.constant 1.000000e+00 : f32
    %1345 = vector.broadcast %cst_818 : f32 to vector<8x32xf32>
    %1346 = arith.divf %1345, %1344 : vector<8x32xf32>
    %1347 = vector.extract_strided_slice %1330 {offsets = [0, 64], sizes = [8, 32], strides = [1, 1]} : vector<8x128xf32> to vector<8x32xf32>
    %1348 = math.tanh %1347 : vector<8x32xf32>
    %1349 = vector.extract_strided_slice %1330 {offsets = [0, 96], sizes = [8, 32], strides = [1, 1]} : vector<8x128xf32> to vector<8x32xf32>
    %cst_819 = arith.constant 0.000000e+00 : f32
    %1350 = vector.broadcast %cst_819 : f32 to vector<8x32xf32>
    %1351 = arith.subf %1350, %1349 : vector<8x32xf32>
    %1352 = math.exp %1351 : vector<8x32xf32>
    %cst_820 = arith.constant 1.000000e+00 : f32
    %1353 = vector.broadcast %cst_820 : f32 to vector<8x32xf32>
    %1354 = arith.addf %1353, %1352 : vector<8x32xf32>
    %cst_821 = arith.constant 1.000000e+00 : f32
    %1355 = vector.broadcast %cst_821 : f32 to vector<8x32xf32>
    %1356 = arith.divf %1355, %1354 : vector<8x32xf32>
    %c0_822 = arith.constant 0 : index
    %c0_823 = arith.constant 0 : index
    %1357 = vector.load %arg30[%c0_822, %c0_823] : memref<8x32xf32, #tpu.memory_space<vmem>>, vector<8x32xf32>
    %1358 = arith.mulf %1346, %1357 : vector<8x32xf32>
    %1359 = arith.mulf %1338, %1348 : vector<8x32xf32>
    %1360 = arith.addf %1358, %1359 : vector<8x32xf32>
    %1361 = math.tanh %1360 : vector<8x32xf32>
    %1362 = arith.mulf %1356, %1361 : vector<8x32xf32>
    %c0_824 = arith.constant 0 : index
    %c0_825 = arith.constant 0 : index
    %1363 = vector.load %arg29[%c0_824, %c0_825] : memref<8x32xf32, #tpu.memory_space<vmem>>, vector<8x32xf32>
    tpu.vector_store %arg29[%c0_824, %c0_825], %1362 {strides = array<i32>} : memref<8x32xf32, #tpu.memory_space<vmem>>, vector<8x32xf32>,
    %c0_826 = arith.constant 0 : index
    %c0_827 = arith.constant 0 : index
    %1364 = vector.load %arg30[%c0_826, %c0_827] : memref<8x32xf32, #tpu.memory_space<vmem>>, vector<8x32xf32>
    tpu.vector_store %arg30[%c0_826, %c0_827], %1360 {strides = array<i32>} : memref<8x32xf32, #tpu.memory_space<vmem>>, vector<8x32xf32>,
    %c0_828 = arith.constant 0 : index
    %c0_829 = arith.constant 0 : index
    %1365 = vector.load %arg26[%c0_828, %c0_829] : memref<32x32xf32, #tpu.memory_space<vmem>>, vector<8x32xf32>
    tpu.vector_store %arg26[%c0_828, %c0_829], %1362 {strides = array<i32>} : memref<32x32xf32, #tpu.memory_space<vmem>>, vector<8x32xf32>,
    %c8_830 = arith.constant 8 : index
    %c0_831 = arith.constant 0 : index
    %1366 = vector.load %arg28[%c8_830, %c0_831] : memref<32x128xf32, #tpu.memory_space<vmem>>, vector<8x128xf32>
    %c0_832 = arith.constant 0 : index
    %c0_833 = arith.constant 0 : index
    %1367 = vector.load %arg29[%c0_832, %c0_833] : memref<8x32xf32, #tpu.memory_space<vmem>>, vector<8x32xf32>
    %cst_834 = arith.constant dense<0.000000e+00> : vector<8x128xf32>
    %1368 = tpu.matmul %1367, %1326, %cst_834 {dimension_numbers = #tpu.dot_dimension_numbers<[1], [0], [0], [1], [0, 0, 1, 1], [], []>} : vector<8x32xf32>, vector<32x128xf32>, vector<8x128xf32> -> vector<8x128xf32>
    %1369 = arith.addf %1366, %1368 : vector<8x128xf32>
    %1370 = vector.extract_strided_slice %1369 {offsets = [0, 0], sizes = [8, 32], strides = [1, 1]} : vector<8x128xf32> to vector<8x32xf32>
    %cst_835 = arith.constant 0.000000e+00 : f32
    %1371 = vector.broadcast %cst_835 : f32 to vector<8x32xf32>
    %1372 = arith.subf %1371, %1370 : vector<8x32xf32>
    %1373 = math.exp %1372 : vector<8x32xf32>
    %cst_836 = arith.constant 1.000000e+00 : f32
    %1374 = vector.broadcast %cst_836 : f32 to vector<8x32xf32>
    %1375 = arith.addf %1374, %1373 : vector<8x32xf32>
    %cst_837 = arith.constant 1.000000e+00 : f32
    %1376 = vector.broadcast %cst_837 : f32 to vector<8x32xf32>
    %1377 = arith.divf %1376, %1375 : vector<8x32xf32>
    %1378 = vector.extract_strided_slice %1369 {offsets = [0, 32], sizes = [8, 32], strides = [1, 1]} : vector<8x128xf32> to vector<8x32xf32>
    %cst_838 = arith.constant 0.000000e+00 : f32
    %1379 = vector.broadcast %cst_838 : f32 to vector<8x32xf32>
    %1380 = arith.subf %1379, %1378 : vector<8x32xf32>
    %1381 = math.exp %1380 : vector<8x32xf32>
    %cst_839 = arith.constant 1.000000e+00 : f32
    %1382 = vector.broadcast %cst_839 : f32 to vector<8x32xf32>
    %1383 = arith.addf %1382, %1381 : vector<8x32xf32>
    %cst_840 = arith.constant 1.000000e+00 : f32
    %1384 = vector.broadcast %cst_840 : f32 to vector<8x32xf32>
    %1385 = arith.divf %1384, %1383 : vector<8x32xf32>
    %1386 = vector.extract_strided_slice %1369 {offsets = [0, 64], sizes = [8, 32], strides = [1, 1]} : vector<8x128xf32> to vector<8x32xf32>
    %1387 = math.tanh %1386 : vector<8x32xf32>
    %1388 = vector.extract_strided_slice %1369 {offsets = [0, 96], sizes = [8, 32], strides = [1, 1]} : vector<8x128xf32> to vector<8x32xf32>
    %cst_841 = arith.constant 0.000000e+00 : f32
    %1389 = vector.broadcast %cst_841 : f32 to vector<8x32xf32>
    %1390 = arith.subf %1389, %1388 : vector<8x32xf32>
    %1391 = math.exp %1390 : vector<8x32xf32>
    %cst_842 = arith.constant 1.000000e+00 : f32
    %1392 = vector.broadcast %cst_842 : f32 to vector<8x32xf32>
    %1393 = arith.addf %1392, %1391 : vector<8x32xf32>
    %cst_843 = arith.constant 1.000000e+00 : f32
    %1394 = vector.broadcast %cst_843 : f32 to vector<8x32xf32>
    %1395 = arith.divf %1394, %1393 : vector<8x32xf32>
    %c0_844 = arith.constant 0 : index
    %c0_845 = arith.constant 0 : index
    %1396 = vector.load %arg30[%c0_844, %c0_845] : memref<8x32xf32, #tpu.memory_space<vmem>>, vector<8x32xf32>
    %1397 = arith.mulf %1385, %1396 : vector<8x32xf32>
    %1398 = arith.mulf %1377, %1387 : vector<8x32xf32>
    %1399 = arith.addf %1397, %1398 : vector<8x32xf32>
    %1400 = math.tanh %1399 : vector<8x32xf32>
    %1401 = arith.mulf %1395, %1400 : vector<8x32xf32>
    %c0_846 = arith.constant 0 : index
    %c0_847 = arith.constant 0 : index
    %1402 = vector.load %arg29[%c0_846, %c0_847] : memref<8x32xf32, #tpu.memory_space<vmem>>, vector<8x32xf32>
    tpu.vector_store %arg29[%c0_846, %c0_847], %1401 {strides = array<i32>} : memref<8x32xf32, #tpu.memory_space<vmem>>, vector<8x32xf32>,
    %c0_848 = arith.constant 0 : index
    %c0_849 = arith.constant 0 : index
    %1403 = vector.load %arg30[%c0_848, %c0_849] : memref<8x32xf32, #tpu.memory_space<vmem>>, vector<8x32xf32>
    tpu.vector_store %arg30[%c0_848, %c0_849], %1399 {strides = array<i32>} : memref<8x32xf32, #tpu.memory_space<vmem>>, vector<8x32xf32>,
    %c8_850 = arith.constant 8 : index
    %c0_851 = arith.constant 0 : index
    %1404 = vector.load %arg26[%c8_850, %c0_851] : memref<32x32xf32, #tpu.memory_space<vmem>>, vector<8x32xf32>
    tpu.vector_store %arg26[%c8_850, %c0_851], %1401 {strides = array<i32>} : memref<32x32xf32, #tpu.memory_space<vmem>>, vector<8x32xf32>,
    %c16_852 = arith.constant 16 : index
    %c0_853 = arith.constant 0 : index
    %1405 = vector.load %arg28[%c16_852, %c0_853] : memref<32x128xf32, #tpu.memory_space<vmem>>, vector<8x128xf32>
    %c0_854 = arith.constant 0 : index
    %c0_855 = arith.constant 0 : index
    %1406 = vector.load %arg29[%c0_854, %c0_855] : memref<8x32xf32, #tpu.memory_space<vmem>>, vector<8x32xf32>
    %cst_856 = arith.constant dense<0.000000e+00> : vector<8x128xf32>
    %1407 = tpu.matmul %1406, %1326, %cst_856 {dimension_numbers = #tpu.dot_dimension_numbers<[1], [0], [0], [1], [0, 0, 1, 1], [], []>} : vector<8x32xf32>, vector<32x128xf32>, vector<8x128xf32> -> vector<8x128xf32>
    %1408 = arith.addf %1405, %1407 : vector<8x128xf32>
    %1409 = vector.extract_strided_slice %1408 {offsets = [0, 0], sizes = [8, 32], strides = [1, 1]} : vector<8x128xf32> to vector<8x32xf32>
    %cst_857 = arith.constant 0.000000e+00 : f32
    %1410 = vector.broadcast %cst_857 : f32 to vector<8x32xf32>
    %1411 = arith.subf %1410, %1409 : vector<8x32xf32>
    %1412 = math.exp %1411 : vector<8x32xf32>
    %cst_858 = arith.constant 1.000000e+00 : f32
    %1413 = vector.broadcast %cst_858 : f32 to vector<8x32xf32>
    %1414 = arith.addf %1413, %1412 : vector<8x32xf32>
    %cst_859 = arith.constant 1.000000e+00 : f32
    %1415 = vector.broadcast %cst_859 : f32 to vector<8x32xf32>
    %1416 = arith.divf %1415, %1414 : vector<8x32xf32>
    %1417 = vector.extract_strided_slice %1408 {offsets = [0, 32], sizes = [8, 32], strides = [1, 1]} : vector<8x128xf32> to vector<8x32xf32>
    %cst_860 = arith.constant 0.000000e+00 : f32
    %1418 = vector.broadcast %cst_860 : f32 to vector<8x32xf32>
    %1419 = arith.subf %1418, %1417 : vector<8x32xf32>
    %1420 = math.exp %1419 : vector<8x32xf32>
    %cst_861 = arith.constant 1.000000e+00 : f32
    %1421 = vector.broadcast %cst_861 : f32 to vector<8x32xf32>
    %1422 = arith.addf %1421, %1420 : vector<8x32xf32>
    %cst_862 = arith.constant 1.000000e+00 : f32
    %1423 = vector.broadcast %cst_862 : f32 to vector<8x32xf32>
    %1424 = arith.divf %1423, %1422 : vector<8x32xf32>
    %1425 = vector.extract_strided_slice %1408 {offsets = [0, 64], sizes = [8, 32], strides = [1, 1]} : vector<8x128xf32> to vector<8x32xf32>
    %1426 = math.tanh %1425 : vector<8x32xf32>
    %1427 = vector.extract_strided_slice %1408 {offsets = [0, 96], sizes = [8, 32], strides = [1, 1]} : vector<8x128xf32> to vector<8x32xf32>
    %cst_863 = arith.constant 0.000000e+00 : f32
    %1428 = vector.broadcast %cst_863 : f32 to vector<8x32xf32>
    %1429 = arith.subf %1428, %1427 : vector<8x32xf32>
    %1430 = math.exp %1429 : vector<8x32xf32>
    %cst_864 = arith.constant 1.000000e+00 : f32
    %1431 = vector.broadcast %cst_864 : f32 to vector<8x32xf32>
    %1432 = arith.addf %1431, %1430 : vector<8x32xf32>
    %cst_865 = arith.constant 1.000000e+00 : f32
    %1433 = vector.broadcast %cst_865 : f32 to vector<8x32xf32>
    %1434 = arith.divf %1433, %1432 : vector<8x32xf32>
    %c0_866 = arith.constant 0 : index
    %c0_867 = arith.constant 0 : index
    %1435 = vector.load %arg30[%c0_866, %c0_867] : memref<8x32xf32, #tpu.memory_space<vmem>>, vector<8x32xf32>
    %1436 = arith.mulf %1424, %1435 : vector<8x32xf32>
    %1437 = arith.mulf %1416, %1426 : vector<8x32xf32>
    %1438 = arith.addf %1436, %1437 : vector<8x32xf32>
    %1439 = math.tanh %1438 : vector<8x32xf32>
    %1440 = arith.mulf %1434, %1439 : vector<8x32xf32>
    %c0_868 = arith.constant 0 : index
    %c0_869 = arith.constant 0 : index
    %1441 = vector.load %arg29[%c0_868, %c0_869] : memref<8x32xf32, #tpu.memory_space<vmem>>, vector<8x32xf32>
    tpu.vector_store %arg29[%c0_868, %c0_869], %1440 {strides = array<i32>} : memref<8x32xf32, #tpu.memory_space<vmem>>, vector<8x32xf32>,
    %c0_870 = arith.constant 0 : index
    %c0_871 = arith.constant 0 : index
    %1442 = vector.load %arg30[%c0_870, %c0_871] : memref<8x32xf32, #tpu.memory_space<vmem>>, vector<8x32xf32>
    tpu.vector_store %arg30[%c0_870, %c0_871], %1438 {strides = array<i32>} : memref<8x32xf32, #tpu.memory_space<vmem>>, vector<8x32xf32>,
    %c16_872 = arith.constant 16 : index
    %c0_873 = arith.constant 0 : index
    %1443 = vector.load %arg26[%c16_872, %c0_873] : memref<32x32xf32, #tpu.memory_space<vmem>>, vector<8x32xf32>
    tpu.vector_store %arg26[%c16_872, %c0_873], %1440 {strides = array<i32>} : memref<32x32xf32, #tpu.memory_space<vmem>>, vector<8x32xf32>,
    %c24_874 = arith.constant 24 : index
    %c0_875 = arith.constant 0 : index
    %1444 = vector.load %arg28[%c24_874, %c0_875] : memref<32x128xf32, #tpu.memory_space<vmem>>, vector<8x128xf32>
    %c0_876 = arith.constant 0 : index
    %c0_877 = arith.constant 0 : index
    %1445 = vector.load %arg29[%c0_876, %c0_877] : memref<8x32xf32, #tpu.memory_space<vmem>>, vector<8x32xf32>
    %cst_878 = arith.constant dense<0.000000e+00> : vector<8x128xf32>
    %1446 = tpu.matmul %1445, %1326, %cst_878 {dimension_numbers = #tpu.dot_dimension_numbers<[1], [0], [0], [1], [0, 0, 1, 1], [], []>} : vector<8x32xf32>, vector<32x128xf32>, vector<8x128xf32> -> vector<8x128xf32>
    %1447 = arith.addf %1444, %1446 : vector<8x128xf32>
    %1448 = vector.extract_strided_slice %1447 {offsets = [0, 0], sizes = [8, 32], strides = [1, 1]} : vector<8x128xf32> to vector<8x32xf32>
    %cst_879 = arith.constant 0.000000e+00 : f32
    %1449 = vector.broadcast %cst_879 : f32 to vector<8x32xf32>
    %1450 = arith.subf %1449, %1448 : vector<8x32xf32>
    %1451 = math.exp %1450 : vector<8x32xf32>
    %cst_880 = arith.constant 1.000000e+00 : f32
    %1452 = vector.broadcast %cst_880 : f32 to vector<8x32xf32>
    %1453 = arith.addf %1452, %1451 : vector<8x32xf32>
    %cst_881 = arith.constant 1.000000e+00 : f32
    %1454 = vector.broadcast %cst_881 : f32 to vector<8x32xf32>
    %1455 = arith.divf %1454, %1453 : vector<8x32xf32>
    %1456 = vector.extract_strided_slice %1447 {offsets = [0, 32], sizes = [8, 32], strides = [1, 1]} : vector<8x128xf32> to vector<8x32xf32>
    %cst_882 = arith.constant 0.000000e+00 : f32
    %1457 = vector.broadcast %cst_882 : f32 to vector<8x32xf32>
    %1458 = arith.subf %1457, %1456 : vector<8x32xf32>
    %1459 = math.exp %1458 : vector<8x32xf32>
    %cst_883 = arith.constant 1.000000e+00 : f32
    %1460 = vector.broadcast %cst_883 : f32 to vector<8x32xf32>
    %1461 = arith.addf %1460, %1459 : vector<8x32xf32>
    %cst_884 = arith.constant 1.000000e+00 : f32
    %1462 = vector.broadcast %cst_884 : f32 to vector<8x32xf32>
    %1463 = arith.divf %1462, %1461 : vector<8x32xf32>
    %1464 = vector.extract_strided_slice %1447 {offsets = [0, 64], sizes = [8, 32], strides = [1, 1]} : vector<8x128xf32> to vector<8x32xf32>
    %1465 = math.tanh %1464 : vector<8x32xf32>
    %1466 = vector.extract_strided_slice %1447 {offsets = [0, 96], sizes = [8, 32], strides = [1, 1]} : vector<8x128xf32> to vector<8x32xf32>
    %cst_885 = arith.constant 0.000000e+00 : f32
    %1467 = vector.broadcast %cst_885 : f32 to vector<8x32xf32>
    %1468 = arith.subf %1467, %1466 : vector<8x32xf32>
    %1469 = math.exp %1468 : vector<8x32xf32>
    %cst_886 = arith.constant 1.000000e+00 : f32
    %1470 = vector.broadcast %cst_886 : f32 to vector<8x32xf32>
    %1471 = arith.addf %1470, %1469 : vector<8x32xf32>
    %cst_887 = arith.constant 1.000000e+00 : f32
    %1472 = vector.broadcast %cst_887 : f32 to vector<8x32xf32>
    %1473 = arith.divf %1472, %1471 : vector<8x32xf32>
    %c0_888 = arith.constant 0 : index
    %c0_889 = arith.constant 0 : index
    %1474 = vector.load %arg30[%c0_888, %c0_889] : memref<8x32xf32, #tpu.memory_space<vmem>>, vector<8x32xf32>
    %1475 = arith.mulf %1463, %1474 : vector<8x32xf32>
    %1476 = arith.mulf %1455, %1465 : vector<8x32xf32>
    %1477 = arith.addf %1475, %1476 : vector<8x32xf32>
    %1478 = math.tanh %1477 : vector<8x32xf32>
    %1479 = arith.mulf %1473, %1478 : vector<8x32xf32>
    %c0_890 = arith.constant 0 : index
    %c0_891 = arith.constant 0 : index
    %1480 = vector.load %arg29[%c0_890, %c0_891] : memref<8x32xf32, #tpu.memory_space<vmem>>, vector<8x32xf32>
    tpu.vector_store %arg29[%c0_890, %c0_891], %1479 {strides = array<i32>} : memref<8x32xf32, #tpu.memory_space<vmem>>, vector<8x32xf32>,
    %c0_892 = arith.constant 0 : index
    %c0_893 = arith.constant 0 : index
    %1481 = vector.load %arg30[%c0_892, %c0_893] : memref<8x32xf32, #tpu.memory_space<vmem>>, vector<8x32xf32>
    tpu.vector_store %arg30[%c0_892, %c0_893], %1477 {strides = array<i32>} : memref<8x32xf32, #tpu.memory_space<vmem>>, vector<8x32xf32>,
    %c24_894 = arith.constant 24 : index
    %c0_895 = arith.constant 0 : index
    %1482 = vector.load %arg26[%c24_894, %c0_895] : memref<32x32xf32, #tpu.memory_space<vmem>>, vector<8x32xf32>
    tpu.vector_store %arg26[%c24_894, %c0_895], %1479 {strides = array<i32>} : memref<32x32xf32, #tpu.memory_space<vmem>>, vector<8x32xf32>,
    %c0_896 = arith.constant 0 : index
    %c0_897 = arith.constant 0 : index
    %1483 = vector.load %arg29[%c0_896, %c0_897] : memref<8x32xf32, #tpu.memory_space<vmem>>, vector<8x32xf32>
    %c0_898 = arith.constant 0 : index
    %c0_899 = arith.constant 0 : index
    %1484 = vector.load %arg30[%c0_898, %c0_899] : memref<8x32xf32, #tpu.memory_space<vmem>>, vector<8x32xf32>
    %c0_900 = arith.constant 0 : index
    %c0_901 = arith.constant 0 : index
    %1485 = vector.load %arg19[%c0_900, %c0_901] : memref<384x8xf32, #tpu.memory_space<vmem>>, vector<384x8xf32>
    %cst_902 = arith.constant 0.000000e+00 : f32
    %1486 = vector.broadcast %cst_902 : f32 to vector<8x8xf32>
    %c0_903 = arith.constant 0 : index
    %c0_904 = arith.constant 0 : index
    %1487 = vector.load %arg20[%c0_903, %c0_904] : memref<1x8xf32, #tpu.memory_space<vmem>>, vector<1x8xf32>
    %1488 = vector.broadcast %1487 : vector<1x8xf32> to vector<8x8xf32>
    %1489 = arith.addf %1486, %1488 : vector<8x8xf32>
    %1490 = vector.extract_strided_slice %1485 {offsets = [0, 0], sizes = [32, 8], strides = [1, 1]} : vector<384x8xf32> to vector<32x8xf32>
    %cst_905 = arith.constant dense<0.000000e+00> : vector<8x8xf32>
    %1491 = tpu.matmul %326, %1490, %cst_905 {dimension_numbers = #tpu.dot_dimension_numbers<[1], [0], [0], [1], [0, 0, 1, 1], [], []>} : vector<8x32xf32>, vector<32x8xf32>, vector<8x8xf32> -> vector<8x8xf32>
    %1492 = arith.addf %1489, %1491 : vector<8x8xf32>
    %1493 = vector.extract_strided_slice %1485 {offsets = [32, 0], sizes = [32, 8], strides = [1, 1]} : vector<384x8xf32> to vector<32x8xf32>
    %cst_906 = arith.constant dense<0.000000e+00> : vector<8x8xf32>
    %1494 = tpu.matmul %327, %1493, %cst_906 {dimension_numbers = #tpu.dot_dimension_numbers<[1], [0], [0], [1], [0, 0, 1, 1], [], []>} : vector<8x32xf32>, vector<32x8xf32>, vector<8x8xf32> -> vector<8x8xf32>
    %1495 = arith.addf %1492, %1494 : vector<8x8xf32>
    %1496 = vector.extract_strided_slice %1485 {offsets = [64, 0], sizes = [32, 8], strides = [1, 1]} : vector<384x8xf32> to vector<32x8xf32>
    %cst_907 = arith.constant dense<0.000000e+00> : vector<8x8xf32>
    %1497 = tpu.matmul %1143, %1496, %cst_907 {dimension_numbers = #tpu.dot_dimension_numbers<[1], [0], [0], [1], [0, 0, 1, 1], [], []>} : vector<8x32xf32>, vector<32x8xf32>, vector<8x8xf32> -> vector<8x8xf32>
    %1498 = arith.addf %1495, %1497 : vector<8x8xf32>
    %1499 = vector.extract_strided_slice %1485 {offsets = [96, 0], sizes = [32, 8], strides = [1, 1]} : vector<384x8xf32> to vector<32x8xf32>
    %cst_908 = arith.constant dense<0.000000e+00> : vector<8x8xf32>
    %1500 = tpu.matmul %1144, %1499, %cst_908 {dimension_numbers = #tpu.dot_dimension_numbers<[1], [0], [0], [1], [0, 0, 1, 1], [], []>} : vector<8x32xf32>, vector<32x8xf32>, vector<8x8xf32> -> vector<8x8xf32>
    %1501 = arith.addf %1498, %1500 : vector<8x8xf32>
    %1502 = vector.extract_strided_slice %1485 {offsets = [128, 0], sizes = [32, 8], strides = [1, 1]} : vector<384x8xf32> to vector<32x8xf32>
    %cst_909 = arith.constant dense<0.000000e+00> : vector<8x8xf32>
    %1503 = tpu.matmul %652, %1502, %cst_909 {dimension_numbers = #tpu.dot_dimension_numbers<[1], [0], [0], [1], [0, 0, 1, 1], [], []>} : vector<8x32xf32>, vector<32x8xf32>, vector<8x8xf32> -> vector<8x8xf32>
    %1504 = arith.addf %1501, %1503 : vector<8x8xf32>
    %1505 = vector.extract_strided_slice %1485 {offsets = [160, 0], sizes = [32, 8], strides = [1, 1]} : vector<384x8xf32> to vector<32x8xf32>
    %cst_910 = arith.constant dense<0.000000e+00> : vector<8x8xf32>
    %1506 = tpu.matmul %653, %1505, %cst_910 {dimension_numbers = #tpu.dot_dimension_numbers<[1], [0], [0], [1], [0, 0, 1, 1], [], []>} : vector<8x32xf32>, vector<32x8xf32>, vector<8x8xf32> -> vector<8x8xf32>
    %1507 = arith.addf %1504, %1506 : vector<8x8xf32>
    %1508 = vector.extract_strided_slice %1485 {offsets = [192, 0], sizes = [32, 8], strides = [1, 1]} : vector<384x8xf32> to vector<32x8xf32>
    %cst_911 = arith.constant dense<0.000000e+00> : vector<8x8xf32>
    %1509 = tpu.matmul %1313, %1508, %cst_911 {dimension_numbers = #tpu.dot_dimension_numbers<[1], [0], [0], [1], [0, 0, 1, 1], [], []>} : vector<8x32xf32>, vector<32x8xf32>, vector<8x8xf32> -> vector<8x8xf32>
    %1510 = arith.addf %1507, %1509 : vector<8x8xf32>
    %1511 = vector.extract_strided_slice %1485 {offsets = [224, 0], sizes = [32, 8], strides = [1, 1]} : vector<384x8xf32> to vector<32x8xf32>
    %cst_912 = arith.constant dense<0.000000e+00> : vector<8x8xf32>
    %1512 = tpu.matmul %1314, %1511, %cst_912 {dimension_numbers = #tpu.dot_dimension_numbers<[1], [0], [0], [1], [0, 0, 1, 1], [], []>} : vector<8x32xf32>, vector<32x8xf32>, vector<8x8xf32> -> vector<8x8xf32>
    %1513 = arith.addf %1510, %1512 : vector<8x8xf32>
    %1514 = vector.extract_strided_slice %1485 {offsets = [256, 0], sizes = [32, 8], strides = [1, 1]} : vector<384x8xf32> to vector<32x8xf32>
    %cst_913 = arith.constant dense<0.000000e+00> : vector<8x8xf32>
    %1515 = tpu.matmul %978, %1514, %cst_913 {dimension_numbers = #tpu.dot_dimension_numbers<[1], [0], [0], [1], [0, 0, 1, 1], [], []>} : vector<8x32xf32>, vector<32x8xf32>, vector<8x8xf32> -> vector<8x8xf32>
    %1516 = arith.addf %1513, %1515 : vector<8x8xf32>
    %1517 = vector.extract_strided_slice %1485 {offsets = [288, 0], sizes = [32, 8], strides = [1, 1]} : vector<384x8xf32> to vector<32x8xf32>
    %cst_914 = arith.constant dense<0.000000e+00> : vector<8x8xf32>
    %1518 = tpu.matmul %979, %1517, %cst_914 {dimension_numbers = #tpu.dot_dimension_numbers<[1], [0], [0], [1], [0, 0, 1, 1], [], []>} : vector<8x32xf32>, vector<32x8xf32>, vector<8x8xf32> -> vector<8x8xf32>
    %1519 = arith.addf %1516, %1518 : vector<8x8xf32>
    %1520 = vector.extract_strided_slice %1485 {offsets = [320, 0], sizes = [32, 8], strides = [1, 1]} : vector<384x8xf32> to vector<32x8xf32>
    %cst_915 = arith.constant dense<0.000000e+00> : vector<8x8xf32>
    %1521 = tpu.matmul %1483, %1520, %cst_915 {dimension_numbers = #tpu.dot_dimension_numbers<[1], [0], [0], [1], [0, 0, 1, 1], [], []>} : vector<8x32xf32>, vector<32x8xf32>, vector<8x8xf32> -> vector<8x8xf32>
    %1522 = arith.addf %1519, %1521 : vector<8x8xf32>
    %1523 = vector.extract_strided_slice %1485 {offsets = [352, 0], sizes = [32, 8], strides = [1, 1]} : vector<384x8xf32> to vector<32x8xf32>
    %cst_916 = arith.constant dense<0.000000e+00> : vector<8x8xf32>
    %1524 = tpu.matmul %1484, %1523, %cst_916 {dimension_numbers = #tpu.dot_dimension_numbers<[1], [0], [0], [1], [0, 0, 1, 1], [], []>} : vector<8x32xf32>, vector<32x8xf32>, vector<8x8xf32> -> vector<8x8xf32>
    %1525 = arith.addf %1522, %1524 : vector<8x8xf32>
    %cst_917 = arith.constant 0.000000e+00 : f32
    %1526 = vector.broadcast %cst_917 : f32 to vector<8x8xf32>
    %1527 = arith.subf %1526, %1525 : vector<8x8xf32>
    %1528 = math.exp %1527 : vector<8x8xf32>
    %cst_918 = arith.constant 1.000000e+00 : f32
    %1529 = vector.broadcast %cst_918 : f32 to vector<8x8xf32>
    %1530 = arith.addf %1529, %1528 : vector<8x8xf32>
    %cst_919 = arith.constant 1.000000e+00 : f32
    %1531 = vector.broadcast %cst_919 : f32 to vector<8x8xf32>
    %1532 = arith.divf %1531, %1530 : vector<8x8xf32>
    %c0_920 = arith.constant 0 : index
    %c0_921 = arith.constant 0 : index
    %1533 = vector.load %arg24[%c0_920, %c0_921] : memref<8x8xf32, #tpu.memory_space<vmem>>, vector<8x8xf32>
    tpu.vector_store %arg24[%c0_920, %c0_921], %1532 {strides = array<i32>} : memref<8x8xf32, #tpu.memory_space<vmem>>, vector<8x8xf32>,
    %c0_922 = arith.constant 0 : index
    %c0_923 = arith.constant 0 : index
    %1534 = vector.load %arg26[%c0_922, %c0_923] : memref<32x32xf32, #tpu.memory_space<vmem>>, vector<32x32xf32>
    %c0_924 = arith.constant 0 : index
    %c0_925 = arith.constant 0 : index
    %1535 = vector.load %arg21[%c0_924, %c0_925] : memref<32x8xf32, #tpu.memory_space<vmem>>, vector<32x8xf32>
    %cst_926 = arith.constant dense<0.000000e+00> : vector<32x8xf32>
    %1536 = tpu.matmul %1534, %1535, %cst_926 {dimension_numbers = #tpu.dot_dimension_numbers<[1], [0], [0], [1], [0, 0, 1, 1], [], []>} : vector<32x32xf32>, vector<32x8xf32>, vector<32x8xf32> -> vector<32x8xf32>
    %c0_927 = arith.constant 0 : index
    %c0_928 = arith.constant 0 : index
    %1537 = vector.load %arg22[%c0_927, %c0_928] : memref<1x8xf32, #tpu.memory_space<vmem>>, vector<1x8xf32>
    %1538 = vector.broadcast %1537 : vector<1x8xf32> to vector<32x8xf32>
    %1539 = arith.addf %1536, %1538 : vector<32x8xf32>
    %1540 = math.tanh %1539 : vector<32x8xf32>
    %1541 = arith.subf %1539, %1540 : vector<32x8xf32>
    %cst_929 = arith.constant 1.000000e-01 : f32
    %1542 = vector.broadcast %cst_929 : f32 to vector<32x8xf32>
    %1543 = arith.mulf %1541, %1542 : vector<32x8xf32>
    %c0_930 = arith.constant 0 : index
    %c0_931 = arith.constant 0 : index
    %1544 = vector.load %arg23[%c0_930, %c0_931] : memref<32x8xf32, #tpu.memory_space<vmem>>, vector<32x8xf32>
    tpu.vector_store %arg23[%c0_930, %c0_931], %1543 {strides = array<i32>} : memref<32x8xf32, #tpu.memory_space<vmem>>, vector<32x8xf32>,
    return
  }
}

</mosaic_0001>

<bundles_post_ra>
// kernel: _fused_network_forward.1
= control target key start
LH: loop header
LB: loop body
LE: loop exit
PB: predicated region body
PF: predicated region fallthrough
CT: control target
= control target key end

     0   :  { %vm100_vm0 = vcmask 64512   ;;  %vm238_vm1 = vcmask 261120   ;;  %v7868_v3 = vmov 0.0|0.0   ;;  %vm7869_vm2 = vmmov 0   ;;  %s7872_s26 = smov 32   ;;  %s9247_s1 = inlined_call_operand.vmem [shape: f32[8,128], index: 1, kind: input, shape index: {}]   ;;  %s9248_s0 = inlined_call_operand.vmem [shape: f32[64,8], index: 0, kind: input, shape index: {}]   ;;  %s9249_s2 = inlined_call_operand.vmem [shape: f32[32,128], index: 2, kind: input, shape index: {}]   ;;  %s9250_s3 = inlined_call_operand.vmem [shape: f32[1,128], index: 3, kind: input, shape index: {}]   ;;  %s9251_s4 = inlined_call_operand.vmem [shape: f32[32,128], index: 4, kind: input, shape index: {}]   ;;  %s9252_s5 = inlined_call_operand.vmem [shape: f32[32,128], index: 5, kind: input, shape index: {}]   ;;  %s9253_s6 = inlined_call_operand.vmem [shape: f32[1,128], index: 6, kind: input, shape index: {}]   ;;  %s9254_s7 = inlined_call_operand.vmem [shape: f32[32,128], index: 7, kind: input, shape index: {}]   ;;  %s9255_s8 = inlined_call_operand.vmem [shape: f32[32,128], index: 8, kind: input, shape index: {}]   ;;  %s9256_s9 = inlined_call_operand.vmem [shape: f32[1,128], index: 9, kind: input, shape index: {}]   ;;  %s9257_s10 = inlined_call_operand.vmem [shape: f32[32,128], index: 10, kind: input, shape index: {}]   ;;  %s9258_s11 = inlined_call_operand.vmem [shape: f32[32,128], index: 11, kind: input, shape index: {}]   ;;  %s9259_s12 = inlined_call_operand.vmem [shape: f32[1,128], index: 12, kind: input, shape index: {}]   ;;  %s9260_s13 = inlined_call_operand.vmem [shape: f32[32,128], index: 13, kind: input, shape index: {}]   ;;  %s9261_s14 = inlined_call_operand.vmem [shape: f32[32,128], index: 14, kind: input, shape index: {}]   ;;  %s9262_s15 = inlined_call_operand.vmem [shape: f32[1,128], index: 15, kind: input, shape index: {}]   ;;  %s9263_s16 = inlined_call_operand.vmem [shape: f32[32,128], index: 16, kind: input, shape index: {}]   ;;  %s9264_s17 = inlined_call_operand.vmem [shape: f32[32,128], index: 17, kind: input, shape index: {}]   ;;  %s9265_s18 = inlined_call_operand.vmem [shape: f32[1,128], index: 18, kind: input, shape index: {}]   ;;  %s9266_s19 = inlined_call_operand.vmem [shape: f32[384,8], index: 19, kind: input, shape index: {}]   ;;  %s9267_s21 = inlined_call_operand.vmem [shape: f32[32,8], index: 21, kind: input, shape index: {}]   ;;  %s9268_s22 = inlined_call_operand.vmem [shape: f32[1,8], index: 22, kind: input, shape index: {}]   ;;  %s9269_s23 = inlined_call_operand.vmem [shape: f32[32,8], index: 23, kind: output, shape index: {0}]   ;;  %s9270_s20 = inlined_call_operand.vmem [shape: f32[1,8], index: 20, kind: input, shape index: {}]   ;;  %s9271_s24 = inlined_call_operand.vmem [shape: f32[8,8], index: 24, kind: output, shape index: {1}]  }
   0x1   :  { %9279 = sst [smem:[#allocation8_spill]] %s9247_s1  ;;  %7261 = vmatprep.subr.bf16.mxu1 %v7868_v3  ;;  %v7870_v4 = vmov 0.0  }
   0x2   :  { %9280 = sst [smem:[#allocation9_spill]] %s9248_s0  ;;  %s9289_s27 = sld [smem:[#allocation8_spill]]  ;;  %6700 = vmatprep.mubr.msk.f32.mxu1 %vm7869_vm2, %v7870_v4  ;;  %239 = vst.msk [vmem:[#allocation6] sm:$0xff] %vm238_vm1, %v7870_v4  ;;  %240 = vst.msk [vmem:[#allocation7] sm:$0xff] %vm238_vm1, %v7870_v4 }
   0x3   :  { %9281 = sst [smem:[#allocation10_spill]] %s9249_s2 }
   0x4   :  { %9282 = sst [smem:[#allocation11_spill]] %s9250_s3  ;;  %s9291_s30 = sld [smem:[#allocation10_spill]] }
   0x5   :  { %9283 = sst [smem:[#allocation12_spill]] %s9251_s4  ;;  %s9292_s0 = sld [smem:[#allocation11_spill]] }
   0x6   :  { %9284 = sst [smem:[#allocation13_spill]] %s9252_s5  ;;  %s7871_s5 = smov 64  }
   0x7   :  { %9285 = sst [smem:[#allocation14_spill]] %s9253_s6  ;;  %s9293_s2 = sld [smem:[#allocation12_spill]] }
   0x8   :  { %9286 = sst [smem:[#allocation15_spill]] %s9254_s7  ;;  %v92_v0 = vld [vmem:[%s9289_s27] sm:$0xff]  ;;  %s7873_s27 = smov 96  }
   0x9   :  { %9287 = sst [smem:[#allocation16_spill]] %s9255_s8  ;;  %6570 = vmatprep.subr.mxu0 %v92_v0  ;;  %v246_v25 = vld [vmem:[#allocation6] sm:$0xff]  ;;  %v328_v47 = vld [vmem:[#allocation7] sm:$0xff]  ;;  %s9294_s4 = sld [smem:[#allocation13_spill]] }
   0xa   :  { %9288 = sst [smem:[#allocation17_spill]] %s9266_s19  ;;  %v241_v7 = vld [vmem:[%s9291_s30] sm:$0xff]  ;;  %v242_v8 = vld [vmem:[%s9291_s30 + $0x8] sm:$0xff]  ;;  %6571 = vmatpush3.msra.mxu0 %v92_v0  ;;  %v243_v14 = vld [vmem:[%s9291_s30 + $0x10] sm:$0xff]  ;;  %s9295_s25 = sld [smem:[#allocation14_spill]] }
   0xb   :  { %s9290_s19 = sld [smem:[#allocation9_spill]]  ;;  %v8024_v10 = vpack.c.bf16 %v242_v8, %v241_v7  ;;  %7205 = vmatprep.subr.bf16.mxu0 %v7868_v3  ;;  %v244_v15 = vld [vmem:[%s9291_s30 + $0x18] sm:$0xff]  ;;  %v6175_v26 = vld [vmem:[%s9292_s0] ss:$0 sm:$0xff]  ;;  %s9297_s3 = sld [smem:[#allocation16_spill]] }
   0xc   :  { %v8046_v19 = vpack.c.bf16 %v244_v15, %v243_v14 }
  0x11   :  { %v76_v1 = vld [vmem:[%s9290_s19] sm:$0xff]  ;;  %v77_v2 = vld [vmem:[%s9290_s19 + $0x8] sm:$0xff]  ;;  %v78_v9 = vld [vmem:[%s9290_s19 + $0x10] sm:$0xff] }
  0x12   :  { %v84_v5 = vmul.f32 50.0, %v76_v1  ;;  %v85_v6 = vmul.f32 50.0, %v77_v2  ;;  %v86_v11 = vmul.f32 50.0, %v78_v9  ;;  %v79_v12 = vld [vmem:[%s9290_s19 + $0x18] sm:$0xff]  ;;  %v80_v13 = vld [vmem:[%s9290_s19 + $0x20] sm:$0xff]  ;;  %v81_v18 = vld [vmem:[%s9290_s19 + $0x28] sm:$0xff] }
  0x13   :  { %v87_v16 = vmul.f32 50.0, %v79_v12  ;;  %v88_v17 = vmul.f32 50.0, %v80_v13  ;;  %v82_v20 = vld [vmem:[%s9290_s19 + $0x30] sm:$0xff]  ;;  %v89_v21 = vmul.f32 50.0, %v81_v18  ;;  %v83_v23 = vld [vmem:[%s9290_s19 + $0x38] sm:$0xff]  ;;  %s9296_s19 = sld [smem:[#allocation15_spill]] }
  0x14   :  { %6572 = vmatprep.mubr.msk.f32.mxu0 %vm100_vm0, %v84_v5  ;;  %v90_v22 = vmul.f32 50.0, %v82_v20  ;;  %v91_v24 = vmul.f32 50.0, %v83_v23 }
  0x15   :  { %6573 = vmatmul.mubr.msk.f32.vlgmr.msra.gmra.mrb[0].mxu0 %vm100_vm0, %v85_v6 }
  0x16   :  { %7207 = vmatpush3.bf16.msra.mxu0 %v8024_v10  ;;  %6575 = vmatprep.mubr.msk.f32.mxu0 %vm100_vm0, %v86_v11 }
  0x17   :  { %7208 = vmatprep.subr.bf16.mxu0 %v7868_v3 }
  0x19   :  { %6576 = vmatmul.mubr.msk.f32.gmra.mrb[2].mxu0 %vm100_vm0, %v87_v16 }
  0x1a   :  { %6578 = vmatprep.mubr.msk.f32.mxu0 %vm100_vm0, %v88_v17  ;;  %7210 = vmatpush3.bf16.msra.mxu0 %v8046_v19 }
  0x1b   :  { %7211 = vmatprep.subr.bf16.mxu0 %v7868_v3 }
  0x1d   :  { %6579 = vmatmul.mubr.msk.f32.gmra.mrb[4].mxu0 %vm100_vm0, %v89_v21 }
  0x1e   :  { %6581 = vmatprep.mubr.msk.f32.mxu0 %vm100_vm0, %v90_v22 }
  0x21   :  { %6582 = vmatmul.mubr.msk.f32.gmra.mrb[6].mxu0 %vm100_vm0, %v91_v24 }
  0x22   :  { %6592 = vmatprep.mubr.msk.f32.mxu0 %vm7869_vm2, %v7870_v4 }
  0x25   :  { %6593 = vmatmul.mubr.msk.f32.vlgmr.msra.gmra.mrb[8].mxu0 %vm238_vm1, %v246_v25 }
  0x26   :  { %7213 = vmatpush3.bf16.msra.mxu0 %v8024_v10  ;;  %6603 = vmatprep.mubr.msk.f32.mxu0 %vm7869_vm2, %v7870_v4 }
  0x27   :  { %7214 = vmatprep.subr.bf16.mxu0 %v7868_v3 }
  0x2a   :  { %7216 = vmatpush3.bf16.msra.mxu0 %v8046_v19 }
  0x2b   :  { %7217 = vmatprep.subr.bf16.mxu0 %v7868_v3 }
  0xe8   :  { %v6574_v27 = vpop.f32.mrb[0].mxu0 }
  0xe9   :  { %v197_v28 = vadd.f32 %v6574_v27, %v6175_v26  ;;  %v191_v29 = vpop.f32.mrb[1].mxu0 }
  0xea   :  { %v192_v42 = vadd.f32 %v6175_v26, %v191_v29 }
  0xec   :  { %v6577_v30 = vpop.f32.mrb[2].mxu0 }
  0xed   :  { %v8074_v31 = vadd.f32 %v6577_v30, %v6175_v26  ;;  %v201_v32 = vpop.f32.mrb[3].mxu0 }
  0xee   :  { %v8076_v33 = vadd.f32 %v6175_v26, %v201_v32 }
  0xf0   :  { %v6580_v34 = vpop.f32.mrb[4].mxu0 }
  0xf1   :  { %v8078_v35 = vadd.f32 %v6580_v34, %v6175_v26  ;;  %v211_v36 = vpop.f32.mrb[5].mxu0 }
  0xf2   :  { %v8080_v37 = vadd.f32 %v6175_v26, %v211_v36 }
  0xf4   :  { %v6583_v38 = vpop.f32.mrb[6].mxu0 }
  0xf5   :  { %v8082_v39 = vadd.f32 %v6583_v38, %v6175_v26  ;;  %v221_v40 = vpop.f32.mrb[7].mxu0 }
  0xf6   :  { %v8084_v41 = vadd.f32 %v6175_v26, %v221_v40 }
  0xf8   :  { %v316_v43 = vpop.f32.mrb[8].mxu0 }
  0xf9   :  { %v320_v44 = vadd.f32 %v316_v43, %v192_v42  ;;  %v6594_v45 = vpop.f32.mrb[9].mxu0 }
  0xfb   :  { %7568 = vtanh.f32 %v320_v44  ;;  %v321_v48 = vsub.f32 0.0, %v320_v44 }
  0xfd   :  { %v322_v49 = vmul.f32 1.442695, %v321_v48 }
  0xff   :  { %7570 = vpow2.f32 %v322_v49 }
 0x105   :  { %v7569_v46 = vpop.eup %7568 }
 0x106   :  { %335 = vrot.lane.b32.xlu0 %v7569_v46, %s7871_s5 }
 0x109   :  { %v7571_v50 = vpop.eup %7570 }
 0x10a   :  { %330 = vrot.lane.b32.xlu0 %v328_v47, %s7872_s26  ;;  %v324_v51 = vadd.f32 1.0, %v7571_v50 }
 0x10c   :  { %7572 = vrcp.f32 %v324_v51 }
 0x116   :  { %v7573_v52 = vpop.eup %7572 }
 0x178   :  { %v336_v53 = vpop.permute.xlu0 %335 }
 0x179   :  { %v338_v54 = vmul.f32 %v7573_v52, %v336_v53 }
 0x17b   :  { %340 = vrot.lane.b32.xlu1 %v338_v54, %s7872_s26 }
 0x17c   :  { %v331_v55 = vpop.permute.xlu0 %330 }
 0x17d   :  { %v333_v56 = vmul.f32 %v7573_v52, %v331_v55 }
 0x1ed   :  { %v341_v57 = vpop.permute.xlu1 %340 }
 0x1ee   :  { %v343_v58 = vadd.f32 %v341_v57, %v333_v56 }
 0x1f0   :  { %7574 = vtanh.f32 %v343_v58 }
 0x1fa   :  { %v7575_v59 = vpop.eup %7574 }
 0x1fb   :  { %346 = vrot.lane.b32.xlu1 %v7575_v59, %s7871_s5 }
 0x1ff   :  { %356 = vrot.lane.b32.xlu1 %v343_v58, %s7873_s27 }
 0x26d   :  { %v347_v60 = vpop.permute.xlu1 %346 }
 0x26e   :  { %v349_v61 = vmul.f32 %v7573_v52, %v347_v60 }
 0x270   :  { %351 = vrot.lane.b32.xlu0 %v349_v61, %s7872_s26 }
 0x271   :  { %v357_v62 = vpop.permute.xlu1 %356 }
 0x272   :  { %359 = vst.msk [vmem:[#allocation7] sm:$0xff] %vm238_vm1, %v357_v62 }
 0x279   :  { %v444_v63 = vld [vmem:[#allocation7] sm:$0xff] }
 0x27a   :  { %446 = vrot.lane.b32.xlu1 %v444_v63, %s7872_s26 }
 0x2e2   :  { %v352_v0 = vpop.permute.xlu0 %351 }
 0x2e3   :  { %354 = vst.msk [vmem:[#allocation6] sm:$0xff] %vm238_vm1, %v352_v0  ;;  %360 = vst.msk [vmem:[#allocation2] sm:$0xff] %vm238_vm1, %v352_v0 }
 0x2ea   :  { %v362_v1 = vld [vmem:[#allocation6] sm:$0xff] }
 0x2eb   :  { %6604 = vmatmul.mubr.msk.f32.vlgmr.msra.gmra.mrb[10].mxu0 %vm238_vm1, %v362_v1 }
 0x2ec   :  { %7219 = vmatpush3.bf16.msra.mxu0 %v8024_v10  ;;  %6614 = vmatprep.mubr.msk.f32.mxu0 %vm7869_vm2, %v7870_v4  ;;  %v447_v16 = vpop.permute.xlu1 %446 }
 0x2ed   :  { %7220 = vmatprep.subr.bf16.mxu0 %v7868_v3 }
 0x2f0   :  { %7222 = vmatpush3.bf16.msra.mxu0 %v8046_v19 }
 0x2f1   :  { %7223 = vmatprep.subr.bf16.mxu0 %v7868_v3 }
 0x3be   :  { %v432_v2 = vpop.f32.mrb[10].mxu0 }
 0x3bf   :  { %v436_v5 = vadd.f32 %v432_v2, %v197_v28  ;;  %v6605_v6 = vpop.f32.mrb[11].mxu0 }
 0x3c1   :  { %7576 = vtanh.f32 %v436_v5  ;;  %v437_v8 = vsub.f32 0.0, %v436_v5 }
 0x3c3   :  { %v438_v9 = vmul.f32 1.442695, %v437_v8 }
 0x3c5   :  { %7578 = vpow2.f32 %v438_v9 }
 0x3cb   :  { %v7577_v7 = vpop.eup %7576 }
 0x3cc   :  { %451 = vrot.lane.b32.xlu0 %v7577_v7, %s7871_s5 }
 0x3cf   :  { %v7579_v11 = vpop.eup %7578 }
 0x3d0   :  { %v440_v12 = vadd.f32 1.0, %v7579_v11 }
 0x3d2   :  { %7580 = vrcp.f32 %v440_v12 }
 0x3dc   :  { %v7581_v13 = vpop.eup %7580 }
 0x3dd   :  { %v449_v17 = vmul.f32 %v7581_v13, %v447_v16 }
 0x43e   :  { %v452_v14 = vpop.permute.xlu0 %451 }
 0x43f   :  { %v454_v15 = vmul.f32 %v7581_v13, %v452_v14 }
 0x441   :  { %456 = vrot.lane.b32.xlu0 %v454_v15, %s7872_s26 }
 0x4b3   :  { %v457_v18 = vpop.permute.xlu0 %456 }
 0x4b4   :  { %v459_v20 = vadd.f32 %v457_v18, %v449_v17 }
 0x4b6   :  { %7582 = vtanh.f32 %v459_v20 }
 0x4c0   :  { %v7583_v21 = vpop.eup %7582 }
 0x4c1   :  { %462 = vrot.lane.b32.xlu1 %v7583_v21, %s7871_s5 }
 0x4c5   :  { %472 = vrot.lane.b32.xlu1 %v459_v20, %s7873_s27 }
 0x533   :  { %v463_v22 = vpop.permute.xlu1 %462 }
 0x534   :  { %v465_v23 = vmul.f32 %v7581_v13, %v463_v22 }
 0x536   :  { %467 = vrot.lane.b32.xlu0 %v465_v23, %s7872_s26 }
 0x537   :  { %v473_v24 = vpop.permute.xlu1 %472 }
 0x538   :  { %475 = vst.msk [vmem:[#allocation7] sm:$0xff] %vm238_vm1, %v473_v24 }
 0x53f   :  { %v560_v25 = vld [vmem:[#allocation7] sm:$0xff] }
 0x540   :  { %562 = vrot.lane.b32.xlu1 %v560_v25, %s7872_s26 }
 0x5a8   :  { %v468_v26 = vpop.permute.xlu0 %467 }
 0x5a9   :  { %470 = vst.msk [vmem:[#allocation6] sm:$0xff] %vm238_vm1, %v468_v26  ;;  %476 = vst.msk [vmem:[#allocation2 + $0x8] sm:$0xff] %vm238_vm1, %v468_v26 }
 0x5b0   :  { %v478_v27 = vld [vmem:[#allocation6] sm:$0xff] }
 0x5b1   :  { %6615 = vmatmul.mubr.msk.f32.vlgmr.msra.gmra.mrb[12].mxu0 %vm238_vm1, %v478_v27 }
 0x5b2   :  { %7225 = vmatpush3.bf16.msra.mxu0 %v8024_v10  ;;  %6625 = vmatprep.mubr.msk.f32.mxu0 %vm7869_vm2, %v7870_v4  ;;  %v563_v45 = vpop.permute.xlu1 %562 }
 0x5b3   :  { %7226 = vmatprep.subr.bf16.mxu0 %v7868_v3 }
 0x5b6   :  { %7228 = vmatpush3.bf16.msra.mxu0 %v8046_v19 }
 0x5b7   :  { %7229 = vmatprep.subr.bf16.mxu0 %v7868_v3 }
 0x684   :  { %v548_v28 = vpop.f32.mrb[12].mxu0 }
 0x685   :  { %v552_v29 = vadd.f32 %v548_v28, %v8076_v33  ;;  %v6616_v30 = vpop.f32.mrb[13].mxu0 }
 0x687   :  { %7584 = vtanh.f32 %v552_v29  ;;  %v553_v34 = vsub.f32 0.0, %v552_v29 }
 0x689   :  { %v554_v36 = vmul.f32 1.442695, %v553_v34 }
 0x68b   :  { %7586 = vpow2.f32 %v554_v36 }
 0x691   :  { %v7585_v32 = vpop.eup %7584 }
 0x692   :  { %567 = vrot.lane.b32.xlu0 %v7585_v32, %s7871_s5 }
 0x695   :  { %v7587_v38 = vpop.eup %7586 }
 0x696   :  { %v556_v40 = vadd.f32 1.0, %v7587_v38 }
 0x698   :  { %7588 = vrcp.f32 %v556_v40 }
 0x6a2   :  { %v7589_v42 = vpop.eup %7588 }
 0x6a3   :  { %v565_v46 = vmul.f32 %v7589_v42, %v563_v45 }
 0x704   :  { %v568_v43 = vpop.permute.xlu0 %567 }
 0x705   :  { %v570_v44 = vmul.f32 %v7589_v42, %v568_v43 }
 0x707   :  { %572 = vrot.lane.b32.xlu0 %v570_v44, %s7872_s26 }
 0x779   :  { %v573_v47 = vpop.permute.xlu0 %572 }
 0x77a   :  { %v575_v33 = vadd.f32 %v573_v47, %v565_v46 }
 0x77c   :  { %7590 = vtanh.f32 %v575_v33 }
 0x786   :  { %v7591_v48 = vpop.eup %7590 }
 0x787   :  { %578 = vrot.lane.b32.xlu1 %v7591_v48, %s7871_s5 }
 0x78b   :  { %588 = vrot.lane.b32.xlu1 %v575_v33, %s7873_s27 }
 0x7f9   :  { %v579_v49 = vpop.permute.xlu1 %578 }
 0x7fa   :  { %v581_v50 = vmul.f32 %v7589_v42, %v579_v49 }
 0x7fc   :  { %583 = vrot.lane.b32.xlu0 %v581_v50, %s7872_s26 }
 0x7fd   :  { %v589_v51 = vpop.permute.xlu1 %588 }
 0x7fe   :  { %591 = vst.msk [vmem:[#allocation7] sm:$0xff] %vm238_vm1, %v589_v51 }
 0x805   :  { %v676_v52 = vld [vmem:[#allocation7] sm:$0xff] }
 0x806   :  { %678 = vrot.lane.b32.xlu1 %v676_v52, %s7872_s26 }
 0x86e   :  { %v584_v53 = vpop.permute.xlu0 %583 }
 0x86f   :  { %586 = vst.msk [vmem:[#allocation6] sm:$0xff] %vm238_vm1, %v584_v53  ;;  %592 = vst.msk [vmem:[#allocation2 + $0x10] sm:$0xff] %vm238_vm1, %v584_v53 }
 0x876   :  { %v594_v54 = vld [vmem:[#allocation6] sm:$0xff] }
 0x877   :  { %6626 = vmatmul.mubr.msk.f32.vlgmr.msra.gmra.mrb[14].mxu0 %vm238_vm1, %v594_v54 }
 0x878   :  { %7231 = vmatpush3.bf16.msra.mxu0 %v8024_v10  ;;  %6636 = vmatprep.mubr.msk.f32.mxu0 %vm7869_vm2, %v7870_v4  ;;  %v679_v2 = vpop.permute.xlu1 %678 }
 0x879   :  { %7232 = vmatprep.subr.bf16.mxu0 %v7868_v3 }
 0x87c   :  { %7234 = vmatpush3.bf16.msra.mxu0 %v8046_v19 }
 0x87d   :  { %7235 = vmatprep.subr.bf16.mxu0 %v7868_v3 }
 0x94a   :  { %v664_v55 = vpop.f32.mrb[14].mxu0 }
 0x94b   :  { %v668_v56 = vadd.f32 %v664_v55, %v8074_v31  ;;  %v6627_v57 = vpop.f32.mrb[15].mxu0 }
 0x94d   :  { %7592 = vtanh.f32 %v668_v56  ;;  %v669_v59 = vsub.f32 0.0, %v668_v56 }
 0x94f   :  { %v670_v60 = vmul.f32 1.442695, %v669_v59 }
 0x951   :  { %7594 = vpow2.f32 %v670_v60 }
 0x957   :  { %v7593_v58 = vpop.eup %7592 }
 0x958   :  { %683 = vrot.lane.b32.xlu0 %v7593_v58, %s7871_s5 }
 0x95b   :  { %v7595_v61 = vpop.eup %7594 }
 0x95c   :  { %v672_v62 = vadd.f32 1.0, %v7595_v61 }
 0x95e   :  { %7596 = vrcp.f32 %v672_v62 }
 0x968   :  { %v7597_v63 = vpop.eup %7596 }
 0x969   :  { %v681_v5 = vmul.f32 %v7597_v63, %v679_v2 }
 0x9ca   :  { %v684_v0 = vpop.permute.xlu0 %683 }
 0x9cb   :  { %v686_v1 = vmul.f32 %v7597_v63, %v684_v0 }
 0x9cd   :  { %688 = vrot.lane.b32.xlu0 %v686_v1, %s7872_s26 }
 0xa3f   :  { %v689_v6 = vpop.permute.xlu0 %688 }
 0xa40   :  { %v691_v31 = vadd.f32 %v689_v6, %v681_v5 }
 0xa42   :  { %7598 = vtanh.f32 %v691_v31 }
 0xa4c   :  { %v7599_v7 = vpop.eup %7598 }
 0xa4d   :  { %694 = vrot.lane.b32.xlu1 %v7599_v7, %s7871_s5 }
 0xa51   :  { %704 = vrot.lane.b32.xlu1 %v691_v31, %s7873_s27 }
 0xabf   :  { %v695_v8 = vpop.permute.xlu1 %694 }
 0xac0   :  { %v697_v9 = vmul.f32 %v7597_v63, %v695_v8 }
 0xac2   :  { %699 = vrot.lane.b32.xlu0 %v697_v9, %s7872_s26 }
 0xac3   :  { %v705_v11 = vpop.permute.xlu1 %704 }
 0xac4   :  { %707 = vst.msk [vmem:[#allocation7] sm:$0xff] %vm238_vm1, %v705_v11 }
 0xacb   :  { %v792_v12 = vld [vmem:[#allocation7] sm:$0xff] }
 0xacc   :  { %794 = vrot.lane.b32.xlu1 %v792_v12, %s7872_s26 }
 0xb34   :  { %v700_v13 = vpop.permute.xlu0 %699 }
 0xb35   :  { %702 = vst.msk [vmem:[#allocation6] sm:$0xff] %vm238_vm1, %v700_v13  ;;  %708 = vst.msk [vmem:[#allocation2 + $0x18] sm:$0xff] %vm238_vm1, %v700_v13 }
 0xb3c   :  { %v710_v14 = vld [vmem:[#allocation6] sm:$0xff] }
 0xb3d   :  { %6637 = vmatmul.mubr.msk.f32.vlgmr.msra.gmra.mrb[16].mxu0 %vm238_vm1, %v710_v14  ;;  %v1183_v14 = vld [vmem:[%s9293_s2] sm:$0xff] }
 0xb3e   :  { %7237 = vmatpush3.bf16.msra.mxu0 %v8024_v10  ;;  %6647 = vmatprep.mubr.msk.f32.mxu0 %vm7869_vm2, %v7870_v4  ;;  %v795_v27 = vpop.permute.xlu1 %794 }
 0xb3f   :  { %7238 = vmatprep.subr.bf16.mxu0 %v7868_v3 }
 0xb42   :  { %7240 = vmatpush3.bf16.msra.mxu0 %v8046_v19 }
 0xb43   :  { %7241 = vmatprep.subr.bf16.mxu0 %v7868_v3 }
 0xc10   :  { %v780_v15 = vpop.f32.mrb[16].mxu0 }
 0xc11   :  { %v784_v16 = vadd.f32 %v780_v15, %v8080_v37  ;;  %v6638_v17 = vpop.f32.mrb[17].mxu0  ;;  %v1184_v15 = vld [vmem:[%s9293_s2 + $0x8] sm:$0xff] }
 0xc13   :  { %7600 = vtanh.f32 %v784_v16  ;;  %v785_v20 = vsub.f32 0.0, %v784_v16  ;;  %v7253_v16 = vpack.c.bf16 %v1184_v15, %v1183_v14 }
 0xc15   :  { %v786_v21 = vmul.f32 1.442695, %v785_v20 }
 0xc17   :  { %7602 = vpow2.f32 %v786_v21 }
 0xc1d   :  { %v7601_v18 = vpop.eup %7600 }
 0xc1e   :  { %799 = vrot.lane.b32.xlu0 %v7601_v18, %s7871_s5 }
 0xc21   :  { %v7603_v22 = vpop.eup %7602 }
 0xc22   :  { %v788_v23 = vadd.f32 1.0, %v7603_v22 }
 0xc24   :  { %7604 = vrcp.f32 %v788_v23  ;;  %v1185_v23 = vld [vmem:[%s9293_s2 + $0x10] sm:$0xff] }
 0xc2e   :  { %v7605_v24 = vpop.eup %7604 }
 0xc2f   :  { %v797_v28 = vmul.f32 %v7605_v24, %v795_v27  ;;  %v1175_v27 = vld [vmem:[#allocation2] sm:$0xff] }
 0xc90   :  { %v800_v25 = vpop.permute.xlu0 %799 }
 0xc91   :  { %v802_v26 = vmul.f32 %v7605_v24, %v800_v25 }
 0xc93   :  { %804 = vrot.lane.b32.xlu0 %v802_v26, %s7872_s26 }
 0xd05   :  { %v805_v29 = vpop.permute.xlu0 %804 }
 0xd06   :  { %v807_v37 = vadd.f32 %v805_v29, %v797_v28  ;;  %v1176_v28 = vld [vmem:[#allocation2 + $0x8] sm:$0xff]  ;;  %v1177_v29 = vld [vmem:[#allocation2 + $0x10] sm:$0xff] }
 0xd08   :  { %7606 = vtanh.f32 %v807_v37 }
 0xd12   :  { %v7607_v30 = vpop.eup %7606 }
 0xd13   :  { %810 = vrot.lane.b32.xlu1 %v7607_v30, %s7871_s5 }
 0xd17   :  { %820 = vrot.lane.b32.xlu1 %v807_v37, %s7873_s27  ;;  %v1178_v37 = vld [vmem:[#allocation2 + $0x18] sm:$0xff] }
 0xd85   :  { %v811_v32 = vpop.permute.xlu1 %810 }
 0xd86   :  { %v813_v34 = vmul.f32 %v7605_v24, %v811_v32  ;;  %v1186_v24 = vld [vmem:[%s9293_s2 + $0x18] sm:$0xff] }
 0xd87   :  { %v7257_v25 = vpack.c.bf16 %v1186_v24, %v1185_v23 }
 0xd88   :  { %815 = vrot.lane.b32.xlu0 %v813_v34, %s7872_s26 }
 0xd89   :  { %v821_v36 = vpop.permute.xlu1 %820 }
 0xd8a   :  { %823 = vst.msk [vmem:[#allocation7] sm:$0xff] %vm238_vm1, %v821_v36 }
 0xd91   :  { %v908_v38 = vld [vmem:[#allocation7] sm:$0xff] }
 0xd92   :  { %910 = vrot.lane.b32.xlu1 %v908_v38, %s7872_s26 }
 0xdfa   :  { %v816_v40 = vpop.permute.xlu0 %815 }
 0xdfb   :  { %818 = vst.msk [vmem:[#allocation6] sm:$0xff] %vm238_vm1, %v816_v40  ;;  %824 = vst.msk [vmem:[#allocation2 + $0x20] sm:$0xff] %vm238_vm1, %v816_v40 }
 0xe02   :  { %v826_v42 = vld [vmem:[#allocation6] sm:$0xff] }
 0xe03   :  { %6648 = vmatmul.mubr.msk.f32.vlgmr.msra.gmra.mrb[18].mxu0 %vm238_vm1, %v826_v42  ;;  %v1179_v30 = vld [vmem:[#allocation2 + $0x20] sm:$0xff] }
 0xe04   :  { %7243 = vmatpush3.bf16.msra.mxu0 %v8024_v10  ;;  %6658 = vmatprep.mubr.msk.f32.mxu0 %vm7869_vm2, %v7870_v4  ;;  %v911_v53 = vpop.permute.xlu1 %910 }
 0xe05   :  { %7244 = vmatprep.subr.bf16.mxu0 %v7868_v3 }
 0xe08   :  { %7246 = vmatpush3.bf16.msra.mxu0 %v8046_v19 }
 0xe09   :  { %7247 = vmatprep.subr.bf16.mxu0 %v7868_v3 }
 0xed6   :  { %v896_v43 = vpop.f32.mrb[18].mxu0 }
 0xed7   :  { %v900_v44 = vadd.f32 %v896_v43, %v8078_v35  ;;  %v6649_v45 = vpop.f32.mrb[19].mxu0 }
 0xed9   :  { %7608 = vtanh.f32 %v900_v44  ;;  %v901_v47 = vsub.f32 0.0, %v900_v44 }
 0xedb   :  { %v902_v33 = vmul.f32 1.442695, %v901_v47 }
 0xedd   :  { %7610 = vpow2.f32 %v902_v33 }
 0xee3   :  { %v7609_v46 = vpop.eup %7608 }
 0xee4   :  { %915 = vrot.lane.b32.xlu0 %v7609_v46, %s7871_s5 }
 0xee7   :  { %v7611_v48 = vpop.eup %7610 }
 0xee8   :  { %v904_v49 = vadd.f32 1.0, %v7611_v48 }
 0xeea   :  { %7612 = vrcp.f32 %v904_v49 }
 0xef4   :  { %v7613_v50 = vpop.eup %7612 }
 0xef5   :  { %v913_v54 = vmul.f32 %v7613_v50, %v911_v53 }
 0xf56   :  { %v916_v51 = vpop.permute.xlu0 %915 }
 0xf57   :  { %v918_v52 = vmul.f32 %v7613_v50, %v916_v51 }
 0xf59   :  { %920 = vrot.lane.b32.xlu0 %v918_v52, %s7872_s26 }
 0xfcb   :  { %v921_v55 = vpop.permute.xlu0 %920 }
 0xfcc   :  { %v923_v35 = vadd.f32 %v921_v55, %v913_v54 }
 0xfce   :  { %7614 = vtanh.f32 %v923_v35 }
 0xfd8   :  { %v7615_v56 = vpop.eup %7614 }
 0xfd9   :  { %926 = vrot.lane.b32.xlu1 %v7615_v56, %s7871_s5 }
 0xfdd   :  { %936 = vrot.lane.b32.xlu1 %v923_v35, %s7873_s27 }
0x104b   :  { %v927_v57 = vpop.permute.xlu1 %926 }
0x104c   :  { %v929_v58 = vmul.f32 %v7613_v50, %v927_v57 }
0x104e   :  { %931 = vrot.lane.b32.xlu0 %v929_v58, %s7872_s26  ;;  %v1333_v58 = vld [vmem:[%s9294_s4] sm:$0xff] }
0x104f   :  { %v937_v59 = vpop.permute.xlu1 %936 }
0x1050   :  { %939 = vst.msk [vmem:[#allocation7] sm:$0xff] %vm238_vm1, %v937_v59  ;;  %v1334_v59 = vld [vmem:[%s9294_s4 + $0x8] sm:$0xff] }
0x1057   :  { %v1024_v60 = vld [vmem:[#allocation7] sm:$0xff] }
0x1058   :  { %1026 = vrot.lane.b32.xlu1 %v1024_v60, %s7872_s26  ;;  %v8240_v60 = vpack.c.bf16 %v1334_v59, %v1333_v58 }
0x105a   :  { %7263 = vmatpush3.bf16.msra.mxu1 %v8240_v60 }
0x105b   :  { %7264 = vmatprep.subr.bf16.mxu1 %v7868_v3 }
0x10c0   :  { %v932_v61 = vpop.permute.xlu0 %931 }
0x10c1   :  { %934 = vst.msk [vmem:[#allocation6] sm:$0xff] %vm238_vm1, %v932_v61  ;;  %940 = vst.msk [vmem:[#allocation2 + $0x28] sm:$0xff] %vm238_vm1, %v932_v61  ;;  %v1335_v61 = vld [vmem:[%s9294_s4 + $0x10] sm:$0xff] }
0x10c8   :  { %v942_v62 = vld [vmem:[#allocation6] sm:$0xff]  ;;  %v1180_v32 = vld [vmem:[#allocation2 + $0x28] sm:$0xff] }
0x10c9   :  { %6659 = vmatmul.mubr.msk.f32.vlgmr.msra.gmra.mrb[20].mxu0 %vm238_vm1, %v942_v62  ;;  %v1336_v62 = vld [vmem:[%s9294_s4 + $0x18] sm:$0xff] }
0x10ca   :  { %7249 = vmatpush3.bf16.msra.mxu0 %v8024_v10  ;;  %6669 = vmatprep.mubr.msk.f32.mxu0 %vm7869_vm2, %v7870_v4 }
0x10cb   :  { %7250 = vmatprep.subr.bf16.mxu0 %v7868_v3 }
0x10ce   :  { %7252 = vmatpush3.bf16.msra.mxu0 %v8046_v19  ;;  %v1027_v19 = vpop.permute.xlu1 %1026 }
0x10cf   :  { %7254 = vmatprep.subr.bf16.mxu0 %v7253_v16 }
0x119c   :  { %v1012_v63 = vpop.f32.mrb[20].mxu0 }
0x119d   :  { %v1016_v0 = vadd.f32 %v1012_v63, %v8084_v41  ;;  %v6660_v1 = vpop.f32.mrb[21].mxu0 }
0x119f   :  { %7616 = vtanh.f32 %v1016_v0  ;;  %v1017_v5 = vsub.f32 0.0, %v1016_v0  ;;  %v8249_v0 = vpack.c.bf16 %v1336_v62, %v1335_v61 }
0x11a1   :  { %v1018_v6 = vmul.f32 1.442695, %v1017_v5  ;;  %7266 = vmatpush3.bf16.msra.mxu1 %v8249_v0 }
0x11a2   :  { %7267 = vmatprep.subr.bf16.mxu1 %v7868_v3 }
0x11a3   :  { %7618 = vpow2.f32 %v1018_v6 }
0x11a9   :  { %v7617_v2 = vpop.eup %7616 }
0x11aa   :  { %1031 = vrot.lane.b32.xlu0 %v7617_v2, %s7871_s5 }
0x11ad   :  { %v7619_v31 = vpop.eup %7618 }
0x11ae   :  { %v1020_v10 = vadd.f32 1.0, %v7619_v31 }
0x11b0   :  { %7620 = vrcp.f32 %v1020_v10 }
0x11ba   :  { %v7621_v7 = vpop.eup %7620 }
0x11bb   :  { %v1029_v11 = vmul.f32 %v7621_v7, %v1027_v19 }
0x121c   :  { %v1032_v8 = vpop.permute.xlu0 %1031 }
0x121d   :  { %v1034_v9 = vmul.f32 %v7621_v7, %v1032_v8 }
0x121f   :  { %1036 = vrot.lane.b32.xlu0 %v1034_v9, %s7872_s26 }
0x1291   :  { %v1037_v12 = vpop.permute.xlu0 %1036 }
0x1292   :  { %v1039_v41 = vadd.f32 %v1037_v12, %v1029_v11  ;;  %v8288_v11 = vld [vmem:[%s9295_s25] ss:$0 sm:$0xff] }
0x1294   :  { %7622 = vtanh.f32 %v1039_v41 }
0x129e   :  { %v7623_v13 = vpop.eup %7622 }
0x129f   :  { %1042 = vrot.lane.b32.xlu1 %v7623_v13, %s7871_s5 }
0x12a3   :  { %1052 = vrot.lane.b32.xlu1 %v1039_v41, %s7873_s27 }
0x1311   :  { %v1043_v17 = vpop.permute.xlu1 %1042 }
0x1312   :  { %v1045_v18 = vmul.f32 %v7621_v7, %v1043_v17 }
0x1314   :  { %1047 = vrot.lane.b32.xlu0 %v1045_v18, %s7872_s26 }
0x1315   :  { %v1053_v20 = vpop.permute.xlu1 %1052 }
0x1316   :  { %1055 = vst.msk [vmem:[#allocation7] sm:$0xff] %vm238_vm1, %v1053_v20 }
0x131d   :  { %v1140_v21 = vld [vmem:[#allocation7] sm:$0xff] }
0x131e   :  { %1142 = vrot.lane.b32.xlu1 %v1140_v21, %s7872_s26 }
0x1386   :  { %v1048_v22 = vpop.permute.xlu0 %1047 }
0x1387   :  { %1050 = vst.msk [vmem:[#allocation6] sm:$0xff] %vm238_vm1, %v1048_v22  ;;  %1056 = vst.msk [vmem:[#allocation2 + $0x30] sm:$0xff] %vm238_vm1, %v1048_v22 }
0x138e   :  { %v1058_v26 = vld [vmem:[#allocation6] sm:$0xff]  ;;  %v1181_v34 = vld [vmem:[#allocation2 + $0x30] sm:$0xff] }
0x138f   :  { %6670 = vmatmul.mubr.msk.f32.vlgmr.msra.gmra.mrb[22].mxu0 %vm238_vm1, %v1058_v26 }
0x1390   :  { %7256 = vmatpush3.bf16.msra.mxu0 %v7253_v16  ;;  %6680 = vmatprep.mubr.msk.f32.mxu0 %vm238_vm1, %v1175_v27  ;;  %v1143_v54 = vpop.permute.xlu1 %1142 }
0x1391   :  { %7258 = vmatprep.subr.bf16.mxu0 %v7257_v25 }
0x1394   :  { %7260 = vmatpush3.bf16.msra.mxu0 %v7257_v25 }
0x1395   :  { %7273 = vmatprep.subr.bf16.mxu0 %v7868_v3 }
0x1397   :  { %6681 = vmatmul.mubr.msk.f32.vlgmr.msra.gmra.mrb[24].mxu0 %vm238_vm1, %v1176_v28 }
0x1398   :  { %6683 = vmatprep.mubr.msk.f32.mxu0 %vm238_vm1, %v1177_v29  ;;  %7275 = vmatpush3.bf16.msra.mxu0 %v8240_v60 }
0x1399   :  { %7276 = vmatprep.subr.bf16.mxu0 %v7868_v3 }
0x139b   :  { %6684 = vmatmul.mubr.msk.f32.gmra.mrb[26].mxu0 %vm238_vm1, %v1178_v37 }
0x139c   :  { %6686 = vmatprep.mubr.msk.f32.mxu0 %vm238_vm1, %v1179_v30  ;;  %7278 = vmatpush3.bf16.msra.mxu0 %v8249_v0 }
0x139d   :  { %7285 = vmatprep.subr.bf16.mxu0 %v7868_v3 }
0x139f   :  { %6687 = vmatmul.mubr.msk.f32.gmra.mrb[28].mxu0 %vm238_vm1, %v1180_v32 }
0x13a0   :  { %6689 = vmatprep.mubr.msk.f32.mxu0 %vm238_vm1, %v1181_v34 }
0x1462   :  { %v1128_v36 = vpop.f32.mrb[22].mxu0 }
0x1463   :  { %v1132_v38 = vadd.f32 %v1128_v36, %v8082_v39  ;;  %v6671_v40 = vpop.f32.mrb[23].mxu0 }
0x1465   :  { %7624 = vtanh.f32 %v1132_v38  ;;  %v1133_v48 = vsub.f32 0.0, %v1132_v38 }
0x1467   :  { %v1134_v49 = vmul.f32 1.442695, %v1133_v48 }
0x1469   :  { %7626 = vpow2.f32 %v1134_v49 }
0x146a   :  { %v8218_v42 = vpop.f32.mrb[24].mxu0 }
0x146b   :  { %v8220_v43 = vpop.f32.mrb[25].mxu0  ;;  %v1290_v38 = vadd.f32 %v8218_v42, %v8288_v11 }
0x146c   :  { %v1285_v12 = vadd.f32 %v8288_v11, %v8220_v43 }
0x146e   :  { %v8222_v44 = vpop.f32.mrb[26].mxu0 }
0x146f   :  { %v7625_v45 = vpop.eup %7624  ;;  %v8224_v46 = vpop.f32.mrb[27].mxu0 }
0x1470   :  { %1147 = vrot.lane.b32.xlu0 %v7625_v45, %s7871_s5 }
0x1472   :  { %v8227_v47 = vpop.f32.mrb[28].mxu0 }
0x1473   :  { %v8229_v33 = vpop.f32.mrb[29].mxu0  ;;  %v7627_v39 = vpop.eup %7626 }
0x1474   :  { %v1136_v50 = vadd.f32 1.0, %v7627_v39 }
0x1476   :  { %7628 = vrcp.f32 %v1136_v50 }
0x1480   :  { %v7629_v51 = vpop.eup %7628 }
0x1481   :  { %v1145_v55 = vmul.f32 %v7629_v51, %v1143_v54 }
0x14e2   :  { %v1148_v52 = vpop.permute.xlu0 %1147 }
0x14e3   :  { %v1150_v53 = vmul.f32 %v7629_v51, %v1148_v52 }
0x14e5   :  { %1152 = vrot.lane.b32.xlu0 %v1150_v53, %s7872_s26 }
0x1557   :  { %v1153_v35 = vpop.permute.xlu0 %1152 }
0x1558   :  { %v1155_v56 = vadd.f32 %v1153_v35, %v1145_v55 }
0x155a   :  { %7630 = vtanh.f32 %v1155_v56 }
0x1564   :  { %v7631_v57 = vpop.eup %7630 }
0x1565   :  { %1158 = vrot.lane.b32.xlu1 %v7631_v57, %s7871_s5 }
0x1569   :  { %1168 = vrot.lane.b32.xlu1 %v1155_v56, %s7873_s27 }
0x15d7   :  { %v1159_v63 = vpop.permute.xlu1 %1158 }
0x15d8   :  { %v1161_v1 = vmul.f32 %v7629_v51, %v1159_v63 }
0x15da   :  { %1163 = vrot.lane.b32.xlu0 %v1161_v1, %s7872_s26 }
0x15db   :  { %v1169_v2 = vpop.permute.xlu1 %1168 }
0x15dc   :  { %1171 = vst.msk [vmem:[#allocation7] sm:$0xff] %vm238_vm1, %v1169_v2  ;;  %v1295_v2 = vadd.f32 %v8288_v11, %v8224_v46 }
0x15e3   :  { %v8260_v5 = vld [vmem:[#allocation7] sm:$0xff] }
0x15e4   :  { %1332 = vst.msk [vmem:[#allocation7] sm:$0xff] %vm238_vm1, %v7870_v4 }
0x15eb   :  { %v1420_v6 = vld [vmem:[#allocation7] sm:$0xff] }
0x15ec   :  { %1422 = vrot.lane.b32.xlu1 %v1420_v6, %s7872_s26 }
0x164c   :  { %v1164_v31 = vpop.permute.xlu0 %1163 }
0x164d   :  { %1166 = vst.msk [vmem:[#allocation6] sm:$0xff] %vm238_vm1, %v1164_v31  ;;  %1172 = vst.msk [vmem:[#allocation2 + $0x38] sm:$0xff] %vm238_vm1, %v1164_v31 }
0x1654   :  { %v8267_v10 = vld [vmem:[#allocation6] sm:$0xff]  ;;  %v1182_v7 = vld [vmem:[#allocation2 + $0x38] sm:$0xff] }
0x1655   :  { %1331 = vst.msk [vmem:[#allocation6] sm:$0xff] %vm238_vm1, %v7870_v4  ;;  %6690 = vmatmul.mubr.msk.f32.gmra.mrb[30].mxu0 %vm238_vm1, %v1182_v7 }
0x1656   :  { %6722 = vmatprep.mubr.msk.f32.mxu0 %vm7869_vm2, %v7870_v4 }
0x165c   :  { %v1338_v8 = vld [vmem:[#allocation6] sm:$0xff] }
0x165d   :  { %6701 = vmatmul.mubr.msk.f32.vlgmr.msra.gmra.mrb[0].mxu1 %vm238_vm1, %v1338_v8 }
0x165e   :  { %7269 = vmatpush3.bf16.msra.mxu1 %v8240_v60  ;;  %6711 = vmatprep.mubr.msk.f32.mxu1 %vm7869_vm2, %v7870_v4  ;;  %v1423_v24 = vpop.permute.xlu1 %1422 }
0x165f   :  { %7270 = vmatprep.subr.bf16.mxu1 %v7868_v3 }
0x1662   :  { %7272 = vmatpush3.bf16.msra.mxu1 %v8249_v0 }
0x1663   :  { %7279 = vmatprep.subr.bf16.mxu1 %v7868_v3 }
0x1728   :  { %v8281_v9 = vpop.f32.mrb[30].mxu0 }
0x1729   :  { %v8283_v19 = vpop.f32.mrb[31].mxu0 }
0x1730   :  { %v1408_v41 = vpop.f32.mrb[0].mxu1 }
0x1731   :  { %v1412_v13 = vadd.f32 %v1408_v41, %v1285_v12  ;;  %v6702_v14 = vpop.f32.mrb[1].mxu1 }
0x1733   :  { %7632 = vtanh.f32 %v1412_v13  ;;  %v1413_v16 = vsub.f32 0.0, %v1412_v13 }
0x1735   :  { %v1414_v17 = vmul.f32 1.442695, %v1413_v16 }
0x1737   :  { %7634 = vpow2.f32 %v1414_v17 }
0x173d   :  { %v7633_v15 = vpop.eup %7632 }
0x173e   :  { %1427 = vrot.lane.b32.xlu0 %v7633_v15, %s7871_s5 }
0x1741   :  { %v7635_v18 = vpop.eup %7634 }
0x1742   :  { %v1416_v20 = vadd.f32 1.0, %v7635_v18 }
0x1744   :  { %7636 = vrcp.f32 %v1416_v20 }
0x174e   :  { %v7637_v21 = vpop.eup %7636 }
0x174f   :  { %v1425_v25 = vmul.f32 %v7637_v21, %v1423_v24 }
0x17b0   :  { %v1428_v22 = vpop.permute.xlu0 %1427 }
0x17b1   :  { %v1430_v23 = vmul.f32 %v7637_v21, %v1428_v22 }
0x17b3   :  { %1432 = vrot.lane.b32.xlu0 %v1430_v23, %s7872_s26 }
0x1825   :  { %v1433_v26 = vpop.permute.xlu0 %1432 }
0x1826   :  { %v1435_v27 = vadd.f32 %v1433_v26, %v1425_v25 }
0x1828   :  { %7638 = vtanh.f32 %v1435_v27 }
0x1832   :  { %v7639_v28 = vpop.eup %7638 }
0x1833   :  { %1438 = vrot.lane.b32.xlu1 %v7639_v28, %s7871_s5 }
0x1837   :  { %1448 = vrot.lane.b32.xlu1 %v1435_v27, %s7873_s27 }
0x18a5   :  { %v1439_v29 = vpop.permute.xlu1 %1438 }
0x18a6   :  { %v1441_v37 = vmul.f32 %v7637_v21, %v1439_v29  ;;  %v1300_v29 = vadd.f32 %v8222_v44, %v8288_v11 }
0x18a8   :  { %1443 = vrot.lane.b32.xlu0 %v1441_v37, %s7872_s26 }
0x18a9   :  { %v1449_v30 = vpop.permute.xlu1 %1448 }
0x18aa   :  { %1451 = vst.msk [vmem:[#allocation7] sm:$0xff] %vm238_vm1, %v1449_v30 }
0x18b1   :  { %v1536_v32 = vld [vmem:[#allocation7] sm:$0xff] }
0x18b2   :  { %1538 = vrot.lane.b32.xlu1 %v1536_v32, %s7872_s26 }
0x191a   :  { %v1444_v34 = vpop.permute.xlu0 %1443 }
0x191b   :  { %1446 = vst.msk [vmem:[#allocation6] sm:$0xff] %vm238_vm1, %v1444_v34  ;;  %1452 = vst.msk [vmem:[#allocation2] sm:$0xff] %vm238_vm1, %v1444_v34 }
0x1922   :  { %v1454_v36 = vld [vmem:[#allocation6] sm:$0xff] }
0x1923   :  { %6712 = vmatmul.mubr.msk.f32.vlgmr.msra.gmra.mrb[2].mxu1 %vm238_vm1, %v1454_v36 }
0x1924   :  { %7281 = vmatpush3.bf16.msra.mxu1 %v8240_v60  ;;  %6733 = vmatprep.mubr.msk.f32.mxu1 %vm7869_vm2, %v7870_v4  ;;  %v1539_v55 = vpop.permute.xlu1 %1538 }
0x1925   :  { %7282 = vmatprep.subr.bf16.mxu1 %v7868_v3 }
0x1928   :  { %7284 = vmatpush3.bf16.msra.mxu1 %v8249_v0 }
0x1929   :  { %7291 = vmatprep.subr.bf16.mxu1 %v7868_v3 }
0x19f6   :  { %v1524_v40 = vpop.f32.mrb[2].mxu1 }
0x19f7   :  { %v1528_v43 = vadd.f32 %v1524_v40, %v1290_v38  ;;  %v6713_v45 = vpop.f32.mrb[3].mxu1 }
0x19f9   :  { %7640 = vtanh.f32 %v1528_v43  ;;  %v1529_v49 = vsub.f32 0.0, %v1528_v43 }
0x19fb   :  { %v1530_v39 = vmul.f32 1.442695, %v1529_v49 }
0x19fd   :  { %7642 = vpow2.f32 %v1530_v39 }
0x1a03   :  { %v7641_v48 = vpop.eup %7640 }
0x1a04   :  { %1543 = vrot.lane.b32.xlu0 %v7641_v48, %s7871_s5 }
0x1a07   :  { %v7643_v50 = vpop.eup %7642 }
0x1a08   :  { %v1532_v51 = vadd.f32 1.0, %v7643_v50 }
0x1a0a   :  { %7644 = vrcp.f32 %v1532_v51 }
0x1a14   :  { %v7645_v52 = vpop.eup %7644 }
0x1a15   :  { %v1541_v42 = vmul.f32 %v7645_v52, %v1539_v55 }
0x1a76   :  { %v1544_v53 = vpop.permute.xlu0 %1543 }
0x1a77   :  { %v1546_v54 = vmul.f32 %v7645_v52, %v1544_v53 }
0x1a79   :  { %1548 = vrot.lane.b32.xlu0 %v1546_v54, %s7872_s26 }
0x1aeb   :  { %v1549_v35 = vpop.permute.xlu0 %1548 }
0x1aec   :  { %v1551_v56 = vadd.f32 %v1549_v35, %v1541_v42 }
0x1aee   :  { %7646 = vtanh.f32 %v1551_v56 }
0x1af8   :  { %v7647_v57 = vpop.eup %7646 }
0x1af9   :  { %1554 = vrot.lane.b32.xlu1 %v7647_v57, %s7871_s5  ;;  %v1305_v57 = vadd.f32 %v8288_v11, %v8229_v33 }
0x1afd   :  { %1564 = vrot.lane.b32.xlu1 %v1551_v56, %s7873_s27 }
0x1b6b   :  { %v1555_v58 = vpop.permute.xlu1 %1554 }
0x1b6c   :  { %v1557_v59 = vmul.f32 %v7645_v52, %v1555_v58 }
0x1b6e   :  { %1559 = vrot.lane.b32.xlu0 %v1557_v59, %s7872_s26 }
0x1b6f   :  { %v1565_v61 = vpop.permute.xlu1 %1564 }
0x1b70   :  { %1567 = vst.msk [vmem:[#allocation7] sm:$0xff] %vm238_vm1, %v1565_v61 }
0x1b77   :  { %v1652_v62 = vld [vmem:[#allocation7] sm:$0xff] }
0x1b78   :  { %1654 = vrot.lane.b32.xlu1 %v1652_v62, %s7872_s26 }
0x1be0   :  { %v1560_v63 = vpop.permute.xlu0 %1559 }
0x1be1   :  { %1562 = vst.msk [vmem:[#allocation6] sm:$0xff] %vm238_vm1, %v1560_v63  ;;  %1568 = vst.msk [vmem:[#allocation2 + $0x8] sm:$0xff] %vm238_vm1, %v1560_v63 }
0x1be8   :  { %v1570_v1 = vld [vmem:[#allocation6] sm:$0xff] }
0x1be9   :  { %6723 = vmatmul.mubr.msk.f32.vlgmr.msra.gmra.mrb[32].mxu0 %vm238_vm1, %v1570_v1 }
0x1bea   :  { %7287 = vmatpush3.bf16.msra.mxu0 %v8240_v60  ;;  %6744 = vmatprep.mubr.msk.f32.mxu0 %vm7869_vm2, %v7870_v4  ;;  %v1655_v18 = vpop.permute.xlu1 %1654 }
0x1beb   :  { %7288 = vmatprep.subr.bf16.mxu0 %v7868_v3 }
0x1bee   :  { %7290 = vmatpush3.bf16.msra.mxu0 %v8249_v0 }
0x1bef   :  { %7297 = vmatprep.subr.bf16.mxu0 %v7868_v3 }
0x1cbc   :  { %v1640_v6 = vpop.f32.mrb[32].mxu0 }
0x1cbd   :  { %v1644_v31 = vadd.f32 %v1640_v6, %v1295_v2  ;;  %v6724_v7 = vpop.f32.mrb[33].mxu0 }
0x1cbf   :  { %7648 = vtanh.f32 %v1644_v31  ;;  %v1645_v12 = vsub.f32 0.0, %v1644_v31 }
0x1cc1   :  { %v1646_v41 = vmul.f32 1.442695, %v1645_v12 }
0x1cc3   :  { %7650 = vpow2.f32 %v1646_v41 }
0x1cc9   :  { %v7649_v8 = vpop.eup %7648 }
0x1cca   :  { %1659 = vrot.lane.b32.xlu0 %v7649_v8, %s7871_s5 }
0x1ccd   :  { %v7651_v13 = vpop.eup %7650 }
0x1cce   :  { %v1648_v14 = vadd.f32 1.0, %v7651_v13 }
0x1cd0   :  { %7652 = vrcp.f32 %v1648_v14 }
0x1cda   :  { %v7653_v15 = vpop.eup %7652 }
0x1cdb   :  { %v1657_v46 = vmul.f32 %v7653_v15, %v1655_v18 }
0x1d3c   :  { %v1660_v16 = vpop.permute.xlu0 %1659 }
0x1d3d   :  { %v1662_v17 = vmul.f32 %v7653_v15, %v1660_v16 }
0x1d3f   :  { %1664 = vrot.lane.b32.xlu0 %v1662_v17, %s7872_s26 }
0x1db1   :  { %v1665_v20 = vpop.permute.xlu0 %1664 }
0x1db2   :  { %v1667_v21 = vadd.f32 %v1665_v20, %v1657_v46 }
0x1db4   :  { %7654 = vtanh.f32 %v1667_v21 }
0x1dbe   :  { %v7655_v22 = vpop.eup %7654 }
0x1dbf   :  { %1670 = vrot.lane.b32.xlu1 %v7655_v22, %s7871_s5 }
0x1dc3   :  { %1680 = vrot.lane.b32.xlu1 %v1667_v21, %s7873_s27  ;;  %v1310_v21 = vadd.f32 %v8227_v47, %v8288_v11 }
0x1e31   :  { %v1671_v23 = vpop.permute.xlu1 %1670 }
0x1e32   :  { %v1673_v24 = vmul.f32 %v7653_v15, %v1671_v23 }
0x1e34   :  { %1675 = vrot.lane.b32.xlu0 %v1673_v24, %s7872_s26 }
0x1e35   :  { %v1681_v25 = vpop.permute.xlu1 %1680 }
0x1e36   :  { %1683 = vst.msk [vmem:[#allocation7] sm:$0xff] %vm238_vm1, %v1681_v25 }
0x1e3d   :  { %v1768_v26 = vld [vmem:[#allocation7] sm:$0xff] }
0x1e3e   :  { %1770 = vrot.lane.b32.xlu1 %v1768_v26, %s7872_s26 }
0x1ea6   :  { %v1676_v27 = vpop.permute.xlu0 %1675 }
0x1ea7   :  { %1678 = vst.msk [vmem:[#allocation6] sm:$0xff] %vm238_vm1, %v1676_v27  ;;  %1684 = vst.msk [vmem:[#allocation2 + $0x10] sm:$0xff] %vm238_vm1, %v1676_v27 }
0x1eae   :  { %v1686_v28 = vld [vmem:[#allocation6] sm:$0xff] }
0x1eaf   :  { %6734 = vmatmul.mubr.msk.f32.vlgmr.msra.gmra.mrb[4].mxu1 %vm238_vm1, %v1686_v28 }
0x1eb0   :  { %7293 = vmatpush3.bf16.msra.mxu1 %v8240_v60  ;;  %6755 = vmatprep.mubr.msk.f32.mxu1 %vm7869_vm2, %v7870_v4  ;;  %v1771_v39 = vpop.permute.xlu1 %1770 }
0x1eb1   :  { %7294 = vmatprep.subr.bf16.mxu1 %v7868_v3 }
0x1eb4   :  { %7296 = vmatpush3.bf16.msra.mxu1 %v8249_v0 }
0x1eb5   :  { %7303 = vmatprep.subr.bf16.mxu1 %v7868_v3 }
0x1f82   :  { %v1756_v37 = vpop.f32.mrb[4].mxu1 }
0x1f83   :  { %v1760_v30 = vadd.f32 %v1756_v37, %v1300_v29  ;;  %v6735_v32 = vpop.f32.mrb[5].mxu1 }
0x1f85   :  { %7656 = vtanh.f32 %v1760_v30  ;;  %v1761_v36 = vsub.f32 0.0, %v1760_v30 }
0x1f87   :  { %v1762_v38 = vmul.f32 1.442695, %v1761_v36 }
0x1f89   :  { %7658 = vpow2.f32 %v1762_v38  ;;  %v2275_v38 = vld [vmem:[%s9296_s19] sm:$0xff] }
0x1f8f   :  { %v7657_v34 = vpop.eup %7656 }
0x1f90   :  { %1775 = vrot.lane.b32.xlu0 %v7657_v34, %s7871_s5 }
0x1f93   :  { %v7659_v40 = vpop.eup %7658 }
0x1f94   :  { %v1764_v43 = vadd.f32 1.0, %v7659_v40  ;;  %v2276_v40 = vld [vmem:[%s9296_s19 + $0x8] sm:$0xff] }
0x1f96   :  { %7660 = vrcp.f32 %v1764_v43  ;;  %v7309_v43 = vpack.c.bf16 %v2276_v40, %v2275_v38 }
0x1fa0   :  { %v7661_v45 = vpop.eup %7660 }
0x1fa1   :  { %v1773_v44 = vmul.f32 %v7661_v45, %v1771_v39 }
0x2002   :  { %v1776_v48 = vpop.permute.xlu0 %1775 }
0x2003   :  { %v1778_v49 = vmul.f32 %v7661_v45, %v1776_v48 }
0x2005   :  { %1780 = vrot.lane.b32.xlu0 %v1778_v49, %s7872_s26 }
0x2077   :  { %v1781_v50 = vpop.permute.xlu0 %1780 }
0x2078   :  { %v1783_v51 = vadd.f32 %v1781_v50, %v1773_v44  ;;  %v2277_v50 = vld [vmem:[%s9296_s19 + $0x10] sm:$0xff] }
0x207a   :  { %7662 = vtanh.f32 %v1783_v51 }
0x2084   :  { %v7663_v52 = vpop.eup %7662 }
0x2085   :  { %1786 = vrot.lane.b32.xlu1 %v7663_v52, %s7871_s5 }
0x2089   :  { %1796 = vrot.lane.b32.xlu1 %v1783_v51, %s7873_s27  ;;  %v2278_v51 = vld [vmem:[%s9296_s19 + $0x18] sm:$0xff] }
0x208a   :  { %v7313_v52 = vpack.c.bf16 %v2278_v51, %v2277_v50  ;;  %v2427_v50 = vld [vmem:[%s9297_s3 + $0x10] sm:$0xff]  ;;  %v2428_v51 = vld [vmem:[%s9297_s3 + $0x18] sm:$0xff] }
0x20f7   :  { %v1787_v53 = vpop.permute.xlu1 %1786 }
0x20f8   :  { %v1789_v54 = vmul.f32 %v7661_v45, %v1787_v53 }
0x20fa   :  { %1791 = vrot.lane.b32.xlu0 %v1789_v54, %s7872_s26  ;;  %v2267_v54 = vld [vmem:[#allocation2] sm:$0xff] }
0x20fb   :  { %v1797_v55 = vpop.permute.xlu1 %1796 }
0x20fc   :  { %1799 = vst.msk [vmem:[#allocation7] sm:$0xff] %vm238_vm1, %v1797_v55  ;;  %v2268_v55 = vld [vmem:[#allocation2 + $0x8] sm:$0xff] }
0x2103   :  { %v1884_v42 = vld [vmem:[#allocation7] sm:$0xff] }
0x2104   :  { %1886 = vrot.lane.b32.xlu1 %v1884_v42, %s7872_s26  ;;  %v2269_v42 = vld [vmem:[#allocation2 + $0x10] sm:$0xff] }
0x216c   :  { %v1792_v35 = vpop.permute.xlu0 %1791 }
0x216d   :  { %1794 = vst.msk [vmem:[#allocation6] sm:$0xff] %vm238_vm1, %v1792_v35  ;;  %1800 = vst.msk [vmem:[#allocation2 + $0x18] sm:$0xff] %vm238_vm1, %v1792_v35 }
0x2174   :  { %v1802_v56 = vld [vmem:[#allocation6] sm:$0xff]  ;;  %v2270_v35 = vld [vmem:[#allocation2 + $0x18] sm:$0xff] }
0x2175   :  { %6745 = vmatmul.mubr.msk.f32.vlgmr.msra.gmra.mrb[34].mxu0 %vm238_vm1, %v1802_v56 }
0x2176   :  { %7299 = vmatpush3.bf16.msra.mxu0 %v8240_v60  ;;  %6766 = vmatprep.mubr.msk.f32.mxu0 %vm7869_vm2, %v7870_v4  ;;  %v1887_v12 = vpop.permute.xlu1 %1886 }
0x2177   :  { %7300 = vmatprep.subr.bf16.mxu0 %v7868_v3 }
0x217a   :  { %7302 = vmatpush3.bf16.msra.mxu0 %v8249_v0 }
0x217b   :  { %7310 = vmatprep.subr.bf16.mxu0 %v7309_v43 }
0x2248   :  { %v1872_v58 = vpop.f32.mrb[34].mxu0 }
0x2249   :  { %v1876_v59 = vadd.f32 %v1872_v58, %v1305_v57  ;;  %v6746_v61 = vpop.f32.mrb[35].mxu0  ;;  %v1315_v58 = vadd.f32 %v8288_v11, %v8283_v19 }
0x224b   :  { %7664 = vtanh.f32 %v1876_v59  ;;  %v1877_v63 = vsub.f32 0.0, %v1876_v59 }
0x224d   :  { %v1878_v1 = vmul.f32 1.442695, %v1877_v63 }
0x224f   :  { %7666 = vpow2.f32 %v1878_v1 }
0x2255   :  { %v7665_v62 = vpop.eup %7664 }
0x2256   :  { %1891 = vrot.lane.b32.xlu0 %v7665_v62, %s7871_s5 }
0x2259   :  { %v7667_v2 = vpop.eup %7666 }
0x225a   :  { %v1880_v6 = vadd.f32 1.0, %v7667_v2 }
0x225c   :  { %7668 = vrcp.f32 %v1880_v6 }
0x2266   :  { %v7669_v31 = vpop.eup %7668 }
0x2267   :  { %v1889_v33 = vmul.f32 %v7669_v31, %v1887_v12 }
0x22c8   :  { %v1892_v7 = vpop.permute.xlu0 %1891 }
0x22c9   :  { %v1894_v8 = vmul.f32 %v7669_v31, %v1892_v7 }
0x22cb   :  { %1896 = vrot.lane.b32.xlu0 %v1894_v8, %s7872_s26 }
0x233d   :  { %v1897_v41 = vpop.permute.xlu0 %1896 }
0x233e   :  { %v1899_v13 = vadd.f32 %v1897_v41, %v1889_v33 }
0x2340   :  { %7670 = vtanh.f32 %v1899_v13 }
0x234a   :  { %v7671_v14 = vpop.eup %7670 }
0x234b   :  { %1902 = vrot.lane.b32.xlu1 %v7671_v14, %s7871_s5 }
0x234f   :  { %1912 = vrot.lane.b32.xlu1 %v1899_v13, %s7873_s27 }
0x23bd   :  { %v1903_v15 = vpop.permute.xlu1 %1902 }
0x23be   :  { %v1905_v16 = vmul.f32 %v7669_v31, %v1903_v15 }
0x23c0   :  { %1907 = vrot.lane.b32.xlu0 %v1905_v16, %s7872_s26 }
0x23c1   :  { %v1913_v17 = vpop.permute.xlu1 %1912 }
0x23c2   :  { %1915 = vst.msk [vmem:[#allocation7] sm:$0xff] %vm238_vm1, %v1913_v17 }
0x23c9   :  { %v2000_v18 = vld [vmem:[#allocation7] sm:$0xff] }
0x23ca   :  { %2002 = vrot.lane.b32.xlu1 %v2000_v18, %s7872_s26 }
0x2432   :  { %v1908_v46 = vpop.permute.xlu0 %1907 }
0x2433   :  { %1910 = vst.msk [vmem:[#allocation6] sm:$0xff] %vm238_vm1, %v1908_v46  ;;  %1916 = vst.msk [vmem:[#allocation2 + $0x20] sm:$0xff] %vm238_vm1, %v1908_v46 }
0x243a   :  { %v1918_v20 = vld [vmem:[#allocation6] sm:$0xff] }
0x243b   :  { %6756 = vmatmul.mubr.msk.f32.vlgmr.msra.gmra.mrb[6].mxu1 %vm238_vm1, %v1918_v20  ;;  %v2271_v56 = vld [vmem:[#allocation2 + $0x20] sm:$0xff] }
0x243c   :  { %7305 = vmatpush3.bf16.msra.mxu1 %v8240_v60  ;;  %6777 = vmatprep.mubr.msk.f32.mxu1 %vm7869_vm2, %v7870_v4  ;;  %v2003_v30 = vpop.permute.xlu1 %2002 }
0x243d   :  { %7306 = vmatprep.subr.bf16.mxu1 %v7868_v3 }
0x2440   :  { %7308 = vmatpush3.bf16.msra.mxu1 %v8249_v0 }
0x2441   :  { %7317 = vmatprep.subr.bf16.mxu1 %v7868_v3 }
0x250e   :  { %v1988_v22 = vpop.f32.mrb[6].mxu1 }
0x250f   :  { %v1992_v23 = vadd.f32 %v1988_v22, %v1310_v21  ;;  %v6757_v24 = vpop.f32.mrb[7].mxu1 }
0x2511   :  { %7672 = vtanh.f32 %v1992_v23  ;;  %v1993_v60 = vsub.f32 0.0, %v1992_v23 }
0x2513   :  { %v1994_v26 = vmul.f32 1.442695, %v1993_v60 }
0x2515   :  { %7674 = vpow2.f32 %v1994_v26 }
0x251b   :  { %v7673_v25 = vpop.eup %7672 }
0x251c   :  { %2007 = vrot.lane.b32.xlu0 %v7673_v25, %s7871_s5 }
0x251f   :  { %v7675_v27 = vpop.eup %7674 }
0x2520   :  { %v1996_v28 = vadd.f32 1.0, %v7675_v27  ;;  %v1320_v27 = vadd.f32 %v8281_v9, %v8288_v11 }
0x2522   :  { %7676 = vrcp.f32 %v1996_v28 }
0x252c   :  { %v7677_v29 = vpop.eup %7676 }
0x252d   :  { %v2005_v47 = vmul.f32 %v7677_v29, %v2003_v30 }
0x258e   :  { %v2008_v0 = vpop.permute.xlu0 %2007 }
0x258f   :  { %v2010_v37 = vmul.f32 %v7677_v29, %v2008_v0 }
0x2591   :  { %2012 = vrot.lane.b32.xlu0 %v2010_v37, %s7872_s26 }
0x2603   :  { %v2013_v32 = vpop.permute.xlu0 %2012 }
0x2604   :  { %v2015_v34 = vadd.f32 %v2013_v32, %v2005_v47 }
0x2606   :  { %7678 = vtanh.f32 %v2015_v34 }
0x2610   :  { %v7679_v36 = vpop.eup %7678 }
0x2611   :  { %2018 = vrot.lane.b32.xlu1 %v7679_v36, %s7871_s5 }
0x2615   :  { %2028 = vrot.lane.b32.xlu1 %v2015_v34, %s7873_s27 }
0x2683   :  { %v2019_v45 = vpop.permute.xlu1 %2018 }
0x2684   :  { %v2021_v48 = vmul.f32 %v7677_v29, %v2019_v45 }
0x2686   :  { %2023 = vrot.lane.b32.xlu0 %v2021_v48, %s7872_s26 }
0x2687   :  { %v2029_v49 = vpop.permute.xlu1 %2028 }
0x2688   :  { %2031 = vst.msk [vmem:[#allocation7] sm:$0xff] %vm238_vm1, %v2029_v49  ;;  %v2425_v49 = vld [vmem:[%s9297_s3] sm:$0xff] }
0x268f   :  { %v2116_v39 = vld [vmem:[#allocation7] sm:$0xff] }
0x2690   :  { %2118 = vrot.lane.b32.xlu1 %v2116_v39, %s7872_s26  ;;  %v2426_v39 = vld [vmem:[%s9297_s3 + $0x8] sm:$0xff] }
0x26f8   :  { %v2024_v44 = vpop.permute.xlu0 %2023 }
0x26f9   :  { %2026 = vst.msk [vmem:[#allocation6] sm:$0xff] %vm238_vm1, %v2024_v44  ;;  %2032 = vst.msk [vmem:[#allocation2 + $0x28] sm:$0xff] %vm238_vm1, %v2024_v44  ;;  %v8449_v44 = vpack.c.bf16 %v2426_v39, %v2425_v49 }
0x2700   :  { %v2034_v53 = vld [vmem:[#allocation6] sm:$0xff]  ;;  %v2272_v57 = vld [vmem:[#allocation2 + $0x28] sm:$0xff] }
0x2701   :  { %6767 = vmatmul.mubr.msk.f32.vlgmr.msra.gmra.mrb[36].mxu0 %vm238_vm1, %v2034_v53  ;;  %v8458_v53 = vpack.c.bf16 %v2428_v51, %v2427_v50 }
0x2702   :  { %7312 = vmatpush3.bf16.msra.mxu0 %v7309_v43  ;;  %6788 = vmatprep.mubr.msk.f32.mxu0 %vm238_vm1, %v2267_v54  ;;  %v2119_v16 = vpop.permute.xlu1 %2118 }
0x2703   :  { %7314 = vmatprep.subr.bf16.mxu0 %v7313_v52 }
0x2706   :  { %7316 = vmatpush3.bf16.msra.mxu0 %v7313_v52 }
0x2707   :  { %7329 = vmatprep.subr.bf16.mxu0 %v7868_v3 }
0x2709   :  { %6789 = vmatmul.mubr.msk.f32.vlgmr.msra.gmra.mrb[38].mxu0 %vm238_vm1, %v2268_v55 }
0x270a   :  { %6791 = vmatprep.mubr.msk.f32.mxu0 %vm238_vm1, %v2269_v42  ;;  %7331 = vmatpush3.bf16.msra.mxu0 %v8449_v44 }
0x270b   :  { %7332 = vmatprep.subr.bf16.mxu0 %v7868_v3 }
0x270d   :  { %6792 = vmatmul.mubr.msk.f32.gmra.mrb[40].mxu0 %vm238_vm1, %v2270_v35 }
0x270e   :  { %6794 = vmatprep.mubr.msk.f32.mxu0 %vm238_vm1, %v2271_v56  ;;  %7334 = vmatpush3.bf16.msra.mxu0 %v8458_v53 }
0x270f   :  { %7341 = vmatprep.subr.bf16.mxu0 %v7868_v3 }
0x2711   :  { %6795 = vmatmul.mubr.msk.f32.gmra.mrb[42].mxu0 %vm238_vm1, %v2272_v57 }
0x27d4   :  { %v2104_v59 = vpop.f32.mrb[36].mxu0 }
0x27d5   :  { %v2108_v61 = vadd.f32 %v2104_v59, %v1315_v58  ;;  %v6768_v62 = vpop.f32.mrb[37].mxu0 }
0x27d7   :  { %7680 = vtanh.f32 %v2108_v61  ;;  %v2109_v19 = vsub.f32 0.0, %v2108_v61 }
0x27d9   :  { %v2110_v12 = vmul.f32 1.442695, %v2109_v19 }
0x27db   :  { %7682 = vpow2.f32 %v2110_v12 }
0x27dc   :  { %v8412_v63 = vpop.f32.mrb[38].mxu0 }
0x27dd   :  { %v8414_v1 = vpop.f32.mrb[39].mxu0 }
0x27e0   :  { %v8416_v2 = vpop.f32.mrb[40].mxu0 }
0x27e1   :  { %v7681_v6 = vpop.eup %7680  ;;  %v8418_v31 = vpop.f32.mrb[41].mxu0 }
0x27e2   :  { %2123 = vrot.lane.b32.xlu0 %v7681_v6, %s7871_s5  ;;  %v8497_v6 = vld [vmem:[%s9256_s9] ss:$0 sm:$0xff] }
0x27e3   :  { %v2377_v19 = vadd.f32 %v8497_v6, %v8414_v1 }
0x27e4   :  { %v8421_v7 = vpop.f32.mrb[42].mxu0 }
0x27e5   :  { %v8423_v8 = vpop.f32.mrb[43].mxu0  ;;  %v7683_v33 = vpop.eup %7682 }
0x27e6   :  { %v2112_v41 = vadd.f32 1.0, %v7683_v33 }
0x27e8   :  { %7684 = vrcp.f32 %v2112_v41 }
0x27f2   :  { %v7685_v13 = vpop.eup %7684 }
0x27f3   :  { %v2121_v17 = vmul.f32 %v7685_v13, %v2119_v16 }
0x2854   :  { %v2124_v14 = vpop.permute.xlu0 %2123 }
0x2855   :  { %v2126_v15 = vmul.f32 %v7685_v13, %v2124_v14 }
0x2857   :  { %2128 = vrot.lane.b32.xlu0 %v2126_v15, %s7872_s26 }
0x28c9   :  { %v2129_v18 = vpop.permute.xlu0 %2128 }
0x28ca   :  { %v2131_v46 = vadd.f32 %v2129_v18, %v2121_v17 }
0x28cc   :  { %7686 = vtanh.f32 %v2131_v46 }
0x28d6   :  { %v7687_v20 = vpop.eup %7686 }
0x28d7   :  { %2134 = vrot.lane.b32.xlu1 %v7687_v20, %s7871_s5 }
0x28db   :  { %2144 = vrot.lane.b32.xlu1 %v2131_v46, %s7873_s27 }
0x2949   :  { %v2135_v21 = vpop.permute.xlu1 %2134 }
0x294a   :  { %v2137_v22 = vmul.f32 %v7685_v13, %v2135_v21 }
0x294c   :  { %2139 = vrot.lane.b32.xlu0 %v2137_v22, %s7872_s26 }
0x294d   :  { %v2145_v23 = vpop.permute.xlu1 %2144 }
0x294e   :  { %2147 = vst.msk [vmem:[#allocation7] sm:$0xff] %vm238_vm1, %v2145_v23 }
0x2955   :  { %v2232_v24 = vld [vmem:[#allocation7] sm:$0xff] }
0x2956   :  { %2234 = vrot.lane.b32.xlu1 %v2232_v24, %s7872_s26 }
0x29be   :  { %v2140_v25 = vpop.permute.xlu0 %2139 }
0x29bf   :  { %2142 = vst.msk [vmem:[#allocation6] sm:$0xff] %vm238_vm1, %v2140_v25  ;;  %2148 = vst.msk [vmem:[#allocation2 + $0x30] sm:$0xff] %vm238_vm1, %v2140_v25 }
0x29c6   :  { %v2150_v60 = vld [vmem:[#allocation6] sm:$0xff]  ;;  %v2273_v26 = vld [vmem:[#allocation2 + $0x30] sm:$0xff] }
0x29c7   :  { %6778 = vmatmul.mubr.msk.f32.vlgmr.msra.gmra.mrb[8].mxu1 %vm238_vm1, %v2150_v60  ;;  %6797 = vmatprep.mubr.msk.f32.mxu0 %vm238_vm1, %v2273_v26 }
0x29c8   :  { %6808 = vmatprep.mubr.msk.f32.mxu1 %vm7869_vm2, %v7870_v4  ;;  %v2235_v43 = vpop.permute.xlu1 %2234  ;;  %7319 = vmatpush3.bf16.msra.mxu1 %v8449_v44 }
0x29c9   :  { %7320 = vmatprep.subr.bf16.mxu1 %v7868_v3 }
0x29cc   :  { %7322 = vmatpush3.bf16.msra.mxu1 %v8458_v53 }
0x29cd   :  { %7323 = vmatprep.subr.bf16.mxu1 %v7868_v3 }
0x2a9a   :  { %v2220_v28 = vpop.f32.mrb[8].mxu1 }
0x2a9b   :  { %v2224_v29 = vadd.f32 %v2220_v28, %v1320_v27  ;;  %v6779_v0 = vpop.f32.mrb[9].mxu1 }
0x2a9c   :  { %v2382_v0 = vadd.f32 %v8412_v63, %v8497_v6 }
0x2a9d   :  { %7688 = vtanh.f32 %v2224_v29  ;;  %v2225_v30 = vsub.f32 0.0, %v2224_v29 }
0x2a9f   :  { %v2226_v47 = vmul.f32 1.442695, %v2225_v30 }
0x2aa1   :  { %7690 = vpow2.f32 %v2226_v47 }
0x2aa7   :  { %v7689_v37 = vpop.eup %7688 }
0x2aa8   :  { %2239 = vrot.lane.b32.xlu0 %v7689_v37, %s7871_s5 }
0x2aab   :  { %v7691_v32 = vpop.eup %7690 }
0x2aac   :  { %v2228_v34 = vadd.f32 1.0, %v7691_v32 }
0x2aae   :  { %7692 = vrcp.f32 %v2228_v34 }
0x2ab8   :  { %v7693_v36 = vpop.eup %7692 }
0x2ab9   :  { %v2237_v9 = vmul.f32 %v7693_v36, %v2235_v43 }
0x2b1a   :  { %v2240_v38 = vpop.permute.xlu0 %2239 }
0x2b1b   :  { %v2242_v40 = vmul.f32 %v7693_v36, %v2240_v38 }
0x2b1d   :  { %2244 = vrot.lane.b32.xlu0 %v2242_v40, %s7872_s26 }
0x2b8f   :  { %v2245_v11 = vpop.permute.xlu0 %2244 }
0x2b90   :  { %v2247_v45 = vadd.f32 %v2245_v11, %v2237_v9 }
0x2b92   :  { %7694 = vtanh.f32 %v2247_v45 }
0x2b9c   :  { %v7695_v48 = vpop.eup %7694 }
0x2b9d   :  { %2250 = vrot.lane.b32.xlu1 %v7695_v48, %s7871_s5 }
0x2ba1   :  { %2260 = vrot.lane.b32.xlu1 %v2247_v45, %s7873_s27 }
0x2c0f   :  { %v2251_v52 = vpop.permute.xlu1 %2250 }
0x2c10   :  { %v2253_v54 = vmul.f32 %v7693_v36, %v2251_v52 }
0x2c12   :  { %2255 = vrot.lane.b32.xlu0 %v2253_v54, %s7872_s26 }
0x2c13   :  { %v2261_v55 = vpop.permute.xlu1 %2260 }
0x2c14   :  { %2263 = vst.msk [vmem:[#allocation7] sm:$0xff] %vm238_vm1, %v2261_v55 }
0x2c1b   :  { %v8469_v42 = vld [vmem:[#allocation7] sm:$0xff] }
0x2c1c   :  { %2424 = vst.msk [vmem:[#allocation7] sm:$0xff] %vm238_vm1, %v7870_v4 }
0x2c23   :  { %v2512_v35 = vld [vmem:[#allocation7] sm:$0xff] }
0x2c24   :  { %2514 = vrot.lane.b32.xlu1 %v2512_v35, %s7872_s26 }
0x2c84   :  { %v2256_v56 = vpop.permute.xlu0 %2255 }
0x2c85   :  { %2258 = vst.msk [vmem:[#allocation6] sm:$0xff] %vm238_vm1, %v2256_v56  ;;  %2264 = vst.msk [vmem:[#allocation2 + $0x38] sm:$0xff] %vm238_vm1, %v2256_v56  ;;  %v2387_v56 = vadd.f32 %v8497_v6, %v8418_v31 }
0x2c8c   :  { %v8476_v57 = vld [vmem:[#allocation6] sm:$0xff]  ;;  %v2274_v58 = vld [vmem:[#allocation2 + $0x38] sm:$0xff] }
0x2c8d   :  { %2423 = vst.msk [vmem:[#allocation6] sm:$0xff] %vm238_vm1, %v7870_v4  ;;  %6798 = vmatmul.mubr.msk.f32.gmra.mrb[44].mxu0 %vm238_vm1, %v2274_v58 }
0x2c8e   :  { %6830 = vmatprep.mubr.msk.f32.mxu0 %vm7869_vm2, %v7870_v4 }
0x2c94   :  { %v2430_v59 = vld [vmem:[#allocation6] sm:$0xff] }
0x2c95   :  { %6809 = vmatmul.mubr.msk.f32.vlgmr.msra.gmra.mrb[10].mxu1 %vm238_vm1, %v2430_v59 }
0x2c96   :  { %7325 = vmatpush3.bf16.msra.mxu1 %v8449_v44  ;;  %6819 = vmatprep.mubr.msk.f32.mxu1 %vm7869_vm2, %v7870_v4  ;;  %v2515_v21 = vpop.permute.xlu1 %2514 }
0x2c97   :  { %7326 = vmatprep.subr.bf16.mxu1 %v7868_v3 }
0x2c9a   :  { %7328 = vmatpush3.bf16.msra.mxu1 %v8458_v53 }
0x2c9b   :  { %7335 = vmatprep.subr.bf16.mxu1 %v7868_v3 }
0x2d60   :  { %v8490_v61 = vpop.f32.mrb[44].mxu0 }
0x2d61   :  { %v8492_v62 = vpop.f32.mrb[45].mxu0 }
0x2d68   :  { %v2500_v12 = vpop.f32.mrb[10].mxu1 }
0x2d69   :  { %v2504_v33 = vadd.f32 %v2500_v12, %v2377_v19  ;;  %v6810_v41 = vpop.f32.mrb[11].mxu1 }
0x2d6b   :  { %7696 = vtanh.f32 %v2504_v33  ;;  %v2505_v14 = vsub.f32 0.0, %v2504_v33 }
0x2d6d   :  { %v2506_v15 = vmul.f32 1.442695, %v2505_v14 }
0x2d6f   :  { %7698 = vpow2.f32 %v2506_v15 }
0x2d75   :  { %v7697_v13 = vpop.eup %7696 }
0x2d76   :  { %2519 = vrot.lane.b32.xlu0 %v7697_v13, %s7871_s5 }
0x2d79   :  { %v7699_v16 = vpop.eup %7698 }
0x2d7a   :  { %v2508_v17 = vadd.f32 1.0, %v7699_v16 }
0x2d7c   :  { %7700 = vrcp.f32 %v2508_v17 }
0x2d86   :  { %v7701_v18 = vpop.eup %7700 }
0x2d87   :  { %v2517_v1 = vmul.f32 %v7701_v18, %v2515_v21 }
0x2de8   :  { %v2520_v46 = vpop.permute.xlu0 %2519 }
0x2de9   :  { %v2522_v20 = vmul.f32 %v7701_v18, %v2520_v46 }
0x2deb   :  { %2524 = vrot.lane.b32.xlu0 %v2522_v20, %s7872_s26 }
0x2e5d   :  { %v2525_v22 = vpop.permute.xlu0 %2524 }
0x2e5e   :  { %v2527_v23 = vadd.f32 %v2525_v22, %v2517_v1 }
0x2e60   :  { %7702 = vtanh.f32 %v2527_v23 }
0x2e6a   :  { %v7703_v24 = vpop.eup %7702 }
0x2e6b   :  { %2530 = vrot.lane.b32.xlu1 %v7703_v24, %s7871_s5 }
0x2e6f   :  { %2540 = vrot.lane.b32.xlu1 %v2527_v23, %s7873_s27 }
0x2edd   :  { %v2531_v25 = vpop.permute.xlu1 %2530 }
0x2ede   :  { %v2533_v60 = vmul.f32 %v7701_v18, %v2531_v25 }
0x2ee0   :  { %2535 = vrot.lane.b32.xlu0 %v2533_v60, %s7872_s26 }
0x2ee1   :  { %v2541_v26 = vpop.permute.xlu1 %2540 }
0x2ee2   :  { %2543 = vst.msk [vmem:[#allocation7] sm:$0xff] %vm238_vm1, %v2541_v26  ;;  %v2392_v26 = vadd.f32 %v8416_v2, %v8497_v6 }
0x2ee9   :  { %v2628_v27 = vld [vmem:[#allocation7] sm:$0xff] }
0x2eea   :  { %2630 = vrot.lane.b32.xlu1 %v2628_v27, %s7872_s26 }
0x2f52   :  { %v2536_v28 = vpop.permute.xlu0 %2535 }
0x2f53   :  { %2538 = vst.msk [vmem:[#allocation6] sm:$0xff] %vm238_vm1, %v2536_v28  ;;  %2544 = vst.msk [vmem:[#allocation2] sm:$0xff] %vm238_vm1, %v2536_v28 }
0x2f5a   :  { %v2546_v29 = vld [vmem:[#allocation6] sm:$0xff] }
0x2f5b   :  { %6820 = vmatmul.mubr.msk.f32.vlgmr.msra.gmra.mrb[12].mxu1 %vm238_vm1, %v2546_v29 }
0x2f5c   :  { %7337 = vmatpush3.bf16.msra.mxu1 %v8449_v44  ;;  %6841 = vmatprep.mubr.msk.f32.mxu1 %vm7869_vm2, %v7870_v4  ;;  %v2631_v45 = vpop.permute.xlu1 %2630 }
0x2f5d   :  { %7338 = vmatprep.subr.bf16.mxu1 %v7868_v3 }
0x2f60   :  { %7340 = vmatpush3.bf16.msra.mxu1 %v8458_v53 }
0x2f61   :  { %7347 = vmatprep.subr.bf16.mxu1 %v7868_v3 }
0x302e   :  { %v2616_v37 = vpop.f32.mrb[12].mxu1 }
0x302f   :  { %v2620_v30 = vadd.f32 %v2616_v37, %v2382_v0  ;;  %v6821_v47 = vpop.f32.mrb[13].mxu1 }
0x3031   :  { %7704 = vtanh.f32 %v2620_v30  ;;  %v2621_v34 = vsub.f32 0.0, %v2620_v30 }
0x3033   :  { %v2622_v36 = vmul.f32 1.442695, %v2621_v34 }
0x3035   :  { %7706 = vpow2.f32 %v2622_v36 }
0x303b   :  { %v7705_v32 = vpop.eup %7704 }
0x303c   :  { %2635 = vrot.lane.b32.xlu0 %v7705_v32, %s7871_s5 }
0x303f   :  { %v7707_v38 = vpop.eup %7706 }
0x3040   :  { %v2624_v40 = vadd.f32 1.0, %v7707_v38 }
0x3042   :  { %7708 = vrcp.f32 %v2624_v40 }
0x304c   :  { %v7709_v43 = vpop.eup %7708 }
0x304d   :  { %v2633_v63 = vmul.f32 %v7709_v43, %v2631_v45 }
0x30ae   :  { %v2636_v9 = vpop.permute.xlu0 %2635 }
0x30af   :  { %v2638_v11 = vmul.f32 %v7709_v43, %v2636_v9 }
0x30b1   :  { %2640 = vrot.lane.b32.xlu0 %v2638_v11, %s7872_s26 }
0x3123   :  { %v2641_v48 = vpop.permute.xlu0 %2640 }
0x3124   :  { %v2643_v49 = vadd.f32 %v2641_v48, %v2633_v63 }
0x3126   :  { %7710 = vtanh.f32 %v2643_v49 }
0x3130   :  { %v7711_v39 = vpop.eup %7710 }
0x3131   :  { %2646 = vrot.lane.b32.xlu1 %v7711_v39, %s7871_s5 }
0x3135   :  { %2656 = vrot.lane.b32.xlu1 %v2643_v49, %s7873_s27 }
0x31a3   :  { %v2647_v50 = vpop.permute.xlu1 %2646 }
0x31a4   :  { %v2649_v51 = vmul.f32 %v7709_v43, %v2647_v50 }
0x31a6   :  { %2651 = vrot.lane.b32.xlu0 %v2649_v51, %s7872_s26  ;;  %v2397_v51 = vadd.f32 %v8497_v6, %v8423_v8 }
0x31a7   :  { %v2657_v52 = vpop.permute.xlu1 %2656 }
0x31a8   :  { %2659 = vst.msk [vmem:[#allocation7] sm:$0xff] %vm238_vm1, %v2657_v52 }
0x31af   :  { %v2744_v54 = vld [vmem:[#allocation7] sm:$0xff] }
0x31b0   :  { %2746 = vrot.lane.b32.xlu1 %v2744_v54, %s7872_s26 }
0x3218   :  { %v2652_v55 = vpop.permute.xlu0 %2651 }
0x3219   :  { %2654 = vst.msk [vmem:[#allocation6] sm:$0xff] %vm238_vm1, %v2652_v55  ;;  %2660 = vst.msk [vmem:[#allocation2 + $0x8] sm:$0xff] %vm238_vm1, %v2652_v55 }
0x3220   :  { %v2662_v35 = vld [vmem:[#allocation6] sm:$0xff] }
0x3221   :  { %6831 = vmatmul.mubr.msk.f32.vlgmr.msra.gmra.mrb[46].mxu0 %vm238_vm1, %v2662_v35 }
0x3222   :  { %7343 = vmatpush3.bf16.msra.mxu0 %v8449_v44  ;;  %6852 = vmatprep.mubr.msk.f32.mxu0 %vm7869_vm2, %v7870_v4  ;;  %v2747_v18 = vpop.permute.xlu1 %2746 }
0x3223   :  { %7344 = vmatprep.subr.bf16.mxu0 %v7868_v3 }
0x3226   :  { %7346 = vmatpush3.bf16.msra.mxu0 %v8458_v53 }
0x3227   :  { %7353 = vmatprep.subr.bf16.mxu0 %v7868_v3 }
0x32f4   :  { %v2732_v58 = vpop.f32.mrb[46].mxu0 }
0x32f5   :  { %v2736_v59 = vadd.f32 %v2732_v58, %v2387_v56  ;;  %v6832_v19 = vpop.f32.mrb[47].mxu0 }
0x32f7   :  { %7712 = vtanh.f32 %v2736_v59  ;;  %v2737_v33 = vsub.f32 0.0, %v2736_v59 }
0x32f9   :  { %v2738_v41 = vmul.f32 1.442695, %v2737_v33 }
0x32fb   :  { %7714 = vpow2.f32 %v2738_v41 }
0x3301   :  { %v7713_v12 = vpop.eup %7712 }
0x3302   :  { %2751 = vrot.lane.b32.xlu0 %v7713_v12, %s7871_s5 }
0x3305   :  { %v7715_v13 = vpop.eup %7714 }
0x3306   :  { %v2740_v14 = vadd.f32 1.0, %v7715_v13 }
0x3308   :  { %7716 = vrcp.f32 %v2740_v14 }
0x3312   :  { %v7717_v15 = vpop.eup %7716 }
0x3313   :  { %v2749_v31 = vmul.f32 %v7717_v15, %v2747_v18 }
0x3374   :  { %v2752_v16 = vpop.permute.xlu0 %2751 }
0x3375   :  { %v2754_v17 = vmul.f32 %v7717_v15, %v2752_v16 }
0x3377   :  { %2756 = vrot.lane.b32.xlu0 %v2754_v17, %s7872_s26 }
0x33e9   :  { %v2757_v46 = vpop.permute.xlu0 %2756 }
0x33ea   :  { %v2759_v20 = vadd.f32 %v2757_v46, %v2749_v31 }
0x33ec   :  { %7718 = vtanh.f32 %v2759_v20 }
0x33f6   :  { %v7719_v21 = vpop.eup %7718 }
0x33f7   :  { %2762 = vrot.lane.b32.xlu1 %v7719_v21, %s7871_s5 }
0x33fb   :  { %2772 = vrot.lane.b32.xlu1 %v2759_v20, %s7873_s27 }
0x3469   :  { %v2763_v1 = vpop.permute.xlu1 %2762 }
0x346a   :  { %v2765_v22 = vmul.f32 %v7717_v15, %v2763_v1  ;;  %v2402_v1 = vadd.f32 %v8421_v7, %v8497_v6 }
0x346c   :  { %2767 = vrot.lane.b32.xlu0 %v2765_v22, %s7872_s26 }
0x346d   :  { %v2773_v23 = vpop.permute.xlu1 %2772 }
0x346e   :  { %2775 = vst.msk [vmem:[#allocation7] sm:$0xff] %vm238_vm1, %v2773_v23 }
0x3475   :  { %v2860_v24 = vld [vmem:[#allocation7] sm:$0xff] }
0x3476   :  { %2862 = vrot.lane.b32.xlu1 %v2860_v24, %s7872_s26 }
0x34de   :  { %v2768_v25 = vpop.permute.xlu0 %2767 }
0x34df   :  { %2770 = vst.msk [vmem:[#allocation6] sm:$0xff] %vm238_vm1, %v2768_v25  ;;  %2776 = vst.msk [vmem:[#allocation2 + $0x10] sm:$0xff] %vm238_vm1, %v2768_v25 }
0x34e6   :  { %v2778_v60 = vld [vmem:[#allocation6] sm:$0xff] }
0x34e7   :  { %6842 = vmatmul.mubr.msk.f32.vlgmr.msra.gmra.mrb[14].mxu1 %vm238_vm1, %v2778_v60 }
0x34e8   :  { %7349 = vmatpush3.bf16.msra.mxu1 %v8449_v44  ;;  %6863 = vmatprep.mubr.msk.f32.mxu1 %vm7869_vm2, %v7870_v4  ;;  %v2863_v40 = vpop.permute.xlu1 %2862 }
0x34e9   :  { %7350 = vmatprep.subr.bf16.mxu1 %v7868_v3 }
0x34ec   :  { %7352 = vmatpush3.bf16.msra.mxu1 %v8458_v53 }
0x34ed   :  { %7359 = vmatprep.subr.bf16.mxu1 %v7868_v3 }
0x35ba   :  { %v2848_v27 = vpop.f32.mrb[14].mxu1 }
0x35bb   :  { %v2852_v28 = vadd.f32 %v2848_v27, %v2392_v26  ;;  %v6843_v29 = vpop.f32.mrb[15].mxu1 }
0x35bd   :  { %7720 = vtanh.f32 %v2852_v28  ;;  %v2853_v37 = vsub.f32 0.0, %v2852_v28 }
0x35bf   :  { %v2854_v30 = vmul.f32 1.442695, %v2853_v37 }
0x35c1   :  { %7722 = vpow2.f32 %v2854_v30 }
0x35c7   :  { %v7721_v0 = vpop.eup %7720 }
0x35c8   :  { %2867 = vrot.lane.b32.xlu0 %v7721_v0, %s7871_s5 }
0x35cb   :  { %v7723_v47 = vpop.eup %7722 }
0x35cc   :  { %v2856_v32 = vadd.f32 1.0, %v7723_v47 }
0x35ce   :  { %7724 = vrcp.f32 %v2856_v32 }
0x35d8   :  { %v7725_v34 = vpop.eup %7724 }
0x35d9   :  { %v2865_v2 = vmul.f32 %v7725_v34, %v2863_v40 }
0x363a   :  { %v2868_v36 = vpop.permute.xlu0 %2867 }
0x363b   :  { %v2870_v38 = vmul.f32 %v7725_v34, %v2868_v36 }
0x363d   :  { %2872 = vrot.lane.b32.xlu0 %v2870_v38, %s7872_s26 }
0x36af   :  { %v2873_v43 = vpop.permute.xlu0 %2872 }
0x36b0   :  { %v2875_v9 = vadd.f32 %v2873_v43, %v2865_v2  ;;  %v2407_v43 = vadd.f32 %v8497_v6, %v8492_v62 }
0x36b2   :  { %7726 = vtanh.f32 %v2875_v9 }
0x36bc   :  { %v7727_v11 = vpop.eup %7726 }
0x36bd   :  { %2878 = vrot.lane.b32.xlu1 %v7727_v11, %s7871_s5 }
0x36c1   :  { %2888 = vrot.lane.b32.xlu1 %v2875_v9, %s7873_s27 }
0x372f   :  { %v2879_v45 = vpop.permute.xlu1 %2878 }
0x3730   :  { %v2881_v63 = vmul.f32 %v7725_v34, %v2879_v45 }
0x3732   :  { %2883 = vrot.lane.b32.xlu0 %v2881_v63, %s7872_s26 }
0x3733   :  { %v2889_v48 = vpop.permute.xlu1 %2888 }
0x3734   :  { %2891 = vst.msk [vmem:[#allocation7] sm:$0xff] %vm238_vm1, %v2889_v48 }
0x373b   :  { %v2976_v49 = vld [vmem:[#allocation7] sm:$0xff] }
0x373c   :  { %2978 = vrot.lane.b32.xlu1 %v2976_v49, %s7872_s26 }
0x37a4   :  { %v2884_v39 = vpop.permute.xlu0 %2883 }
0x37a5   :  { %2886 = vst.msk [vmem:[#allocation6] sm:$0xff] %vm238_vm1, %v2884_v39  ;;  %2892 = vst.msk [vmem:[#allocation2 + $0x18] sm:$0xff] %vm238_vm1, %v2884_v39 }
0x37ac   :  { %v2894_v50 = vld [vmem:[#allocation6] sm:$0xff] }
0x37ad   :  { %6853 = vmatmul.mubr.msk.f32.vlgmr.msra.gmra.mrb[48].mxu0 %vm238_vm1, %v2894_v50 }
0x37ae   :  { %7355 = vmatpush3.bf16.msra.mxu0 %v8449_v44  ;;  %6874 = vmatprep.mubr.msk.f32.mxu0 %vm7869_vm2, %v7870_v4  ;;  %v2979_v13 = vpop.permute.xlu1 %2978 }
0x37af   :  { %7356 = vmatprep.subr.bf16.mxu0 %v7868_v3 }
0x37b2   :  { %7358 = vmatpush3.bf16.msra.mxu0 %v8458_v53 }
0x37b3   :  { %7365 = vmatprep.subr.bf16.mxu0 %v7868_v3 }
0x3880   :  { %v2964_v52 = vpop.f32.mrb[48].mxu0 }
0x3881   :  { %v2968_v54 = vadd.f32 %v2964_v52, %v2397_v51  ;;  %v6854_v55 = vpop.f32.mrb[49].mxu0 }
0x3883   :  { %7728 = vtanh.f32 %v2968_v54  ;;  %v2969_v56 = vsub.f32 0.0, %v2968_v54 }
0x3885   :  { %v2970_v58 = vmul.f32 1.442695, %v2969_v56 }
0x3887   :  { %7730 = vpow2.f32 %v2970_v58 }
0x388d   :  { %v7729_v35 = vpop.eup %7728 }
0x388e   :  { %2983 = vrot.lane.b32.xlu0 %v7729_v35, %s7871_s5 }
0x3891   :  { %v7731_v59 = vpop.eup %7730 }
0x3892   :  { %v2972_v19 = vadd.f32 1.0, %v7731_v59 }
0x3894   :  { %7732 = vrcp.f32 %v2972_v19 }
0x389e   :  { %v7733_v12 = vpop.eup %7732 }
0x389f   :  { %v2981_v8 = vmul.f32 %v7733_v12, %v2979_v13 }
0x3900   :  { %v2984_v33 = vpop.permute.xlu0 %2983 }
0x3901   :  { %v2986_v41 = vmul.f32 %v7733_v12, %v2984_v33 }
0x3903   :  { %2988 = vrot.lane.b32.xlu0 %v2986_v41, %s7872_s26 }
0x3975   :  { %v2989_v14 = vpop.permute.xlu0 %2988 }
0x3976   :  { %v2991_v15 = vadd.f32 %v2989_v14, %v2981_v8  ;;  %v2412_v8 = vadd.f32 %v8490_v61, %v8497_v6 }
0x3978   :  { %7734 = vtanh.f32 %v2991_v15 }
0x3982   :  { %v7735_v16 = vpop.eup %7734 }
0x3983   :  { %2994 = vrot.lane.b32.xlu1 %v7735_v16, %s7871_s5 }
0x3987   :  { %3004 = vrot.lane.b32.xlu1 %v2991_v15, %s7873_s27 }
0x39f5   :  { %v2995_v17 = vpop.permute.xlu1 %2994 }
0x39f6   :  { %v2997_v18 = vmul.f32 %v7733_v12, %v2995_v17 }
0x39f8   :  { %2999 = vrot.lane.b32.xlu0 %v2997_v18, %s7872_s26 }
0x39f9   :  { %v3005_v31 = vpop.permute.xlu1 %3004 }
0x39fa   :  { %3007 = vst.msk [vmem:[#allocation7] sm:$0xff] %vm238_vm1, %v3005_v31 }
0x3a01   :  { %v3092_v46 = vld [vmem:[#allocation7] sm:$0xff] }
0x3a02   :  { %3094 = vrot.lane.b32.xlu1 %v3092_v46, %s7872_s26 }
0x3a6a   :  { %v3000_v20 = vpop.permute.xlu0 %2999 }
0x3a6b   :  { %3002 = vst.msk [vmem:[#allocation6] sm:$0xff] %vm238_vm1, %v3000_v20  ;;  %3008 = vst.msk [vmem:[#allocation2 + $0x20] sm:$0xff] %vm238_vm1, %v3000_v20 }
0x3a72   :  { %v3010_v21 = vld [vmem:[#allocation6] sm:$0xff] }
0x3a73   :  { %6864 = vmatmul.mubr.msk.f32.vlgmr.msra.gmra.mrb[16].mxu1 %vm238_vm1, %v3010_v21 }
0x3a74   :  { %7361 = vmatpush3.bf16.msra.mxu1 %v8449_v44  ;;  %6885 = vmatprep.mubr.msk.f32.mxu1 %vm7869_vm2, %v7870_v4  ;;  %v3095_v0 = vpop.permute.xlu1 %3094 }
0x3a75   :  { %7362 = vmatprep.subr.bf16.mxu1 %v7868_v3 }
0x3a78   :  { %7364 = vmatpush3.bf16.msra.mxu1 %v8458_v53 }
0x3a79   :  { %7371 = vmatprep.subr.bf16.mxu1 %v7868_v3 }
0x3b46   :  { %v3080_v22 = vpop.f32.mrb[16].mxu1 }
0x3b47   :  { %v3084_v23 = vadd.f32 %v3080_v22, %v2402_v1  ;;  %v6865_v24 = vpop.f32.mrb[17].mxu1 }
0x3b49   :  { %7736 = vtanh.f32 %v3084_v23  ;;  %v3085_v44 = vsub.f32 0.0, %v3084_v23 }
0x3b4b   :  { %v3086_v60 = vmul.f32 1.442695, %v3085_v44  ;;  %v3360_v44 = vld [vmem:[%s9257_s10] sm:$0xff] }
0x3b4d   :  { %7738 = vpow2.f32 %v3086_v60  ;;  %v3361_v60 = vld [vmem:[%s9257_s10 + $0x8] sm:$0xff] }
0x3b53   :  { %v7737_v25 = vpop.eup %7736 }
0x3b54   :  { %3099 = vrot.lane.b32.xlu0 %v7737_v25, %s7871_s5 }
0x3b57   :  { %v7739_v26 = vpop.eup %7738 }
0x3b58   :  { %v3088_v27 = vadd.f32 1.0, %v7739_v26  ;;  %v7366_v26 = vpack.c.bf16 %v3361_v60, %v3360_v44 }
0x3b5a   :  { %7740 = vrcp.f32 %v3088_v27  ;;  %v3362_v27 = vld [vmem:[%s9257_s10 + $0x10] sm:$0xff] }
0x3b64   :  { %v7741_v28 = vpop.eup %7740 }
0x3b65   :  { %v3097_v7 = vmul.f32 %v7741_v28, %v3095_v0  ;;  %v3447_v0 = vld [vmem:[%s9258_s11 + $0x8] sm:$0xff] }
0x3bc6   :  { %v3100_v53 = vpop.permute.xlu0 %3099 }
0x3bc7   :  { %v3102_v29 = vmul.f32 %v7741_v28, %v3100_v53 }
0x3bc9   :  { %3104 = vrot.lane.b32.xlu0 %v3102_v29, %s7872_s26  ;;  %v3446_v29 = vld [vmem:[%s9258_s11] sm:$0xff] }
0x3c3b   :  { %v3105_v37 = vpop.permute.xlu0 %3104 }
0x3c3c   :  { %v3107_v30 = vadd.f32 %v3105_v37, %v3097_v7  ;;  %v8643_v7 = vpack.c.bf16 %v3447_v0, %v3446_v29  ;;  %v3448_v37 = vld [vmem:[%s9258_s11 + $0x10] sm:$0xff]  ;;  %v3917_v29 = vld [vmem:[%s9260_s13 + $0x8] sm:$0xff] }
0x3c3e   :  { %7742 = vtanh.f32 %v3107_v30 }
0x3c48   :  { %v7743_v47 = vpop.eup %7742 }
0x3c49   :  { %3110 = vrot.lane.b32.xlu1 %v7743_v47, %s7871_s5 }
0x3c4d   :  { %3120 = vrot.lane.b32.xlu1 %v3107_v30, %s7873_s27  ;;  %v3449_v30 = vld [vmem:[%s9258_s11 + $0x18] sm:$0xff] }
0x3cbb   :  { %v3111_v32 = vpop.permute.xlu1 %3110 }
0x3cbc   :  { %v3113_v34 = vmul.f32 %v7741_v28, %v3111_v32  ;;  %v3363_v28 = vld [vmem:[%s9257_s10 + $0x18] sm:$0xff]  ;;  %v8652_v32 = vpack.c.bf16 %v3449_v30, %v3448_v37  ;;  %s9298_s10 = sld [smem:[#allocation17_spill]] }
0x3cbd   :  { %v7369_v53 = vpack.c.bf16 %v3363_v28, %v3362_v27 }
0x3cbe   :  { %3115 = vrot.lane.b32.xlu0 %v3113_v34, %s7872_s26 }
0x3cbf   :  { %v3121_v36 = vpop.permute.xlu1 %3120 }
0x3cc0   :  { %3123 = vst.msk [vmem:[#allocation7] sm:$0xff] %vm238_vm1, %v3121_v36 }
0x3cc7   :  { %v3208_v38 = vld [vmem:[#allocation7] sm:$0xff] }
0x3cc8   :  { %3210 = vrot.lane.b32.xlu1 %v3208_v38, %s7872_s26 }
0x3d30   :  { %v3116_v40 = vpop.permute.xlu0 %3115 }
0x3d31   :  { %3118 = vst.msk [vmem:[#allocation6] sm:$0xff] %vm238_vm1, %v3116_v40  ;;  %3124 = vst.msk [vmem:[#allocation2 + $0x28] sm:$0xff] %vm238_vm1, %v3116_v40 }
0x3d38   :  { %v3126_v2 = vld [vmem:[#allocation6] sm:$0xff] }
0x3d39   :  { %6875 = vmatmul.mubr.msk.f32.vlgmr.msra.gmra.mrb[50].mxu0 %vm238_vm1, %v3126_v2 }
0x3d3a   :  { %6896 = vmatprep.mubr.msk.f32.mxu0 %vm7869_vm2, %v7870_v4  ;;  %v3211_v55 = vpop.permute.xlu1 %3210  ;;  %7367 = vmatpush3.bf16.msra.mxu0 %v7366_v26 }
0x3d3b   :  { %7368 = vmatprep.subr.bf16.mxu0 %v7868_v3 }
0x3d3e   :  { %7370 = vmatpush3.bf16.msra.mxu0 %v7369_v53  ;;  %v3916_v53 = vld [vmem:[%s9260_s13] sm:$0xff] }
0x3d3f   :  { %7377 = vmatprep.subr.bf16.mxu0 %v7868_v3  ;;  %v7395_v0 = vpack.c.bf16 %v3917_v29, %v3916_v53  ;;  %v4031_v53 = vld [vmem:[%s9261_s14 + $0x8] sm:$0xff] }
0x3e0c   :  { %v3196_v9 = vpop.f32.mrb[50].mxu0 }
0x3e0d   :  { %v3200_v11 = vadd.f32 %v3196_v9, %v2407_v43  ;;  %v6876_v45 = vpop.f32.mrb[51].mxu0 }
0x3e0f   :  { %7744 = vtanh.f32 %v3200_v11  ;;  %v3201_v48 = vsub.f32 0.0, %v3200_v11 }
0x3e11   :  { %v3202_v49 = vmul.f32 1.442695, %v3201_v48  ;;  %v6226_v48 = vld [vmem:[%s9259_s12] ss:$0 sm:$0xff] }
0x3e13   :  { %7746 = vpow2.f32 %v3202_v49 }
0x3e19   :  { %v7745_v63 = vpop.eup %7744 }
0x3e1a   :  { %3215 = vrot.lane.b32.xlu0 %v7745_v63, %s7871_s5 }
0x3e1d   :  { %v7747_v39 = vpop.eup %7746 }
0x3e1e   :  { %v3204_v50 = vadd.f32 1.0, %v7747_v39 }
0x3e20   :  { %7748 = vrcp.f32 %v3204_v50 }
0x3e2a   :  { %v7749_v51 = vpop.eup %7748 }
0x3e2b   :  { %v3213_v62 = vmul.f32 %v7749_v51, %v3211_v55 }
0x3e8c   :  { %v3216_v52 = vpop.permute.xlu0 %3215 }
0x3e8d   :  { %v3218_v54 = vmul.f32 %v7749_v51, %v3216_v52 }
0x3e8f   :  { %3220 = vrot.lane.b32.xlu0 %v3218_v54, %s7872_s26 }
0x3f01   :  { %v3221_v35 = vpop.permute.xlu0 %3220 }
0x3f02   :  { %v3223_v56 = vadd.f32 %v3221_v35, %v3213_v62 }
0x3f04   :  { %7750 = vtanh.f32 %v3223_v56 }
0x3f0e   :  { %v7751_v58 = vpop.eup %7750 }
0x3f0f   :  { %3226 = vrot.lane.b32.xlu1 %v7751_v58, %s7871_s5 }
0x3f13   :  { %3236 = vrot.lane.b32.xlu1 %v3223_v56, %s7873_s27 }
0x3f81   :  { %v3227_v59 = vpop.permute.xlu1 %3226 }
0x3f82   :  { %v3229_v19 = vmul.f32 %v7749_v51, %v3227_v59 }
0x3f84   :  { %3231 = vrot.lane.b32.xlu0 %v3229_v19, %s7872_s26 }
0x3f85   :  { %v3237_v12 = vpop.permute.xlu1 %3236 }
0x3f86   :  { %3239 = vst.msk [vmem:[#allocation7] sm:$0xff] %vm238_vm1, %v3237_v12 }
0x3f8d   :  { %v3324_v33 = vld [vmem:[#allocation7] sm:$0xff] }
0x3f8e   :  { %3326 = vrot.lane.b32.xlu1 %v3324_v33, %s7872_s26 }
0x3ff6   :  { %v3232_v41 = vpop.permute.xlu0 %3231 }
0x3ff7   :  { %3234 = vst.msk [vmem:[#allocation6] sm:$0xff] %vm238_vm1, %v3232_v41  ;;  %3240 = vst.msk [vmem:[#allocation2 + $0x30] sm:$0xff] %vm238_vm1, %v3232_v41 }
0x3ffe   :  { %v3242_v13 = vld [vmem:[#allocation6] sm:$0xff] }
0x3fff   :  { %6886 = vmatmul.mubr.msk.f32.vlgmr.msra.gmra.mrb[18].mxu1 %vm238_vm1, %v3242_v13 }
0x4000   :  { %6907 = vmatprep.mubr.msk.f32.mxu1 %vm7869_vm2, %v7870_v4  ;;  %v3327_v23 = vpop.permute.xlu1 %3326  ;;  %7373 = vmatpush3.bf16.msra.mxu1 %v8643_v7 }
0x4001   :  { %7374 = vmatprep.subr.bf16.mxu1 %v7868_v3 }
0x4004   :  { %7376 = vmatpush3.bf16.msra.mxu1 %v8652_v32 }
0x4005   :  { %7383 = vmatprep.subr.bf16.mxu1 %v7868_v3 }
0x40d2   :  { %v3312_v14 = vpop.f32.mrb[18].mxu1 }
0x40d3   :  { %v3316_v15 = vadd.f32 %v3312_v14, %v2412_v8  ;;  %v6887_v16 = vpop.f32.mrb[19].mxu1 }
0x40d5   :  { %7752 = vtanh.f32 %v3316_v15  ;;  %v3317_v18 = vsub.f32 0.0, %v3316_v15 }
0x40d7   :  { %v3318_v31 = vmul.f32 1.442695, %v3317_v18 }
0x40d9   :  { %7754 = vpow2.f32 %v3318_v31 }
0x40df   :  { %v7753_v17 = vpop.eup %7752 }
0x40e0   :  { %3331 = vrot.lane.b32.xlu0 %v7753_v17, %s7871_s5 }
0x40e3   :  { %v7755_v46 = vpop.eup %7754 }
0x40e4   :  { %v3320_v20 = vadd.f32 1.0, %v7755_v46 }
0x40e6   :  { %7756 = vrcp.f32 %v3320_v20 }
0x40f0   :  { %v7757_v21 = vpop.eup %7756 }
0x40f1   :  { %v3329_v61 = vmul.f32 %v7757_v21, %v3327_v23 }
0x4152   :  { %v3332_v1 = vpop.permute.xlu0 %3331 }
0x4153   :  { %v3334_v22 = vmul.f32 %v7757_v21, %v3332_v1 }
0x4155   :  { %3336 = vrot.lane.b32.xlu0 %v3334_v22, %s7872_s26 }
0x41c7   :  { %v3337_v6 = vpop.permute.xlu0 %3336 }
0x41c8   :  { %v3339_v24 = vadd.f32 %v3337_v6, %v3329_v61 }
0x41ca   :  { %7758 = vtanh.f32 %v3339_v24 }
0x41d4   :  { %v7759_v25 = vpop.eup %7758 }
0x41d5   :  { %3342 = vrot.lane.b32.xlu1 %v7759_v25, %s7871_s5 }
0x41d9   :  { %3352 = vrot.lane.b32.xlu1 %v3339_v24, %s7873_s27 }
0x4247   :  { %v3343_v47 = vpop.permute.xlu1 %3342 }
0x4248   :  { %v3345_v34 = vmul.f32 %v7757_v21, %v3343_v47 }
0x424a   :  { %3347 = vrot.lane.b32.xlu0 %v3345_v34, %s7872_s26  ;;  %v3918_v34 = vld [vmem:[%s9260_s13 + $0x10] sm:$0xff] }
0x424b   :  { %v3353_v36 = vpop.permute.xlu1 %3352 }
0x424c   :  { %3355 = vst.msk [vmem:[#allocation7] sm:$0xff] %vm238_vm1, %v3353_v36  ;;  %v3919_v36 = vld [vmem:[%s9260_s13 + $0x18] sm:$0xff] }
0x4253   :  { %v8659_v38 = vld [vmem:[#allocation7] sm:$0xff] }
0x4254   :  { %3445 = vst.msk [vmem:[#allocation7] sm:$0xff] %vm238_vm1, %v7870_v4 }
0x425b   :  { %v3532_v40 = vld [vmem:[#allocation7] sm:$0xff] }
0x425c   :  { %3534 = vrot.lane.b32.xlu1 %v3532_v40, %s7872_s26  ;;  %v7399_v40 = vpack.c.bf16 %v3919_v36, %v3918_v34 }
0x42bc   :  { %v3348_v2 = vpop.permute.xlu0 %3347 }
0x42bd   :  { %3350 = vst.msk [vmem:[#allocation6] sm:$0xff] %vm238_vm1, %v3348_v2  ;;  %3356 = vst.msk [vmem:[#allocation2 + $0x38] sm:$0xff] %vm238_vm1, %v3348_v2 }
0x42c4   :  { %v8666_v43 = vld [vmem:[#allocation6] sm:$0xff]  ;;  %v3359_v9 = vld [vmem:[#allocation2 + $0x38] sm:$0xff] }
0x42c5   :  { %3444 = vst.msk [vmem:[#allocation6] sm:$0xff] %vm238_vm1, %v7870_v4  ;;  %6897 = vmatmul.mubr.msk.f32.vlgmr.msra.gmra.mrb[52].mxu0 %vm238_vm1, %v3359_v9 }
0x42c6   :  { %7379 = vmatpush3.bf16.msra.mxu0 %v8643_v7  ;;  %6918 = vmatprep.mubr.msk.f32.mxu0 %vm7869_vm2, %v7870_v4 }
0x42c7   :  { %7380 = vmatprep.subr.bf16.mxu0 %v7868_v3 }
0x42ca   :  { %7382 = vmatpush3.bf16.msra.mxu0 %v8652_v32 }
0x42cb   :  { %7389 = vmatprep.subr.bf16.mxu0 %v7868_v3 }
0x42cc   :  { %v3450_v11 = vld [vmem:[#allocation6] sm:$0xff] }
0x42cd   :  { %6908 = vmatmul.mubr.msk.f32.vlgmr.msra.gmra.mrb[20].mxu1 %vm238_vm1, %v3450_v11 }
0x42ce   :  { %7385 = vmatpush3.bf16.msra.mxu1 %v8643_v7  ;;  %6929 = vmatprep.mubr.msk.f32.mxu1 %vm7869_vm2, %v7870_v4  ;;  %v3535_v19 = vpop.permute.xlu1 %3534 }
0x42cf   :  { %7386 = vmatprep.subr.bf16.mxu1 %v7868_v3 }
0x42d2   :  { %7388 = vmatpush3.bf16.msra.mxu1 %v8652_v32 }
0x42d3   :  { %7396 = vmatprep.subr.bf16.mxu1 %v7395_v0 }
0x4398   :  { %v3440_v45 = vpop.f32.mrb[52].mxu0 }
0x4399   :  { %v6898_v63 = vpop.f32.mrb[53].mxu0  ;;  %v8686_v49 = vadd.f32 %v6226_v48, %v3440_v45 }
0x43a0   :  { %v3520_v39 = vpop.f32.mrb[20].mxu1 }
0x43a1   :  { %v3524_v50 = vadd.f32 %v3520_v39, %v8686_v49  ;;  %v6909_v51 = vpop.f32.mrb[21].mxu1 }
0x43a3   :  { %7760 = vtanh.f32 %v3524_v50  ;;  %v3525_v54 = vsub.f32 0.0, %v3524_v50 }
0x43a5   :  { %v3526_v55 = vmul.f32 1.442695, %v3525_v54 }
0x43a7   :  { %7762 = vpow2.f32 %v3526_v55 }
0x43ad   :  { %v7761_v52 = vpop.eup %7760 }
0x43ae   :  { %3539 = vrot.lane.b32.xlu0 %v7761_v52, %s7871_s5 }
0x43b1   :  { %v7763_v62 = vpop.eup %7762 }
0x43b2   :  { %v3528_v35 = vadd.f32 1.0, %v7763_v62 }
0x43b4   :  { %7764 = vrcp.f32 %v3528_v35 }
0x43be   :  { %v7765_v56 = vpop.eup %7764 }
0x43bf   :  { %v3537_v12 = vmul.f32 %v7765_v56, %v3535_v19 }
0x4420   :  { %v3540_v58 = vpop.permute.xlu0 %3539 }
0x4421   :  { %v3542_v59 = vmul.f32 %v7765_v56, %v3540_v58 }
0x4423   :  { %3544 = vrot.lane.b32.xlu0 %v3542_v59, %s7872_s26 }
0x4495   :  { %v3545_v33 = vpop.permute.xlu0 %3544 }
0x4496   :  { %v3547_v41 = vadd.f32 %v3545_v33, %v3537_v12 }
0x4498   :  { %7766 = vtanh.f32 %v3547_v41 }
0x44a2   :  { %v7767_v13 = vpop.eup %7766 }
0x44a3   :  { %3550 = vrot.lane.b32.xlu1 %v7767_v13, %s7871_s5 }
0x44a7   :  { %3560 = vrot.lane.b32.xlu1 %v3547_v41, %s7873_s27 }
0x4515   :  { %v3551_v8 = vpop.permute.xlu1 %3550 }
0x4516   :  { %v3553_v14 = vmul.f32 %v7765_v56, %v3551_v8 }
0x4518   :  { %3555 = vrot.lane.b32.xlu0 %v3553_v14, %s7872_s26 }
0x4519   :  { %v3561_v15 = vpop.permute.xlu1 %3560 }
0x451a   :  { %3563 = vst.msk [vmem:[#allocation7] sm:$0xff] %vm238_vm1, %v3561_v15 }
0x4521   :  { %v3647_v16 = vld [vmem:[#allocation7] sm:$0xff] }
0x4522   :  { %3649 = vrot.lane.b32.xlu1 %v3647_v16, %s7872_s26 }
0x458a   :  { %v3556_v17 = vpop.permute.xlu0 %3555 }
0x458b   :  { %3558 = vst.msk [vmem:[#allocation6] sm:$0xff] %vm238_vm1, %v3556_v17  ;;  %3564 = vst.msk [vmem:[#allocation3] sm:$0xff] %vm238_vm1, %v3556_v17 }
0x4592   :  { %v3565_v18 = vld [vmem:[#allocation6] sm:$0xff] }
0x4593   :  { %6919 = vmatmul.mubr.msk.f32.vlgmr.msra.gmra.mrb[54].mxu0 %vm238_vm1, %v3565_v18  ;;  %v3912_v9 = vld [vmem:[#allocation3] sm:$0xff] }
0x4594   :  { %7391 = vmatpush3.bf16.msra.mxu0 %v8643_v7  ;;  %6940 = vmatprep.mubr.msk.f32.mxu0 %vm7869_vm2, %v7870_v4  ;;  %v3650_v44 = vpop.permute.xlu1 %3649 }
0x4595   :  { %7392 = vmatprep.subr.bf16.mxu0 %v7868_v3 }
0x4598   :  { %7394 = vmatpush3.bf16.msra.mxu0 %v8652_v32 }
0x4599   :  { %7403 = vmatprep.subr.bf16.mxu0 %v7868_v3 }
0x4666   :  { %v3635_v31 = vpop.f32.mrb[54].mxu0 }
0x4667   :  { %v3639_v46 = vadd.f32 %v3635_v31, %v8686_v49  ;;  %v6920_v20 = vpop.f32.mrb[55].mxu0 }
0x4669   :  { %7768 = vtanh.f32 %v3639_v46  ;;  %v3640_v1 = vsub.f32 0.0, %v3639_v46 }
0x466b   :  { %v3641_v22 = vmul.f32 1.442695, %v3640_v1 }
0x466d   :  { %7770 = vpow2.f32 %v3641_v22 }
0x4673   :  { %v7769_v21 = vpop.eup %7768 }
0x4674   :  { %3654 = vrot.lane.b32.xlu0 %v7769_v21, %s7871_s5 }
0x4677   :  { %v7771_v23 = vpop.eup %7770 }
0x4678   :  { %v3643_v61 = vadd.f32 1.0, %v7771_v23 }
0x467a   :  { %7772 = vrcp.f32 %v3643_v61 }
0x4684   :  { %v7773_v6 = vpop.eup %7772 }
0x4685   :  { %v3652_v60 = vmul.f32 %v7773_v6, %v3650_v44 }
0x46e6   :  { %v3655_v24 = vpop.permute.xlu0 %3654 }
0x46e7   :  { %v3657_v25 = vmul.f32 %v7773_v6, %v3655_v24 }
0x46e9   :  { %3659 = vrot.lane.b32.xlu0 %v3657_v25, %s7872_s26 }
0x475b   :  { %v3660_v26 = vpop.permute.xlu0 %3659 }
0x475c   :  { %v3662_v27 = vadd.f32 %v3660_v26, %v3652_v60 }
0x475e   :  { %7774 = vtanh.f32 %v3662_v27 }
0x4768   :  { %v7775_v28 = vpop.eup %7774 }
0x4769   :  { %3665 = vrot.lane.b32.xlu1 %v7775_v28, %s7871_s5  ;;  %v4030_v28 = vld [vmem:[%s9261_s14] sm:$0xff] }
0x476a   :  { %v8760_v29 = vpack.c.bf16 %v4031_v53, %v4030_v28 }
0x476d   :  { %3675 = vrot.lane.b32.xlu1 %v3662_v27, %s7873_s27 }
0x47db   :  { %v3666_v7 = vpop.permute.xlu1 %3665 }
0x47dc   :  { %v3668_v37 = vmul.f32 %v7773_v6, %v3666_v7  ;;  %v4033_v7 = vld [vmem:[%s9261_s14 + $0x18] sm:$0xff] }
0x47de   :  { %3670 = vrot.lane.b32.xlu0 %v3668_v37, %s7872_s26 }
0x47df   :  { %v3676_v30 = vpop.permute.xlu1 %3675 }
0x47e0   :  { %3678 = vst.msk [vmem:[#allocation7] sm:$0xff] %vm238_vm1, %v3676_v30 }
0x47e7   :  { %v3762_v47 = vld [vmem:[#allocation7] sm:$0xff] }
0x47e8   :  { %3764 = vrot.lane.b32.xlu1 %v3762_v47, %s7872_s26 }
0x4850   :  { %v3671_v32 = vpop.permute.xlu0 %3670 }
0x4851   :  { %3673 = vst.msk [vmem:[#allocation6] sm:$0xff] %vm238_vm1, %v3671_v32  ;;  %3679 = vst.msk [vmem:[#allocation3 + $0x8] sm:$0xff] %vm238_vm1, %v3671_v32 }
0x4858   :  { %v3680_v2 = vld [vmem:[#allocation6] sm:$0xff]  ;;  %v3913_v11 = vld [vmem:[#allocation3 + $0x8] sm:$0xff] }
0x4859   :  { %6930 = vmatmul.mubr.msk.f32.vlgmr.msra.gmra.mrb[22].mxu1 %vm238_vm1, %v3680_v2 }
0x485a   :  { %7398 = vmatpush3.bf16.msra.mxu1 %v7395_v0  ;;  %6951 = vmatprep.mubr.msk.f32.mxu1 %vm238_vm1, %v3912_v9  ;;  %v3765_v59 = vpop.permute.xlu1 %3764  ;;  %v4032_v0 = vld [vmem:[%s9261_s14 + $0x10] sm:$0xff] }
0x485b   :  { %7400 = vmatprep.subr.bf16.mxu1 %v7399_v40  ;;  %v8769_v30 = vpack.c.bf16 %v4033_v7, %v4032_v0  ;;  %v4505_v0 = vld [vmem:[%s9263_s16 + $0x8] sm:$0xff] }
0x485e   :  { %7402 = vmatpush3.bf16.msra.mxu1 %v7399_v40 }
0x485f   :  { %7409 = vmatprep.subr.bf16.mxu1 %v7868_v3 }
0x4861   :  { %6952 = vmatmul.mubr.msk.f32.vlgmr.msra.gmra.mrb[24].mxu1 %vm238_vm1, %v3913_v11 }
0x4862   :  { %7411 = vmatpush3.bf16.msra.mxu1 %v8760_v29 }
0x4863   :  { %7412 = vmatprep.subr.bf16.mxu1 %v7868_v3 }
0x4866   :  { %7414 = vmatpush3.bf16.msra.mxu1 %v8769_v30 }
0x4867   :  { %7421 = vmatprep.subr.bf16.mxu1 %v7868_v3 }
0x492c   :  { %v3750_v45 = vpop.f32.mrb[22].mxu1 }
0x492d   :  { %v3754_v63 = vadd.f32 %v3750_v45, %v8686_v49  ;;  %v6931_v48 = vpop.f32.mrb[23].mxu1 }
0x492e   :  { %v8807_v48 = vld [vmem:[%s9262_s15] ss:$0 sm:$0xff] }
0x492f   :  { %7776 = vtanh.f32 %v3754_v63  ;;  %v3755_v52 = vsub.f32 0.0, %v3754_v63 }
0x4931   :  { %v3756_v54 = vmul.f32 1.442695, %v3755_v52 }
0x4933   :  { %7778 = vpow2.f32 %v3756_v54 }
0x4934   :  { %v8732_v39 = vpop.f32.mrb[24].mxu1 }
0x4935   :  { %v8734_v50 = vpop.f32.mrb[25].mxu1 }
0x4939   :  { %v7777_v51 = vpop.eup %7776 }
0x493a   :  { %3769 = vrot.lane.b32.xlu0 %v7777_v51, %s7871_s5  ;;  %v4006_v51 = vadd.f32 %v8807_v48, %v8734_v50 }
0x493d   :  { %v7779_v55 = vpop.eup %7778 }
0x493e   :  { %v3758_v62 = vadd.f32 1.0, %v7779_v55 }
0x4940   :  { %7780 = vrcp.f32 %v3758_v62 }
0x494a   :  { %v7781_v35 = vpop.eup %7780 }
0x494b   :  { %v3767_v19 = vmul.f32 %v7781_v35, %v3765_v59 }
0x49ac   :  { %v3770_v56 = vpop.permute.xlu0 %3769 }
0x49ad   :  { %v3772_v58 = vmul.f32 %v7781_v35, %v3770_v56 }
0x49af   :  { %3774 = vrot.lane.b32.xlu0 %v3772_v58, %s7872_s26 }
0x4a21   :  { %v3775_v12 = vpop.permute.xlu0 %3774 }
0x4a22   :  { %v3777_v33 = vadd.f32 %v3775_v12, %v3767_v19 }
0x4a24   :  { %7782 = vtanh.f32 %v3777_v33 }
0x4a2e   :  { %v7783_v41 = vpop.eup %7782 }
0x4a2f   :  { %3780 = vrot.lane.b32.xlu1 %v7783_v41, %s7871_s5 }
0x4a33   :  { %3790 = vrot.lane.b32.xlu1 %v3777_v33, %s7873_s27 }
0x4aa1   :  { %v3781_v13 = vpop.permute.xlu1 %3780 }
0x4aa2   :  { %v3783_v8 = vmul.f32 %v7781_v35, %v3781_v13 }
0x4aa4   :  { %3785 = vrot.lane.b32.xlu0 %v3783_v8, %s7872_s26 }
0x4aa5   :  { %v3791_v14 = vpop.permute.xlu1 %3790 }
0x4aa6   :  { %3793 = vst.msk [vmem:[#allocation7] sm:$0xff] %vm238_vm1, %v3791_v14 }
0x4aad   :  { %v3877_v15 = vld [vmem:[#allocation7] sm:$0xff] }
0x4aae   :  { %3879 = vrot.lane.b32.xlu1 %v3877_v15, %s7872_s26 }
0x4b16   :  { %v3786_v16 = vpop.permute.xlu0 %3785 }
0x4b17   :  { %3788 = vst.msk [vmem:[#allocation6] sm:$0xff] %vm238_vm1, %v3786_v16  ;;  %3794 = vst.msk [vmem:[#allocation3 + $0x10] sm:$0xff] %vm238_vm1, %v3786_v16 }
0x4b1e   :  { %v3795_v17 = vld [vmem:[#allocation6] sm:$0xff]  ;;  %v3914_v18 = vld [vmem:[#allocation3 + $0x10] sm:$0xff] }
0x4b1f   :  { %6941 = vmatmul.mubr.msk.f32.vlgmr.msra.gmra.mrb[56].mxu0 %vm238_vm1, %v3795_v17  ;;  %6954 = vmatprep.mubr.msk.f32.mxu1 %vm238_vm1, %v3914_v18 }
0x4b20   :  { %6965 = vmatprep.mubr.msk.f32.mxu0 %vm7869_vm2, %v7870_v4  ;;  %v3880_v44 = vpop.permute.xlu1 %3879  ;;  %7405 = vmatpush3.bf16.msra.mxu0 %v8760_v29 }
0x4b21   :  { %7406 = vmatprep.subr.bf16.mxu0 %v7868_v3 }
0x4b24   :  { %7408 = vmatpush3.bf16.msra.mxu0 %v8769_v30 }
0x4b25   :  { %7415 = vmatprep.subr.bf16.mxu0 %v7868_v3 }
0x4bf2   :  { %v3865_v31 = vpop.f32.mrb[56].mxu0 }
0x4bf3   :  { %v3869_v46 = vadd.f32 %v3865_v31, %v8686_v49  ;;  %v6942_v20 = vpop.f32.mrb[57].mxu0 }
0x4bf4   :  { %v4011_v20 = vadd.f32 %v8732_v39, %v8807_v48 }
0x4bf5   :  { %7784 = vtanh.f32 %v3869_v46  ;;  %v3870_v1 = vsub.f32 0.0, %v3869_v46 }
0x4bf7   :  { %v3871_v22 = vmul.f32 1.442695, %v3870_v1 }
0x4bf9   :  { %7786 = vpow2.f32 %v3871_v22 }
0x4bff   :  { %v7785_v21 = vpop.eup %7784 }
0x4c00   :  { %3884 = vrot.lane.b32.xlu0 %v7785_v21, %s7871_s5 }
0x4c03   :  { %v7787_v23 = vpop.eup %7786 }
0x4c04   :  { %v3873_v61 = vadd.f32 1.0, %v7787_v23 }
0x4c06   :  { %7788 = vrcp.f32 %v3873_v61 }
0x4c10   :  { %v7789_v6 = vpop.eup %7788 }
0x4c11   :  { %v3882_v60 = vmul.f32 %v7789_v6, %v3880_v44 }
0x4c72   :  { %v3885_v24 = vpop.permute.xlu0 %3884 }
0x4c73   :  { %v3887_v25 = vmul.f32 %v7789_v6, %v3885_v24 }
0x4c75   :  { %3889 = vrot.lane.b32.xlu0 %v3887_v25, %s7872_s26 }
0x4ce7   :  { %v3890_v26 = vpop.permute.xlu0 %3889 }
0x4ce8   :  { %v3892_v49 = vadd.f32 %v3890_v26, %v3882_v60 }
0x4cea   :  { %7790 = vtanh.f32 %v3892_v49 }
0x4cf4   :  { %v7791_v27 = vpop.eup %7790 }
0x4cf5   :  { %3895 = vrot.lane.b32.xlu1 %v7791_v27, %s7871_s5 }
0x4cf9   :  { %3905 = vrot.lane.b32.xlu1 %v3892_v49, %s7873_s27 }
0x4d67   :  { %v3896_v37 = vpop.permute.xlu1 %3895 }
0x4d68   :  { %v3898_v47 = vmul.f32 %v7789_v6, %v3896_v37 }
0x4d6a   :  { %3900 = vrot.lane.b32.xlu0 %v3898_v47, %s7872_s26 }
0x4d6b   :  { %v3906_v32 = vpop.permute.xlu1 %3905 }
0x4d6c   :  { %3908 = vst.msk [vmem:[#allocation7] sm:$0xff] %vm238_vm1, %v3906_v32 }
0x4d73   :  { %v8780_v34 = vld [vmem:[#allocation7] sm:$0xff] }
0x4d74   :  { %4029 = vst.msk [vmem:[#allocation7] sm:$0xff] %vm238_vm1, %v7870_v4 }
0x4d7b   :  { %v4117_v36 = vld [vmem:[#allocation7] sm:$0xff] }
0x4d7c   :  { %4119 = vrot.lane.b32.xlu1 %v4117_v36, %s7872_s26 }
0x4ddc   :  { %v3901_v40 = vpop.permute.xlu0 %3900 }
0x4ddd   :  { %3903 = vst.msk [vmem:[#allocation6] sm:$0xff] %vm238_vm1, %v3901_v40  ;;  %3909 = vst.msk [vmem:[#allocation3 + $0x18] sm:$0xff] %vm238_vm1, %v3901_v40  ;;  %v4506_v40 = vld [vmem:[%s9263_s16 + $0x10] sm:$0xff] }
0x4de4   :  { %v8787_v2 = vld [vmem:[#allocation6] sm:$0xff]  ;;  %v3915_v9 = vld [vmem:[#allocation3 + $0x18] sm:$0xff] }
0x4de5   :  { %4028 = vst.msk [vmem:[#allocation6] sm:$0xff] %vm238_vm1, %v7870_v4  ;;  %6955 = vmatmul.mubr.msk.f32.gmra.mrb[26].mxu1 %vm238_vm1, %v3915_v9  ;;  %v4507_v9 = vld [vmem:[%s9263_s16 + $0x18] sm:$0xff] }
0x4de6   :  { %6976 = vmatprep.mubr.msk.f32.mxu1 %vm7869_vm2, %v7870_v4 }
0x4dec   :  { %v4035_v11 = vld [vmem:[#allocation6] sm:$0xff] }
0x4ded   :  { %6966 = vmatmul.mubr.msk.f32.vlgmr.msra.gmra.mrb[58].mxu0 %vm238_vm1, %v4035_v11  ;;  %v7431_v11 = vpack.c.bf16 %v4507_v9, %v4506_v40 }
0x4dee   :  { %7417 = vmatpush3.bf16.msra.mxu0 %v8760_v29  ;;  %6987 = vmatprep.mubr.msk.f32.mxu0 %vm7869_vm2, %v7870_v4  ;;  %v4120_v41 = vpop.permute.xlu1 %4119 }
0x4def   :  { %7418 = vmatprep.subr.bf16.mxu0 %v7868_v3 }
0x4df2   :  { %7420 = vmatpush3.bf16.msra.mxu0 %v8769_v30 }
0x4eb8   :  { %v8800_v45 = vpop.f32.mrb[26].mxu1 }
0x4eb9   :  { %v8802_v63 = vpop.f32.mrb[27].mxu1 }
0x4ec0   :  { %v4105_v52 = vpop.f32.mrb[58].mxu0 }
0x4ec1   :  { %v4109_v54 = vadd.f32 %v4105_v52, %v4006_v51  ;;  %v6967_v55 = vpop.f32.mrb[59].mxu0 }
0x4ec2   :  { %v4016_v55 = vadd.f32 %v8807_v48, %v8802_v63 }
0x4ec3   :  { %7792 = vtanh.f32 %v4109_v54  ;;  %v4110_v35 = vsub.f32 0.0, %v4109_v54 }
0x4ec5   :  { %v4111_v56 = vmul.f32 1.442695, %v4110_v35 }
0x4ec7   :  { %7794 = vpow2.f32 %v4111_v56 }
0x4ecd   :  { %v7793_v62 = vpop.eup %7792 }
0x4ece   :  { %4124 = vrot.lane.b32.xlu0 %v7793_v62, %s7871_s5 }
0x4ed1   :  { %v7795_v58 = vpop.eup %7794 }
0x4ed2   :  { %v4113_v59 = vadd.f32 1.0, %v7795_v58 }
0x4ed4   :  { %7796 = vrcp.f32 %v4113_v59 }
0x4ede   :  { %v7797_v19 = vpop.eup %7796 }
0x4edf   :  { %v4122_v50 = vmul.f32 %v7797_v19, %v4120_v41 }
0x4f40   :  { %v4125_v12 = vpop.permute.xlu0 %4124 }
0x4f41   :  { %v4127_v33 = vmul.f32 %v7797_v19, %v4125_v12 }
0x4f43   :  { %4129 = vrot.lane.b32.xlu0 %v4127_v33, %s7872_s26 }
0x4fb5   :  { %v4130_v13 = vpop.permute.xlu0 %4129 }
0x4fb6   :  { %v4132_v8 = vadd.f32 %v4130_v13, %v4122_v50 }
0x4fb8   :  { %7798 = vtanh.f32 %v4132_v8 }
0x4fc2   :  { %v7799_v14 = vpop.eup %7798 }
0x4fc3   :  { %4135 = vrot.lane.b32.xlu1 %v7799_v14, %s7871_s5 }
0x4fc7   :  { %4145 = vrot.lane.b32.xlu1 %v4132_v8, %s7873_s27 }
0x5035   :  { %v4136_v15 = vpop.permute.xlu1 %4135 }
0x5036   :  { %v4138_v16 = vmul.f32 %v7797_v19, %v4136_v15 }
0x5038   :  { %4140 = vrot.lane.b32.xlu0 %v4138_v16, %s7872_s26 }
0x5039   :  { %v4146_v17 = vpop.permute.xlu1 %4145 }
0x503a   :  { %4148 = vst.msk [vmem:[#allocation7] sm:$0xff] %vm238_vm1, %v4146_v17 }
0x5041   :  { %v4233_v18 = vld [vmem:[#allocation7] sm:$0xff] }
0x5042   :  { %4235 = vrot.lane.b32.xlu1 %v4233_v18, %s7872_s26 }
0x50aa   :  { %v4141_v31 = vpop.permute.xlu0 %4140 }
0x50ab   :  { %4143 = vst.msk [vmem:[#allocation6] sm:$0xff] %vm238_vm1, %v4141_v31  ;;  %4149 = vst.msk [vmem:[#allocation3] sm:$0xff] %vm238_vm1, %v4141_v31 }
0x50b2   :  { %v4151_v46 = vld [vmem:[#allocation6] sm:$0xff] }
0x50b3   :  { %6977 = vmatmul.mubr.msk.f32.vlgmr.msra.gmra.mrb[28].mxu1 %vm238_vm1, %v4151_v46  ;;  %v4500_v52 = vld [vmem:[#allocation3] sm:$0xff] }
0x50b4   :  { %7423 = vmatpush3.bf16.msra.mxu1 %v8760_v29  ;;  %6998 = vmatprep.mubr.msk.f32.mxu1 %vm7869_vm2, %v7870_v4  ;;  %v4236_v49 = vpop.permute.xlu1 %4235  ;;  %v4504_v29 = vld [vmem:[%s9263_s16] sm:$0xff] }
0x50b5   :  { %7424 = vmatprep.subr.bf16.mxu1 %v7868_v3  ;;  %v7427_v7 = vpack.c.bf16 %v4505_v0, %v4504_v29 }
0x50b7   :  { %7428 = vmatprep.subr.bf16.mxu0 %v7427_v7 }
0x50b8   :  { %7426 = vmatpush3.bf16.msra.mxu1 %v8769_v30 }
0x50b9   :  { %7435 = vmatprep.subr.bf16.mxu1 %v7868_v3 }
0x5186   :  { %v4221_v21 = vpop.f32.mrb[28].mxu1 }
0x5187   :  { %v4225_v1 = vadd.f32 %v4221_v21, %v4011_v20  ;;  %v6978_v22 = vpop.f32.mrb[29].mxu1 }
0x5189   :  { %7800 = vtanh.f32 %v4225_v1  ;;  %v4226_v61 = vsub.f32 0.0, %v4225_v1 }
0x518b   :  { %v4227_v6 = vmul.f32 1.442695, %v4226_v61  ;;  %v4021_v61 = vadd.f32 %v8800_v45, %v8807_v48 }
0x518d   :  { %7802 = vpow2.f32 %v4227_v6 }
0x5193   :  { %v7801_v23 = vpop.eup %7800 }
0x5194   :  { %4240 = vrot.lane.b32.xlu0 %v7801_v23, %s7871_s5 }
0x5197   :  { %v7803_v24 = vpop.eup %7802 }
0x5198   :  { %v4229_v25 = vadd.f32 1.0, %v7803_v24 }
0x519a   :  { %7804 = vrcp.f32 %v4229_v25 }
0x51a4   :  { %v7805_v44 = vpop.eup %7804 }
0x51a5   :  { %v4238_v39 = vmul.f32 %v7805_v44, %v4236_v49 }
0x5206   :  { %v4241_v60 = vpop.permute.xlu0 %4240 }
0x5207   :  { %v4243_v26 = vmul.f32 %v7805_v44, %v4241_v60 }
0x5209   :  { %4245 = vrot.lane.b32.xlu0 %v4243_v26, %s7872_s26 }
0x527b   :  { %v4246_v27 = vpop.permute.xlu0 %4245 }
0x527c   :  { %v4248_v28 = vadd.f32 %v4246_v27, %v4238_v39 }
0x527e   :  { %7806 = vtanh.f32 %v4248_v28 }
0x5288   :  { %v7807_v53 = vpop.eup %7806 }
0x5289   :  { %4251 = vrot.lane.b32.xlu1 %v7807_v53, %s7871_s5 }
0x528d   :  { %4261 = vrot.lane.b32.xlu1 %v4248_v28, %s7873_s27 }
0x52fb   :  { %v4252_v37 = vpop.permute.xlu1 %4251 }
0x52fc   :  { %v4254_v30 = vmul.f32 %v7805_v44, %v4252_v37  ;;  %v4618_v37 = vld [vmem:[%s9264_s17] sm:$0xff] }
0x52fe   :  { %4256 = vrot.lane.b32.xlu0 %v4254_v30, %s7872_s26  ;;  %v4619_v30 = vld [vmem:[%s9264_s17 + $0x8] sm:$0xff] }
0x52ff   :  { %v4262_v47 = vpop.permute.xlu1 %4261 }
0x5300   :  { %4264 = vst.msk [vmem:[#allocation7] sm:$0xff] %vm238_vm1, %v4262_v47  ;;  %v8885_v47 = vpack.c.bf16 %v4619_v30, %v4618_v37 }
0x5307   :  { %v4349_v32 = vld [vmem:[#allocation7] sm:$0xff] }
0x5308   :  { %4351 = vrot.lane.b32.xlu1 %v4349_v32, %s7872_s26  ;;  %v4620_v32 = vld [vmem:[%s9264_s17 + $0x10] sm:$0xff] }
0x5370   :  { %v4257_v36 = vpop.permute.xlu0 %4256 }
0x5371   :  { %4259 = vst.msk [vmem:[#allocation6] sm:$0xff] %vm238_vm1, %v4257_v36  ;;  %4265 = vst.msk [vmem:[#allocation3 + $0x8] sm:$0xff] %vm238_vm1, %v4257_v36  ;;  %v4621_v36 = vld [vmem:[%s9264_s17 + $0x18] sm:$0xff] }
0x5372   :  { %v8894_v9 = vpack.c.bf16 %v4621_v36, %v4620_v32 }
0x5378   :  { %v4267_v51 = vld [vmem:[#allocation6] sm:$0xff]  ;;  %v4501_v54 = vld [vmem:[#allocation3 + $0x8] sm:$0xff] }
0x5379   :  { %6988 = vmatmul.mubr.msk.f32.vlgmr.msra.gmra.mrb[60].mxu0 %vm238_vm1, %v4267_v51 }
0x537a   :  { %7430 = vmatpush3.bf16.msra.mxu0 %v7427_v7  ;;  %7009 = vmatprep.mubr.msk.f32.mxu0 %vm238_vm1, %v4500_v52  ;;  %v4352_v14 = vpop.permute.xlu1 %4351 }
0x537b   :  { %7432 = vmatprep.subr.bf16.mxu0 %v7431_v11 }
0x537e   :  { %7434 = vmatpush3.bf16.msra.mxu0 %v7431_v11 }
0x537f   :  { %7441 = vmatprep.subr.bf16.mxu0 %v7868_v3 }
0x5381   :  { %7010 = vmatmul.mubr.msk.f32.vlgmr.msra.gmra.mrb[62].mxu0 %vm238_vm1, %v4501_v54 }
0x5382   :  { %7443 = vmatpush3.bf16.msra.mxu0 %v8885_v47 }
0x5383   :  { %7444 = vmatprep.subr.bf16.mxu0 %v7868_v3 }
0x5386   :  { %7446 = vmatpush3.bf16.msra.mxu0 %v8894_v9 }
0x5387   :  { %7453 = vmatprep.subr.bf16.mxu0 %v7868_v3 }
0x544c   :  { %v4337_v62 = vpop.f32.mrb[60].mxu0 }
0x544d   :  { %v4341_v35 = vadd.f32 %v4337_v62, %v4016_v55  ;;  %v6989_v56 = vpop.f32.mrb[61].mxu0 }
0x544f   :  { %7808 = vtanh.f32 %v4341_v35  ;;  %v4342_v12 = vsub.f32 0.0, %v4341_v35 }
0x5451   :  { %v4343_v33 = vmul.f32 1.442695, %v4342_v12 }
0x5453   :  { %7810 = vpow2.f32 %v4343_v33  ;;  %v8933_v33 = vld [vmem:[%s9265_s18] ss:$0 sm:$0xff] }
0x5454   :  { %v8856_v58 = vpop.f32.mrb[62].mxu0 }
0x5455   :  { %v8858_v59 = vpop.f32.mrb[63].mxu0 }
0x5459   :  { %v7809_v19 = vpop.eup %7808 }
0x545a   :  { %4356 = vrot.lane.b32.xlu0 %v7809_v19, %s7871_s5 }
0x545d   :  { %v7811_v41 = vpop.eup %7810 }
0x545e   :  { %v4345_v50 = vadd.f32 1.0, %v7811_v41  ;;  %v4594_v41 = vadd.f32 %v8933_v33, %v8858_v59 }
0x5460   :  { %7812 = vrcp.f32 %v4345_v50 }
0x546a   :  { %v7813_v13 = vpop.eup %7812 }
0x546b   :  { %v4354_v15 = vmul.f32 %v7813_v13, %v4352_v14 }
0x54cc   :  { %v4357_v8 = vpop.permute.xlu0 %4356 }
0x54cd   :  { %v4359_v63 = vmul.f32 %v7813_v13, %v4357_v8 }
0x54cf   :  { %4361 = vrot.lane.b32.xlu0 %v4359_v63, %s7872_s26 }
0x5541   :  { %v4362_v16 = vpop.permute.xlu0 %4361 }
0x5542   :  { %v4364_v17 = vadd.f32 %v4362_v16, %v4354_v15 }
0x5544   :  { %7814 = vtanh.f32 %v4364_v17 }
0x554e   :  { %v7815_v18 = vpop.eup %7814 }
0x554f   :  { %4367 = vrot.lane.b32.xlu1 %v7815_v18, %s7871_s5 }
0x5553   :  { %4377 = vrot.lane.b32.xlu1 %v4364_v17, %s7873_s27 }
0x55c1   :  { %v4368_v31 = vpop.permute.xlu1 %4367 }
0x55c2   :  { %v4370_v46 = vmul.f32 %v7813_v13, %v4368_v31 }
0x55c4   :  { %4372 = vrot.lane.b32.xlu0 %v4370_v46, %s7872_s26 }
0x55c5   :  { %v4378_v20 = vpop.permute.xlu1 %4377 }
0x55c6   :  { %4380 = vst.msk [vmem:[#allocation7] sm:$0xff] %vm238_vm1, %v4378_v20 }
0x55cd   :  { %v4465_v21 = vld [vmem:[#allocation7] sm:$0xff] }
0x55ce   :  { %4467 = vrot.lane.b32.xlu1 %v4465_v21, %s7872_s26 }
0x5636   :  { %v4373_v1 = vpop.permute.xlu0 %4372 }
0x5637   :  { %4375 = vst.msk [vmem:[#allocation6] sm:$0xff] %vm238_vm1, %v4373_v1  ;;  %4381 = vst.msk [vmem:[#allocation3 + $0x10] sm:$0xff] %vm238_vm1, %v4373_v1 }
0x563e   :  { %v4383_v22 = vld [vmem:[#allocation6] sm:$0xff]  ;;  %v4502_v23 = vld [vmem:[#allocation3 + $0x10] sm:$0xff] }
0x563f   :  { %6999 = vmatmul.mubr.msk.f32.vlgmr.msra.gmra.mrb[30].mxu1 %vm238_vm1, %v4383_v22  ;;  %7012 = vmatprep.mubr.msk.f32.mxu0 %vm238_vm1, %v4502_v23 }
0x5640   :  { %7023 = vmatprep.mubr.msk.f32.mxu1 %vm7869_vm2, %v7870_v4  ;;  %v4468_v29 = vpop.permute.xlu1 %4467  ;;  %7437 = vmatpush3.bf16.msra.mxu1 %v8885_v47 }
0x5641   :  { %7438 = vmatprep.subr.bf16.mxu1 %v7868_v3 }
0x5644   :  { %7440 = vmatpush3.bf16.msra.mxu1 %v8894_v9 }
0x5645   :  { %7447 = vmatprep.subr.bf16.mxu1 %v7868_v3 }
0x5712   :  { %v4453_v6 = vpop.f32.mrb[30].mxu1 }
0x5713   :  { %v4457_v24 = vadd.f32 %v4453_v6, %v4021_v61  ;;  %v7000_v25 = vpop.f32.mrb[31].mxu1 }
0x5715   :  { %7816 = vtanh.f32 %v4457_v24  ;;  %v4458_v60 = vsub.f32 0.0, %v4457_v24 }
0x5717   :  { %v4459_v26 = vmul.f32 1.442695, %v4458_v60  ;;  %v4599_v60 = vadd.f32 %v8856_v58, %v8933_v33 }
0x5719   :  { %7818 = vpow2.f32 %v4459_v26 }
0x571f   :  { %v7817_v44 = vpop.eup %7816 }
0x5720   :  { %4472 = vrot.lane.b32.xlu0 %v7817_v44, %s7871_s5 }
0x5723   :  { %v7819_v49 = vpop.eup %7818 }
0x5724   :  { %v4461_v39 = vadd.f32 1.0, %v7819_v49 }
0x5726   :  { %7820 = vrcp.f32 %v4461_v39 }
0x5730   :  { %v7821_v27 = vpop.eup %7820 }
0x5731   :  { %v4470_v45 = vmul.f32 %v7821_v27, %v4468_v29 }
0x5792   :  { %v4473_v28 = vpop.permute.xlu0 %4472 }
0x5793   :  { %v4475_v53 = vmul.f32 %v7821_v27, %v4473_v28 }
0x5795   :  { %4477 = vrot.lane.b32.xlu0 %v4475_v53, %s7872_s26 }
0x5807   :  { %v4478_v48 = vpop.permute.xlu0 %4477 }
0x5808   :  { %v4480_v0 = vadd.f32 %v4478_v48, %v4470_v45 }
0x580a   :  { %7822 = vtanh.f32 %v4480_v0 }
0x5814   :  { %v7823_v7 = vpop.eup %7822 }
0x5815   :  { %4483 = vrot.lane.b32.xlu1 %v7823_v7, %s7871_s5 }
0x5819   :  { %4493 = vrot.lane.b32.xlu1 %v4480_v0, %s7873_s27 }
0x5887   :  { %v4484_v40 = vpop.permute.xlu1 %4483 }
0x5888   :  { %v4486_v11 = vmul.f32 %v7821_v27, %v4484_v40 }
0x588a   :  { %4488 = vrot.lane.b32.xlu0 %v4486_v11, %s7872_s26 }
0x588b   :  { %v4494_v51 = vpop.permute.xlu1 %4493 }
0x588c   :  { %4496 = vst.msk [vmem:[#allocation7] sm:$0xff] %vm238_vm1, %v4494_v51 }
0x5893   :  { %v8905_v52 = vld [vmem:[#allocation7] sm:$0xff] }
0x5894   :  { %4617 = vst.msk [vmem:[#allocation7] sm:$0xff] %vm238_vm1, %v7870_v4 }
0x589b   :  { %v4705_v54 = vld [vmem:[#allocation7] sm:$0xff] }
0x589c   :  { %4707 = vrot.lane.b32.xlu1 %v4705_v54, %s7872_s26  ;;  %v5088_v54 = vld [vmem:[%s9298_s10] sm:$0xff] }
0x58fc   :  { %v4489_v55 = vpop.permute.xlu0 %4488 }
0x58fd   :  { %4491 = vst.msk [vmem:[#allocation6] sm:$0xff] %vm238_vm1, %v4489_v55  ;;  %4497 = vst.msk [vmem:[#allocation3 + $0x18] sm:$0xff] %vm238_vm1, %v4489_v55  ;;  %v5089_v55 = vld [vmem:[%s9298_s10 + $0x8] sm:$0xff] }
0x5904   :  { %v8912_v62 = vld [vmem:[#allocation6] sm:$0xff]  ;;  %v4503_v35 = vld [vmem:[#allocation3 + $0x18] sm:$0xff] }
0x5905   :  { %4616 = vst.msk [vmem:[#allocation6] sm:$0xff] %vm238_vm1, %v7870_v4  ;;  %7013 = vmatmul.mubr.msk.f32.gmra.mrb[64].mxu0 %vm238_vm1, %v4503_v35  ;;  %v7460_v35 = vpack.c.bf16 %v5089_v55, %v5088_v54  ;;  %v5125_v54 = vld [vmem:[%s9298_s10 + $0x128] sm:$0xff] }
0x5906   :  { %7034 = vmatprep.mubr.msk.f32.mxu0 %vm7869_vm2, %v7870_v4 }
0x590c   :  { %v4623_v56 = vld [vmem:[#allocation6] sm:$0xff] }
0x590d   :  { %7024 = vmatmul.mubr.msk.f32.vlgmr.msra.gmra.mrb[32].mxu1 %vm238_vm1, %v4623_v56  ;;  %v5090_v56 = vld [vmem:[%s9298_s10 + $0x10] sm:$0xff] }
0x590e   :  { %7449 = vmatpush3.bf16.msra.mxu1 %v8885_v47  ;;  %7045 = vmatprep.mubr.msk.f32.mxu1 %vm7869_vm2, %v7870_v4  ;;  %v4708_v20 = vpop.permute.xlu1 %4707 }
0x590f   :  { %7450 = vmatprep.subr.bf16.mxu1 %v7868_v3 }
0x5912   :  { %7452 = vmatpush3.bf16.msra.mxu1 %v8894_v9 }
0x5913   :  { %7459 = vmatprep.subr.bf16.mxu1 %v7868_v3 }
0x59d8   :  { %v8926_v19 = vpop.f32.mrb[64].mxu0 }
0x59d9   :  { %v8928_v12 = vpop.f32.mrb[65].mxu0 }
0x59e0   :  { %v4693_v50 = vpop.f32.mrb[32].mxu1 }
0x59e1   :  { %v4697_v13 = vadd.f32 %v4693_v50, %v4594_v41  ;;  %v7025_v8 = vpop.f32.mrb[33].mxu1  ;;  %v5091_v41 = vld [vmem:[%s9298_s10 + $0x18] sm:$0xff] }
0x59e2   :  { %v5092_v8 = vld [vmem:[%s9298_s10 + $0x20] sm:$0xff] }
0x59e3   :  { %7824 = vtanh.f32 %v4697_v13  ;;  %v4698_v14 = vsub.f32 0.0, %v4697_v13  ;;  %v7463_v13 = vpack.c.bf16 %v5091_v41, %v5090_v56  ;;  %v4604_v41 = vadd.f32 %v8933_v33, %v8928_v12 }
0x59e5   :  { %v4699_v15 = vmul.f32 1.442695, %v4698_v14 }
0x59e7   :  { %7826 = vpow2.f32 %v4699_v15  ;;  %v5094_v15 = vld [vmem:[%s9298_s10 + $0x30] sm:$0xff] }
0x59ed   :  { %v7825_v63 = vpop.eup %7824 }
0x59ee   :  { %4712 = vrot.lane.b32.xlu0 %v7825_v63, %s7871_s5  ;;  %v5093_v63 = vld [vmem:[%s9298_s10 + $0x28] sm:$0xff] }
0x59ef   :  { %v7466_v14 = vpack.c.bf16 %v5093_v63, %v5092_v8 }
0x59f1   :  { %v7827_v16 = vpop.eup %7826 }
0x59f2   :  { %v4701_v17 = vadd.f32 1.0, %v7827_v16  ;;  %v5095_v16 = vld [vmem:[%s9298_s10 + $0x38] sm:$0xff] }
0x59f4   :  { %7828 = vrcp.f32 %v4701_v17  ;;  %v7469_v17 = vpack.c.bf16 %v5095_v16, %v5094_v15 }
0x59fe   :  { %v7829_v18 = vpop.eup %7828 }
0x59ff   :  { %v4710_v59 = vmul.f32 %v7829_v18, %v4708_v20  ;;  %v5099_v20 = vld [vmem:[%s9298_s10 + $0x58] sm:$0xff] }
0x5a60   :  { %v4713_v31 = vpop.permute.xlu0 %4712 }
0x5a61   :  { %v4715_v46 = vmul.f32 %v7829_v18, %v4713_v31  ;;  %v5097_v31 = vld [vmem:[%s9298_s10 + $0x48] sm:$0xff] }
0x5a63   :  { %4717 = vrot.lane.b32.xlu0 %v4715_v46, %s7872_s26 }
0x5ad5   :  { %v4718_v21 = vpop.permute.xlu0 %4717 }
0x5ad6   :  { %v4720_v1 = vadd.f32 %v4718_v21, %v4710_v59  ;;  %v5100_v21 = vld [vmem:[%s9298_s10 + $0x60] sm:$0xff] }
0x5ad8   :  { %7830 = vtanh.f32 %v4720_v1 }
0x5ae2   :  { %v7831_v22 = vpop.eup %7830 }
0x5ae3   :  { %4723 = vrot.lane.b32.xlu1 %v7831_v22, %s7871_s5 }
0x5ae7   :  { %4733 = vrot.lane.b32.xlu1 %v4720_v1, %s7873_s27  ;;  %v5101_v1 = vld [vmem:[%s9298_s10 + $0x68] sm:$0xff] }
0x5ae8   :  { %v7478_v22 = vpack.c.bf16 %v5101_v1, %v5100_v21  ;;  %v6044_v21 = vld [vmem:[%s9267_s21 + $0x8] sm:$0xff] }
0x5b55   :  { %v4724_v23 = vpop.permute.xlu1 %4723 }
0x5b56   :  { %v4726_v61 = vmul.f32 %v7829_v18, %v4724_v23  ;;  %v5096_v18 = vld [vmem:[%s9298_s10 + $0x40] sm:$0xff]  ;;  %v5103_v23 = vld [vmem:[%s9298_s10 + $0x78] sm:$0xff] }
0x5b57   :  { %v7472_v46 = vpack.c.bf16 %v5097_v31, %v5096_v18 }
0x5b58   :  { %4728 = vrot.lane.b32.xlu0 %v4726_v61, %s7872_s26 }
0x5b59   :  { %v4734_v6 = vpop.permute.xlu1 %4733 }
0x5b5a   :  { %4736 = vst.msk [vmem:[#allocation7] sm:$0xff] %vm238_vm1, %v4734_v6  ;;  %v5104_v6 = vld [vmem:[%s9298_s10 + $0x80] sm:$0xff] }
0x5b61   :  { %v4821_v24 = vld [vmem:[#allocation7] sm:$0xff] }
0x5b62   :  { %4823 = vrot.lane.b32.xlu1 %v4821_v24, %s7872_s26  ;;  %v5105_v24 = vld [vmem:[%s9298_s10 + $0x88] sm:$0xff] }
0x5bca   :  { %v4729_v25 = vpop.permute.xlu0 %4728 }
0x5bcb   :  { %4731 = vst.msk [vmem:[#allocation6] sm:$0xff] %vm238_vm1, %v4729_v25  ;;  %4737 = vst.msk [vmem:[#allocation3] sm:$0xff] %vm238_vm1, %v4729_v25  ;;  %v7484_v25 = vpack.c.bf16 %v5105_v24, %v5104_v6  ;;  %v6045_v24 = vld [vmem:[%s9267_s21 + $0x10] sm:$0xff] }
0x5bd2   :  { %v4739_v44 = vld [vmem:[#allocation6] sm:$0xff] }
0x5bd3   :  { %7035 = vmatmul.mubr.msk.f32.vlgmr.msra.gmra.mrb[66].mxu0 %vm238_vm1, %v4739_v44  ;;  %v5107_v44 = vld [vmem:[%s9298_s10 + $0x98] sm:$0xff] }
0x5bd4   :  { %7455 = vmatpush3.bf16.msra.mxu0 %v8885_v47  ;;  %7056 = vmatprep.mubr.msk.f32.mxu0 %vm7869_vm2, %v7870_v4  ;;  %v4824_v37 = vpop.permute.xlu1 %4823 }
0x5bd5   :  { %7456 = vmatprep.subr.bf16.mxu0 %v7868_v3 }
0x5bd8   :  { %7458 = vmatpush3.bf16.msra.mxu0 %v8894_v9 }
0x5ca6   :  { %v4809_v26 = vpop.f32.mrb[66].mxu0 }
0x5ca7   :  { %v4813_v49 = vadd.f32 %v4809_v26, %v4599_v60  ;;  %v7036_v39 = vpop.f32.mrb[67].mxu0  ;;  %v5108_v26 = vld [vmem:[%s9298_s10 + $0xa0] sm:$0xff] }
0x5ca9   :  { %7832 = vtanh.f32 %v4813_v49  ;;  %v4814_v28 = vsub.f32 0.0, %v4813_v49  ;;  %v5109_v49 = vld [vmem:[%s9298_s10 + $0xa8] sm:$0xff] }
0x5caa   :  { %v7490_v39 = vpack.c.bf16 %v5109_v49, %v5108_v26 }
0x5cab   :  { %v4815_v53 = vmul.f32 1.442695, %v4814_v28 }
0x5cad   :  { %7834 = vpow2.f32 %v4815_v53  ;;  %v5112_v53 = vld [vmem:[%s9298_s10 + $0xc0] sm:$0xff] }
0x5cb3   :  { %v7833_v27 = vpop.eup %7832 }
0x5cb4   :  { %4828 = vrot.lane.b32.xlu0 %v7833_v27, %s7871_s5  ;;  %v5111_v27 = vld [vmem:[%s9298_s10 + $0xb8] sm:$0xff] }
0x5cb7   :  { %v7835_v29 = vpop.eup %7834 }
0x5cb8   :  { %v4817_v45 = vadd.f32 1.0, %v7835_v29  ;;  %v5113_v29 = vld [vmem:[%s9298_s10 + $0xc8] sm:$0xff] }
0x5cba   :  { %7836 = vrcp.f32 %v4817_v45  ;;  %v7496_v45 = vpack.c.bf16 %v5113_v29, %v5112_v53  ;;  %v9178_v53 = vld [vmem:[%s9268_s22] ss:$0 sm:$0xff] }
0x5cc4   :  { %v7837_v48 = vpop.eup %7836 }
0x5cc5   :  { %v4826_v58 = vmul.f32 %v7837_v48, %v4824_v37  ;;  %v5117_v37 = vld [vmem:[%s9298_s10 + $0xe8] sm:$0xff] }
0x5d26   :  { %v4829_v0 = vpop.permute.xlu0 %4828 }
0x5d27   :  { %v4831_v7 = vmul.f32 %v7837_v48, %v4829_v0 }
0x5d29   :  { %4833 = vrot.lane.b32.xlu0 %v4831_v7, %s7872_s26  ;;  %v5116_v7 = vld [vmem:[%s9298_s10 + $0xe0] sm:$0xff] }
0x5d9b   :  { %v4834_v30 = vpop.permute.xlu0 %4833 }
0x5d9c   :  { %v4836_v47 = vadd.f32 %v4834_v30, %v4826_v58  ;;  %v7502_v58 = vpack.c.bf16 %v5117_v37, %v5116_v7  ;;  %v5119_v30 = vld [vmem:[%s9298_s10 + $0xf8] sm:$0xff] }
0x5d9e   :  { %7838 = vtanh.f32 %v4836_v47 }
0x5da8   :  { %v7839_v32 = vpop.eup %7838 }
0x5da9   :  { %4839 = vrot.lane.b32.xlu1 %v7839_v32, %s7871_s5  ;;  %v5120_v32 = vld [vmem:[%s9298_s10 + $0x100] sm:$0xff] }
0x5dad   :  { %4849 = vrot.lane.b32.xlu1 %v4836_v47, %s7873_s27 }
0x5e1b   :  { %v4840_v36 = vpop.permute.xlu1 %4839 }
0x5e1c   :  { %v4842_v40 = vmul.f32 %v7837_v48, %v4840_v36  ;;  %v5115_v48 = vld [vmem:[%s9298_s10 + $0xd8] sm:$0xff]  ;;  %v5121_v36 = vld [vmem:[%s9298_s10 + $0x108] sm:$0xff] }
0x5e1e   :  { %4844 = vrot.lane.b32.xlu0 %v4842_v40, %s7872_s26  ;;  %v7508_v40 = vpack.c.bf16 %v5121_v36, %v5120_v32 }
0x5e1f   :  { %v4850_v9 = vpop.permute.xlu1 %4849 }
0x5e20   :  { %4852 = vst.msk [vmem:[#allocation7] sm:$0xff] %vm238_vm1, %v4850_v9  ;;  %v5123_v9 = vld [vmem:[%s9298_s10 + $0x118] sm:$0xff] }
0x5e27   :  { %v4937_v11 = vld [vmem:[#allocation7] sm:$0xff] }
0x5e28   :  { %4939 = vrot.lane.b32.xlu1 %v4937_v11, %s7872_s26 }
0x5e90   :  { %v4845_v51 = vpop.permute.xlu0 %4844 }
0x5e91   :  { %4847 = vst.msk [vmem:[#allocation6] sm:$0xff] %vm238_vm1, %v4845_v51  ;;  %4853 = vst.msk [vmem:[#allocation3 + $0x8] sm:$0xff] %vm238_vm1, %v4845_v51  ;;  %v5124_v51 = vld [vmem:[%s9298_s10 + $0x120] sm:$0xff] }
0x5e92   :  { %v7514_v55 = vpack.c.bf16 %v5125_v54, %v5124_v51 }
0x5e98   :  { %v4855_v50 = vld [vmem:[#allocation6] sm:$0xff]  ;;  %v6040_v26 = vld [vmem:[#allocation3 + $0x8] sm:$0xff] }
0x5e99   :  { %7046 = vmatmul.mubr.msk.f32.vlgmr.msra.gmra.mrb[34].mxu1 %vm238_vm1, %v4855_v50 }
0x5e9a   :  { %7461 = vmatpush3.bf16.msra.mxu1 %v7460_v35  ;;  %7067 = vmatprep.mubr.msk.f32.mxu1 %vm7869_vm2, %v7870_v4  ;;  %v5127_v35 = vld [vmem:[%s9298_s10 + $0x138] sm:$0xff]  ;;  %v4940_v31 = vpop.permute.xlu1 %4939 }
0x5e9b   :  { %7462 = vmatprep.subr.bf16.mxu1 %v7868_v3 }
0x5e9e   :  { %7464 = vmatpush3.bf16.msra.mxu1 %v7463_v13 }
0x5e9f   :  { %7465 = vmatprep.subr.bf16.mxu1 %v7868_v3 }
0x5ea1   :  { %7068 = vmatmul.mubr.msk.f32.vlgmr.msra.gmra.mrb[36].mxu1 %vm238_vm1, %v8267_v10  ;;  %v5098_v10 = vld [vmem:[%s9298_s10 + $0x50] sm:$0xff] }
0x5ea2   :  { %7467 = vmatpush3.bf16.msra.mxu1 %v7466_v14  ;;  %7078 = vmatprep.mubr.msk.f32.mxu1 %vm7869_vm2, %v7870_v4  ;;  %v7475_v59 = vpack.c.bf16 %v5099_v20, %v5098_v10 }
0x5ea3   :  { %7468 = vmatprep.subr.bf16.mxu1 %v7868_v3 }
0x5ea6   :  { %7470 = vmatpush3.bf16.msra.mxu1 %v7469_v17 }
0x5ea7   :  { %7471 = vmatprep.subr.bf16.mxu1 %v7868_v3 }
0x5ea9   :  { %7079 = vmatmul.mubr.msk.f32.vlgmr.msra.gmra.mrb[36].mxu1 %vm238_vm1, %v8260_v5  ;;  %v5102_v5 = vld [vmem:[%s9298_s10 + $0x70] sm:$0xff] }
0x5eaa   :  { %7473 = vmatpush3.bf16.msra.mxu1 %v7472_v46  ;;  %7089 = vmatprep.mubr.msk.f32.mxu1 %vm7869_vm2, %v7870_v4  ;;  %v7481_v61 = vpack.c.bf16 %v5103_v23, %v5102_v5 }
0x5eab   :  { %7474 = vmatprep.subr.bf16.mxu1 %v7868_v3 }
0x5eae   :  { %7476 = vmatpush3.bf16.msra.mxu1 %v7475_v59  ;;  %v6043_v59 = vld [vmem:[%s9267_s21] sm:$0xff] }
0x5eaf   :  { %7477 = vmatprep.subr.bf16.mxu1 %v7868_v3  ;;  %v7531_v1 = vpack.c.bf16 %v6044_v21, %v6043_v59 }
0x5eb1   :  { %7090 = vmatmul.mubr.msk.f32.vlgmr.msra.gmra.mrb[36].mxu1 %vm238_vm1, %v8787_v2  ;;  %v5106_v2 = vld [vmem:[%s9298_s10 + $0x90] sm:$0xff]  ;;  %7532 = vmatprep.subr.bf16.mxu0 %v7531_v1 }
0x5eb2   :  { %7479 = vmatpush3.bf16.msra.mxu1 %v7478_v22  ;;  %7100 = vmatprep.mubr.msk.f32.mxu1 %vm7869_vm2, %v7870_v4  ;;  %v7487_v60 = vpack.c.bf16 %v5107_v44, %v5106_v2 }
0x5eb3   :  { %7480 = vmatprep.subr.bf16.mxu1 %v7868_v3 }
0x5eb6   :  { %7482 = vmatpush3.bf16.msra.mxu1 %v7481_v61 }
0x5eb7   :  { %7483 = vmatprep.subr.bf16.mxu1 %v7868_v3 }
0x5eb9   :  { %7101 = vmatmul.mubr.msk.f32.vlgmr.msra.gmra.mrb[36].mxu1 %vm238_vm1, %v8780_v34  ;;  %v5110_v34 = vld [vmem:[%s9298_s10 + $0xb0] sm:$0xff] }
0x5eba   :  { %7485 = vmatpush3.bf16.msra.mxu1 %v7484_v25  ;;  %7111 = vmatprep.mubr.msk.f32.mxu1 %vm7869_vm2, %v7870_v4  ;;  %v7493_v28 = vpack.c.bf16 %v5111_v27, %v5110_v34  ;;  %v6046_v25 = vld [vmem:[%s9267_s21 + $0x18] sm:$0xff] }
0x5ebb   :  { %7486 = vmatprep.subr.bf16.mxu1 %v7868_v3  ;;  %v7535_v2 = vpack.c.bf16 %v6046_v25, %v6045_v24 }
0x5ebe   :  { %7488 = vmatpush3.bf16.msra.mxu1 %v7487_v60  ;;  %v6039_v60 = vld [vmem:[#allocation3] sm:$0xff] }
0x5ebf   :  { %7489 = vmatprep.subr.bf16.mxu1 %v7868_v3 }
0x5ec1   :  { %7112 = vmatmul.mubr.msk.f32.vlgmr.msra.gmra.mrb[36].mxu1 %vm238_vm1, %v8476_v57  ;;  %v5114_v57 = vld [vmem:[%s9298_s10 + $0xd0] sm:$0xff] }
0x5ec2   :  { %7491 = vmatpush3.bf16.msra.mxu1 %v7490_v39  ;;  %7122 = vmatprep.mubr.msk.f32.mxu1 %vm7869_vm2, %v7870_v4  ;;  %v7499_v0 = vpack.c.bf16 %v5115_v48, %v5114_v57  ;;  %v4609_v39 = vadd.f32 %v8926_v19, %v8933_v33 }
0x5ec3   :  { %7492 = vmatprep.subr.bf16.mxu1 %v7868_v3 }
0x5ec6   :  { %7494 = vmatpush3.bf16.msra.mxu1 %v7493_v28 }
0x5ec7   :  { %7495 = vmatprep.subr.bf16.mxu1 %v7868_v3 }
0x5ec9   :  { %7123 = vmatmul.mubr.msk.f32.vlgmr.msra.gmra.mrb[36].mxu1 %vm238_vm1, %v8469_v42  ;;  %v5118_v42 = vld [vmem:[%s9298_s10 + $0xf0] sm:$0xff] }
0x5eca   :  { %7497 = vmatpush3.bf16.msra.mxu1 %v7496_v45  ;;  %7133 = vmatprep.mubr.msk.f32.mxu1 %vm7869_vm2, %v7870_v4  ;;  %v7505_v47 = vpack.c.bf16 %v5119_v30, %v5118_v42 }
0x5ecb   :  { %7498 = vmatprep.subr.bf16.mxu1 %v7868_v3 }
0x5ece   :  { %7500 = vmatpush3.bf16.msra.mxu1 %v7499_v0 }
0x5ecf   :  { %7501 = vmatprep.subr.bf16.mxu1 %v7868_v3 }
0x5ed1   :  { %7134 = vmatmul.mubr.msk.f32.vlgmr.msra.gmra.mrb[36].mxu1 %vm238_vm1, %v8912_v62  ;;  %v5122_v62 = vld [vmem:[%s9298_s10 + $0x110] sm:$0xff] }
0x5ed2   :  { %7503 = vmatpush3.bf16.msra.mxu1 %v7502_v58  ;;  %7144 = vmatprep.mubr.msk.f32.mxu1 %vm7869_vm2, %v7870_v4  ;;  %v7511_v11 = vpack.c.bf16 %v5123_v9, %v5122_v62 }
0x5ed3   :  { %7504 = vmatprep.subr.bf16.mxu1 %v7868_v3 }
0x5ed6   :  { %7506 = vmatpush3.bf16.msra.mxu1 %v7505_v47 }
0x5ed7   :  { %7507 = vmatprep.subr.bf16.mxu1 %v7868_v3 }
0x5ed9   :  { %7145 = vmatmul.mubr.msk.f32.vlgmr.msra.gmra.mrb[36].mxu1 %vm238_vm1, %v8905_v52  ;;  %v5126_v52 = vld [vmem:[%s9298_s10 + $0x130] sm:$0xff] }
0x5eda   :  { %7509 = vmatpush3.bf16.msra.mxu1 %v7508_v40  ;;  %7155 = vmatprep.mubr.msk.f32.mxu1 %vm7869_vm2, %v7870_v4  ;;  %v7517_v56 = vpack.c.bf16 %v5127_v35, %v5126_v52  ;;  %v5128_v35 = vld [vmem:[%s9298_s10 + $0x140] sm:$0xff] }
0x5edb   :  { %7510 = vmatprep.subr.bf16.mxu1 %v7868_v3 }
0x5ede   :  { %7512 = vmatpush3.bf16.msra.mxu1 %v7511_v11 }
0x5edf   :  { %7513 = vmatprep.subr.bf16.mxu1 %v7868_v3 }
0x5ee1   :  { %7156 = vmatmul.mubr.msk.f32.vlgmr.msra.gmra.mrb[36].mxu1 %vm238_vm1, %v8666_v43 }
0x5ee2   :  { %7515 = vmatpush3.bf16.msra.mxu1 %v7514_v55  ;;  %7166 = vmatprep.mubr.msk.f32.mxu1 %vm7869_vm2, %v7870_v4 }
0x5ee3   :  { %7516 = vmatprep.subr.bf16.mxu1 %v7868_v3 }
0x5ee6   :  { %7518 = vmatpush3.bf16.msra.mxu1 %v7517_v56  ;;  %v5129_v56 = vld [vmem:[%s9298_s10 + $0x148] sm:$0xff] }
0x5ee7   :  { %7519 = vmatprep.subr.bf16.mxu1 %v7868_v3 }
0x5ee9   :  { %7167 = vmatmul.mubr.msk.f32.vlgmr.msra.gmra.mrb[36].mxu1 %vm238_vm1, %v8659_v38 }
0x5eea   :  { %7177 = vmatprep.mubr.msk.f32.mxu1 %vm7869_vm2, %v7870_v4 }
0x5f6c   :  { %v4925_v43 = vpop.f32.mrb[34].mxu1 }
0x5f6d   :  { %v4929_v50 = vadd.f32 %v4925_v43, %v4604_v41  ;;  %v7047_v13 = vpop.f32.mrb[35].mxu1  ;;  %v7520_v41 = vpack.c.bf16 %v5129_v56, %v5128_v35  ;;  %v5130_v43 = vld [vmem:[%s9298_s10 + $0x150] sm:$0xff] }
0x5f6f   :  { %7840 = vtanh.f32 %v4929_v50  ;;  %v4930_v63 = vsub.f32 0.0, %v4929_v50  ;;  %v5131_v50 = vld [vmem:[%s9298_s10 + $0x158] sm:$0xff]  ;;  %7521 = vmatpush3.bf16.msra.mxu1 %v7520_v41 }
0x5f70   :  { %v7523_v13 = vpack.c.bf16 %v5131_v50, %v5130_v43  ;;  %7522 = vmatprep.subr.bf16.mxu1 %v7868_v3 }
0x5f71   :  { %v4931_v14 = vmul.f32 1.442695, %v4930_v63 }
0x5f73   :  { %7842 = vpow2.f32 %v4931_v14  ;;  %7524 = vmatpush3.bf16.msra.mxu1 %v7523_v13 }
0x5f74   :  { %7525 = vmatprep.subr.bf16.mxu1 %v7868_v3 }
0x5f79   :  { %v7841_v8 = vpop.eup %7840 }
0x5f7a   :  { %4944 = vrot.lane.b32.xlu0 %v7841_v8, %s7871_s5 }
0x5f7d   :  { %v7843_v15 = vpop.eup %7842 }
0x5f7e   :  { %v4933_v16 = vadd.f32 1.0, %v7843_v15 }
0x5f80   :  { %7844 = vrcp.f32 %v4933_v16  ;;  %v5132_v16 = vld [vmem:[%s9298_s10 + $0x160] sm:$0xff] }
0x5f8a   :  { %v7845_v38 = vpop.eup %7844 }
0x5f8b   :  { %v4942_v12 = vmul.f32 %v7845_v38, %v4940_v31  ;;  %v5135_v31 = vld [vmem:[%s9298_s10 + $0x178] sm:$0xff] }
0x5fec   :  { %v4945_v17 = vpop.permute.xlu0 %4944 }
0x5fed   :  { %v4947_v18 = vmul.f32 %v7845_v38, %v4945_v17 }
0x5fef   :  { %4949 = vrot.lane.b32.xlu0 %v4947_v18, %s7872_s26  ;;  %v5134_v18 = vld [vmem:[%s9298_s10 + $0x170] sm:$0xff] }
0x6061   :  { %v4950_v46 = vpop.permute.xlu0 %4949 }
0x6062   :  { %v4952_v10 = vadd.f32 %v4950_v46, %v4942_v12 }
0x6064   :  { %7846 = vtanh.f32 %v4952_v10 }
0x606e   :  { %v7847_v20 = vpop.eup %7846 }
0x606f   :  { %4955 = vrot.lane.b32.xlu1 %v7847_v20, %s7871_s5 }
0x6073   :  { %4965 = vrot.lane.b32.xlu1 %v4952_v10, %s7873_s27  ;;  %v7529_v10 = vpack.c.bf16 %v5135_v31, %v5134_v18 }
0x60e1   :  { %v4956_v22 = vpop.permute.xlu1 %4955 }
0x60e2   :  { %v4958_v5 = vmul.f32 %v7845_v38, %v4956_v22  ;;  %v5133_v38 = vld [vmem:[%s9298_s10 + $0x168] sm:$0xff] }
0x60e3   :  { %v7526_v17 = vpack.c.bf16 %v5133_v38, %v5132_v16 }
0x60e4   :  { %4960 = vrot.lane.b32.xlu0 %v4958_v5, %s7872_s26  ;;  %v6250_v5 = vld [vmem:[%s9270_s20] ss:$0 sm:$0xff] }
0x60e5   :  { %v4966_v23 = vpop.permute.xlu1 %4965 }
0x60e6   :  { %4968 = vst.msk [vmem:[#allocation7] sm:$0xff] %vm238_vm1, %v4966_v23 }
0x60ed   :  { %v5053_v61 = vld [vmem:[#allocation7] sm:$0xff] }
0x60ee   :  { %5055 = vrot.lane.b32.xlu1 %v5053_v61, %s7872_s26 }
0x6156   :  { %v4961_v6 = vpop.permute.xlu0 %4960 }
0x6157   :  { %4963 = vst.msk [vmem:[#allocation6] sm:$0xff] %vm238_vm1, %v4961_v6  ;;  %4969 = vst.msk [vmem:[#allocation3 + $0x10] sm:$0xff] %vm238_vm1, %v4961_v6 }
0x615e   :  { %v4971_v44 = vld [vmem:[#allocation6] sm:$0xff]  ;;  %v6041_v49 = vld [vmem:[#allocation3 + $0x10] sm:$0xff] }
0x615f   :  { %7057 = vmatmul.mubr.msk.f32.vlgmr.msra.gmra.mrb[68].mxu0 %vm238_vm1, %v4971_v44 }
0x6160   :  { %7534 = vmatpush3.bf16.msra.mxu0 %v7531_v1  ;;  %7199 = vmatprep.mubr.msk.f32.mxu0 %vm238_vm1, %v6039_v60  ;;  %v5056_v11 = vpop.permute.xlu1 %5055 }
0x6161   :  { %7536 = vmatprep.subr.bf16.mxu0 %v7535_v2 }
0x6164   :  { %7538 = vmatpush3.bf16.msra.mxu0 %v7535_v2 }
0x6167   :  { %7200 = vmatmul.mubr.msk.f32.vlgmr.msra.gmra.mrb[70].mxu0 %vm238_vm1, %v6040_v26 }
0x6168   :  { %7202 = vmatprep.mubr.msk.f32.mxu0 %vm238_vm1, %v6041_v49 }
0x6232   :  { %v5041_v34 = vpop.f32.mrb[68].mxu0 }
0x6233   :  { %v5045_v27 = vadd.f32 %v5041_v34, %v4609_v39  ;;  %v7058_v28 = vpop.f32.mrb[69].mxu0 }
0x6235   :  { %7848 = vtanh.f32 %v5045_v27  ;;  %v5046_v30 = vsub.f32 0.0, %v5045_v27 }
0x6237   :  { %v5047_v47 = vmul.f32 1.442695, %v5046_v30 }
0x623a   :  { %v7201_v29 = vpop.f32.mrb[70].mxu0 }
0x623b   :  { %v6138_v45 = vadd.f32 %v7201_v29, %v9178_v53  ;;  %v6132_v57 = vpop.f32.mrb[71].mxu0 }
0x623c   :  { %v6133_v48 = vadd.f32 %v9178_v53, %v6132_v57 }
0x623d   :  { %7850 = vtanh.f32 %v6138_v45 }
0x623e   :  { %7852 = vtanh.f32 %v6133_v48 }
0x623f   :  { %v7849_v0 = vpop.eup %7848  ;;  %7854 = vpow2.f32 %v5047_v47 }
0x6240   :  { %5060 = vrot.lane.b32.xlu0 %v7849_v0, %s7871_s5 }
0x6247   :  { %v7851_v19 = vpop.eup %7850 }
0x6248   :  { %v7853_v33 = vpop.eup %7852  ;;  %v6156_v7 = vsub.f32 %v6138_v45, %v7851_v19 }
0x6249   :  { %v6155_v37 = vsub.f32 %v6133_v48, %v7853_v33  ;;  %v7855_v32 = vpop.eup %7854 }
0x624a   :  { %v6160_v58 = vmul.f32 0.1, %v6156_v7  ;;  %v5049_v36 = vadd.f32 1.0, %v7855_v32 }
0x624b   :  { %v6159_v42 = vmul.f32 0.1, %v6155_v37 }
0x624c   :  { %6164 = vst.msk [vmem:[%s9269_s23 + $0x8] sm:$0xff] %vm100_vm0, %v6160_v58  ;;  %7856 = vrcp.f32 %v5049_v36 }
0x624d   :  { %6163 = vst.msk [vmem:[%s9269_s23] sm:$0xff] %vm100_vm0, %v6159_v42 }
0x6256   :  { %v7857_v40 = vpop.eup %7856 }
0x6257   :  { %v5058_v51 = vmul.f32 %v7857_v40, %v5056_v11 }
0x62b2   :  { %v5061_v62 = vpop.permute.xlu0 %5060 }
0x62b3   :  { %v5063_v9 = vmul.f32 %v7857_v40, %v5061_v62 }
0x62b5   :  { %5065 = vrot.lane.b32.xlu0 %v5063_v9, %s7872_s26 }
0x6327   :  { %v5066_v54 = vpop.permute.xlu0 %5065 }
0x6328   :  { %v5068_v55 = vadd.f32 %v5066_v54, %v5058_v51 }
0x632a   :  { %7858 = vtanh.f32 %v5068_v55 }
0x6334   :  { %v7859_v52 = vpop.eup %7858 }
0x6335   :  { %5071 = vrot.lane.b32.xlu1 %v7859_v52, %s7871_s5 }
0x6339   :  { %5081 = vrot.lane.b32.xlu1 %v5068_v55, %s7873_s27 }
0x63a7   :  { %v5072_v8 = vpop.permute.xlu1 %5071 }
0x63a8   :  { %v5074_v63 = vmul.f32 %v7857_v40, %v5072_v8 }
0x63aa   :  { %5076 = vrot.lane.b32.xlu0 %v5074_v63, %s7872_s26 }
0x63ab   :  { %v5082_v14 = vpop.permute.xlu1 %5081 }
0x63ac   :  { %5084 = vst.msk [vmem:[#allocation7] sm:$0xff] %vm238_vm1, %v5082_v14 }
0x63b3   :  { %v5087_v20 = vld [vmem:[#allocation7] sm:$0xff] }
0x641c   :  { %v5077_v15 = vpop.permute.xlu0 %5076 }
0x641d   :  { %5079 = vst.msk [vmem:[#allocation6] sm:$0xff] %vm238_vm1, %v5077_v15  ;;  %5085 = vst.msk [vmem:[#allocation3 + $0x18] sm:$0xff] %vm238_vm1, %v5077_v15 }
0x6424   :  { %v5086_v12 = vld [vmem:[#allocation6] sm:$0xff]  ;;  %v6042_v46 = vld [vmem:[#allocation3 + $0x18] sm:$0xff] }
0x6425   :  { %7178 = vmatmul.mubr.msk.f32.vlgmr.msra.gmra.mrb[36].mxu1 %vm238_vm1, %v5086_v12  ;;  %7203 = vmatmul.mubr.msk.f32.gmra.mrb[72].mxu0 %vm238_vm1, %v6042_v46 }
0x6426   :  { %7527 = vmatpush3.bf16.msra.mxu1 %v7526_v17  ;;  %7188 = vmatprep.mubr.msk.f32.mxu1 %vm7869_vm2, %v7870_v4 }
0x6427   :  { %7528 = vmatprep.subr.bf16.mxu1 %v7868_v3 }
0x642a   :  { %7530 = vmatpush3.bf16.msra.mxu1 %v7529_v10 }
0x642d   :  { %7189 = vmatmul.mubr.msk.f32.vlgmr.msra.gmra.mrb[36].mxu1 %vm238_vm1, %v5087_v20 }
0x64f8   :  { %v7204_v59 = vpop.f32.mrb[72].mxu0 }
0x64f9   :  { %v6148_v21 = vadd.f32 %v7204_v59, %v9178_v53  ;;  %v6142_v1 = vpop.f32.mrb[73].mxu0 }
0x64fa   :  { %v6143_v22 = vadd.f32 %v9178_v53, %v6142_v1 }
0x64fb   :  { %7860 = vtanh.f32 %v6148_v21 }
0x64fc   :  { %7862 = vtanh.f32 %v6143_v22 }
0x6500   :  { %v6027_v23 = vpop.f32.mrb[36].mxu1 }
0x6501   :  { %v7539_v4 = vadd.f32 %v6250_v5, %v6027_v23  ;;  %v7190_v61 = vpop.f32.mrb[37].mxu1 }
0x6503   :  { %v6032_v3 = vsub.f32 0.0, %v7539_v4 }
0x6505   :  { %v7861_v6 = vpop.eup %7860  ;;  %v6033_v24 = vmul.f32 1.442695, %v6032_v3 }
0x6506   :  { %v7863_v25 = vpop.eup %7862  ;;  %v6158_v2 = vsub.f32 %v6148_v21, %v7861_v6 }
0x6507   :  { %v6157_v44 = vsub.f32 %v6143_v22, %v7863_v25  ;;  %7864 = vpow2.f32 %v6033_v24 }
0x6508   :  { %v6162_v60 = vmul.f32 0.1, %v6158_v2 }
0x6509   :  { %v6161_v26 = vmul.f32 0.1, %v6157_v44 }
0x650a   :  { %6166 = vst.msk [vmem:[%s9269_s23 + $0x18] sm:$0xff] %vm100_vm0, %v6162_v60 }
0x650b   :  { %6165 = vst.msk [vmem:[%s9269_s23 + $0x10] sm:$0xff] %vm100_vm0, %v6161_v26 }
0x6511   :  { %v7865_v49 = vpop.eup %7864 }
0x6512   :  { %v6035_v39 = vadd.f32 1.0, %v7865_v49 }
0x6514   :  { %7866 = vrcp.f32 %v6035_v39 }
0x651e   :  { %v7867_v34 = vpop.eup %7866 }
0x651f   :  { %6038 = vst.msk [vmem:[%s9271_s24] sm:$0xff] %vm100_vm0, %v7867_v34 }

</bundles_post_ra>
